<compile_context>
chip_gen: v7x
topology: tpu7x:2x2x1
jax: 0.10.0
libtpu: 0.0.40
codegen_flags: <defaults>
</compile_context>

<pallas_src>
import functools

import numpy as np
import jax
import jax.numpy as jnp
from jax.experimental import pallas as pl
from jax.experimental.pallas import tpu as pltpu


_BF16 = jnp.bfloat16

# Flattening order of the stacked per-layer weights passed to the kernel.
ENC_KEYS = ('wq', 'bq', 'wkv', 'bkv', 'wo', 'bo', 'g1', 'b1',
            'w1', 'fb1', 'w2', 'fb2', 'g2', 'b2')
DEC_KEYS = ('swq', 'sbq', 'swkv', 'sbkv', 'swo', 'sbo', 'g1', 'b1',
            'cwq', 'cbq', 'cwkv', 'cbkv', 'cwo', 'cbo', 'g2', 'b2',
            'w1', 'fb1', 'w2', 'fb2', 'g3', 'b3')


# ----------------------------------------------------------------------------
# In-kernel helpers (pure functions on values; `scr` is a VMEM scratch ref)
# ----------------------------------------------------------------------------

def _layernorm(y, g, beta):
    mu = jnp.mean(y, axis=-1, keepdims=True)
    var = jnp.mean((y - mu) ** 2, axis=-1, keepdims=True)
    return (y - mu) * jax.lax.rsqrt(var + 1e-5) * g + beta


def _attention(xq, xkv, wq, bq, wkv, bkv, wo, bo, g, beta, scr, num_heads):
    # 1/sqrt(dh) already folded into (wq, bq) at init.
    Sq = xq.shape[0]
    q = jnp.dot(xq.astype(_BF16), wq, preferred_element_type=jnp.float32) + bq
    kv = jnp.dot(xkv.astype(_BF16), wkv, preferred_element_type=jnp.float32) + bkv
    D = q.shape[-1]
    k = kv[:, :D]
    v = kv[:, D:]
    dh = D // num_heads
    for h in range(num_heads):                       # static unroll (tiny H)
        qh = q[:, h * dh:(h + 1) * dh].astype(_BF16)
        kh = k[:, h * dh:(h + 1) * dh].astype(_BF16)
        vh = v[:, h * dh:(h + 1) * dh].astype(_BF16)
        s = jax.lax.dot_general(qh, kh, (((1,), (1,)), ((), ())),
                                preferred_element_type=jnp.float32)
        s = s - jnp.max(s, axis=-1, keepdims=True)
        p = jnp.exp(s)
        p = p * pl.reciprocal(jnp.sum(p, axis=-1, keepdims=True), approx=False)
        # write head output directly at its lane offset (no concatenate)
        scr[0:Sq, h * dh:(h + 1) * dh] = jnp.dot(
            p.astype(_BF16), vh, preferred_element_type=jnp.float32)
    attn = scr[0:Sq, 0:D]
    out = jnp.dot(attn.astype(_BF16), wo, preferred_element_type=jnp.float32) + bo
    return _layernorm(out + xq, g, beta)


def _ffn(x, w1, b1, w2, b2, g, beta):
    h = jnp.dot(x.astype(_BF16), w1, preferred_element_type=jnp.float32) + b1
    h = jnp.maximum(h, 0.0)
    y = jnp.dot(h.astype(_BF16), w2, preferred_element_type=jnp.float32) + b2
    return _layernorm(y + x, g, beta)


# ----------------------------------------------------------------------------
# Single fused kernel: whole forward pass for one batch element
# ----------------------------------------------------------------------------

def _transformer_kernel(pxl_ref, pos_ref, wemb_ref, img_w_ref, img_b_ref,
                        *refs, num_heads, n_enc, n_dec):
    n_e, n_d = len(ENC_KEYS), len(DEC_KEYS)
    enc = dict(zip(ENC_KEYS, refs[:n_e]))
    dec = dict(zip(DEC_KEYS, refs[n_e:n_e + n_d]))
    proj_w_ref = refs[n_e + n_d]
    proj_b_ref = refs[n_e + n_d + 1]
    out_ref = refs[n_e + n_d + 2]
    scr = refs[n_e + n_d + 3]

    # --- image embedding + positional encoding ---
    x = (jnp.dot(pxl_ref[...].astype(_BF16), img_w_ref[...],
                 preferred_element_type=jnp.float32)
         + img_b_ref[...] + pos_ref[...])

    # --- encoder stack (activations stay in registers/VMEM) ---
    for l in range(n_enc):
        x = _attention(x, x,
                       enc['wq'][l], enc['bq'][l], enc['wkv'][l], enc['bkv'][l],
                       enc['wo'][l], enc['bo'][l], enc['g1'][l], enc['b1'][l],
                       scr, num_heads)
        x = _ffn(x, enc['w1'][l], enc['fb1'][l], enc['w2'][l], enc['fb2'][l],
                 enc['g2'][l], enc['b2'][l])
    enc_out = x

    # --- decoder stack ---
    y = wemb_ref[...]
    for l in range(n_dec):
        # TODO(synk): reference Decoder2 shows no causal mask; none applied.
        y = _attention(y, y,
                       dec['swq'][l], dec['sbq'][l], dec['swkv'][l], dec['sbkv'][l],
                       dec['swo'][l], dec['sbo'][l], dec['g1'][l], dec['b1'][l],
                       scr, num_heads)
        y = _attention(y, enc_out,
                       dec['cwq'][l], dec['cbq'][l], dec['cwkv'][l], dec['cbkv'][l],
                       dec['cwo'][l], dec['cbo'][l], dec['g2'][l], dec['b2'][l],
                       scr, num_heads)
        y = _ffn(y, dec['w1'][l], dec['fb1'][l], dec['w2'][l], dec['fb2'][l],
                 dec['g3'][l], dec['b3'][l])

    # --- final vocab projection (lane-padded => dense unmasked store) ---
    out_ref[...] = (jnp.dot(y.astype(_BF16), proj_w_ref[...],
                            preferred_element_type=jnp.float32)
                    + proj_b_ref[...])


# ----------------------------------------------------------------------------
# pallas_call wrapper
# ----------------------------------------------------------------------------

def _cost_estimate(B, Simg, P, D, Sw, Wd, F, Vpad, H, n_enc, n_dec, arrays):
    def attn_flops(Sq, Skv, Dq, Dkv, Do):
        return (2 * Sq * Dq * Do + 2 * Skv * Dkv * 2 * Do
                + 4 * Sq * Skv * Do + 2 * Sq * Do * Do)

    def ffn_flops(S, Din, Fh):
        return 4 * S * Din * Fh

    fl = 2 * Simg * P * D
    fl += n_enc * (attn_flops(Simg, Simg, D, D, D) + ffn_flops(Simg, D, F))
    fl += n_dec * (attn_flops(Sw, Sw, Wd, Wd, Wd)
                   + attn_flops(Sw, Simg, Wd, D, Wd)
                   + ffn_flops(Sw, Wd, F))
    fl += 2 * Sw * Wd * Vpad
    fl *= B
    tr = B * H * (n_enc * Simg * Simg + n_dec * (Sw * Sw + Sw * Simg))
    by = sum(int(a.size) * a.dtype.itemsize for a in arrays) + B * Sw * Vpad * 4
    return pl.CostEstimate(flops=int(fl), transcendentals=int(tr),
                           bytes_accessed=int(by))


def fused_forward(params, pxl_input, wemb, num_heads):
    B, Simg, P = pxl_input.shape
    _, Sw, Wd = wemb.shape
    D = params['img_w'].shape[1]
    F = params['enc']['w1'].shape[-1]
    Vpad = params['proj_w'].shape[1]
    n_enc = params['enc']['wq'].shape[0]
    n_dec = params['dec']['swq'].shape[0]

    enc_list = [params['enc'][k] for k in ENC_KEYS]
    dec_list = [params['dec'][k] for k in DEC_KEYS]

    batch_arrays = [pxl_input, params['pos_img'], wemb]
    weight_arrays = ([params['img_w'], params['img_b']] + enc_list + dec_list
                     + [params['proj_w'], params['proj_b']])
    inputs = batch_arrays + weight_arrays

    def batch_spec(a):
        nd = a.ndim
        return pl.BlockSpec((None,) + a.shape[1:],
                            lambda b, _n=nd: (b,) + (0,) * (_n - 1))

    def full_spec(a):
        nd = a.ndim
        return pl.BlockSpec(a.shape, lambda b, _n=nd: (0,) * _n)

    in_specs = ([batch_spec(a) for a in batch_arrays]
                + [full_spec(a) for a in weight_arrays])
    out_specs = pl.BlockSpec((None, Sw, Vpad), lambda b: (b, 0, 0))

    scr_S = max(Simg, Sw)
    scr_D = max(D, Wd)

    kernel = functools.partial(_transformer_kernel, num_heads=num_heads,
                               n_enc=int(n_enc), n_dec=int(n_dec))

    return pl.pallas_call(
        kernel,
        grid=(B,),
        out_shape=jax.ShapeDtypeStruct((B, Sw, Vpad), jnp.float32),
        in_specs=in_specs,
        out_specs=out_specs,
        scratch_shapes=[pltpu.VMEM((scr_S, scr_D), jnp.float32)],
        compiler_params=pltpu.CompilerParams(
            dimension_semantics=("parallel",),      # v7x: one batch per TC
            vmem_limit_bytes=32 * 1024 * 1024),
        cost_estimate=_cost_estimate(B, Simg, P, D, Sw, Wd, F, Vpad,
                                     num_heads, n_enc, n_dec, inputs),
    )(*inputs)


# ----------------------------------------------------------------------------
# Positional encoding — exact reproduction of getPositionEncoding semantics
# (it encodes the *batch index*, as in the reference).  Precomputed once.
# ----------------------------------------------------------------------------

def get_position_encoding(batch_size, seq_len, d, n=10000):
    P = np.zeros((batch_size, seq_len, d), dtype=np.float32)
    for k in range(seq_len):
        for i in np.arange(int(d / 2)):
            denominator = np.power(n, 2 * i / d)
            batch_indices = np.arange(batch_size)
            P[:, k, 2 * i] = np.sin(batch_indices / denominator)
            P[:, k, 2 * i + 1] = np.cos(batch_indices / denominator)
    return jnp.asarray(P)


# ----------------------------------------------------------------------------
# Parameter initialization.  Matmul weights pre-cast to bf16; attention scale
# folded into Q projection; per-layer weights stacked along a leading L axis.
# ----------------------------------------------------------------------------

def _dense(key, fan_in, fan_out, scale=0.02):
    kw, kb = jax.random.split(key)
    w = scale * jax.random.normal(kw, (fan_in, fan_out), jnp.float32)
    b = scale * jax.random.normal(kb, (1, fan_out), jnp.float32)
    return w, b


def init_params(key, pxl_size, emb_dim, num_heads, hidden_dim_ff,
                Wemb_dim, voc_size, num_encoder_layers, num_decoder_layers):
    keys = jax.random.split(key, 6)
    params = {}

    img_w, img_b = _dense(keys[0], pxl_size, emb_dim)
    params['img_w'] = img_w.astype(_BF16)
    params['img_b'] = img_b
    params['word_emb'] = 0.02 * jax.random.normal(keys[1], (voc_size, Wemb_dim),
                                                  jnp.float32)

    # final projection: lane-pad vocab dim to a multiple of 128 (dense stores)
    proj_w, proj_b = _dense(keys[2], Wemb_dim, voc_size)
    pad = (-voc_size) % 128
    params['proj_w'] = jnp.pad(proj_w, ((0, 0), (0, pad))).astype(_BF16)
    params['proj_b'] = jnp.pad(proj_b, ((0, 0), (0, pad)))

    def attn_weights(k, q_dim, kv_dim, out_dim):
        k1, k2, k3, k4 = jax.random.split(k, 4)
        scl = 1.0 / float(np.sqrt(out_dim // num_heads))
        wq, bq = _dense(k1, q_dim, out_dim)
        wq, bq = wq * scl, bq * scl                 # fold 1/sqrt(dh) into Q
        wk, bk = _dense(k2, kv_dim, out_dim)
        wv, bv = _dense(k3, kv_dim, out_dim)
        wkv = jnp.concatenate([wk, wv], axis=1)
        bkv = jnp.concatenate([bk, bv], axis=1)
        wo, bo = _dense(k4, out_dim, out_dim)
        return (wq.astype(_BF16), bq, wkv.astype(_BF16), bkv,
                wo.astype(_BF16), bo)

    def ln(dim):
        return jnp.ones((1, dim), jnp.float32), jnp.zeros((1, dim), jnp.float32)

    # --- encoder layers ---
    enc_layers = []
    for ek in jax.random.split(keys[3], num_encoder_layers):
        k1, kf1, kf2 = jax.random.split(ek, 3)
        wq, bq, wkv, bkv, wo, bo = attn_weights(k1, emb_dim, emb_dim, emb_dim)
        g1, b1 = ln(emb_dim)
        w1, fb1 = _dense(kf1, emb_dim, hidden_dim_ff)
        w2, fb2 = _dense(kf2, hidden_dim_ff, emb_dim)
        g2, b2 = ln(emb_dim)
        enc_layers.append(dict(wq=wq, bq=bq, wkv=wkv, bkv=bkv, wo=wo, bo=bo,
                               g1=g1, b1=b1,
                               w1=w1.astype(_BF16), fb1=fb1,
                               w2=w2.astype(_BF16), fb2=fb2,
                               g2=g2, b2=b2))
    params['enc'] = {k: jnp.stack([lyr[k] for lyr in enc_layers])
                     for k in ENC_KEYS}

    # --- decoder layers ---
    dec_layers = []
    for dk in jax.random.split(keys[4], num_decoder_layers):
        k1, k2, kf1, kf2 = jax.random.split(dk, 4)
        swq, sbq, swkv, sbkv, swo, sbo = attn_weights(k1, Wemb_dim, Wemb_dim,
                                                      Wemb_dim)
        g1, b1 = ln(Wemb_dim)
        cwq, cbq, cwkv, cbkv, cwo, cbo = attn_weights(k2, Wemb_dim, emb_dim,
                                                      Wemb_dim)
        g2, b2 = ln(Wemb_dim)
        w1, fb1 = _dense(kf1, Wemb_dim, hidden_dim_ff)
        w2, fb2 = _dense(kf2, hidden_dim_ff, Wemb_dim)
        g3, b3 = ln(Wemb_dim)
        dec_layers.append(dict(swq=swq, sbq=sbq, swkv=swkv, sbkv=sbkv,
                               swo=swo, sbo=sbo, g1=g1, b1=b1,
                               cwq=cwq, cbq=cbq, cwkv=cwkv, cbkv=cbkv,
                               cwo=cwo, cbo=cbo, g2=g2, b2=b2,
                               w1=w1.astype(_BF16), fb1=fb1,
                               w2=w2.astype(_BF16), fb2=fb2,
                               g3=g3, b3=b3))
    params['dec'] = {k: jnp.stack([lyr[k] for lyr in dec_layers])
                     for k in DEC_KEYS}
    return params


# ----------------------------------------------------------------------------
# Forward (jitted; whole transformer = one fused pallas_call + tiny XLA glue)
# ----------------------------------------------------------------------------

@functools.partial(jax.jit, static_argnames=('num_heads',))
def transformer_forward(params, pxl_input, word_inpt, *, num_heads):
    # word-embedding gather + positional encoding add (tiny glue, left to XLA)
    wemb = jnp.take(params['word_emb'], word_inpt, axis=0) + params['pos_word']
    out_padded = fused_forward(params, pxl_input, wemb, num_heads)
    voc_size = params['word_emb'].shape[0]          # static shape under jit
    return out_padded[:, :, :voc_size]


# ----------------------------------------------------------------------------
# Main
# ----------------------------------------------------------------------------

if __name__ == "__main__":
    pxl_size = 16
    emb_dim = 32
    num_heads = 4
    hidden_dim_ff = 64
    Wemb_dim = 32
    Pemb_dim = 32      # unused (Decoder2 definition not provided)
    new_dim = 32       # unused (Decoder2 definition not provided)
    voc_size = 50
    num_encoder_layers = 2
    num_decoder_layers = 2

    batch = 2
    img_seq = 8
    word_seq = 8

    key = jax.random.PRNGKey(0)
    k_params, k_pxl, k_word = jax.random.split(key, 3)

    params = init_params(k_params, pxl_size, emb_dim, num_heads, hidden_dim_ff,
                         Wemb_dim, voc_size, num_encoder_layers,
                         num_decoder_layers)
    # positional encodings precomputed once (host numpy) — constants under jit
    params['pos_img'] = get_position_encoding(batch, img_seq, emb_dim)
    params['pos_word'] = get_position_encoding(batch, word_seq, Wemb_dim)

    pxl_input = jax.random.normal(k_pxl, (batch, img_seq, pxl_size), jnp.float32)
    word_inpt = jax.random.randint(k_word, (batch, word_seq), 0, voc_size,
                                   jnp.int32)

    prediction = transformer_forward(params, pxl_input, word_inpt,
                                     num_heads=num_heads)
    prediction = jax.block_until_ready(prediction)

    assert prediction.shape == (batch, word_seq, voc_size)
    assert prediction.dtype == jnp.float32
    print("KERNEL_OK")
</pallas_src>

<mosaic_0001>
module attributes {stable_mosaic.version = 11 : i64} {
  func.func @_transformer_kernel(%arg0: i32, %arg1: memref<1x8x16xf32, #tpu.memory_space<vmem>>, %arg2: memref<1x8x32xf32, #tpu.memory_space<vmem>>, %arg3: memref<1x8x32xf32, #tpu.memory_space<vmem>>, %arg4: memref<16x32xbf16, #tpu.memory_space<vmem>>, %arg5: memref<1x32xf32, #tpu.memory_space<vmem>>, %arg6: memref<2x32x32xbf16, #tpu.memory_space<vmem>>, %arg7: memref<2x1x32xf32, #tpu.memory_space<vmem>>, %arg8: memref<2x32x64xbf16, #tpu.memory_space<vmem>>, %arg9: memref<2x1x64xf32, #tpu.memory_space<vmem>>, %arg10: memref<2x32x32xbf16, #tpu.memory_space<vmem>>, %arg11: memref<2x1x32xf32, #tpu.memory_space<vmem>>, %arg12: memref<2x1x32xf32, #tpu.memory_space<vmem>>, %arg13: memref<2x1x32xf32, #tpu.memory_space<vmem>>, %arg14: memref<2x32x64xbf16, #tpu.memory_space<vmem>>, %arg15: memref<2x1x64xf32, #tpu.memory_space<vmem>>, %arg16: memref<2x64x32xbf16, #tpu.memory_space<vmem>>, %arg17: memref<2x1x32xf32, #tpu.memory_space<vmem>>, %arg18: memref<2x1x32xf32, #tpu.memory_space<vmem>>, %arg19: memref<2x1x32xf32, #tpu.memory_space<vmem>>, %arg20: memref<2x32x32xbf16, #tpu.memory_space<vmem>>, %arg21: memref<2x1x32xf32, #tpu.memory_space<vmem>>, %arg22: memref<2x32x64xbf16, #tpu.memory_space<vmem>>, %arg23: memref<2x1x64xf32, #tpu.memory_space<vmem>>, %arg24: memref<2x32x32xbf16, #tpu.memory_space<vmem>>, %arg25: memref<2x1x32xf32, #tpu.memory_space<vmem>>, %arg26: memref<2x1x32xf32, #tpu.memory_space<vmem>>, %arg27: memref<2x1x32xf32, #tpu.memory_space<vmem>>, %arg28: memref<2x32x32xbf16, #tpu.memory_space<vmem>>, %arg29: memref<2x1x32xf32, #tpu.memory_space<vmem>>, %arg30: memref<2x32x64xbf16, #tpu.memory_space<vmem>>, %arg31: memref<2x1x64xf32, #tpu.memory_space<vmem>>, %arg32: memref<2x32x32xbf16, #tpu.memory_space<vmem>>, %arg33: memref<2x1x32xf32, #tpu.memory_space<vmem>>, %arg34: memref<2x1x32xf32, #tpu.memory_space<vmem>>, %arg35: memref<2x1x32xf32, #tpu.memory_space<vmem>>, %arg36: memref<2x32x64xbf16, #tpu.memory_space<vmem>>, %arg37: memref<2x1x64xf32, #tpu.memory_space<vmem>>, %arg38: memref<2x64x32xbf16, #tpu.memory_space<vmem>>, %arg39: memref<2x1x32xf32, #tpu.memory_space<vmem>>, %arg40: memref<2x1x32xf32, #tpu.memory_space<vmem>>, %arg41: memref<2x1x32xf32, #tpu.memory_space<vmem>>, %arg42: memref<32x128xbf16, #tpu.memory_space<vmem>>, %arg43: memref<1x128xf32, #tpu.memory_space<vmem>>, %arg44: memref<1x8x128xf32, #tpu.memory_space<vmem>>, %arg45: memref<8x32xf32, #tpu.memory_space<vmem>>) attributes {dimension_semantics = [#tpu.dimension_semantics<parallel>], iteration_bounds = array<i64: 2>, scalar_prefetch = 0 : i64, scratch_operands = 1 : i64, tpu.core_type = #tpu.core_type<tc>, window_params = [{transform_indices = @transform_0, window_bounds = array<i64: 1, 8, 16>}, {transform_indices = @transform_1, window_bounds = array<i64: 1, 8, 32>}, {transform_indices = @transform_2, window_bounds = array<i64: 1, 8, 32>}, {pipeline_mode = #tpu.pipeline_mode<synchronous>, transform_indices = @transform_3, window_bounds = array<i64: 16, 32>}, {pipeline_mode = #tpu.pipeline_mode<synchronous>, transform_indices = @transform_4, window_bounds = array<i64: 1, 32>}, {pipeline_mode = #tpu.pipeline_mode<synchronous>, transform_indices = @transform_5, window_bounds = array<i64: 2, 32, 32>}, {pipeline_mode = #tpu.pipeline_mode<synchronous>, transform_indices = @transform_6, window_bounds = array<i64: 2, 1, 32>}, {pipeline_mode = #tpu.pipeline_mode<synchronous>, transform_indices = @transform_7, window_bounds = array<i64: 2, 32, 64>}, {pipeline_mode = #tpu.pipeline_mode<synchronous>, transform_indices = @transform_8, window_bounds = array<i64: 2, 1, 64>}, {pipeline_mode = #tpu.pipeline_mode<synchronous>, transform_indices = @transform_9, window_bounds = array<i64: 2, 32, 32>}, {pipeline_mode = #tpu.pipeline_mode<synchronous>, transform_indices = @transform_10, window_bounds = array<i64: 2, 1, 32>}, {pipeline_mode = #tpu.pipeline_mode<synchronous>, transform_indices = @transform_11, window_bounds = array<i64: 2, 1, 32>}, {pipeline_mode = #tpu.pipeline_mode<synchronous>, transform_indices = @transform_12, window_bounds = array<i64: 2, 1, 32>}, {pipeline_mode = #tpu.pipeline_mode<synchronous>, transform_indices = @transform_13, window_bounds = array<i64: 2, 32, 64>}, {pipeline_mode = #tpu.pipeline_mode<synchronous>, transform_indices = @transform_14, window_bounds = array<i64: 2, 1, 64>}, {pipeline_mode = #tpu.pipeline_mode<synchronous>, transform_indices = @transform_15, window_bounds = array<i64: 2, 64, 32>}, {pipeline_mode = #tpu.pipeline_mode<synchronous>, transform_indices = @transform_16, window_bounds = array<i64: 2, 1, 32>}, {pipeline_mode = #tpu.pipeline_mode<synchronous>, transform_indices = @transform_17, window_bounds = array<i64: 2, 1, 32>}, {pipeline_mode = #tpu.pipeline_mode<synchronous>, transform_indices = @transform_18, window_bounds = array<i64: 2, 1, 32>}, {pipeline_mode = #tpu.pipeline_mode<synchronous>, transform_indices = @transform_19, window_bounds = array<i64: 2, 32, 32>}, {pipeline_mode = #tpu.pipeline_mode<synchronous>, transform_indices = @transform_20, window_bounds = array<i64: 2, 1, 32>}, {pipeline_mode = #tpu.pipeline_mode<synchronous>, transform_indices = @transform_21, window_bounds = array<i64: 2, 32, 64>}, {pipeline_mode = #tpu.pipeline_mode<synchronous>, transform_indices = @transform_22, window_bounds = array<i64: 2, 1, 64>}, {pipeline_mode = #tpu.pipeline_mode<synchronous>, transform_indices = @transform_23, window_bounds = array<i64: 2, 32, 32>}, {pipeline_mode = #tpu.pipeline_mode<synchronous>, transform_indices = @transform_24, window_bounds = array<i64: 2, 1, 32>}, {pipeline_mode = #tpu.pipeline_mode<synchronous>, transform_indices = @transform_25, window_bounds = array<i64: 2, 1, 32>}, {pipeline_mode = #tpu.pipeline_mode<synchronous>, transform_indices = @transform_26, window_bounds = array<i64: 2, 1, 32>}, {pipeline_mode = #tpu.pipeline_mode<synchronous>, transform_indices = @transform_27, window_bounds = array<i64: 2, 32, 32>}, {pipeline_mode = #tpu.pipeline_mode<synchronous>, transform_indices = @transform_28, window_bounds = array<i64: 2, 1, 32>}, {pipeline_mode = #tpu.pipeline_mode<synchronous>, transform_indices = @transform_29, window_bounds = array<i64: 2, 32, 64>}, {pipeline_mode = #tpu.pipeline_mode<synchronous>, transform_indices = @transform_30, window_bounds = array<i64: 2, 1, 64>}, {pipeline_mode = #tpu.pipeline_mode<synchronous>, transform_indices = @transform_31, window_bounds = array<i64: 2, 32, 32>}, {pipeline_mode = #tpu.pipeline_mode<synchronous>, transform_indices = @transform_32, window_bounds = array<i64: 2, 1, 32>}, {pipeline_mode = #tpu.pipeline_mode<synchronous>, transform_indices = @transform_33, window_bounds = array<i64: 2, 1, 32>}, {pipeline_mode = #tpu.pipeline_mode<synchronous>, transform_indices = @transform_34, window_bounds = array<i64: 2, 1, 32>}, {pipeline_mode = #tpu.pipeline_mode<synchronous>, transform_indices = @transform_35, window_bounds = array<i64: 2, 32, 64>}, {pipeline_mode = #tpu.pipeline_mode<synchronous>, transform_indices = @transform_36, window_bounds = array<i64: 2, 1, 64>}, {pipeline_mode = #tpu.pipeline_mode<synchronous>, transform_indices = @transform_37, window_bounds = array<i64: 2, 64, 32>}, {pipeline_mode = #tpu.pipeline_mode<synchronous>, transform_indices = @transform_38, window_bounds = array<i64: 2, 1, 32>}, {pipeline_mode = #tpu.pipeline_mode<synchronous>, transform_indices = @transform_39, window_bounds = array<i64: 2, 1, 32>}, {pipeline_mode = #tpu.pipeline_mode<synchronous>, transform_indices = @transform_40, window_bounds = array<i64: 2, 1, 32>}, {pipeline_mode = #tpu.pipeline_mode<synchronous>, transform_indices = @transform_41, window_bounds = array<i64: 32, 128>}, {pipeline_mode = #tpu.pipeline_mode<synchronous>, transform_indices = @transform_42, window_bounds = array<i64: 1, 128>}, {transform_indices = @transform_43, window_bounds = array<i64: 1, 8, 128>}]} {
    %c0 = arith.constant 0 : index
    %c0_0 = arith.constant 0 : index
    %c0_1 = arith.constant 0 : index
    %0 = vector.load %arg1[%c0, %c0_0, %c0_1] : memref<1x8x16xf32, #tpu.memory_space<vmem>>, vector<1x8x16xf32>
    %1 = vector.shape_cast %0 : vector<1x8x16xf32> to vector<8x16xf32>
    %2 = arith.truncf %1 : vector<8x16xf32> to vector<8x16xbf16>
    %c0_2 = arith.constant 0 : index
    %c0_3 = arith.constant 0 : index
    %3 = vector.load %arg4[%c0_2, %c0_3] : memref<16x32xbf16, #tpu.memory_space<vmem>>, vector<16x32xbf16>
    %cst = arith.constant dense<0.000000e+00> : vector<8x32xf32>
    %4 = tpu.matmul %2, %3, %cst {dimension_numbers = #tpu.dot_dimension_numbers<[1], [0], [0], [1], [0, 0, 1, 1], [], []>} : vector<8x16xbf16>, vector<16x32xbf16>, vector<8x32xf32> -> vector<8x32xf32>
    %c0_4 = arith.constant 0 : index
    %c0_5 = arith.constant 0 : index
    %5 = vector.load %arg5[%c0_4, %c0_5] : memref<1x32xf32, #tpu.memory_space<vmem>>, vector<1x32xf32>
    %6 = vector.broadcast %5 : vector<1x32xf32> to vector<8x32xf32>
    %7 = arith.addf %4, %6 : vector<8x32xf32>
    %c0_6 = arith.constant 0 : index
    %c0_7 = arith.constant 0 : index
    %c0_8 = arith.constant 0 : index
    %8 = vector.load %arg2[%c0_6, %c0_7, %c0_8] : memref<1x8x32xf32, #tpu.memory_space<vmem>>, vector<1x8x32xf32>
    %9 = vector.shape_cast %8 : vector<1x8x32xf32> to vector<8x32xf32>
    %10 = arith.addf %7, %9 : vector<8x32xf32>
    %c0_9 = arith.constant 0 : index
    %c0_10 = arith.constant 0 : index
    %c0_11 = arith.constant 0 : index
    %11 = vector.load %arg6[%c0_9, %c0_10, %c0_11] : memref<2x32x32xbf16, #tpu.memory_space<vmem>>, vector<1x32x32xbf16>
    %12 = vector.shape_cast %11 : vector<1x32x32xbf16> to vector<32x32xbf16>
    %c0_12 = arith.constant 0 : index
    %c0_13 = arith.constant 0 : index
    %c0_14 = arith.constant 0 : index
    %13 = vector.load %arg7[%c0_12, %c0_13, %c0_14] : memref<2x1x32xf32, #tpu.memory_space<vmem>>, vector<1x1x32xf32>
    %14 = vector.shape_cast %13 : vector<1x1x32xf32> to vector<1x32xf32>
    %c0_15 = arith.constant 0 : index
    %c0_16 = arith.constant 0 : index
    %c0_17 = arith.constant 0 : index
    %15 = vector.load %arg8[%c0_15, %c0_16, %c0_17] : memref<2x32x64xbf16, #tpu.memory_space<vmem>>, vector<1x32x64xbf16>
    %16 = vector.shape_cast %15 : vector<1x32x64xbf16> to vector<32x64xbf16>
    %c0_18 = arith.constant 0 : index
    %c0_19 = arith.constant 0 : index
    %c0_20 = arith.constant 0 : index
    %17 = vector.load %arg9[%c0_18, %c0_19, %c0_20] : memref<2x1x64xf32, #tpu.memory_space<vmem>>, vector<1x1x64xf32>
    %18 = vector.shape_cast %17 : vector<1x1x64xf32> to vector<1x64xf32>
    %c0_21 = arith.constant 0 : index
    %c0_22 = arith.constant 0 : index
    %c0_23 = arith.constant 0 : index
    %19 = vector.load %arg10[%c0_21, %c0_22, %c0_23] : memref<2x32x32xbf16, #tpu.memory_space<vmem>>, vector<1x32x32xbf16>
    %20 = vector.shape_cast %19 : vector<1x32x32xbf16> to vector<32x32xbf16>
    %c0_24 = arith.constant 0 : index
    %c0_25 = arith.constant 0 : index
    %c0_26 = arith.constant 0 : index
    %21 = vector.load %arg11[%c0_24, %c0_25, %c0_26] : memref<2x1x32xf32, #tpu.memory_space<vmem>>, vector<1x1x32xf32>
    %22 = vector.shape_cast %21 : vector<1x1x32xf32> to vector<1x32xf32>
    %c0_27 = arith.constant 0 : index
    %c0_28 = arith.constant 0 : index
    %c0_29 = arith.constant 0 : index
    %23 = vector.load %arg12[%c0_27, %c0_28, %c0_29] : memref<2x1x32xf32, #tpu.memory_space<vmem>>, vector<1x1x32xf32>
    %24 = vector.shape_cast %23 : vector<1x1x32xf32> to vector<1x32xf32>
    %c0_30 = arith.constant 0 : index
    %c0_31 = arith.constant 0 : index
    %c0_32 = arith.constant 0 : index
    %25 = vector.load %arg13[%c0_30, %c0_31, %c0_32] : memref<2x1x32xf32, #tpu.memory_space<vmem>>, vector<1x1x32xf32>
    %26 = vector.shape_cast %25 : vector<1x1x32xf32> to vector<1x32xf32>
    %27 = arith.truncf %10 : vector<8x32xf32> to vector<8x32xbf16>
    %cst_33 = arith.constant dense<0.000000e+00> : vector<8x32xf32>
    %28 = tpu.matmul %27, %12, %cst_33 {dimension_numbers = #tpu.dot_dimension_numbers<[1], [0], [0], [1], [0, 0, 1, 1], [], []>} : vector<8x32xbf16>, vector<32x32xbf16>, vector<8x32xf32> -> vector<8x32xf32>
    %29 = vector.broadcast %14 : vector<1x32xf32> to vector<8x32xf32>
    %30 = arith.addf %28, %29 : vector<8x32xf32>
    %31 = arith.truncf %10 : vector<8x32xf32> to vector<8x32xbf16>
    %cst_34 = arith.constant dense<0.000000e+00> : vector<8x64xf32>
    %32 = tpu.matmul %31, %16, %cst_34 {dimension_numbers = #tpu.dot_dimension_numbers<[1], [0], [0], [1], [0, 0, 1, 1], [], []>} : vector<8x32xbf16>, vector<32x64xbf16>, vector<8x64xf32> -> vector<8x64xf32>
    %33 = vector.broadcast %18 : vector<1x64xf32> to vector<8x64xf32>
    %34 = arith.addf %32, %33 : vector<8x64xf32>
    %35 = vector.extract_strided_slice %34 {offsets = [0, 0], sizes = [8, 32], strides = [1, 1]} : vector<8x64xf32> to vector<8x32xf32>
    %36 = vector.extract_strided_slice %34 {offsets = [0, 32], sizes = [8, 32], strides = [1, 1]} : vector<8x64xf32> to vector<8x32xf32>
    %37 = vector.extract_strided_slice %30 {offsets = [0, 0], sizes = [8, 8], strides = [1, 1]} : vector<8x32xf32> to vector<8x8xf32>
    %38 = arith.truncf %37 : vector<8x8xf32> to vector<8x8xbf16>
    %39 = vector.extract_strided_slice %35 {offsets = [0, 0], sizes = [8, 8], strides = [1, 1]} : vector<8x32xf32> to vector<8x8xf32>
    %40 = arith.truncf %39 : vector<8x8xf32> to vector<8x8xbf16>
    %41 = vector.extract_strided_slice %36 {offsets = [0, 0], sizes = [8, 8], strides = [1, 1]} : vector<8x32xf32> to vector<8x8xf32>
    %42 = arith.truncf %41 : vector<8x8xf32> to vector<8x8xbf16>
    %cst_35 = arith.constant dense<0.000000e+00> : vector<8x8xf32>
    %43 = tpu.matmul %38, %40, %cst_35 {dimension_numbers = #tpu.dot_dimension_numbers<[1], [1], [0], [0], [0, 0, 1, 0], [], []>} : vector<8x8xbf16>, vector<8x8xbf16>, vector<8x8xf32> -> vector<8x8xf32>
    %cst_36 = arith.constant dense<0xFF800000> : vector<8xf32>
    %44 = vector.multi_reduction <maximumf>, %43, %cst_36 [1] : vector<8x8xf32> to vector<8xf32>
    %45 = vector.shape_cast %44 : vector<8xf32> to vector<8x1xf32>
    %46 = vector.broadcast %45 : vector<8x1xf32> to vector<8x8xf32>
    %47 = arith.subf %43, %46 : vector<8x8xf32>
    %48 = math.exp %47 : vector<8x8xf32>
    %cst_37 = arith.constant dense<0.000000e+00> : vector<8xf32>
    %49 = vector.multi_reduction <add>, %48, %cst_37 [1] : vector<8x8xf32> to vector<8xf32>
    %50 = vector.shape_cast %49 : vector<8xf32> to vector<8x1xf32>
    %51 = tpu.reciprocal %50 : vector<8x1xf32> -> vector<8x1xf32>
    %52 = vector.broadcast %51 : vector<8x1xf32> to vector<8x8xf32>
    %53 = arith.mulf %48, %52 : vector<8x8xf32>
    %54 = arith.truncf %53 : vector<8x8xf32> to vector<8x8xbf16>
    %cst_38 = arith.constant dense<0.000000e+00> : vector<8x8xf32>
    %55 = tpu.matmul %54, %42, %cst_38 {dimension_numbers = #tpu.dot_dimension_numbers<[1], [0], [0], [1], [0, 0, 1, 1], [], []>} : vector<8x8xbf16>, vector<8x8xbf16>, vector<8x8xf32> -> vector<8x8xf32>
    %c0_39 = arith.constant 0 : index
    %c0_40 = arith.constant 0 : index
    %56 = vector.load %arg45[%c0_39, %c0_40] : memref<8x32xf32, #tpu.memory_space<vmem>>, vector<8x8xf32>
    tpu.vector_store %arg45[%c0_39, %c0_40], %55 {strides = array<i32>} : memref<8x32xf32, #tpu.memory_space<vmem>>, vector<8x8xf32>,
    %57 = vector.extract_strided_slice %30 {offsets = [0, 8], sizes = [8, 8], strides = [1, 1]} : vector<8x32xf32> to vector<8x8xf32>
    %58 = arith.truncf %57 : vector<8x8xf32> to vector<8x8xbf16>
    %59 = vector.extract_strided_slice %35 {offsets = [0, 8], sizes = [8, 8], strides = [1, 1]} : vector<8x32xf32> to vector<8x8xf32>
    %60 = arith.truncf %59 : vector<8x8xf32> to vector<8x8xbf16>
    %61 = vector.extract_strided_slice %36 {offsets = [0, 8], sizes = [8, 8], strides = [1, 1]} : vector<8x32xf32> to vector<8x8xf32>
    %62 = arith.truncf %61 : vector<8x8xf32> to vector<8x8xbf16>
    %cst_41 = arith.constant dense<0.000000e+00> : vector<8x8xf32>
    %63 = tpu.matmul %58, %60, %cst_41 {dimension_numbers = #tpu.dot_dimension_numbers<[1], [1], [0], [0], [0, 0, 1, 0], [], []>} : vector<8x8xbf16>, vector<8x8xbf16>, vector<8x8xf32> -> vector<8x8xf32>
    %cst_42 = arith.constant dense<0xFF800000> : vector<8xf32>
    %64 = vector.multi_reduction <maximumf>, %63, %cst_42 [1] : vector<8x8xf32> to vector<8xf32>
    %65 = vector.shape_cast %64 : vector<8xf32> to vector<8x1xf32>
    %66 = vector.broadcast %65 : vector<8x1xf32> to vector<8x8xf32>
    %67 = arith.subf %63, %66 : vector<8x8xf32>
    %68 = math.exp %67 : vector<8x8xf32>
    %cst_43 = arith.constant dense<0.000000e+00> : vector<8xf32>
    %69 = vector.multi_reduction <add>, %68, %cst_43 [1] : vector<8x8xf32> to vector<8xf32>
    %70 = vector.shape_cast %69 : vector<8xf32> to vector<8x1xf32>
    %71 = tpu.reciprocal %70 : vector<8x1xf32> -> vector<8x1xf32>
    %72 = vector.broadcast %71 : vector<8x1xf32> to vector<8x8xf32>
    %73 = arith.mulf %68, %72 : vector<8x8xf32>
    %74 = arith.truncf %73 : vector<8x8xf32> to vector<8x8xbf16>
    %cst_44 = arith.constant dense<0.000000e+00> : vector<8x8xf32>
    %75 = tpu.matmul %74, %62, %cst_44 {dimension_numbers = #tpu.dot_dimension_numbers<[1], [0], [0], [1], [0, 0, 1, 1], [], []>} : vector<8x8xbf16>, vector<8x8xbf16>, vector<8x8xf32> -> vector<8x8xf32>
    %c0_45 = arith.constant 0 : index
    %c8 = arith.constant 8 : index
    %76 = vector.load %arg45[%c0_45, %c8] : memref<8x32xf32, #tpu.memory_space<vmem>>, vector<8x8xf32>
    tpu.vector_store %arg45[%c0_45, %c8], %75 {strides = array<i32>} : memref<8x32xf32, #tpu.memory_space<vmem>>, vector<8x8xf32>,
    %77 = vector.extract_strided_slice %30 {offsets = [0, 16], sizes = [8, 8], strides = [1, 1]} : vector<8x32xf32> to vector<8x8xf32>
    %78 = arith.truncf %77 : vector<8x8xf32> to vector<8x8xbf16>
    %79 = vector.extract_strided_slice %35 {offsets = [0, 16], sizes = [8, 8], strides = [1, 1]} : vector<8x32xf32> to vector<8x8xf32>
    %80 = arith.truncf %79 : vector<8x8xf32> to vector<8x8xbf16>
    %81 = vector.extract_strided_slice %36 {offsets = [0, 16], sizes = [8, 8], strides = [1, 1]} : vector<8x32xf32> to vector<8x8xf32>
    %82 = arith.truncf %81 : vector<8x8xf32> to vector<8x8xbf16>
    %cst_46 = arith.constant dense<0.000000e+00> : vector<8x8xf32>
    %83 = tpu.matmul %78, %80, %cst_46 {dimension_numbers = #tpu.dot_dimension_numbers<[1], [1], [0], [0], [0, 0, 1, 0], [], []>} : vector<8x8xbf16>, vector<8x8xbf16>, vector<8x8xf32> -> vector<8x8xf32>
    %cst_47 = arith.constant dense<0xFF800000> : vector<8xf32>
    %84 = vector.multi_reduction <maximumf>, %83, %cst_47 [1] : vector<8x8xf32> to vector<8xf32>
    %85 = vector.shape_cast %84 : vector<8xf32> to vector<8x1xf32>
    %86 = vector.broadcast %85 : vector<8x1xf32> to vector<8x8xf32>
    %87 = arith.subf %83, %86 : vector<8x8xf32>
    %88 = math.exp %87 : vector<8x8xf32>
    %cst_48 = arith.constant dense<0.000000e+00> : vector<8xf32>
    %89 = vector.multi_reduction <add>, %88, %cst_48 [1] : vector<8x8xf32> to vector<8xf32>
    %90 = vector.shape_cast %89 : vector<8xf32> to vector<8x1xf32>
    %91 = tpu.reciprocal %90 : vector<8x1xf32> -> vector<8x1xf32>
    %92 = vector.broadcast %91 : vector<8x1xf32> to vector<8x8xf32>
    %93 = arith.mulf %88, %92 : vector<8x8xf32>
    %94 = arith.truncf %93 : vector<8x8xf32> to vector<8x8xbf16>
    %cst_49 = arith.constant dense<0.000000e+00> : vector<8x8xf32>
    %95 = tpu.matmul %94, %82, %cst_49 {dimension_numbers = #tpu.dot_dimension_numbers<[1], [0], [0], [1], [0, 0, 1, 1], [], []>} : vector<8x8xbf16>, vector<8x8xbf16>, vector<8x8xf32> -> vector<8x8xf32>
    %c0_50 = arith.constant 0 : index
    %c16 = arith.constant 16 : index
    %96 = vector.load %arg45[%c0_50, %c16] : memref<8x32xf32, #tpu.memory_space<vmem>>, vector<8x8xf32>
    tpu.vector_store %arg45[%c0_50, %c16], %95 {strides = array<i32>} : memref<8x32xf32, #tpu.memory_space<vmem>>, vector<8x8xf32>,
    %97 = vector.extract_strided_slice %30 {offsets = [0, 24], sizes = [8, 8], strides = [1, 1]} : vector<8x32xf32> to vector<8x8xf32>
    %98 = arith.truncf %97 : vector<8x8xf32> to vector<8x8xbf16>
    %99 = vector.extract_strided_slice %35 {offsets = [0, 24], sizes = [8, 8], strides = [1, 1]} : vector<8x32xf32> to vector<8x8xf32>
    %100 = arith.truncf %99 : vector<8x8xf32> to vector<8x8xbf16>
    %101 = vector.extract_strided_slice %36 {offsets = [0, 24], sizes = [8, 8], strides = [1, 1]} : vector<8x32xf32> to vector<8x8xf32>
    %102 = arith.truncf %101 : vector<8x8xf32> to vector<8x8xbf16>
    %cst_51 = arith.constant dense<0.000000e+00> : vector<8x8xf32>
    %103 = tpu.matmul %98, %100, %cst_51 {dimension_numbers = #tpu.dot_dimension_numbers<[1], [1], [0], [0], [0, 0, 1, 0], [], []>} : vector<8x8xbf16>, vector<8x8xbf16>, vector<8x8xf32> -> vector<8x8xf32>
    %cst_52 = arith.constant dense<0xFF800000> : vector<8xf32>
    %104 = vector.multi_reduction <maximumf>, %103, %cst_52 [1] : vector<8x8xf32> to vector<8xf32>
    %105 = vector.shape_cast %104 : vector<8xf32> to vector<8x1xf32>
    %106 = vector.broadcast %105 : vector<8x1xf32> to vector<8x8xf32>
    %107 = arith.subf %103, %106 : vector<8x8xf32>
    %108 = math.exp %107 : vector<8x8xf32>
    %cst_53 = arith.constant dense<0.000000e+00> : vector<8xf32>
    %109 = vector.multi_reduction <add>, %108, %cst_53 [1] : vector<8x8xf32> to vector<8xf32>
    %110 = vector.shape_cast %109 : vector<8xf32> to vector<8x1xf32>
    %111 = tpu.reciprocal %110 : vector<8x1xf32> -> vector<8x1xf32>
    %112 = vector.broadcast %111 : vector<8x1xf32> to vector<8x8xf32>
    %113 = arith.mulf %108, %112 : vector<8x8xf32>
    %114 = arith.truncf %113 : vector<8x8xf32> to vector<8x8xbf16>
    %cst_54 = arith.constant dense<0.000000e+00> : vector<8x8xf32>
    %115 = tpu.matmul %114, %102, %cst_54 {dimension_numbers = #tpu.dot_dimension_numbers<[1], [0], [0], [1], [0, 0, 1, 1], [], []>} : vector<8x8xbf16>, vector<8x8xbf16>, vector<8x8xf32> -> vector<8x8xf32>
    %c0_55 = arith.constant 0 : index
    %c24 = arith.constant 24 : index
    %116 = vector.load %arg45[%c0_55, %c24] : memref<8x32xf32, #tpu.memory_space<vmem>>, vector<8x8xf32>
    tpu.vector_store %arg45[%c0_55, %c24], %115 {strides = array<i32>} : memref<8x32xf32, #tpu.memory_space<vmem>>, vector<8x8xf32>,
    %c0_56 = arith.constant 0 : index
    %c0_57 = arith.constant 0 : index
    %117 = vector.load %arg45[%c0_56, %c0_57] : memref<8x32xf32, #tpu.memory_space<vmem>>, vector<8x32xf32>
    %118 = arith.truncf %117 : vector<8x32xf32> to vector<8x32xbf16>
    %cst_58 = arith.constant dense<0.000000e+00> : vector<8x32xf32>
    %119 = tpu.matmul %118, %20, %cst_58 {dimension_numbers = #tpu.dot_dimension_numbers<[1], [0], [0], [1], [0, 0, 1, 1], [], []>} : vector<8x32xbf16>, vector<32x32xbf16>, vector<8x32xf32> -> vector<8x32xf32>
    %120 = vector.broadcast %22 : vector<1x32xf32> to vector<8x32xf32>
    %121 = arith.addf %119, %120 : vector<8x32xf32>
    %122 = arith.addf %121, %10 : vector<8x32xf32>
    %cst_59 = arith.constant dense<0.000000e+00> : vector<8xf32>
    %123 = vector.multi_reduction <add>, %122, %cst_59 [1] : vector<8x32xf32> to vector<8xf32>
    %124 = vector.shape_cast %123 : vector<8xf32> to vector<8x1xf32>
    %cst_60 = arith.constant 3.200000e+01 : f32
    %125 = vector.broadcast %cst_60 : f32 to vector<8x1xf32>
    %126 = arith.divf %124, %125 : vector<8x1xf32>
    %127 = vector.broadcast %126 : vector<8x1xf32> to vector<8x32xf32>
    %128 = arith.subf %122, %127 : vector<8x32xf32>
    %129 = arith.mulf %128, %128 : vector<8x32xf32>
    %cst_61 = arith.constant dense<0.000000e+00> : vector<8xf32>
    %130 = vector.multi_reduction <add>, %129, %cst_61 [1] : vector<8x32xf32> to vector<8xf32>
    %131 = vector.shape_cast %130 : vector<8xf32> to vector<8x1xf32>
    %cst_62 = arith.constant 3.200000e+01 : f32
    %132 = vector.broadcast %cst_62 : f32 to vector<8x1xf32>
    %133 = arith.divf %131, %132 : vector<8x1xf32>
    %134 = vector.broadcast %126 : vector<8x1xf32> to vector<8x32xf32>
    %135 = arith.subf %122, %134 : vector<8x32xf32>
    %cst_63 = arith.constant 9.99999974E-6 : f32
    %136 = vector.broadcast %cst_63 : f32 to vector<8x1xf32>
    %137 = arith.addf %133, %136 : vector<8x1xf32>
    %138 = math.rsqrt %137 : vector<8x1xf32>
    %139 = vector.broadcast %138 : vector<8x1xf32> to vector<8x32xf32>
    %140 = arith.mulf %135, %139 : vector<8x32xf32>
    %141 = vector.broadcast %24 : vector<1x32xf32> to vector<8x32xf32>
    %142 = arith.mulf %140, %141 : vector<8x32xf32>
    %143 = vector.broadcast %26 : vector<1x32xf32> to vector<8x32xf32>
    %144 = arith.addf %142, %143 : vector<8x32xf32>
    %c0_64 = arith.constant 0 : index
    %c0_65 = arith.constant 0 : index
    %c0_66 = arith.constant 0 : index
    %145 = vector.load %arg14[%c0_64, %c0_65, %c0_66] : memref<2x32x64xbf16, #tpu.memory_space<vmem>>, vector<1x32x64xbf16>
    %146 = vector.shape_cast %145 : vector<1x32x64xbf16> to vector<32x64xbf16>
    %c0_67 = arith.constant 0 : index
    %c0_68 = arith.constant 0 : index
    %c0_69 = arith.constant 0 : index
    %147 = vector.load %arg15[%c0_67, %c0_68, %c0_69] : memref<2x1x64xf32, #tpu.memory_space<vmem>>, vector<1x1x64xf32>
    %148 = vector.shape_cast %147 : vector<1x1x64xf32> to vector<1x64xf32>
    %c0_70 = arith.constant 0 : index
    %c0_71 = arith.constant 0 : index
    %c0_72 = arith.constant 0 : index
    %149 = vector.load %arg16[%c0_70, %c0_71, %c0_72] : memref<2x64x32xbf16, #tpu.memory_space<vmem>>, vector<1x64x32xbf16>
    %150 = vector.shape_cast %149 : vector<1x64x32xbf16> to vector<64x32xbf16>
    %c0_73 = arith.constant 0 : index
    %c0_74 = arith.constant 0 : index
    %c0_75 = arith.constant 0 : index
    %151 = vector.load %arg17[%c0_73, %c0_74, %c0_75] : memref<2x1x32xf32, #tpu.memory_space<vmem>>, vector<1x1x32xf32>
    %152 = vector.shape_cast %151 : vector<1x1x32xf32> to vector<1x32xf32>
    %c0_76 = arith.constant 0 : index
    %c0_77 = arith.constant 0 : index
    %c0_78 = arith.constant 0 : index
    %153 = vector.load %arg18[%c0_76, %c0_77, %c0_78] : memref<2x1x32xf32, #tpu.memory_space<vmem>>, vector<1x1x32xf32>
    %154 = vector.shape_cast %153 : vector<1x1x32xf32> to vector<1x32xf32>
    %c0_79 = arith.constant 0 : index
    %c0_80 = arith.constant 0 : index
    %c0_81 = arith.constant 0 : index
    %155 = vector.load %arg19[%c0_79, %c0_80, %c0_81] : memref<2x1x32xf32, #tpu.memory_space<vmem>>, vector<1x1x32xf32>
    %156 = vector.shape_cast %155 : vector<1x1x32xf32> to vector<1x32xf32>
    %157 = arith.truncf %144 : vector<8x32xf32> to vector<8x32xbf16>
    %cst_82 = arith.constant dense<0.000000e+00> : vector<8x64xf32>
    %158 = tpu.matmul %157, %146, %cst_82 {dimension_numbers = #tpu.dot_dimension_numbers<[1], [0], [0], [1], [0, 0, 1, 1], [], []>} : vector<8x32xbf16>, vector<32x64xbf16>, vector<8x64xf32> -> vector<8x64xf32>
    %159 = vector.broadcast %148 : vector<1x64xf32> to vector<8x64xf32>
    %160 = arith.addf %158, %159 : vector<8x64xf32>
    %cst_83 = arith.constant 0.000000e+00 : f32
    %161 = vector.broadcast %cst_83 : f32 to vector<8x64xf32>
    %162 = arith.maximumf %160, %161 : vector<8x64xf32>
    %163 = arith.truncf %162 : vector<8x64xf32> to vector<8x64xbf16>
    %cst_84 = arith.constant dense<0.000000e+00> : vector<8x32xf32>
    %164 = tpu.matmul %163, %150, %cst_84 {dimension_numbers = #tpu.dot_dimension_numbers<[1], [0], [0], [1], [0, 0, 1, 1], [], []>} : vector<8x64xbf16>, vector<64x32xbf16>, vector<8x32xf32> -> vector<8x32xf32>
    %165 = vector.broadcast %152 : vector<1x32xf32> to vector<8x32xf32>
    %166 = arith.addf %164, %165 : vector<8x32xf32>
    %167 = arith.addf %166, %144 : vector<8x32xf32>
    %cst_85 = arith.constant dense<0.000000e+00> : vector<8xf32>
    %168 = vector.multi_reduction <add>, %167, %cst_85 [1] : vector<8x32xf32> to vector<8xf32>
    %169 = vector.shape_cast %168 : vector<8xf32> to vector<8x1xf32>
    %cst_86 = arith.constant 3.200000e+01 : f32
    %170 = vector.broadcast %cst_86 : f32 to vector<8x1xf32>
    %171 = arith.divf %169, %170 : vector<8x1xf32>
    %172 = vector.broadcast %171 : vector<8x1xf32> to vector<8x32xf32>
    %173 = arith.subf %167, %172 : vector<8x32xf32>
    %174 = arith.mulf %173, %173 : vector<8x32xf32>
    %cst_87 = arith.constant dense<0.000000e+00> : vector<8xf32>
    %175 = vector.multi_reduction <add>, %174, %cst_87 [1] : vector<8x32xf32> to vector<8xf32>
    %176 = vector.shape_cast %175 : vector<8xf32> to vector<8x1xf32>
    %cst_88 = arith.constant 3.200000e+01 : f32
    %177 = vector.broadcast %cst_88 : f32 to vector<8x1xf32>
    %178 = arith.divf %176, %177 : vector<8x1xf32>
    %179 = vector.broadcast %171 : vector<8x1xf32> to vector<8x32xf32>
    %180 = arith.subf %167, %179 : vector<8x32xf32>
    %cst_89 = arith.constant 9.99999974E-6 : f32
    %181 = vector.broadcast %cst_89 : f32 to vector<8x1xf32>
    %182 = arith.addf %178, %181 : vector<8x1xf32>
    %183 = math.rsqrt %182 : vector<8x1xf32>
    %184 = vector.broadcast %183 : vector<8x1xf32> to vector<8x32xf32>
    %185 = arith.mulf %180, %184 : vector<8x32xf32>
    %186 = vector.broadcast %154 : vector<1x32xf32> to vector<8x32xf32>
    %187 = arith.mulf %185, %186 : vector<8x32xf32>
    %188 = vector.broadcast %156 : vector<1x32xf32> to vector<8x32xf32>
    %189 = arith.addf %187, %188 : vector<8x32xf32>
    %c1 = arith.constant 1 : index
    %c0_90 = arith.constant 0 : index
    %c0_91 = arith.constant 0 : index
    %190 = vector.load %arg6[%c1, %c0_90, %c0_91] : memref<2x32x32xbf16, #tpu.memory_space<vmem>>, vector<1x32x32xbf16>
    %191 = vector.shape_cast %190 : vector<1x32x32xbf16> to vector<32x32xbf16>
    %c1_92 = arith.constant 1 : index
    %c0_93 = arith.constant 0 : index
    %c0_94 = arith.constant 0 : index
    %192 = vector.load %arg7[%c1_92, %c0_93, %c0_94] : memref<2x1x32xf32, #tpu.memory_space<vmem>>, vector<1x1x32xf32>
    %193 = vector.shape_cast %192 : vector<1x1x32xf32> to vector<1x32xf32>
    %c1_95 = arith.constant 1 : index
    %c0_96 = arith.constant 0 : index
    %c0_97 = arith.constant 0 : index
    %194 = vector.load %arg8[%c1_95, %c0_96, %c0_97] : memref<2x32x64xbf16, #tpu.memory_space<vmem>>, vector<1x32x64xbf16>
    %195 = vector.shape_cast %194 : vector<1x32x64xbf16> to vector<32x64xbf16>
    %c1_98 = arith.constant 1 : index
    %c0_99 = arith.constant 0 : index
    %c0_100 = arith.constant 0 : index
    %196 = vector.load %arg9[%c1_98, %c0_99, %c0_100] : memref<2x1x64xf32, #tpu.memory_space<vmem>>, vector<1x1x64xf32>
    %197 = vector.shape_cast %196 : vector<1x1x64xf32> to vector<1x64xf32>
    %c1_101 = arith.constant 1 : index
    %c0_102 = arith.constant 0 : index
    %c0_103 = arith.constant 0 : index
    %198 = vector.load %arg10[%c1_101, %c0_102, %c0_103] : memref<2x32x32xbf16, #tpu.memory_space<vmem>>, vector<1x32x32xbf16>
    %199 = vector.shape_cast %198 : vector<1x32x32xbf16> to vector<32x32xbf16>
    %c1_104 = arith.constant 1 : index
    %c0_105 = arith.constant 0 : index
    %c0_106 = arith.constant 0 : index
    %200 = vector.load %arg11[%c1_104, %c0_105, %c0_106] : memref<2x1x32xf32, #tpu.memory_space<vmem>>, vector<1x1x32xf32>
    %201 = vector.shape_cast %200 : vector<1x1x32xf32> to vector<1x32xf32>
    %c1_107 = arith.constant 1 : index
    %c0_108 = arith.constant 0 : index
    %c0_109 = arith.constant 0 : index
    %202 = vector.load %arg12[%c1_107, %c0_108, %c0_109] : memref<2x1x32xf32, #tpu.memory_space<vmem>>, vector<1x1x32xf32>
    %203 = vector.shape_cast %202 : vector<1x1x32xf32> to vector<1x32xf32>
    %c1_110 = arith.constant 1 : index
    %c0_111 = arith.constant 0 : index
    %c0_112 = arith.constant 0 : index
    %204 = vector.load %arg13[%c1_110, %c0_111, %c0_112] : memref<2x1x32xf32, #tpu.memory_space<vmem>>, vector<1x1x32xf32>
    %205 = vector.shape_cast %204 : vector<1x1x32xf32> to vector<1x32xf32>
    %206 = arith.truncf %189 : vector<8x32xf32> to vector<8x32xbf16>
    %cst_113 = arith.constant dense<0.000000e+00> : vector<8x32xf32>
    %207 = tpu.matmul %206, %191, %cst_113 {dimension_numbers = #tpu.dot_dimension_numbers<[1], [0], [0], [1], [0, 0, 1, 1], [], []>} : vector<8x32xbf16>, vector<32x32xbf16>, vector<8x32xf32> -> vector<8x32xf32>
    %208 = vector.broadcast %193 : vector<1x32xf32> to vector<8x32xf32>
    %209 = arith.addf %207, %208 : vector<8x32xf32>
    %210 = arith.truncf %189 : vector<8x32xf32> to vector<8x32xbf16>
    %cst_114 = arith.constant dense<0.000000e+00> : vector<8x64xf32>
    %211 = tpu.matmul %210, %195, %cst_114 {dimension_numbers = #tpu.dot_dimension_numbers<[1], [0], [0], [1], [0, 0, 1, 1], [], []>} : vector<8x32xbf16>, vector<32x64xbf16>, vector<8x64xf32> -> vector<8x64xf32>
    %212 = vector.broadcast %197 : vector<1x64xf32> to vector<8x64xf32>
    %213 = arith.addf %211, %212 : vector<8x64xf32>
    %214 = vector.extract_strided_slice %213 {offsets = [0, 0], sizes = [8, 32], strides = [1, 1]} : vector<8x64xf32> to vector<8x32xf32>
    %215 = vector.extract_strided_slice %213 {offsets = [0, 32], sizes = [8, 32], strides = [1, 1]} : vector<8x64xf32> to vector<8x32xf32>
    %216 = vector.extract_strided_slice %209 {offsets = [0, 0], sizes = [8, 8], strides = [1, 1]} : vector<8x32xf32> to vector<8x8xf32>
    %217 = arith.truncf %216 : vector<8x8xf32> to vector<8x8xbf16>
    %218 = vector.extract_strided_slice %214 {offsets = [0, 0], sizes = [8, 8], strides = [1, 1]} : vector<8x32xf32> to vector<8x8xf32>
    %219 = arith.truncf %218 : vector<8x8xf32> to vector<8x8xbf16>
    %220 = vector.extract_strided_slice %215 {offsets = [0, 0], sizes = [8, 8], strides = [1, 1]} : vector<8x32xf32> to vector<8x8xf32>
    %221 = arith.truncf %220 : vector<8x8xf32> to vector<8x8xbf16>
    %cst_115 = arith.constant dense<0.000000e+00> : vector<8x8xf32>
    %222 = tpu.matmul %217, %219, %cst_115 {dimension_numbers = #tpu.dot_dimension_numbers<[1], [1], [0], [0], [0, 0, 1, 0], [], []>} : vector<8x8xbf16>, vector<8x8xbf16>, vector<8x8xf32> -> vector<8x8xf32>
    %cst_116 = arith.constant dense<0xFF800000> : vector<8xf32>
    %223 = vector.multi_reduction <maximumf>, %222, %cst_116 [1] : vector<8x8xf32> to vector<8xf32>
    %224 = vector.shape_cast %223 : vector<8xf32> to vector<8x1xf32>
    %225 = vector.broadcast %224 : vector<8x1xf32> to vector<8x8xf32>
    %226 = arith.subf %222, %225 : vector<8x8xf32>
    %227 = math.exp %226 : vector<8x8xf32>
    %cst_117 = arith.constant dense<0.000000e+00> : vector<8xf32>
    %228 = vector.multi_reduction <add>, %227, %cst_117 [1] : vector<8x8xf32> to vector<8xf32>
    %229 = vector.shape_cast %228 : vector<8xf32> to vector<8x1xf32>
    %230 = tpu.reciprocal %229 : vector<8x1xf32> -> vector<8x1xf32>
    %231 = vector.broadcast %230 : vector<8x1xf32> to vector<8x8xf32>
    %232 = arith.mulf %227, %231 : vector<8x8xf32>
    %233 = arith.truncf %232 : vector<8x8xf32> to vector<8x8xbf16>
    %cst_118 = arith.constant dense<0.000000e+00> : vector<8x8xf32>
    %234 = tpu.matmul %233, %221, %cst_118 {dimension_numbers = #tpu.dot_dimension_numbers<[1], [0], [0], [1], [0, 0, 1, 1], [], []>} : vector<8x8xbf16>, vector<8x8xbf16>, vector<8x8xf32> -> vector<8x8xf32>
    %c0_119 = arith.constant 0 : index
    %c0_120 = arith.constant 0 : index
    %235 = vector.load %arg45[%c0_119, %c0_120] : memref<8x32xf32, #tpu.memory_space<vmem>>, vector<8x8xf32>
    tpu.vector_store %arg45[%c0_119, %c0_120], %234 {strides = array<i32>} : memref<8x32xf32, #tpu.memory_space<vmem>>, vector<8x8xf32>,
    %236 = vector.extract_strided_slice %209 {offsets = [0, 8], sizes = [8, 8], strides = [1, 1]} : vector<8x32xf32> to vector<8x8xf32>
    %237 = arith.truncf %236 : vector<8x8xf32> to vector<8x8xbf16>
    %238 = vector.extract_strided_slice %214 {offsets = [0, 8], sizes = [8, 8], strides = [1, 1]} : vector<8x32xf32> to vector<8x8xf32>
    %239 = arith.truncf %238 : vector<8x8xf32> to vector<8x8xbf16>
    %240 = vector.extract_strided_slice %215 {offsets = [0, 8], sizes = [8, 8], strides = [1, 1]} : vector<8x32xf32> to vector<8x8xf32>
    %241 = arith.truncf %240 : vector<8x8xf32> to vector<8x8xbf16>
    %cst_121 = arith.constant dense<0.000000e+00> : vector<8x8xf32>
    %242 = tpu.matmul %237, %239, %cst_121 {dimension_numbers = #tpu.dot_dimension_numbers<[1], [1], [0], [0], [0, 0, 1, 0], [], []>} : vector<8x8xbf16>, vector<8x8xbf16>, vector<8x8xf32> -> vector<8x8xf32>
    %cst_122 = arith.constant dense<0xFF800000> : vector<8xf32>
    %243 = vector.multi_reduction <maximumf>, %242, %cst_122 [1] : vector<8x8xf32> to vector<8xf32>
    %244 = vector.shape_cast %243 : vector<8xf32> to vector<8x1xf32>
    %245 = vector.broadcast %244 : vector<8x1xf32> to vector<8x8xf32>
    %246 = arith.subf %242, %245 : vector<8x8xf32>
    %247 = math.exp %246 : vector<8x8xf32>
    %cst_123 = arith.constant dense<0.000000e+00> : vector<8xf32>
    %248 = vector.multi_reduction <add>, %247, %cst_123 [1] : vector<8x8xf32> to vector<8xf32>
    %249 = vector.shape_cast %248 : vector<8xf32> to vector<8x1xf32>
    %250 = tpu.reciprocal %249 : vector<8x1xf32> -> vector<8x1xf32>
    %251 = vector.broadcast %250 : vector<8x1xf32> to vector<8x8xf32>
    %252 = arith.mulf %247, %251 : vector<8x8xf32>
    %253 = arith.truncf %252 : vector<8x8xf32> to vector<8x8xbf16>
    %cst_124 = arith.constant dense<0.000000e+00> : vector<8x8xf32>
    %254 = tpu.matmul %253, %241, %cst_124 {dimension_numbers = #tpu.dot_dimension_numbers<[1], [0], [0], [1], [0, 0, 1, 1], [], []>} : vector<8x8xbf16>, vector<8x8xbf16>, vector<8x8xf32> -> vector<8x8xf32>
    %c0_125 = arith.constant 0 : index
    %c8_126 = arith.constant 8 : index
    %255 = vector.load %arg45[%c0_125, %c8_126] : memref<8x32xf32, #tpu.memory_space<vmem>>, vector<8x8xf32>
    tpu.vector_store %arg45[%c0_125, %c8_126], %254 {strides = array<i32>} : memref<8x32xf32, #tpu.memory_space<vmem>>, vector<8x8xf32>,
    %256 = vector.extract_strided_slice %209 {offsets = [0, 16], sizes = [8, 8], strides = [1, 1]} : vector<8x32xf32> to vector<8x8xf32>
    %257 = arith.truncf %256 : vector<8x8xf32> to vector<8x8xbf16>
    %258 = vector.extract_strided_slice %214 {offsets = [0, 16], sizes = [8, 8], strides = [1, 1]} : vector<8x32xf32> to vector<8x8xf32>
    %259 = arith.truncf %258 : vector<8x8xf32> to vector<8x8xbf16>
    %260 = vector.extract_strided_slice %215 {offsets = [0, 16], sizes = [8, 8], strides = [1, 1]} : vector<8x32xf32> to vector<8x8xf32>
    %261 = arith.truncf %260 : vector<8x8xf32> to vector<8x8xbf16>
    %cst_127 = arith.constant dense<0.000000e+00> : vector<8x8xf32>
    %262 = tpu.matmul %257, %259, %cst_127 {dimension_numbers = #tpu.dot_dimension_numbers<[1], [1], [0], [0], [0, 0, 1, 0], [], []>} : vector<8x8xbf16>, vector<8x8xbf16>, vector<8x8xf32> -> vector<8x8xf32>
    %cst_128 = arith.constant dense<0xFF800000> : vector<8xf32>
    %263 = vector.multi_reduction <maximumf>, %262, %cst_128 [1] : vector<8x8xf32> to vector<8xf32>
    %264 = vector.shape_cast %263 : vector<8xf32> to vector<8x1xf32>
    %265 = vector.broadcast %264 : vector<8x1xf32> to vector<8x8xf32>
    %266 = arith.subf %262, %265 : vector<8x8xf32>
    %267 = math.exp %266 : vector<8x8xf32>
    %cst_129 = arith.constant dense<0.000000e+00> : vector<8xf32>
    %268 = vector.multi_reduction <add>, %267, %cst_129 [1] : vector<8x8xf32> to vector<8xf32>
    %269 = vector.shape_cast %268 : vector<8xf32> to vector<8x1xf32>
    %270 = tpu.reciprocal %269 : vector<8x1xf32> -> vector<8x1xf32>
    %271 = vector.broadcast %270 : vector<8x1xf32> to vector<8x8xf32>
    %272 = arith.mulf %267, %271 : vector<8x8xf32>
    %273 = arith.truncf %272 : vector<8x8xf32> to vector<8x8xbf16>
    %cst_130 = arith.constant dense<0.000000e+00> : vector<8x8xf32>
    %274 = tpu.matmul %273, %261, %cst_130 {dimension_numbers = #tpu.dot_dimension_numbers<[1], [0], [0], [1], [0, 0, 1, 1], [], []>} : vector<8x8xbf16>, vector<8x8xbf16>, vector<8x8xf32> -> vector<8x8xf32>
    %c0_131 = arith.constant 0 : index
    %c16_132 = arith.constant 16 : index
    %275 = vector.load %arg45[%c0_131, %c16_132] : memref<8x32xf32, #tpu.memory_space<vmem>>, vector<8x8xf32>
    tpu.vector_store %arg45[%c0_131, %c16_132], %274 {strides = array<i32>} : memref<8x32xf32, #tpu.memory_space<vmem>>, vector<8x8xf32>,
    %276 = vector.extract_strided_slice %209 {offsets = [0, 24], sizes = [8, 8], strides = [1, 1]} : vector<8x32xf32> to vector<8x8xf32>
    %277 = arith.truncf %276 : vector<8x8xf32> to vector<8x8xbf16>
    %278 = vector.extract_strided_slice %214 {offsets = [0, 24], sizes = [8, 8], strides = [1, 1]} : vector<8x32xf32> to vector<8x8xf32>
    %279 = arith.truncf %278 : vector<8x8xf32> to vector<8x8xbf16>
    %280 = vector.extract_strided_slice %215 {offsets = [0, 24], sizes = [8, 8], strides = [1, 1]} : vector<8x32xf32> to vector<8x8xf32>
    %281 = arith.truncf %280 : vector<8x8xf32> to vector<8x8xbf16>
    %cst_133 = arith.constant dense<0.000000e+00> : vector<8x8xf32>
    %282 = tpu.matmul %277, %279, %cst_133 {dimension_numbers = #tpu.dot_dimension_numbers<[1], [1], [0], [0], [0, 0, 1, 0], [], []>} : vector<8x8xbf16>, vector<8x8xbf16>, vector<8x8xf32> -> vector<8x8xf32>
    %cst_134 = arith.constant dense<0xFF800000> : vector<8xf32>
    %283 = vector.multi_reduction <maximumf>, %282, %cst_134 [1] : vector<8x8xf32> to vector<8xf32>
    %284 = vector.shape_cast %283 : vector<8xf32> to vector<8x1xf32>
    %285 = vector.broadcast %284 : vector<8x1xf32> to vector<8x8xf32>
    %286 = arith.subf %282, %285 : vector<8x8xf32>
    %287 = math.exp %286 : vector<8x8xf32>
    %cst_135 = arith.constant dense<0.000000e+00> : vector<8xf32>
    %288 = vector.multi_reduction <add>, %287, %cst_135 [1] : vector<8x8xf32> to vector<8xf32>
    %289 = vector.shape_cast %288 : vector<8xf32> to vector<8x1xf32>
    %290 = tpu.reciprocal %289 : vector<8x1xf32> -> vector<8x1xf32>
    %291 = vector.broadcast %290 : vector<8x1xf32> to vector<8x8xf32>
    %292 = arith.mulf %287, %291 : vector<8x8xf32>
    %293 = arith.truncf %292 : vector<8x8xf32> to vector<8x8xbf16>
    %cst_136 = arith.constant dense<0.000000e+00> : vector<8x8xf32>
    %294 = tpu.matmul %293, %281, %cst_136 {dimension_numbers = #tpu.dot_dimension_numbers<[1], [0], [0], [1], [0, 0, 1, 1], [], []>} : vector<8x8xbf16>, vector<8x8xbf16>, vector<8x8xf32> -> vector<8x8xf32>
    %c0_137 = arith.constant 0 : index
    %c24_138 = arith.constant 24 : index
    %295 = vector.load %arg45[%c0_137, %c24_138] : memref<8x32xf32, #tpu.memory_space<vmem>>, vector<8x8xf32>
    tpu.vector_store %arg45[%c0_137, %c24_138], %294 {strides = array<i32>} : memref<8x32xf32, #tpu.memory_space<vmem>>, vector<8x8xf32>,
    %c0_139 = arith.constant 0 : index
    %c0_140 = arith.constant 0 : index
    %296 = vector.load %arg45[%c0_139, %c0_140] : memref<8x32xf32, #tpu.memory_space<vmem>>, vector<8x32xf32>
    %297 = arith.truncf %296 : vector<8x32xf32> to vector<8x32xbf16>
    %cst_141 = arith.constant dense<0.000000e+00> : vector<8x32xf32>
    %298 = tpu.matmul %297, %199, %cst_141 {dimension_numbers = #tpu.dot_dimension_numbers<[1], [0], [0], [1], [0, 0, 1, 1], [], []>} : vector<8x32xbf16>, vector<32x32xbf16>, vector<8x32xf32> -> vector<8x32xf32>
    %299 = vector.broadcast %201 : vector<1x32xf32> to vector<8x32xf32>
    %300 = arith.addf %298, %299 : vector<8x32xf32>
    %301 = arith.addf %300, %189 : vector<8x32xf32>
    %cst_142 = arith.constant dense<0.000000e+00> : vector<8xf32>
    %302 = vector.multi_reduction <add>, %301, %cst_142 [1] : vector<8x32xf32> to vector<8xf32>
    %303 = vector.shape_cast %302 : vector<8xf32> to vector<8x1xf32>
    %cst_143 = arith.constant 3.200000e+01 : f32
    %304 = vector.broadcast %cst_143 : f32 to vector<8x1xf32>
    %305 = arith.divf %303, %304 : vector<8x1xf32>
    %306 = vector.broadcast %305 : vector<8x1xf32> to vector<8x32xf32>
    %307 = arith.subf %301, %306 : vector<8x32xf32>
    %308 = arith.mulf %307, %307 : vector<8x32xf32>
    %cst_144 = arith.constant dense<0.000000e+00> : vector<8xf32>
    %309 = vector.multi_reduction <add>, %308, %cst_144 [1] : vector<8x32xf32> to vector<8xf32>
    %310 = vector.shape_cast %309 : vector<8xf32> to vector<8x1xf32>
    %cst_145 = arith.constant 3.200000e+01 : f32
    %311 = vector.broadcast %cst_145 : f32 to vector<8x1xf32>
    %312 = arith.divf %310, %311 : vector<8x1xf32>
    %313 = vector.broadcast %305 : vector<8x1xf32> to vector<8x32xf32>
    %314 = arith.subf %301, %313 : vector<8x32xf32>
    %cst_146 = arith.constant 9.99999974E-6 : f32
    %315 = vector.broadcast %cst_146 : f32 to vector<8x1xf32>
    %316 = arith.addf %312, %315 : vector<8x1xf32>
    %317 = math.rsqrt %316 : vector<8x1xf32>
    %318 = vector.broadcast %317 : vector<8x1xf32> to vector<8x32xf32>
    %319 = arith.mulf %314, %318 : vector<8x32xf32>
    %320 = vector.broadcast %203 : vector<1x32xf32> to vector<8x32xf32>
    %321 = arith.mulf %319, %320 : vector<8x32xf32>
    %322 = vector.broadcast %205 : vector<1x32xf32> to vector<8x32xf32>
    %323 = arith.addf %321, %322 : vector<8x32xf32>
    %c1_147 = arith.constant 1 : index
    %c0_148 = arith.constant 0 : index
    %c0_149 = arith.constant 0 : index
    %324 = vector.load %arg14[%c1_147, %c0_148, %c0_149] : memref<2x32x64xbf16, #tpu.memory_space<vmem>>, vector<1x32x64xbf16>
    %325 = vector.shape_cast %324 : vector<1x32x64xbf16> to vector<32x64xbf16>
    %c1_150 = arith.constant 1 : index
    %c0_151 = arith.constant 0 : index
    %c0_152 = arith.constant 0 : index
    %326 = vector.load %arg15[%c1_150, %c0_151, %c0_152] : memref<2x1x64xf32, #tpu.memory_space<vmem>>, vector<1x1x64xf32>
    %327 = vector.shape_cast %326 : vector<1x1x64xf32> to vector<1x64xf32>
    %c1_153 = arith.constant 1 : index
    %c0_154 = arith.constant 0 : index
    %c0_155 = arith.constant 0 : index
    %328 = vector.load %arg16[%c1_153, %c0_154, %c0_155] : memref<2x64x32xbf16, #tpu.memory_space<vmem>>, vector<1x64x32xbf16>
    %329 = vector.shape_cast %328 : vector<1x64x32xbf16> to vector<64x32xbf16>
    %c1_156 = arith.constant 1 : index
    %c0_157 = arith.constant 0 : index
    %c0_158 = arith.constant 0 : index
    %330 = vector.load %arg17[%c1_156, %c0_157, %c0_158] : memref<2x1x32xf32, #tpu.memory_space<vmem>>, vector<1x1x32xf32>
    %331 = vector.shape_cast %330 : vector<1x1x32xf32> to vector<1x32xf32>
    %c1_159 = arith.constant 1 : index
    %c0_160 = arith.constant 0 : index
    %c0_161 = arith.constant 0 : index
    %332 = vector.load %arg18[%c1_159, %c0_160, %c0_161] : memref<2x1x32xf32, #tpu.memory_space<vmem>>, vector<1x1x32xf32>
    %333 = vector.shape_cast %332 : vector<1x1x32xf32> to vector<1x32xf32>
    %c1_162 = arith.constant 1 : index
    %c0_163 = arith.constant 0 : index
    %c0_164 = arith.constant 0 : index
    %334 = vector.load %arg19[%c1_162, %c0_163, %c0_164] : memref<2x1x32xf32, #tpu.memory_space<vmem>>, vector<1x1x32xf32>
    %335 = vector.shape_cast %334 : vector<1x1x32xf32> to vector<1x32xf32>
    %336 = arith.truncf %323 : vector<8x32xf32> to vector<8x32xbf16>
    %cst_165 = arith.constant dense<0.000000e+00> : vector<8x64xf32>
    %337 = tpu.matmul %336, %325, %cst_165 {dimension_numbers = #tpu.dot_dimension_numbers<[1], [0], [0], [1], [0, 0, 1, 1], [], []>} : vector<8x32xbf16>, vector<32x64xbf16>, vector<8x64xf32> -> vector<8x64xf32>
    %338 = vector.broadcast %327 : vector<1x64xf32> to vector<8x64xf32>
    %339 = arith.addf %337, %338 : vector<8x64xf32>
    %cst_166 = arith.constant 0.000000e+00 : f32
    %340 = vector.broadcast %cst_166 : f32 to vector<8x64xf32>
    %341 = arith.maximumf %339, %340 : vector<8x64xf32>
    %342 = arith.truncf %341 : vector<8x64xf32> to vector<8x64xbf16>
    %cst_167 = arith.constant dense<0.000000e+00> : vector<8x32xf32>
    %343 = tpu.matmul %342, %329, %cst_167 {dimension_numbers = #tpu.dot_dimension_numbers<[1], [0], [0], [1], [0, 0, 1, 1], [], []>} : vector<8x64xbf16>, vector<64x32xbf16>, vector<8x32xf32> -> vector<8x32xf32>
    %344 = vector.broadcast %331 : vector<1x32xf32> to vector<8x32xf32>
    %345 = arith.addf %343, %344 : vector<8x32xf32>
    %346 = arith.addf %345, %323 : vector<8x32xf32>
    %cst_168 = arith.constant dense<0.000000e+00> : vector<8xf32>
    %347 = vector.multi_reduction <add>, %346, %cst_168 [1] : vector<8x32xf32> to vector<8xf32>
    %348 = vector.shape_cast %347 : vector<8xf32> to vector<8x1xf32>
    %cst_169 = arith.constant 3.200000e+01 : f32
    %349 = vector.broadcast %cst_169 : f32 to vector<8x1xf32>
    %350 = arith.divf %348, %349 : vector<8x1xf32>
    %351 = vector.broadcast %350 : vector<8x1xf32> to vector<8x32xf32>
    %352 = arith.subf %346, %351 : vector<8x32xf32>
    %353 = arith.mulf %352, %352 : vector<8x32xf32>
    %cst_170 = arith.constant dense<0.000000e+00> : vector<8xf32>
    %354 = vector.multi_reduction <add>, %353, %cst_170 [1] : vector<8x32xf32> to vector<8xf32>
    %355 = vector.shape_cast %354 : vector<8xf32> to vector<8x1xf32>
    %cst_171 = arith.constant 3.200000e+01 : f32
    %356 = vector.broadcast %cst_171 : f32 to vector<8x1xf32>
    %357 = arith.divf %355, %356 : vector<8x1xf32>
    %358 = vector.broadcast %350 : vector<8x1xf32> to vector<8x32xf32>
    %359 = arith.subf %346, %358 : vector<8x32xf32>
    %cst_172 = arith.constant 9.99999974E-6 : f32
    %360 = vector.broadcast %cst_172 : f32 to vector<8x1xf32>
    %361 = arith.addf %357, %360 : vector<8x1xf32>
    %362 = math.rsqrt %361 : vector<8x1xf32>
    %363 = vector.broadcast %362 : vector<8x1xf32> to vector<8x32xf32>
    %364 = arith.mulf %359, %363 : vector<8x32xf32>
    %365 = vector.broadcast %333 : vector<1x32xf32> to vector<8x32xf32>
    %366 = arith.mulf %364, %365 : vector<8x32xf32>
    %367 = vector.broadcast %335 : vector<1x32xf32> to vector<8x32xf32>
    %368 = arith.addf %366, %367 : vector<8x32xf32>
    %c0_173 = arith.constant 0 : index
    %c0_174 = arith.constant 0 : index
    %c0_175 = arith.constant 0 : index
    %369 = vector.load %arg3[%c0_173, %c0_174, %c0_175] : memref<1x8x32xf32, #tpu.memory_space<vmem>>, vector<1x8x32xf32>
    %370 = vector.shape_cast %369 : vector<1x8x32xf32> to vector<8x32xf32>
    %c0_176 = arith.constant 0 : index
    %c0_177 = arith.constant 0 : index
    %c0_178 = arith.constant 0 : index
    %371 = vector.load %arg20[%c0_176, %c0_177, %c0_178] : memref<2x32x32xbf16, #tpu.memory_space<vmem>>, vector<1x32x32xbf16>
    %372 = vector.shape_cast %371 : vector<1x32x32xbf16> to vector<32x32xbf16>
    %c0_179 = arith.constant 0 : index
    %c0_180 = arith.constant 0 : index
    %c0_181 = arith.constant 0 : index
    %373 = vector.load %arg21[%c0_179, %c0_180, %c0_181] : memref<2x1x32xf32, #tpu.memory_space<vmem>>, vector<1x1x32xf32>
    %374 = vector.shape_cast %373 : vector<1x1x32xf32> to vector<1x32xf32>
    %c0_182 = arith.constant 0 : index
    %c0_183 = arith.constant 0 : index
    %c0_184 = arith.constant 0 : index
    %375 = vector.load %arg22[%c0_182, %c0_183, %c0_184] : memref<2x32x64xbf16, #tpu.memory_space<vmem>>, vector<1x32x64xbf16>
    %376 = vector.shape_cast %375 : vector<1x32x64xbf16> to vector<32x64xbf16>
    %c0_185 = arith.constant 0 : index
    %c0_186 = arith.constant 0 : index
    %c0_187 = arith.constant 0 : index
    %377 = vector.load %arg23[%c0_185, %c0_186, %c0_187] : memref<2x1x64xf32, #tpu.memory_space<vmem>>, vector<1x1x64xf32>
    %378 = vector.shape_cast %377 : vector<1x1x64xf32> to vector<1x64xf32>
    %c0_188 = arith.constant 0 : index
    %c0_189 = arith.constant 0 : index
    %c0_190 = arith.constant 0 : index
    %379 = vector.load %arg24[%c0_188, %c0_189, %c0_190] : memref<2x32x32xbf16, #tpu.memory_space<vmem>>, vector<1x32x32xbf16>
    %380 = vector.shape_cast %379 : vector<1x32x32xbf16> to vector<32x32xbf16>
    %c0_191 = arith.constant 0 : index
    %c0_192 = arith.constant 0 : index
    %c0_193 = arith.constant 0 : index
    %381 = vector.load %arg25[%c0_191, %c0_192, %c0_193] : memref<2x1x32xf32, #tpu.memory_space<vmem>>, vector<1x1x32xf32>
    %382 = vector.shape_cast %381 : vector<1x1x32xf32> to vector<1x32xf32>
    %c0_194 = arith.constant 0 : index
    %c0_195 = arith.constant 0 : index
    %c0_196 = arith.constant 0 : index
    %383 = vector.load %arg26[%c0_194, %c0_195, %c0_196] : memref<2x1x32xf32, #tpu.memory_space<vmem>>, vector<1x1x32xf32>
    %384 = vector.shape_cast %383 : vector<1x1x32xf32> to vector<1x32xf32>
    %c0_197 = arith.constant 0 : index
    %c0_198 = arith.constant 0 : index
    %c0_199 = arith.constant 0 : index
    %385 = vector.load %arg27[%c0_197, %c0_198, %c0_199] : memref<2x1x32xf32, #tpu.memory_space<vmem>>, vector<1x1x32xf32>
    %386 = vector.shape_cast %385 : vector<1x1x32xf32> to vector<1x32xf32>
    %387 = arith.truncf %370 : vector<8x32xf32> to vector<8x32xbf16>
    %cst_200 = arith.constant dense<0.000000e+00> : vector<8x32xf32>
    %388 = tpu.matmul %387, %372, %cst_200 {dimension_numbers = #tpu.dot_dimension_numbers<[1], [0], [0], [1], [0, 0, 1, 1], [], []>} : vector<8x32xbf16>, vector<32x32xbf16>, vector<8x32xf32> -> vector<8x32xf32>
    %389 = vector.broadcast %374 : vector<1x32xf32> to vector<8x32xf32>
    %390 = arith.addf %388, %389 : vector<8x32xf32>
    %391 = arith.truncf %370 : vector<8x32xf32> to vector<8x32xbf16>
    %cst_201 = arith.constant dense<0.000000e+00> : vector<8x64xf32>
    %392 = tpu.matmul %391, %376, %cst_201 {dimension_numbers = #tpu.dot_dimension_numbers<[1], [0], [0], [1], [0, 0, 1, 1], [], []>} : vector<8x32xbf16>, vector<32x64xbf16>, vector<8x64xf32> -> vector<8x64xf32>
    %393 = vector.broadcast %378 : vector<1x64xf32> to vector<8x64xf32>
    %394 = arith.addf %392, %393 : vector<8x64xf32>
    %395 = vector.extract_strided_slice %394 {offsets = [0, 0], sizes = [8, 32], strides = [1, 1]} : vector<8x64xf32> to vector<8x32xf32>
    %396 = vector.extract_strided_slice %394 {offsets = [0, 32], sizes = [8, 32], strides = [1, 1]} : vector<8x64xf32> to vector<8x32xf32>
    %397 = vector.extract_strided_slice %390 {offsets = [0, 0], sizes = [8, 8], strides = [1, 1]} : vector<8x32xf32> to vector<8x8xf32>
    %398 = arith.truncf %397 : vector<8x8xf32> to vector<8x8xbf16>
    %399 = vector.extract_strided_slice %395 {offsets = [0, 0], sizes = [8, 8], strides = [1, 1]} : vector<8x32xf32> to vector<8x8xf32>
    %400 = arith.truncf %399 : vector<8x8xf32> to vector<8x8xbf16>
    %401 = vector.extract_strided_slice %396 {offsets = [0, 0], sizes = [8, 8], strides = [1, 1]} : vector<8x32xf32> to vector<8x8xf32>
    %402 = arith.truncf %401 : vector<8x8xf32> to vector<8x8xbf16>
    %cst_202 = arith.constant dense<0.000000e+00> : vector<8x8xf32>
    %403 = tpu.matmul %398, %400, %cst_202 {dimension_numbers = #tpu.dot_dimension_numbers<[1], [1], [0], [0], [0, 0, 1, 0], [], []>} : vector<8x8xbf16>, vector<8x8xbf16>, vector<8x8xf32> -> vector<8x8xf32>
    %cst_203 = arith.constant dense<0xFF800000> : vector<8xf32>
    %404 = vector.multi_reduction <maximumf>, %403, %cst_203 [1] : vector<8x8xf32> to vector<8xf32>
    %405 = vector.shape_cast %404 : vector<8xf32> to vector<8x1xf32>
    %406 = vector.broadcast %405 : vector<8x1xf32> to vector<8x8xf32>
    %407 = arith.subf %403, %406 : vector<8x8xf32>
    %408 = math.exp %407 : vector<8x8xf32>
    %cst_204 = arith.constant dense<0.000000e+00> : vector<8xf32>
    %409 = vector.multi_reduction <add>, %408, %cst_204 [1] : vector<8x8xf32> to vector<8xf32>
    %410 = vector.shape_cast %409 : vector<8xf32> to vector<8x1xf32>
    %411 = tpu.reciprocal %410 : vector<8x1xf32> -> vector<8x1xf32>
    %412 = vector.broadcast %411 : vector<8x1xf32> to vector<8x8xf32>
    %413 = arith.mulf %408, %412 : vector<8x8xf32>
    %414 = arith.truncf %413 : vector<8x8xf32> to vector<8x8xbf16>
    %cst_205 = arith.constant dense<0.000000e+00> : vector<8x8xf32>
    %415 = tpu.matmul %414, %402, %cst_205 {dimension_numbers = #tpu.dot_dimension_numbers<[1], [0], [0], [1], [0, 0, 1, 1], [], []>} : vector<8x8xbf16>, vector<8x8xbf16>, vector<8x8xf32> -> vector<8x8xf32>
    %c0_206 = arith.constant 0 : index
    %c0_207 = arith.constant 0 : index
    %416 = vector.load %arg45[%c0_206, %c0_207] : memref<8x32xf32, #tpu.memory_space<vmem>>, vector<8x8xf32>
    tpu.vector_store %arg45[%c0_206, %c0_207], %415 {strides = array<i32>} : memref<8x32xf32, #tpu.memory_space<vmem>>, vector<8x8xf32>,
    %417 = vector.extract_strided_slice %390 {offsets = [0, 8], sizes = [8, 8], strides = [1, 1]} : vector<8x32xf32> to vector<8x8xf32>
    %418 = arith.truncf %417 : vector<8x8xf32> to vector<8x8xbf16>
    %419 = vector.extract_strided_slice %395 {offsets = [0, 8], sizes = [8, 8], strides = [1, 1]} : vector<8x32xf32> to vector<8x8xf32>
    %420 = arith.truncf %419 : vector<8x8xf32> to vector<8x8xbf16>
    %421 = vector.extract_strided_slice %396 {offsets = [0, 8], sizes = [8, 8], strides = [1, 1]} : vector<8x32xf32> to vector<8x8xf32>
    %422 = arith.truncf %421 : vector<8x8xf32> to vector<8x8xbf16>
    %cst_208 = arith.constant dense<0.000000e+00> : vector<8x8xf32>
    %423 = tpu.matmul %418, %420, %cst_208 {dimension_numbers = #tpu.dot_dimension_numbers<[1], [1], [0], [0], [0, 0, 1, 0], [], []>} : vector<8x8xbf16>, vector<8x8xbf16>, vector<8x8xf32> -> vector<8x8xf32>
    %cst_209 = arith.constant dense<0xFF800000> : vector<8xf32>
    %424 = vector.multi_reduction <maximumf>, %423, %cst_209 [1] : vector<8x8xf32> to vector<8xf32>
    %425 = vector.shape_cast %424 : vector<8xf32> to vector<8x1xf32>
    %426 = vector.broadcast %425 : vector<8x1xf32> to vector<8x8xf32>
    %427 = arith.subf %423, %426 : vector<8x8xf32>
    %428 = math.exp %427 : vector<8x8xf32>
    %cst_210 = arith.constant dense<0.000000e+00> : vector<8xf32>
    %429 = vector.multi_reduction <add>, %428, %cst_210 [1] : vector<8x8xf32> to vector<8xf32>
    %430 = vector.shape_cast %429 : vector<8xf32> to vector<8x1xf32>
    %431 = tpu.reciprocal %430 : vector<8x1xf32> -> vector<8x1xf32>
    %432 = vector.broadcast %431 : vector<8x1xf32> to vector<8x8xf32>
    %433 = arith.mulf %428, %432 : vector<8x8xf32>
    %434 = arith.truncf %433 : vector<8x8xf32> to vector<8x8xbf16>
    %cst_211 = arith.constant dense<0.000000e+00> : vector<8x8xf32>
    %435 = tpu.matmul %434, %422, %cst_211 {dimension_numbers = #tpu.dot_dimension_numbers<[1], [0], [0], [1], [0, 0, 1, 1], [], []>} : vector<8x8xbf16>, vector<8x8xbf16>, vector<8x8xf32> -> vector<8x8xf32>
    %c0_212 = arith.constant 0 : index
    %c8_213 = arith.constant 8 : index
    %436 = vector.load %arg45[%c0_212, %c8_213] : memref<8x32xf32, #tpu.memory_space<vmem>>, vector<8x8xf32>
    tpu.vector_store %arg45[%c0_212, %c8_213], %435 {strides = array<i32>} : memref<8x32xf32, #tpu.memory_space<vmem>>, vector<8x8xf32>,
    %437 = vector.extract_strided_slice %390 {offsets = [0, 16], sizes = [8, 8], strides = [1, 1]} : vector<8x32xf32> to vector<8x8xf32>
    %438 = arith.truncf %437 : vector<8x8xf32> to vector<8x8xbf16>
    %439 = vector.extract_strided_slice %395 {offsets = [0, 16], sizes = [8, 8], strides = [1, 1]} : vector<8x32xf32> to vector<8x8xf32>
    %440 = arith.truncf %439 : vector<8x8xf32> to vector<8x8xbf16>
    %441 = vector.extract_strided_slice %396 {offsets = [0, 16], sizes = [8, 8], strides = [1, 1]} : vector<8x32xf32> to vector<8x8xf32>
    %442 = arith.truncf %441 : vector<8x8xf32> to vector<8x8xbf16>
    %cst_214 = arith.constant dense<0.000000e+00> : vector<8x8xf32>
    %443 = tpu.matmul %438, %440, %cst_214 {dimension_numbers = #tpu.dot_dimension_numbers<[1], [1], [0], [0], [0, 0, 1, 0], [], []>} : vector<8x8xbf16>, vector<8x8xbf16>, vector<8x8xf32> -> vector<8x8xf32>
    %cst_215 = arith.constant dense<0xFF800000> : vector<8xf32>
    %444 = vector.multi_reduction <maximumf>, %443, %cst_215 [1] : vector<8x8xf32> to vector<8xf32>
    %445 = vector.shape_cast %444 : vector<8xf32> to vector<8x1xf32>
    %446 = vector.broadcast %445 : vector<8x1xf32> to vector<8x8xf32>
    %447 = arith.subf %443, %446 : vector<8x8xf32>
    %448 = math.exp %447 : vector<8x8xf32>
    %cst_216 = arith.constant dense<0.000000e+00> : vector<8xf32>
    %449 = vector.multi_reduction <add>, %448, %cst_216 [1] : vector<8x8xf32> to vector<8xf32>
    %450 = vector.shape_cast %449 : vector<8xf32> to vector<8x1xf32>
    %451 = tpu.reciprocal %450 : vector<8x1xf32> -> vector<8x1xf32>
    %452 = vector.broadcast %451 : vector<8x1xf32> to vector<8x8xf32>
    %453 = arith.mulf %448, %452 : vector<8x8xf32>
    %454 = arith.truncf %453 : vector<8x8xf32> to vector<8x8xbf16>
    %cst_217 = arith.constant dense<0.000000e+00> : vector<8x8xf32>
    %455 = tpu.matmul %454, %442, %cst_217 {dimension_numbers = #tpu.dot_dimension_numbers<[1], [0], [0], [1], [0, 0, 1, 1], [], []>} : vector<8x8xbf16>, vector<8x8xbf16>, vector<8x8xf32> -> vector<8x8xf32>
    %c0_218 = arith.constant 0 : index
    %c16_219 = arith.constant 16 : index
    %456 = vector.load %arg45[%c0_218, %c16_219] : memref<8x32xf32, #tpu.memory_space<vmem>>, vector<8x8xf32>
    tpu.vector_store %arg45[%c0_218, %c16_219], %455 {strides = array<i32>} : memref<8x32xf32, #tpu.memory_space<vmem>>, vector<8x8xf32>,
    %457 = vector.extract_strided_slice %390 {offsets = [0, 24], sizes = [8, 8], strides = [1, 1]} : vector<8x32xf32> to vector<8x8xf32>
    %458 = arith.truncf %457 : vector<8x8xf32> to vector<8x8xbf16>
    %459 = vector.extract_strided_slice %395 {offsets = [0, 24], sizes = [8, 8], strides = [1, 1]} : vector<8x32xf32> to vector<8x8xf32>
    %460 = arith.truncf %459 : vector<8x8xf32> to vector<8x8xbf16>
    %461 = vector.extract_strided_slice %396 {offsets = [0, 24], sizes = [8, 8], strides = [1, 1]} : vector<8x32xf32> to vector<8x8xf32>
    %462 = arith.truncf %461 : vector<8x8xf32> to vector<8x8xbf16>
    %cst_220 = arith.constant dense<0.000000e+00> : vector<8x8xf32>
    %463 = tpu.matmul %458, %460, %cst_220 {dimension_numbers = #tpu.dot_dimension_numbers<[1], [1], [0], [0], [0, 0, 1, 0], [], []>} : vector<8x8xbf16>, vector<8x8xbf16>, vector<8x8xf32> -> vector<8x8xf32>
    %cst_221 = arith.constant dense<0xFF800000> : vector<8xf32>
    %464 = vector.multi_reduction <maximumf>, %463, %cst_221 [1] : vector<8x8xf32> to vector<8xf32>
    %465 = vector.shape_cast %464 : vector<8xf32> to vector<8x1xf32>
    %466 = vector.broadcast %465 : vector<8x1xf32> to vector<8x8xf32>
    %467 = arith.subf %463, %466 : vector<8x8xf32>
    %468 = math.exp %467 : vector<8x8xf32>
    %cst_222 = arith.constant dense<0.000000e+00> : vector<8xf32>
    %469 = vector.multi_reduction <add>, %468, %cst_222 [1] : vector<8x8xf32> to vector<8xf32>
    %470 = vector.shape_cast %469 : vector<8xf32> to vector<8x1xf32>
    %471 = tpu.reciprocal %470 : vector<8x1xf32> -> vector<8x1xf32>
    %472 = vector.broadcast %471 : vector<8x1xf32> to vector<8x8xf32>
    %473 = arith.mulf %468, %472 : vector<8x8xf32>
    %474 = arith.truncf %473 : vector<8x8xf32> to vector<8x8xbf16>
    %cst_223 = arith.constant dense<0.000000e+00> : vector<8x8xf32>
    %475 = tpu.matmul %474, %462, %cst_223 {dimension_numbers = #tpu.dot_dimension_numbers<[1], [0], [0], [1], [0, 0, 1, 1], [], []>} : vector<8x8xbf16>, vector<8x8xbf16>, vector<8x8xf32> -> vector<8x8xf32>
    %c0_224 = arith.constant 0 : index
    %c24_225 = arith.constant 24 : index
    %476 = vector.load %arg45[%c0_224, %c24_225] : memref<8x32xf32, #tpu.memory_space<vmem>>, vector<8x8xf32>
    tpu.vector_store %arg45[%c0_224, %c24_225], %475 {strides = array<i32>} : memref<8x32xf32, #tpu.memory_space<vmem>>, vector<8x8xf32>,
    %c0_226 = arith.constant 0 : index
    %c0_227 = arith.constant 0 : index
    %477 = vector.load %arg45[%c0_226, %c0_227] : memref<8x32xf32, #tpu.memory_space<vmem>>, vector<8x32xf32>
    %478 = arith.truncf %477 : vector<8x32xf32> to vector<8x32xbf16>
    %cst_228 = arith.constant dense<0.000000e+00> : vector<8x32xf32>
    %479 = tpu.matmul %478, %380, %cst_228 {dimension_numbers = #tpu.dot_dimension_numbers<[1], [0], [0], [1], [0, 0, 1, 1], [], []>} : vector<8x32xbf16>, vector<32x32xbf16>, vector<8x32xf32> -> vector<8x32xf32>
    %480 = vector.broadcast %382 : vector<1x32xf32> to vector<8x32xf32>
    %481 = arith.addf %479, %480 : vector<8x32xf32>
    %482 = arith.addf %481, %370 : vector<8x32xf32>
    %cst_229 = arith.constant dense<0.000000e+00> : vector<8xf32>
    %483 = vector.multi_reduction <add>, %482, %cst_229 [1] : vector<8x32xf32> to vector<8xf32>
    %484 = vector.shape_cast %483 : vector<8xf32> to vector<8x1xf32>
    %cst_230 = arith.constant 3.200000e+01 : f32
    %485 = vector.broadcast %cst_230 : f32 to vector<8x1xf32>
    %486 = arith.divf %484, %485 : vector<8x1xf32>
    %487 = vector.broadcast %486 : vector<8x1xf32> to vector<8x32xf32>
    %488 = arith.subf %482, %487 : vector<8x32xf32>
    %489 = arith.mulf %488, %488 : vector<8x32xf32>
    %cst_231 = arith.constant dense<0.000000e+00> : vector<8xf32>
    %490 = vector.multi_reduction <add>, %489, %cst_231 [1] : vector<8x32xf32> to vector<8xf32>
    %491 = vector.shape_cast %490 : vector<8xf32> to vector<8x1xf32>
    %cst_232 = arith.constant 3.200000e+01 : f32
    %492 = vector.broadcast %cst_232 : f32 to vector<8x1xf32>
    %493 = arith.divf %491, %492 : vector<8x1xf32>
    %494 = vector.broadcast %486 : vector<8x1xf32> to vector<8x32xf32>
    %495 = arith.subf %482, %494 : vector<8x32xf32>
    %cst_233 = arith.constant 9.99999974E-6 : f32
    %496 = vector.broadcast %cst_233 : f32 to vector<8x1xf32>
    %497 = arith.addf %493, %496 : vector<8x1xf32>
    %498 = math.rsqrt %497 : vector<8x1xf32>
    %499 = vector.broadcast %498 : vector<8x1xf32> to vector<8x32xf32>
    %500 = arith.mulf %495, %499 : vector<8x32xf32>
    %501 = vector.broadcast %384 : vector<1x32xf32> to vector<8x32xf32>
    %502 = arith.mulf %500, %501 : vector<8x32xf32>
    %503 = vector.broadcast %386 : vector<1x32xf32> to vector<8x32xf32>
    %504 = arith.addf %502, %503 : vector<8x32xf32>
    %c0_234 = arith.constant 0 : index
    %c0_235 = arith.constant 0 : index
    %c0_236 = arith.constant 0 : index
    %505 = vector.load %arg28[%c0_234, %c0_235, %c0_236] : memref<2x32x32xbf16, #tpu.memory_space<vmem>>, vector<1x32x32xbf16>
    %506 = vector.shape_cast %505 : vector<1x32x32xbf16> to vector<32x32xbf16>
    %c0_237 = arith.constant 0 : index
    %c0_238 = arith.constant 0 : index
    %c0_239 = arith.constant 0 : index
    %507 = vector.load %arg29[%c0_237, %c0_238, %c0_239] : memref<2x1x32xf32, #tpu.memory_space<vmem>>, vector<1x1x32xf32>
    %508 = vector.shape_cast %507 : vector<1x1x32xf32> to vector<1x32xf32>
    %c0_240 = arith.constant 0 : index
    %c0_241 = arith.constant 0 : index
    %c0_242 = arith.constant 0 : index
    %509 = vector.load %arg30[%c0_240, %c0_241, %c0_242] : memref<2x32x64xbf16, #tpu.memory_space<vmem>>, vector<1x32x64xbf16>
    %510 = vector.shape_cast %509 : vector<1x32x64xbf16> to vector<32x64xbf16>
    %c0_243 = arith.constant 0 : index
    %c0_244 = arith.constant 0 : index
    %c0_245 = arith.constant 0 : index
    %511 = vector.load %arg31[%c0_243, %c0_244, %c0_245] : memref<2x1x64xf32, #tpu.memory_space<vmem>>, vector<1x1x64xf32>
    %512 = vector.shape_cast %511 : vector<1x1x64xf32> to vector<1x64xf32>
    %c0_246 = arith.constant 0 : index
    %c0_247 = arith.constant 0 : index
    %c0_248 = arith.constant 0 : index
    %513 = vector.load %arg32[%c0_246, %c0_247, %c0_248] : memref<2x32x32xbf16, #tpu.memory_space<vmem>>, vector<1x32x32xbf16>
    %514 = vector.shape_cast %513 : vector<1x32x32xbf16> to vector<32x32xbf16>
    %c0_249 = arith.constant 0 : index
    %c0_250 = arith.constant 0 : index
    %c0_251 = arith.constant 0 : index
    %515 = vector.load %arg33[%c0_249, %c0_250, %c0_251] : memref<2x1x32xf32, #tpu.memory_space<vmem>>, vector<1x1x32xf32>
    %516 = vector.shape_cast %515 : vector<1x1x32xf32> to vector<1x32xf32>
    %c0_252 = arith.constant 0 : index
    %c0_253 = arith.constant 0 : index
    %c0_254 = arith.constant 0 : index
    %517 = vector.load %arg34[%c0_252, %c0_253, %c0_254] : memref<2x1x32xf32, #tpu.memory_space<vmem>>, vector<1x1x32xf32>
    %518 = vector.shape_cast %517 : vector<1x1x32xf32> to vector<1x32xf32>
    %c0_255 = arith.constant 0 : index
    %c0_256 = arith.constant 0 : index
    %c0_257 = arith.constant 0 : index
    %519 = vector.load %arg35[%c0_255, %c0_256, %c0_257] : memref<2x1x32xf32, #tpu.memory_space<vmem>>, vector<1x1x32xf32>
    %520 = vector.shape_cast %519 : vector<1x1x32xf32> to vector<1x32xf32>
    %521 = arith.truncf %504 : vector<8x32xf32> to vector<8x32xbf16>
    %cst_258 = arith.constant dense<0.000000e+00> : vector<8x32xf32>
    %522 = tpu.matmul %521, %506, %cst_258 {dimension_numbers = #tpu.dot_dimension_numbers<[1], [0], [0], [1], [0, 0, 1, 1], [], []>} : vector<8x32xbf16>, vector<32x32xbf16>, vector<8x32xf32> -> vector<8x32xf32>
    %523 = vector.broadcast %508 : vector<1x32xf32> to vector<8x32xf32>
    %524 = arith.addf %522, %523 : vector<8x32xf32>
    %525 = arith.truncf %368 : vector<8x32xf32> to vector<8x32xbf16>
    %cst_259 = arith.constant dense<0.000000e+00> : vector<8x64xf32>
    %526 = tpu.matmul %525, %510, %cst_259 {dimension_numbers = #tpu.dot_dimension_numbers<[1], [0], [0], [1], [0, 0, 1, 1], [], []>} : vector<8x32xbf16>, vector<32x64xbf16>, vector<8x64xf32> -> vector<8x64xf32>
    %527 = vector.broadcast %512 : vector<1x64xf32> to vector<8x64xf32>
    %528 = arith.addf %526, %527 : vector<8x64xf32>
    %529 = vector.extract_strided_slice %528 {offsets = [0, 0], sizes = [8, 32], strides = [1, 1]} : vector<8x64xf32> to vector<8x32xf32>
    %530 = vector.extract_strided_slice %528 {offsets = [0, 32], sizes = [8, 32], strides = [1, 1]} : vector<8x64xf32> to vector<8x32xf32>
    %531 = vector.extract_strided_slice %524 {offsets = [0, 0], sizes = [8, 8], strides = [1, 1]} : vector<8x32xf32> to vector<8x8xf32>
    %532 = arith.truncf %531 : vector<8x8xf32> to vector<8x8xbf16>
    %533 = vector.extract_strided_slice %529 {offsets = [0, 0], sizes = [8, 8], strides = [1, 1]} : vector<8x32xf32> to vector<8x8xf32>
    %534 = arith.truncf %533 : vector<8x8xf32> to vector<8x8xbf16>
    %535 = vector.extract_strided_slice %530 {offsets = [0, 0], sizes = [8, 8], strides = [1, 1]} : vector<8x32xf32> to vector<8x8xf32>
    %536 = arith.truncf %535 : vector<8x8xf32> to vector<8x8xbf16>
    %cst_260 = arith.constant dense<0.000000e+00> : vector<8x8xf32>
    %537 = tpu.matmul %532, %534, %cst_260 {dimension_numbers = #tpu.dot_dimension_numbers<[1], [1], [0], [0], [0, 0, 1, 0], [], []>} : vector<8x8xbf16>, vector<8x8xbf16>, vector<8x8xf32> -> vector<8x8xf32>
    %cst_261 = arith.constant dense<0xFF800000> : vector<8xf32>
    %538 = vector.multi_reduction <maximumf>, %537, %cst_261 [1] : vector<8x8xf32> to vector<8xf32>
    %539 = vector.shape_cast %538 : vector<8xf32> to vector<8x1xf32>
    %540 = vector.broadcast %539 : vector<8x1xf32> to vector<8x8xf32>
    %541 = arith.subf %537, %540 : vector<8x8xf32>
    %542 = math.exp %541 : vector<8x8xf32>
    %cst_262 = arith.constant dense<0.000000e+00> : vector<8xf32>
    %543 = vector.multi_reduction <add>, %542, %cst_262 [1] : vector<8x8xf32> to vector<8xf32>
    %544 = vector.shape_cast %543 : vector<8xf32> to vector<8x1xf32>
    %545 = tpu.reciprocal %544 : vector<8x1xf32> -> vector<8x1xf32>
    %546 = vector.broadcast %545 : vector<8x1xf32> to vector<8x8xf32>
    %547 = arith.mulf %542, %546 : vector<8x8xf32>
    %548 = arith.truncf %547 : vector<8x8xf32> to vector<8x8xbf16>
    %cst_263 = arith.constant dense<0.000000e+00> : vector<8x8xf32>
    %549 = tpu.matmul %548, %536, %cst_263 {dimension_numbers = #tpu.dot_dimension_numbers<[1], [0], [0], [1], [0, 0, 1, 1], [], []>} : vector<8x8xbf16>, vector<8x8xbf16>, vector<8x8xf32> -> vector<8x8xf32>
    %c0_264 = arith.constant 0 : index
    %c0_265 = arith.constant 0 : index
    %550 = vector.load %arg45[%c0_264, %c0_265] : memref<8x32xf32, #tpu.memory_space<vmem>>, vector<8x8xf32>
    tpu.vector_store %arg45[%c0_264, %c0_265], %549 {strides = array<i32>} : memref<8x32xf32, #tpu.memory_space<vmem>>, vector<8x8xf32>,
    %551 = vector.extract_strided_slice %524 {offsets = [0, 8], sizes = [8, 8], strides = [1, 1]} : vector<8x32xf32> to vector<8x8xf32>
    %552 = arith.truncf %551 : vector<8x8xf32> to vector<8x8xbf16>
    %553 = vector.extract_strided_slice %529 {offsets = [0, 8], sizes = [8, 8], strides = [1, 1]} : vector<8x32xf32> to vector<8x8xf32>
    %554 = arith.truncf %553 : vector<8x8xf32> to vector<8x8xbf16>
    %555 = vector.extract_strided_slice %530 {offsets = [0, 8], sizes = [8, 8], strides = [1, 1]} : vector<8x32xf32> to vector<8x8xf32>
    %556 = arith.truncf %555 : vector<8x8xf32> to vector<8x8xbf16>
    %cst_266 = arith.constant dense<0.000000e+00> : vector<8x8xf32>
    %557 = tpu.matmul %552, %554, %cst_266 {dimension_numbers = #tpu.dot_dimension_numbers<[1], [1], [0], [0], [0, 0, 1, 0], [], []>} : vector<8x8xbf16>, vector<8x8xbf16>, vector<8x8xf32> -> vector<8x8xf32>
    %cst_267 = arith.constant dense<0xFF800000> : vector<8xf32>
    %558 = vector.multi_reduction <maximumf>, %557, %cst_267 [1] : vector<8x8xf32> to vector<8xf32>
    %559 = vector.shape_cast %558 : vector<8xf32> to vector<8x1xf32>
    %560 = vector.broadcast %559 : vector<8x1xf32> to vector<8x8xf32>
    %561 = arith.subf %557, %560 : vector<8x8xf32>
    %562 = math.exp %561 : vector<8x8xf32>
    %cst_268 = arith.constant dense<0.000000e+00> : vector<8xf32>
    %563 = vector.multi_reduction <add>, %562, %cst_268 [1] : vector<8x8xf32> to vector<8xf32>
    %564 = vector.shape_cast %563 : vector<8xf32> to vector<8x1xf32>
    %565 = tpu.reciprocal %564 : vector<8x1xf32> -> vector<8x1xf32>
    %566 = vector.broadcast %565 : vector<8x1xf32> to vector<8x8xf32>
    %567 = arith.mulf %562, %566 : vector<8x8xf32>
    %568 = arith.truncf %567 : vector<8x8xf32> to vector<8x8xbf16>
    %cst_269 = arith.constant dense<0.000000e+00> : vector<8x8xf32>
    %569 = tpu.matmul %568, %556, %cst_269 {dimension_numbers = #tpu.dot_dimension_numbers<[1], [0], [0], [1], [0, 0, 1, 1], [], []>} : vector<8x8xbf16>, vector<8x8xbf16>, vector<8x8xf32> -> vector<8x8xf32>
    %c0_270 = arith.constant 0 : index
    %c8_271 = arith.constant 8 : index
    %570 = vector.load %arg45[%c0_270, %c8_271] : memref<8x32xf32, #tpu.memory_space<vmem>>, vector<8x8xf32>
    tpu.vector_store %arg45[%c0_270, %c8_271], %569 {strides = array<i32>} : memref<8x32xf32, #tpu.memory_space<vmem>>, vector<8x8xf32>,
    %571 = vector.extract_strided_slice %524 {offsets = [0, 16], sizes = [8, 8], strides = [1, 1]} : vector<8x32xf32> to vector<8x8xf32>
    %572 = arith.truncf %571 : vector<8x8xf32> to vector<8x8xbf16>
    %573 = vector.extract_strided_slice %529 {offsets = [0, 16], sizes = [8, 8], strides = [1, 1]} : vector<8x32xf32> to vector<8x8xf32>
    %574 = arith.truncf %573 : vector<8x8xf32> to vector<8x8xbf16>
    %575 = vector.extract_strided_slice %530 {offsets = [0, 16], sizes = [8, 8], strides = [1, 1]} : vector<8x32xf32> to vector<8x8xf32>
    %576 = arith.truncf %575 : vector<8x8xf32> to vector<8x8xbf16>
    %cst_272 = arith.constant dense<0.000000e+00> : vector<8x8xf32>
    %577 = tpu.matmul %572, %574, %cst_272 {dimension_numbers = #tpu.dot_dimension_numbers<[1], [1], [0], [0], [0, 0, 1, 0], [], []>} : vector<8x8xbf16>, vector<8x8xbf16>, vector<8x8xf32> -> vector<8x8xf32>
    %cst_273 = arith.constant dense<0xFF800000> : vector<8xf32>
    %578 = vector.multi_reduction <maximumf>, %577, %cst_273 [1] : vector<8x8xf32> to vector<8xf32>
    %579 = vector.shape_cast %578 : vector<8xf32> to vector<8x1xf32>
    %580 = vector.broadcast %579 : vector<8x1xf32> to vector<8x8xf32>
    %581 = arith.subf %577, %580 : vector<8x8xf32>
    %582 = math.exp %581 : vector<8x8xf32>
    %cst_274 = arith.constant dense<0.000000e+00> : vector<8xf32>
    %583 = vector.multi_reduction <add>, %582, %cst_274 [1] : vector<8x8xf32> to vector<8xf32>
    %584 = vector.shape_cast %583 : vector<8xf32> to vector<8x1xf32>
    %585 = tpu.reciprocal %584 : vector<8x1xf32> -> vector<8x1xf32>
    %586 = vector.broadcast %585 : vector<8x1xf32> to vector<8x8xf32>
    %587 = arith.mulf %582, %586 : vector<8x8xf32>
    %588 = arith.truncf %587 : vector<8x8xf32> to vector<8x8xbf16>
    %cst_275 = arith.constant dense<0.000000e+00> : vector<8x8xf32>
    %589 = tpu.matmul %588, %576, %cst_275 {dimension_numbers = #tpu.dot_dimension_numbers<[1], [0], [0], [1], [0, 0, 1, 1], [], []>} : vector<8x8xbf16>, vector<8x8xbf16>, vector<8x8xf32> -> vector<8x8xf32>
    %c0_276 = arith.constant 0 : index
    %c16_277 = arith.constant 16 : index
    %590 = vector.load %arg45[%c0_276, %c16_277] : memref<8x32xf32, #tpu.memory_space<vmem>>, vector<8x8xf32>
    tpu.vector_store %arg45[%c0_276, %c16_277], %589 {strides = array<i32>} : memref<8x32xf32, #tpu.memory_space<vmem>>, vector<8x8xf32>,
    %591 = vector.extract_strided_slice %524 {offsets = [0, 24], sizes = [8, 8], strides = [1, 1]} : vector<8x32xf32> to vector<8x8xf32>
    %592 = arith.truncf %591 : vector<8x8xf32> to vector<8x8xbf16>
    %593 = vector.extract_strided_slice %529 {offsets = [0, 24], sizes = [8, 8], strides = [1, 1]} : vector<8x32xf32> to vector<8x8xf32>
    %594 = arith.truncf %593 : vector<8x8xf32> to vector<8x8xbf16>
    %595 = vector.extract_strided_slice %530 {offsets = [0, 24], sizes = [8, 8], strides = [1, 1]} : vector<8x32xf32> to vector<8x8xf32>
    %596 = arith.truncf %595 : vector<8x8xf32> to vector<8x8xbf16>
    %cst_278 = arith.constant dense<0.000000e+00> : vector<8x8xf32>
    %597 = tpu.matmul %592, %594, %cst_278 {dimension_numbers = #tpu.dot_dimension_numbers<[1], [1], [0], [0], [0, 0, 1, 0], [], []>} : vector<8x8xbf16>, vector<8x8xbf16>, vector<8x8xf32> -> vector<8x8xf32>
    %cst_279 = arith.constant dense<0xFF800000> : vector<8xf32>
    %598 = vector.multi_reduction <maximumf>, %597, %cst_279 [1] : vector<8x8xf32> to vector<8xf32>
    %599 = vector.shape_cast %598 : vector<8xf32> to vector<8x1xf32>
    %600 = vector.broadcast %599 : vector<8x1xf32> to vector<8x8xf32>
    %601 = arith.subf %597, %600 : vector<8x8xf32>
    %602 = math.exp %601 : vector<8x8xf32>
    %cst_280 = arith.constant dense<0.000000e+00> : vector<8xf32>
    %603 = vector.multi_reduction <add>, %602, %cst_280 [1] : vector<8x8xf32> to vector<8xf32>
    %604 = vector.shape_cast %603 : vector<8xf32> to vector<8x1xf32>
    %605 = tpu.reciprocal %604 : vector<8x1xf32> -> vector<8x1xf32>
    %606 = vector.broadcast %605 : vector<8x1xf32> to vector<8x8xf32>
    %607 = arith.mulf %602, %606 : vector<8x8xf32>
    %608 = arith.truncf %607 : vector<8x8xf32> to vector<8x8xbf16>
    %cst_281 = arith.constant dense<0.000000e+00> : vector<8x8xf32>
    %609 = tpu.matmul %608, %596, %cst_281 {dimension_numbers = #tpu.dot_dimension_numbers<[1], [0], [0], [1], [0, 0, 1, 1], [], []>} : vector<8x8xbf16>, vector<8x8xbf16>, vector<8x8xf32> -> vector<8x8xf32>
    %c0_282 = arith.constant 0 : index
    %c24_283 = arith.constant 24 : index
    %610 = vector.load %arg45[%c0_282, %c24_283] : memref<8x32xf32, #tpu.memory_space<vmem>>, vector<8x8xf32>
    tpu.vector_store %arg45[%c0_282, %c24_283], %609 {strides = array<i32>} : memref<8x32xf32, #tpu.memory_space<vmem>>, vector<8x8xf32>,
    %c0_284 = arith.constant 0 : index
    %c0_285 = arith.constant 0 : index
    %611 = vector.load %arg45[%c0_284, %c0_285] : memref<8x32xf32, #tpu.memory_space<vmem>>, vector<8x32xf32>
    %612 = arith.truncf %611 : vector<8x32xf32> to vector<8x32xbf16>
    %cst_286 = arith.constant dense<0.000000e+00> : vector<8x32xf32>
    %613 = tpu.matmul %612, %514, %cst_286 {dimension_numbers = #tpu.dot_dimension_numbers<[1], [0], [0], [1], [0, 0, 1, 1], [], []>} : vector<8x32xbf16>, vector<32x32xbf16>, vector<8x32xf32> -> vector<8x32xf32>
    %614 = vector.broadcast %516 : vector<1x32xf32> to vector<8x32xf32>
    %615 = arith.addf %613, %614 : vector<8x32xf32>
    %616 = arith.addf %615, %504 : vector<8x32xf32>
    %cst_287 = arith.constant dense<0.000000e+00> : vector<8xf32>
    %617 = vector.multi_reduction <add>, %616, %cst_287 [1] : vector<8x32xf32> to vector<8xf32>
    %618 = vector.shape_cast %617 : vector<8xf32> to vector<8x1xf32>
    %cst_288 = arith.constant 3.200000e+01 : f32
    %619 = vector.broadcast %cst_288 : f32 to vector<8x1xf32>
    %620 = arith.divf %618, %619 : vector<8x1xf32>
    %621 = vector.broadcast %620 : vector<8x1xf32> to vector<8x32xf32>
    %622 = arith.subf %616, %621 : vector<8x32xf32>
    %623 = arith.mulf %622, %622 : vector<8x32xf32>
    %cst_289 = arith.constant dense<0.000000e+00> : vector<8xf32>
    %624 = vector.multi_reduction <add>, %623, %cst_289 [1] : vector<8x32xf32> to vector<8xf32>
    %625 = vector.shape_cast %624 : vector<8xf32> to vector<8x1xf32>
    %cst_290 = arith.constant 3.200000e+01 : f32
    %626 = vector.broadcast %cst_290 : f32 to vector<8x1xf32>
    %627 = arith.divf %625, %626 : vector<8x1xf32>
    %628 = vector.broadcast %620 : vector<8x1xf32> to vector<8x32xf32>
    %629 = arith.subf %616, %628 : vector<8x32xf32>
    %cst_291 = arith.constant 9.99999974E-6 : f32
    %630 = vector.broadcast %cst_291 : f32 to vector<8x1xf32>
    %631 = arith.addf %627, %630 : vector<8x1xf32>
    %632 = math.rsqrt %631 : vector<8x1xf32>
    %633 = vector.broadcast %632 : vector<8x1xf32> to vector<8x32xf32>
    %634 = arith.mulf %629, %633 : vector<8x32xf32>
    %635 = vector.broadcast %518 : vector<1x32xf32> to vector<8x32xf32>
    %636 = arith.mulf %634, %635 : vector<8x32xf32>
    %637 = vector.broadcast %520 : vector<1x32xf32> to vector<8x32xf32>
    %638 = arith.addf %636, %637 : vector<8x32xf32>
    %c0_292 = arith.constant 0 : index
    %c0_293 = arith.constant 0 : index
    %c0_294 = arith.constant 0 : index
    %639 = vector.load %arg36[%c0_292, %c0_293, %c0_294] : memref<2x32x64xbf16, #tpu.memory_space<vmem>>, vector<1x32x64xbf16>
    %640 = vector.shape_cast %639 : vector<1x32x64xbf16> to vector<32x64xbf16>
    %c0_295 = arith.constant 0 : index
    %c0_296 = arith.constant 0 : index
    %c0_297 = arith.constant 0 : index
    %641 = vector.load %arg37[%c0_295, %c0_296, %c0_297] : memref<2x1x64xf32, #tpu.memory_space<vmem>>, vector<1x1x64xf32>
    %642 = vector.shape_cast %641 : vector<1x1x64xf32> to vector<1x64xf32>
    %c0_298 = arith.constant 0 : index
    %c0_299 = arith.constant 0 : index
    %c0_300 = arith.constant 0 : index
    %643 = vector.load %arg38[%c0_298, %c0_299, %c0_300] : memref<2x64x32xbf16, #tpu.memory_space<vmem>>, vector<1x64x32xbf16>
    %644 = vector.shape_cast %643 : vector<1x64x32xbf16> to vector<64x32xbf16>
    %c0_301 = arith.constant 0 : index
    %c0_302 = arith.constant 0 : index
    %c0_303 = arith.constant 0 : index
    %645 = vector.load %arg39[%c0_301, %c0_302, %c0_303] : memref<2x1x32xf32, #tpu.memory_space<vmem>>, vector<1x1x32xf32>
    %646 = vector.shape_cast %645 : vector<1x1x32xf32> to vector<1x32xf32>
    %c0_304 = arith.constant 0 : index
    %c0_305 = arith.constant 0 : index
    %c0_306 = arith.constant 0 : index
    %647 = vector.load %arg40[%c0_304, %c0_305, %c0_306] : memref<2x1x32xf32, #tpu.memory_space<vmem>>, vector<1x1x32xf32>
    %648 = vector.shape_cast %647 : vector<1x1x32xf32> to vector<1x32xf32>
    %c0_307 = arith.constant 0 : index
    %c0_308 = arith.constant 0 : index
    %c0_309 = arith.constant 0 : index
    %649 = vector.load %arg41[%c0_307, %c0_308, %c0_309] : memref<2x1x32xf32, #tpu.memory_space<vmem>>, vector<1x1x32xf32>
    %650 = vector.shape_cast %649 : vector<1x1x32xf32> to vector<1x32xf32>
    %651 = arith.truncf %638 : vector<8x32xf32> to vector<8x32xbf16>
    %cst_310 = arith.constant dense<0.000000e+00> : vector<8x64xf32>
    %652 = tpu.matmul %651, %640, %cst_310 {dimension_numbers = #tpu.dot_dimension_numbers<[1], [0], [0], [1], [0, 0, 1, 1], [], []>} : vector<8x32xbf16>, vector<32x64xbf16>, vector<8x64xf32> -> vector<8x64xf32>
    %653 = vector.broadcast %642 : vector<1x64xf32> to vector<8x64xf32>
    %654 = arith.addf %652, %653 : vector<8x64xf32>
    %cst_311 = arith.constant 0.000000e+00 : f32
    %655 = vector.broadcast %cst_311 : f32 to vector<8x64xf32>
    %656 = arith.maximumf %654, %655 : vector<8x64xf32>
    %657 = arith.truncf %656 : vector<8x64xf32> to vector<8x64xbf16>
    %cst_312 = arith.constant dense<0.000000e+00> : vector<8x32xf32>
    %658 = tpu.matmul %657, %644, %cst_312 {dimension_numbers = #tpu.dot_dimension_numbers<[1], [0], [0], [1], [0, 0, 1, 1], [], []>} : vector<8x64xbf16>, vector<64x32xbf16>, vector<8x32xf32> -> vector<8x32xf32>
    %659 = vector.broadcast %646 : vector<1x32xf32> to vector<8x32xf32>
    %660 = arith.addf %658, %659 : vector<8x32xf32>
    %661 = arith.addf %660, %638 : vector<8x32xf32>
    %cst_313 = arith.constant dense<0.000000e+00> : vector<8xf32>
    %662 = vector.multi_reduction <add>, %661, %cst_313 [1] : vector<8x32xf32> to vector<8xf32>
    %663 = vector.shape_cast %662 : vector<8xf32> to vector<8x1xf32>
    %cst_314 = arith.constant 3.200000e+01 : f32
    %664 = vector.broadcast %cst_314 : f32 to vector<8x1xf32>
    %665 = arith.divf %663, %664 : vector<8x1xf32>
    %666 = vector.broadcast %665 : vector<8x1xf32> to vector<8x32xf32>
    %667 = arith.subf %661, %666 : vector<8x32xf32>
    %668 = arith.mulf %667, %667 : vector<8x32xf32>
    %cst_315 = arith.constant dense<0.000000e+00> : vector<8xf32>
    %669 = vector.multi_reduction <add>, %668, %cst_315 [1] : vector<8x32xf32> to vector<8xf32>
    %670 = vector.shape_cast %669 : vector<8xf32> to vector<8x1xf32>
    %cst_316 = arith.constant 3.200000e+01 : f32
    %671 = vector.broadcast %cst_316 : f32 to vector<8x1xf32>
    %672 = arith.divf %670, %671 : vector<8x1xf32>
    %673 = vector.broadcast %665 : vector<8x1xf32> to vector<8x32xf32>
    %674 = arith.subf %661, %673 : vector<8x32xf32>
    %cst_317 = arith.constant 9.99999974E-6 : f32
    %675 = vector.broadcast %cst_317 : f32 to vector<8x1xf32>
    %676 = arith.addf %672, %675 : vector<8x1xf32>
    %677 = math.rsqrt %676 : vector<8x1xf32>
    %678 = vector.broadcast %677 : vector<8x1xf32> to vector<8x32xf32>
    %679 = arith.mulf %674, %678 : vector<8x32xf32>
    %680 = vector.broadcast %648 : vector<1x32xf32> to vector<8x32xf32>
    %681 = arith.mulf %679, %680 : vector<8x32xf32>
    %682 = vector.broadcast %650 : vector<1x32xf32> to vector<8x32xf32>
    %683 = arith.addf %681, %682 : vector<8x32xf32>
    %c1_318 = arith.constant 1 : index
    %c0_319 = arith.constant 0 : index
    %c0_320 = arith.constant 0 : index
    %684 = vector.load %arg20[%c1_318, %c0_319, %c0_320] : memref<2x32x32xbf16, #tpu.memory_space<vmem>>, vector<1x32x32xbf16>
    %685 = vector.shape_cast %684 : vector<1x32x32xbf16> to vector<32x32xbf16>
    %c1_321 = arith.constant 1 : index
    %c0_322 = arith.constant 0 : index
    %c0_323 = arith.constant 0 : index
    %686 = vector.load %arg21[%c1_321, %c0_322, %c0_323] : memref<2x1x32xf32, #tpu.memory_space<vmem>>, vector<1x1x32xf32>
    %687 = vector.shape_cast %686 : vector<1x1x32xf32> to vector<1x32xf32>
    %c1_324 = arith.constant 1 : index
    %c0_325 = arith.constant 0 : index
    %c0_326 = arith.constant 0 : index
    %688 = vector.load %arg22[%c1_324, %c0_325, %c0_326] : memref<2x32x64xbf16, #tpu.memory_space<vmem>>, vector<1x32x64xbf16>
    %689 = vector.shape_cast %688 : vector<1x32x64xbf16> to vector<32x64xbf16>
    %c1_327 = arith.constant 1 : index
    %c0_328 = arith.constant 0 : index
    %c0_329 = arith.constant 0 : index
    %690 = vector.load %arg23[%c1_327, %c0_328, %c0_329] : memref<2x1x64xf32, #tpu.memory_space<vmem>>, vector<1x1x64xf32>
    %691 = vector.shape_cast %690 : vector<1x1x64xf32> to vector<1x64xf32>
    %c1_330 = arith.constant 1 : index
    %c0_331 = arith.constant 0 : index
    %c0_332 = arith.constant 0 : index
    %692 = vector.load %arg24[%c1_330, %c0_331, %c0_332] : memref<2x32x32xbf16, #tpu.memory_space<vmem>>, vector<1x32x32xbf16>
    %693 = vector.shape_cast %692 : vector<1x32x32xbf16> to vector<32x32xbf16>
    %c1_333 = arith.constant 1 : index
    %c0_334 = arith.constant 0 : index
    %c0_335 = arith.constant 0 : index
    %694 = vector.load %arg25[%c1_333, %c0_334, %c0_335] : memref<2x1x32xf32, #tpu.memory_space<vmem>>, vector<1x1x32xf32>
    %695 = vector.shape_cast %694 : vector<1x1x32xf32> to vector<1x32xf32>
    %c1_336 = arith.constant 1 : index
    %c0_337 = arith.constant 0 : index
    %c0_338 = arith.constant 0 : index
    %696 = vector.load %arg26[%c1_336, %c0_337, %c0_338] : memref<2x1x32xf32, #tpu.memory_space<vmem>>, vector<1x1x32xf32>
    %697 = vector.shape_cast %696 : vector<1x1x32xf32> to vector<1x32xf32>
    %c1_339 = arith.constant 1 : index
    %c0_340 = arith.constant 0 : index
    %c0_341 = arith.constant 0 : index
    %698 = vector.load %arg27[%c1_339, %c0_340, %c0_341] : memref<2x1x32xf32, #tpu.memory_space<vmem>>, vector<1x1x32xf32>
    %699 = vector.shape_cast %698 : vector<1x1x32xf32> to vector<1x32xf32>
    %700 = arith.truncf %683 : vector<8x32xf32> to vector<8x32xbf16>
    %cst_342 = arith.constant dense<0.000000e+00> : vector<8x32xf32>
    %701 = tpu.matmul %700, %685, %cst_342 {dimension_numbers = #tpu.dot_dimension_numbers<[1], [0], [0], [1], [0, 0, 1, 1], [], []>} : vector<8x32xbf16>, vector<32x32xbf16>, vector<8x32xf32> -> vector<8x32xf32>
    %702 = vector.broadcast %687 : vector<1x32xf32> to vector<8x32xf32>
    %703 = arith.addf %701, %702 : vector<8x32xf32>
    %704 = arith.truncf %683 : vector<8x32xf32> to vector<8x32xbf16>
    %cst_343 = arith.constant dense<0.000000e+00> : vector<8x64xf32>
    %705 = tpu.matmul %704, %689, %cst_343 {dimension_numbers = #tpu.dot_dimension_numbers<[1], [0], [0], [1], [0, 0, 1, 1], [], []>} : vector<8x32xbf16>, vector<32x64xbf16>, vector<8x64xf32> -> vector<8x64xf32>
    %706 = vector.broadcast %691 : vector<1x64xf32> to vector<8x64xf32>
    %707 = arith.addf %705, %706 : vector<8x64xf32>
    %708 = vector.extract_strided_slice %707 {offsets = [0, 0], sizes = [8, 32], strides = [1, 1]} : vector<8x64xf32> to vector<8x32xf32>
    %709 = vector.extract_strided_slice %707 {offsets = [0, 32], sizes = [8, 32], strides = [1, 1]} : vector<8x64xf32> to vector<8x32xf32>
    %710 = vector.extract_strided_slice %703 {offsets = [0, 0], sizes = [8, 8], strides = [1, 1]} : vector<8x32xf32> to vector<8x8xf32>
    %711 = arith.truncf %710 : vector<8x8xf32> to vector<8x8xbf16>
    %712 = vector.extract_strided_slice %708 {offsets = [0, 0], sizes = [8, 8], strides = [1, 1]} : vector<8x32xf32> to vector<8x8xf32>
    %713 = arith.truncf %712 : vector<8x8xf32> to vector<8x8xbf16>
    %714 = vector.extract_strided_slice %709 {offsets = [0, 0], sizes = [8, 8], strides = [1, 1]} : vector<8x32xf32> to vector<8x8xf32>
    %715 = arith.truncf %714 : vector<8x8xf32> to vector<8x8xbf16>
    %cst_344 = arith.constant dense<0.000000e+00> : vector<8x8xf32>
    %716 = tpu.matmul %711, %713, %cst_344 {dimension_numbers = #tpu.dot_dimension_numbers<[1], [1], [0], [0], [0, 0, 1, 0], [], []>} : vector<8x8xbf16>, vector<8x8xbf16>, vector<8x8xf32> -> vector<8x8xf32>
    %cst_345 = arith.constant dense<0xFF800000> : vector<8xf32>
    %717 = vector.multi_reduction <maximumf>, %716, %cst_345 [1] : vector<8x8xf32> to vector<8xf32>
    %718 = vector.shape_cast %717 : vector<8xf32> to vector<8x1xf32>
    %719 = vector.broadcast %718 : vector<8x1xf32> to vector<8x8xf32>
    %720 = arith.subf %716, %719 : vector<8x8xf32>
    %721 = math.exp %720 : vector<8x8xf32>
    %cst_346 = arith.constant dense<0.000000e+00> : vector<8xf32>
    %722 = vector.multi_reduction <add>, %721, %cst_346 [1] : vector<8x8xf32> to vector<8xf32>
    %723 = vector.shape_cast %722 : vector<8xf32> to vector<8x1xf32>
    %724 = tpu.reciprocal %723 : vector<8x1xf32> -> vector<8x1xf32>
    %725 = vector.broadcast %724 : vector<8x1xf32> to vector<8x8xf32>
    %726 = arith.mulf %721, %725 : vector<8x8xf32>
    %727 = arith.truncf %726 : vector<8x8xf32> to vector<8x8xbf16>
    %cst_347 = arith.constant dense<0.000000e+00> : vector<8x8xf32>
    %728 = tpu.matmul %727, %715, %cst_347 {dimension_numbers = #tpu.dot_dimension_numbers<[1], [0], [0], [1], [0, 0, 1, 1], [], []>} : vector<8x8xbf16>, vector<8x8xbf16>, vector<8x8xf32> -> vector<8x8xf32>
    %c0_348 = arith.constant 0 : index
    %c0_349 = arith.constant 0 : index
    %729 = vector.load %arg45[%c0_348, %c0_349] : memref<8x32xf32, #tpu.memory_space<vmem>>, vector<8x8xf32>
    tpu.vector_store %arg45[%c0_348, %c0_349], %728 {strides = array<i32>} : memref<8x32xf32, #tpu.memory_space<vmem>>, vector<8x8xf32>,
    %730 = vector.extract_strided_slice %703 {offsets = [0, 8], sizes = [8, 8], strides = [1, 1]} : vector<8x32xf32> to vector<8x8xf32>
    %731 = arith.truncf %730 : vector<8x8xf32> to vector<8x8xbf16>
    %732 = vector.extract_strided_slice %708 {offsets = [0, 8], sizes = [8, 8], strides = [1, 1]} : vector<8x32xf32> to vector<8x8xf32>
    %733 = arith.truncf %732 : vector<8x8xf32> to vector<8x8xbf16>
    %734 = vector.extract_strided_slice %709 {offsets = [0, 8], sizes = [8, 8], strides = [1, 1]} : vector<8x32xf32> to vector<8x8xf32>
    %735 = arith.truncf %734 : vector<8x8xf32> to vector<8x8xbf16>
    %cst_350 = arith.constant dense<0.000000e+00> : vector<8x8xf32>
    %736 = tpu.matmul %731, %733, %cst_350 {dimension_numbers = #tpu.dot_dimension_numbers<[1], [1], [0], [0], [0, 0, 1, 0], [], []>} : vector<8x8xbf16>, vector<8x8xbf16>, vector<8x8xf32> -> vector<8x8xf32>
    %cst_351 = arith.constant dense<0xFF800000> : vector<8xf32>
    %737 = vector.multi_reduction <maximumf>, %736, %cst_351 [1] : vector<8x8xf32> to vector<8xf32>
    %738 = vector.shape_cast %737 : vector<8xf32> to vector<8x1xf32>
    %739 = vector.broadcast %738 : vector<8x1xf32> to vector<8x8xf32>
    %740 = arith.subf %736, %739 : vector<8x8xf32>
    %741 = math.exp %740 : vector<8x8xf32>
    %cst_352 = arith.constant dense<0.000000e+00> : vector<8xf32>
    %742 = vector.multi_reduction <add>, %741, %cst_352 [1] : vector<8x8xf32> to vector<8xf32>
    %743 = vector.shape_cast %742 : vector<8xf32> to vector<8x1xf32>
    %744 = tpu.reciprocal %743 : vector<8x1xf32> -> vector<8x1xf32>
    %745 = vector.broadcast %744 : vector<8x1xf32> to vector<8x8xf32>
    %746 = arith.mulf %741, %745 : vector<8x8xf32>
    %747 = arith.truncf %746 : vector<8x8xf32> to vector<8x8xbf16>
    %cst_353 = arith.constant dense<0.000000e+00> : vector<8x8xf32>
    %748 = tpu.matmul %747, %735, %cst_353 {dimension_numbers = #tpu.dot_dimension_numbers<[1], [0], [0], [1], [0, 0, 1, 1], [], []>} : vector<8x8xbf16>, vector<8x8xbf16>, vector<8x8xf32> -> vector<8x8xf32>
    %c0_354 = arith.constant 0 : index
    %c8_355 = arith.constant 8 : index
    %749 = vector.load %arg45[%c0_354, %c8_355] : memref<8x32xf32, #tpu.memory_space<vmem>>, vector<8x8xf32>
    tpu.vector_store %arg45[%c0_354, %c8_355], %748 {strides = array<i32>} : memref<8x32xf32, #tpu.memory_space<vmem>>, vector<8x8xf32>,
    %750 = vector.extract_strided_slice %703 {offsets = [0, 16], sizes = [8, 8], strides = [1, 1]} : vector<8x32xf32> to vector<8x8xf32>
    %751 = arith.truncf %750 : vector<8x8xf32> to vector<8x8xbf16>
    %752 = vector.extract_strided_slice %708 {offsets = [0, 16], sizes = [8, 8], strides = [1, 1]} : vector<8x32xf32> to vector<8x8xf32>
    %753 = arith.truncf %752 : vector<8x8xf32> to vector<8x8xbf16>
    %754 = vector.extract_strided_slice %709 {offsets = [0, 16], sizes = [8, 8], strides = [1, 1]} : vector<8x32xf32> to vector<8x8xf32>
    %755 = arith.truncf %754 : vector<8x8xf32> to vector<8x8xbf16>
    %cst_356 = arith.constant dense<0.000000e+00> : vector<8x8xf32>
    %756 = tpu.matmul %751, %753, %cst_356 {dimension_numbers = #tpu.dot_dimension_numbers<[1], [1], [0], [0], [0, 0, 1, 0], [], []>} : vector<8x8xbf16>, vector<8x8xbf16>, vector<8x8xf32> -> vector<8x8xf32>
    %cst_357 = arith.constant dense<0xFF800000> : vector<8xf32>
    %757 = vector.multi_reduction <maximumf>, %756, %cst_357 [1] : vector<8x8xf32> to vector<8xf32>
    %758 = vector.shape_cast %757 : vector<8xf32> to vector<8x1xf32>
    %759 = vector.broadcast %758 : vector<8x1xf32> to vector<8x8xf32>
    %760 = arith.subf %756, %759 : vector<8x8xf32>
    %761 = math.exp %760 : vector<8x8xf32>
    %cst_358 = arith.constant dense<0.000000e+00> : vector<8xf32>
    %762 = vector.multi_reduction <add>, %761, %cst_358 [1] : vector<8x8xf32> to vector<8xf32>
    %763 = vector.shape_cast %762 : vector<8xf32> to vector<8x1xf32>
    %764 = tpu.reciprocal %763 : vector<8x1xf32> -> vector<8x1xf32>
    %765 = vector.broadcast %764 : vector<8x1xf32> to vector<8x8xf32>
    %766 = arith.mulf %761, %765 : vector<8x8xf32>
    %767 = arith.truncf %766 : vector<8x8xf32> to vector<8x8xbf16>
    %cst_359 = arith.constant dense<0.000000e+00> : vector<8x8xf32>
    %768 = tpu.matmul %767, %755, %cst_359 {dimension_numbers = #tpu.dot_dimension_numbers<[1], [0], [0], [1], [0, 0, 1, 1], [], []>} : vector<8x8xbf16>, vector<8x8xbf16>, vector<8x8xf32> -> vector<8x8xf32>
    %c0_360 = arith.constant 0 : index
    %c16_361 = arith.constant 16 : index
    %769 = vector.load %arg45[%c0_360, %c16_361] : memref<8x32xf32, #tpu.memory_space<vmem>>, vector<8x8xf32>
    tpu.vector_store %arg45[%c0_360, %c16_361], %768 {strides = array<i32>} : memref<8x32xf32, #tpu.memory_space<vmem>>, vector<8x8xf32>,
    %770 = vector.extract_strided_slice %703 {offsets = [0, 24], sizes = [8, 8], strides = [1, 1]} : vector<8x32xf32> to vector<8x8xf32>
    %771 = arith.truncf %770 : vector<8x8xf32> to vector<8x8xbf16>
    %772 = vector.extract_strided_slice %708 {offsets = [0, 24], sizes = [8, 8], strides = [1, 1]} : vector<8x32xf32> to vector<8x8xf32>
    %773 = arith.truncf %772 : vector<8x8xf32> to vector<8x8xbf16>
    %774 = vector.extract_strided_slice %709 {offsets = [0, 24], sizes = [8, 8], strides = [1, 1]} : vector<8x32xf32> to vector<8x8xf32>
    %775 = arith.truncf %774 : vector<8x8xf32> to vector<8x8xbf16>
    %cst_362 = arith.constant dense<0.000000e+00> : vector<8x8xf32>
    %776 = tpu.matmul %771, %773, %cst_362 {dimension_numbers = #tpu.dot_dimension_numbers<[1], [1], [0], [0], [0, 0, 1, 0], [], []>} : vector<8x8xbf16>, vector<8x8xbf16>, vector<8x8xf32> -> vector<8x8xf32>
    %cst_363 = arith.constant dense<0xFF800000> : vector<8xf32>
    %777 = vector.multi_reduction <maximumf>, %776, %cst_363 [1] : vector<8x8xf32> to vector<8xf32>
    %778 = vector.shape_cast %777 : vector<8xf32> to vector<8x1xf32>
    %779 = vector.broadcast %778 : vector<8x1xf32> to vector<8x8xf32>
    %780 = arith.subf %776, %779 : vector<8x8xf32>
    %781 = math.exp %780 : vector<8x8xf32>
    %cst_364 = arith.constant dense<0.000000e+00> : vector<8xf32>
    %782 = vector.multi_reduction <add>, %781, %cst_364 [1] : vector<8x8xf32> to vector<8xf32>
    %783 = vector.shape_cast %782 : vector<8xf32> to vector<8x1xf32>
    %784 = tpu.reciprocal %783 : vector<8x1xf32> -> vector<8x1xf32>
    %785 = vector.broadcast %784 : vector<8x1xf32> to vector<8x8xf32>
    %786 = arith.mulf %781, %785 : vector<8x8xf32>
    %787 = arith.truncf %786 : vector<8x8xf32> to vector<8x8xbf16>
    %cst_365 = arith.constant dense<0.000000e+00> : vector<8x8xf32>
    %788 = tpu.matmul %787, %775, %cst_365 {dimension_numbers = #tpu.dot_dimension_numbers<[1], [0], [0], [1], [0, 0, 1, 1], [], []>} : vector<8x8xbf16>, vector<8x8xbf16>, vector<8x8xf32> -> vector<8x8xf32>
    %c0_366 = arith.constant 0 : index
    %c24_367 = arith.constant 24 : index
    %789 = vector.load %arg45[%c0_366, %c24_367] : memref<8x32xf32, #tpu.memory_space<vmem>>, vector<8x8xf32>
    tpu.vector_store %arg45[%c0_366, %c24_367], %788 {strides = array<i32>} : memref<8x32xf32, #tpu.memory_space<vmem>>, vector<8x8xf32>,
    %c0_368 = arith.constant 0 : index
    %c0_369 = arith.constant 0 : index
    %790 = vector.load %arg45[%c0_368, %c0_369] : memref<8x32xf32, #tpu.memory_space<vmem>>, vector<8x32xf32>
    %791 = arith.truncf %790 : vector<8x32xf32> to vector<8x32xbf16>
    %cst_370 = arith.constant dense<0.000000e+00> : vector<8x32xf32>
    %792 = tpu.matmul %791, %693, %cst_370 {dimension_numbers = #tpu.dot_dimension_numbers<[1], [0], [0], [1], [0, 0, 1, 1], [], []>} : vector<8x32xbf16>, vector<32x32xbf16>, vector<8x32xf32> -> vector<8x32xf32>
    %793 = vector.broadcast %695 : vector<1x32xf32> to vector<8x32xf32>
    %794 = arith.addf %792, %793 : vector<8x32xf32>
    %795 = arith.addf %794, %683 : vector<8x32xf32>
    %cst_371 = arith.constant dense<0.000000e+00> : vector<8xf32>
    %796 = vector.multi_reduction <add>, %795, %cst_371 [1] : vector<8x32xf32> to vector<8xf32>
    %797 = vector.shape_cast %796 : vector<8xf32> to vector<8x1xf32>
    %cst_372 = arith.constant 3.200000e+01 : f32
    %798 = vector.broadcast %cst_372 : f32 to vector<8x1xf32>
    %799 = arith.divf %797, %798 : vector<8x1xf32>
    %800 = vector.broadcast %799 : vector<8x1xf32> to vector<8x32xf32>
    %801 = arith.subf %795, %800 : vector<8x32xf32>
    %802 = arith.mulf %801, %801 : vector<8x32xf32>
    %cst_373 = arith.constant dense<0.000000e+00> : vector<8xf32>
    %803 = vector.multi_reduction <add>, %802, %cst_373 [1] : vector<8x32xf32> to vector<8xf32>
    %804 = vector.shape_cast %803 : vector<8xf32> to vector<8x1xf32>
    %cst_374 = arith.constant 3.200000e+01 : f32
    %805 = vector.broadcast %cst_374 : f32 to vector<8x1xf32>
    %806 = arith.divf %804, %805 : vector<8x1xf32>
    %807 = vector.broadcast %799 : vector<8x1xf32> to vector<8x32xf32>
    %808 = arith.subf %795, %807 : vector<8x32xf32>
    %cst_375 = arith.constant 9.99999974E-6 : f32
    %809 = vector.broadcast %cst_375 : f32 to vector<8x1xf32>
    %810 = arith.addf %806, %809 : vector<8x1xf32>
    %811 = math.rsqrt %810 : vector<8x1xf32>
    %812 = vector.broadcast %811 : vector<8x1xf32> to vector<8x32xf32>
    %813 = arith.mulf %808, %812 : vector<8x32xf32>
    %814 = vector.broadcast %697 : vector<1x32xf32> to vector<8x32xf32>
    %815 = arith.mulf %813, %814 : vector<8x32xf32>
    %816 = vector.broadcast %699 : vector<1x32xf32> to vector<8x32xf32>
    %817 = arith.addf %815, %816 : vector<8x32xf32>
    %c1_376 = arith.constant 1 : index
    %c0_377 = arith.constant 0 : index
    %c0_378 = arith.constant 0 : index
    %818 = vector.load %arg28[%c1_376, %c0_377, %c0_378] : memref<2x32x32xbf16, #tpu.memory_space<vmem>>, vector<1x32x32xbf16>
    %819 = vector.shape_cast %818 : vector<1x32x32xbf16> to vector<32x32xbf16>
    %c1_379 = arith.constant 1 : index
    %c0_380 = arith.constant 0 : index
    %c0_381 = arith.constant 0 : index
    %820 = vector.load %arg29[%c1_379, %c0_380, %c0_381] : memref<2x1x32xf32, #tpu.memory_space<vmem>>, vector<1x1x32xf32>
    %821 = vector.shape_cast %820 : vector<1x1x32xf32> to vector<1x32xf32>
    %c1_382 = arith.constant 1 : index
    %c0_383 = arith.constant 0 : index
    %c0_384 = arith.constant 0 : index
    %822 = vector.load %arg30[%c1_382, %c0_383, %c0_384] : memref<2x32x64xbf16, #tpu.memory_space<vmem>>, vector<1x32x64xbf16>
    %823 = vector.shape_cast %822 : vector<1x32x64xbf16> to vector<32x64xbf16>
    %c1_385 = arith.constant 1 : index
    %c0_386 = arith.constant 0 : index
    %c0_387 = arith.constant 0 : index
    %824 = vector.load %arg31[%c1_385, %c0_386, %c0_387] : memref<2x1x64xf32, #tpu.memory_space<vmem>>, vector<1x1x64xf32>
    %825 = vector.shape_cast %824 : vector<1x1x64xf32> to vector<1x64xf32>
    %c1_388 = arith.constant 1 : index
    %c0_389 = arith.constant 0 : index
    %c0_390 = arith.constant 0 : index
    %826 = vector.load %arg32[%c1_388, %c0_389, %c0_390] : memref<2x32x32xbf16, #tpu.memory_space<vmem>>, vector<1x32x32xbf16>
    %827 = vector.shape_cast %826 : vector<1x32x32xbf16> to vector<32x32xbf16>
    %c1_391 = arith.constant 1 : index
    %c0_392 = arith.constant 0 : index
    %c0_393 = arith.constant 0 : index
    %828 = vector.load %arg33[%c1_391, %c0_392, %c0_393] : memref<2x1x32xf32, #tpu.memory_space<vmem>>, vector<1x1x32xf32>
    %829 = vector.shape_cast %828 : vector<1x1x32xf32> to vector<1x32xf32>
    %c1_394 = arith.constant 1 : index
    %c0_395 = arith.constant 0 : index
    %c0_396 = arith.constant 0 : index
    %830 = vector.load %arg34[%c1_394, %c0_395, %c0_396] : memref<2x1x32xf32, #tpu.memory_space<vmem>>, vector<1x1x32xf32>
    %831 = vector.shape_cast %830 : vector<1x1x32xf32> to vector<1x32xf32>
    %c1_397 = arith.constant 1 : index
    %c0_398 = arith.constant 0 : index
    %c0_399 = arith.constant 0 : index
    %832 = vector.load %arg35[%c1_397, %c0_398, %c0_399] : memref<2x1x32xf32, #tpu.memory_space<vmem>>, vector<1x1x32xf32>
    %833 = vector.shape_cast %832 : vector<1x1x32xf32> to vector<1x32xf32>
    %834 = arith.truncf %817 : vector<8x32xf32> to vector<8x32xbf16>
    %cst_400 = arith.constant dense<0.000000e+00> : vector<8x32xf32>
    %835 = tpu.matmul %834, %819, %cst_400 {dimension_numbers = #tpu.dot_dimension_numbers<[1], [0], [0], [1], [0, 0, 1, 1], [], []>} : vector<8x32xbf16>, vector<32x32xbf16>, vector<8x32xf32> -> vector<8x32xf32>
    %836 = vector.broadcast %821 : vector<1x32xf32> to vector<8x32xf32>
    %837 = arith.addf %835, %836 : vector<8x32xf32>
    %838 = arith.truncf %368 : vector<8x32xf32> to vector<8x32xbf16>
    %cst_401 = arith.constant dense<0.000000e+00> : vector<8x64xf32>
    %839 = tpu.matmul %838, %823, %cst_401 {dimension_numbers = #tpu.dot_dimension_numbers<[1], [0], [0], [1], [0, 0, 1, 1], [], []>} : vector<8x32xbf16>, vector<32x64xbf16>, vector<8x64xf32> -> vector<8x64xf32>
    %840 = vector.broadcast %825 : vector<1x64xf32> to vector<8x64xf32>
    %841 = arith.addf %839, %840 : vector<8x64xf32>
    %842 = vector.extract_strided_slice %841 {offsets = [0, 0], sizes = [8, 32], strides = [1, 1]} : vector<8x64xf32> to vector<8x32xf32>
    %843 = vector.extract_strided_slice %841 {offsets = [0, 32], sizes = [8, 32], strides = [1, 1]} : vector<8x64xf32> to vector<8x32xf32>
    %844 = vector.extract_strided_slice %837 {offsets = [0, 0], sizes = [8, 8], strides = [1, 1]} : vector<8x32xf32> to vector<8x8xf32>
    %845 = arith.truncf %844 : vector<8x8xf32> to vector<8x8xbf16>
    %846 = vector.extract_strided_slice %842 {offsets = [0, 0], sizes = [8, 8], strides = [1, 1]} : vector<8x32xf32> to vector<8x8xf32>
    %847 = arith.truncf %846 : vector<8x8xf32> to vector<8x8xbf16>
    %848 = vector.extract_strided_slice %843 {offsets = [0, 0], sizes = [8, 8], strides = [1, 1]} : vector<8x32xf32> to vector<8x8xf32>
    %849 = arith.truncf %848 : vector<8x8xf32> to vector<8x8xbf16>
    %cst_402 = arith.constant dense<0.000000e+00> : vector<8x8xf32>
    %850 = tpu.matmul %845, %847, %cst_402 {dimension_numbers = #tpu.dot_dimension_numbers<[1], [1], [0], [0], [0, 0, 1, 0], [], []>} : vector<8x8xbf16>, vector<8x8xbf16>, vector<8x8xf32> -> vector<8x8xf32>
    %cst_403 = arith.constant dense<0xFF800000> : vector<8xf32>
    %851 = vector.multi_reduction <maximumf>, %850, %cst_403 [1] : vector<8x8xf32> to vector<8xf32>
    %852 = vector.shape_cast %851 : vector<8xf32> to vector<8x1xf32>
    %853 = vector.broadcast %852 : vector<8x1xf32> to vector<8x8xf32>
    %854 = arith.subf %850, %853 : vector<8x8xf32>
    %855 = math.exp %854 : vector<8x8xf32>
    %cst_404 = arith.constant dense<0.000000e+00> : vector<8xf32>
    %856 = vector.multi_reduction <add>, %855, %cst_404 [1] : vector<8x8xf32> to vector<8xf32>
    %857 = vector.shape_cast %856 : vector<8xf32> to vector<8x1xf32>
    %858 = tpu.reciprocal %857 : vector<8x1xf32> -> vector<8x1xf32>
    %859 = vector.broadcast %858 : vector<8x1xf32> to vector<8x8xf32>
    %860 = arith.mulf %855, %859 : vector<8x8xf32>
    %861 = arith.truncf %860 : vector<8x8xf32> to vector<8x8xbf16>
    %cst_405 = arith.constant dense<0.000000e+00> : vector<8x8xf32>
    %862 = tpu.matmul %861, %849, %cst_405 {dimension_numbers = #tpu.dot_dimension_numbers<[1], [0], [0], [1], [0, 0, 1, 1], [], []>} : vector<8x8xbf16>, vector<8x8xbf16>, vector<8x8xf32> -> vector<8x8xf32>
    %c0_406 = arith.constant 0 : index
    %c0_407 = arith.constant 0 : index
    %863 = vector.load %arg45[%c0_406, %c0_407] : memref<8x32xf32, #tpu.memory_space<vmem>>, vector<8x8xf32>
    tpu.vector_store %arg45[%c0_406, %c0_407], %862 {strides = array<i32>} : memref<8x32xf32, #tpu.memory_space<vmem>>, vector<8x8xf32>,
    %864 = vector.extract_strided_slice %837 {offsets = [0, 8], sizes = [8, 8], strides = [1, 1]} : vector<8x32xf32> to vector<8x8xf32>
    %865 = arith.truncf %864 : vector<8x8xf32> to vector<8x8xbf16>
    %866 = vector.extract_strided_slice %842 {offsets = [0, 8], sizes = [8, 8], strides = [1, 1]} : vector<8x32xf32> to vector<8x8xf32>
    %867 = arith.truncf %866 : vector<8x8xf32> to vector<8x8xbf16>
    %868 = vector.extract_strided_slice %843 {offsets = [0, 8], sizes = [8, 8], strides = [1, 1]} : vector<8x32xf32> to vector<8x8xf32>
    %869 = arith.truncf %868 : vector<8x8xf32> to vector<8x8xbf16>
    %cst_408 = arith.constant dense<0.000000e+00> : vector<8x8xf32>
    %870 = tpu.matmul %865, %867, %cst_408 {dimension_numbers = #tpu.dot_dimension_numbers<[1], [1], [0], [0], [0, 0, 1, 0], [], []>} : vector<8x8xbf16>, vector<8x8xbf16>, vector<8x8xf32> -> vector<8x8xf32>
    %cst_409 = arith.constant dense<0xFF800000> : vector<8xf32>
    %871 = vector.multi_reduction <maximumf>, %870, %cst_409 [1] : vector<8x8xf32> to vector<8xf32>
    %872 = vector.shape_cast %871 : vector<8xf32> to vector<8x1xf32>
    %873 = vector.broadcast %872 : vector<8x1xf32> to vector<8x8xf32>
    %874 = arith.subf %870, %873 : vector<8x8xf32>
    %875 = math.exp %874 : vector<8x8xf32>
    %cst_410 = arith.constant dense<0.000000e+00> : vector<8xf32>
    %876 = vector.multi_reduction <add>, %875, %cst_410 [1] : vector<8x8xf32> to vector<8xf32>
    %877 = vector.shape_cast %876 : vector<8xf32> to vector<8x1xf32>
    %878 = tpu.reciprocal %877 : vector<8x1xf32> -> vector<8x1xf32>
    %879 = vector.broadcast %878 : vector<8x1xf32> to vector<8x8xf32>
    %880 = arith.mulf %875, %879 : vector<8x8xf32>
    %881 = arith.truncf %880 : vector<8x8xf32> to vector<8x8xbf16>
    %cst_411 = arith.constant dense<0.000000e+00> : vector<8x8xf32>
    %882 = tpu.matmul %881, %869, %cst_411 {dimension_numbers = #tpu.dot_dimension_numbers<[1], [0], [0], [1], [0, 0, 1, 1], [], []>} : vector<8x8xbf16>, vector<8x8xbf16>, vector<8x8xf32> -> vector<8x8xf32>
    %c0_412 = arith.constant 0 : index
    %c8_413 = arith.constant 8 : index
    %883 = vector.load %arg45[%c0_412, %c8_413] : memref<8x32xf32, #tpu.memory_space<vmem>>, vector<8x8xf32>
    tpu.vector_store %arg45[%c0_412, %c8_413], %882 {strides = array<i32>} : memref<8x32xf32, #tpu.memory_space<vmem>>, vector<8x8xf32>,
    %884 = vector.extract_strided_slice %837 {offsets = [0, 16], sizes = [8, 8], strides = [1, 1]} : vector<8x32xf32> to vector<8x8xf32>
    %885 = arith.truncf %884 : vector<8x8xf32> to vector<8x8xbf16>
    %886 = vector.extract_strided_slice %842 {offsets = [0, 16], sizes = [8, 8], strides = [1, 1]} : vector<8x32xf32> to vector<8x8xf32>
    %887 = arith.truncf %886 : vector<8x8xf32> to vector<8x8xbf16>
    %888 = vector.extract_strided_slice %843 {offsets = [0, 16], sizes = [8, 8], strides = [1, 1]} : vector<8x32xf32> to vector<8x8xf32>
    %889 = arith.truncf %888 : vector<8x8xf32> to vector<8x8xbf16>
    %cst_414 = arith.constant dense<0.000000e+00> : vector<8x8xf32>
    %890 = tpu.matmul %885, %887, %cst_414 {dimension_numbers = #tpu.dot_dimension_numbers<[1], [1], [0], [0], [0, 0, 1, 0], [], []>} : vector<8x8xbf16>, vector<8x8xbf16>, vector<8x8xf32> -> vector<8x8xf32>
    %cst_415 = arith.constant dense<0xFF800000> : vector<8xf32>
    %891 = vector.multi_reduction <maximumf>, %890, %cst_415 [1] : vector<8x8xf32> to vector<8xf32>
    %892 = vector.shape_cast %891 : vector<8xf32> to vector<8x1xf32>
    %893 = vector.broadcast %892 : vector<8x1xf32> to vector<8x8xf32>
    %894 = arith.subf %890, %893 : vector<8x8xf32>
    %895 = math.exp %894 : vector<8x8xf32>
    %cst_416 = arith.constant dense<0.000000e+00> : vector<8xf32>
    %896 = vector.multi_reduction <add>, %895, %cst_416 [1] : vector<8x8xf32> to vector<8xf32>
    %897 = vector.shape_cast %896 : vector<8xf32> to vector<8x1xf32>
    %898 = tpu.reciprocal %897 : vector<8x1xf32> -> vector<8x1xf32>
    %899 = vector.broadcast %898 : vector<8x1xf32> to vector<8x8xf32>
    %900 = arith.mulf %895, %899 : vector<8x8xf32>
    %901 = arith.truncf %900 : vector<8x8xf32> to vector<8x8xbf16>
    %cst_417 = arith.constant dense<0.000000e+00> : vector<8x8xf32>
    %902 = tpu.matmul %901, %889, %cst_417 {dimension_numbers = #tpu.dot_dimension_numbers<[1], [0], [0], [1], [0, 0, 1, 1], [], []>} : vector<8x8xbf16>, vector<8x8xbf16>, vector<8x8xf32> -> vector<8x8xf32>
    %c0_418 = arith.constant 0 : index
    %c16_419 = arith.constant 16 : index
    %903 = vector.load %arg45[%c0_418, %c16_419] : memref<8x32xf32, #tpu.memory_space<vmem>>, vector<8x8xf32>
    tpu.vector_store %arg45[%c0_418, %c16_419], %902 {strides = array<i32>} : memref<8x32xf32, #tpu.memory_space<vmem>>, vector<8x8xf32>,
    %904 = vector.extract_strided_slice %837 {offsets = [0, 24], sizes = [8, 8], strides = [1, 1]} : vector<8x32xf32> to vector<8x8xf32>
    %905 = arith.truncf %904 : vector<8x8xf32> to vector<8x8xbf16>
    %906 = vector.extract_strided_slice %842 {offsets = [0, 24], sizes = [8, 8], strides = [1, 1]} : vector<8x32xf32> to vector<8x8xf32>
    %907 = arith.truncf %906 : vector<8x8xf32> to vector<8x8xbf16>
    %908 = vector.extract_strided_slice %843 {offsets = [0, 24], sizes = [8, 8], strides = [1, 1]} : vector<8x32xf32> to vector<8x8xf32>
    %909 = arith.truncf %908 : vector<8x8xf32> to vector<8x8xbf16>
    %cst_420 = arith.constant dense<0.000000e+00> : vector<8x8xf32>
    %910 = tpu.matmul %905, %907, %cst_420 {dimension_numbers = #tpu.dot_dimension_numbers<[1], [1], [0], [0], [0, 0, 1, 0], [], []>} : vector<8x8xbf16>, vector<8x8xbf16>, vector<8x8xf32> -> vector<8x8xf32>
    %cst_421 = arith.constant dense<0xFF800000> : vector<8xf32>
    %911 = vector.multi_reduction <maximumf>, %910, %cst_421 [1] : vector<8x8xf32> to vector<8xf32>
    %912 = vector.shape_cast %911 : vector<8xf32> to vector<8x1xf32>
    %913 = vector.broadcast %912 : vector<8x1xf32> to vector<8x8xf32>
    %914 = arith.subf %910, %913 : vector<8x8xf32>
    %915 = math.exp %914 : vector<8x8xf32>
    %cst_422 = arith.constant dense<0.000000e+00> : vector<8xf32>
    %916 = vector.multi_reduction <add>, %915, %cst_422 [1] : vector<8x8xf32> to vector<8xf32>
    %917 = vector.shape_cast %916 : vector<8xf32> to vector<8x1xf32>
    %918 = tpu.reciprocal %917 : vector<8x1xf32> -> vector<8x1xf32>
    %919 = vector.broadcast %918 : vector<8x1xf32> to vector<8x8xf32>
    %920 = arith.mulf %915, %919 : vector<8x8xf32>
    %921 = arith.truncf %920 : vector<8x8xf32> to vector<8x8xbf16>
    %cst_423 = arith.constant dense<0.000000e+00> : vector<8x8xf32>
    %922 = tpu.matmul %921, %909, %cst_423 {dimension_numbers = #tpu.dot_dimension_numbers<[1], [0], [0], [1], [0, 0, 1, 1], [], []>} : vector<8x8xbf16>, vector<8x8xbf16>, vector<8x8xf32> -> vector<8x8xf32>
    %c0_424 = arith.constant 0 : index
    %c24_425 = arith.constant 24 : index
    %923 = vector.load %arg45[%c0_424, %c24_425] : memref<8x32xf32, #tpu.memory_space<vmem>>, vector<8x8xf32>
    tpu.vector_store %arg45[%c0_424, %c24_425], %922 {strides = array<i32>} : memref<8x32xf32, #tpu.memory_space<vmem>>, vector<8x8xf32>,
    %c0_426 = arith.constant 0 : index
    %c0_427 = arith.constant 0 : index
    %924 = vector.load %arg45[%c0_426, %c0_427] : memref<8x32xf32, #tpu.memory_space<vmem>>, vector<8x32xf32>
    %925 = arith.truncf %924 : vector<8x32xf32> to vector<8x32xbf16>
    %cst_428 = arith.constant dense<0.000000e+00> : vector<8x32xf32>
    %926 = tpu.matmul %925, %827, %cst_428 {dimension_numbers = #tpu.dot_dimension_numbers<[1], [0], [0], [1], [0, 0, 1, 1], [], []>} : vector<8x32xbf16>, vector<32x32xbf16>, vector<8x32xf32> -> vector<8x32xf32>
    %927 = vector.broadcast %829 : vector<1x32xf32> to vector<8x32xf32>
    %928 = arith.addf %926, %927 : vector<8x32xf32>
    %929 = arith.addf %928, %817 : vector<8x32xf32>
    %cst_429 = arith.constant dense<0.000000e+00> : vector<8xf32>
    %930 = vector.multi_reduction <add>, %929, %cst_429 [1] : vector<8x32xf32> to vector<8xf32>
    %931 = vector.shape_cast %930 : vector<8xf32> to vector<8x1xf32>
    %cst_430 = arith.constant 3.200000e+01 : f32
    %932 = vector.broadcast %cst_430 : f32 to vector<8x1xf32>
    %933 = arith.divf %931, %932 : vector<8x1xf32>
    %934 = vector.broadcast %933 : vector<8x1xf32> to vector<8x32xf32>
    %935 = arith.subf %929, %934 : vector<8x32xf32>
    %936 = arith.mulf %935, %935 : vector<8x32xf32>
    %cst_431 = arith.constant dense<0.000000e+00> : vector<8xf32>
    %937 = vector.multi_reduction <add>, %936, %cst_431 [1] : vector<8x32xf32> to vector<8xf32>
    %938 = vector.shape_cast %937 : vector<8xf32> to vector<8x1xf32>
    %cst_432 = arith.constant 3.200000e+01 : f32
    %939 = vector.broadcast %cst_432 : f32 to vector<8x1xf32>
    %940 = arith.divf %938, %939 : vector<8x1xf32>
    %941 = vector.broadcast %933 : vector<8x1xf32> to vector<8x32xf32>
    %942 = arith.subf %929, %941 : vector<8x32xf32>
    %cst_433 = arith.constant 9.99999974E-6 : f32
    %943 = vector.broadcast %cst_433 : f32 to vector<8x1xf32>
    %944 = arith.addf %940, %943 : vector<8x1xf32>
    %945 = math.rsqrt %944 : vector<8x1xf32>
    %946 = vector.broadcast %945 : vector<8x1xf32> to vector<8x32xf32>
    %947 = arith.mulf %942, %946 : vector<8x32xf32>
    %948 = vector.broadcast %831 : vector<1x32xf32> to vector<8x32xf32>
    %949 = arith.mulf %947, %948 : vector<8x32xf32>
    %950 = vector.broadcast %833 : vector<1x32xf32> to vector<8x32xf32>
    %951 = arith.addf %949, %950 : vector<8x32xf32>
    %c1_434 = arith.constant 1 : index
    %c0_435 = arith.constant 0 : index
    %c0_436 = arith.constant 0 : index
    %952 = vector.load %arg36[%c1_434, %c0_435, %c0_436] : memref<2x32x64xbf16, #tpu.memory_space<vmem>>, vector<1x32x64xbf16>
    %953 = vector.shape_cast %952 : vector<1x32x64xbf16> to vector<32x64xbf16>
    %c1_437 = arith.constant 1 : index
    %c0_438 = arith.constant 0 : index
    %c0_439 = arith.constant 0 : index
    %954 = vector.load %arg37[%c1_437, %c0_438, %c0_439] : memref<2x1x64xf32, #tpu.memory_space<vmem>>, vector<1x1x64xf32>
    %955 = vector.shape_cast %954 : vector<1x1x64xf32> to vector<1x64xf32>
    %c1_440 = arith.constant 1 : index
    %c0_441 = arith.constant 0 : index
    %c0_442 = arith.constant 0 : index
    %956 = vector.load %arg38[%c1_440, %c0_441, %c0_442] : memref<2x64x32xbf16, #tpu.memory_space<vmem>>, vector<1x64x32xbf16>
    %957 = vector.shape_cast %956 : vector<1x64x32xbf16> to vector<64x32xbf16>
    %c1_443 = arith.constant 1 : index
    %c0_444 = arith.constant 0 : index
    %c0_445 = arith.constant 0 : index
    %958 = vector.load %arg39[%c1_443, %c0_444, %c0_445] : memref<2x1x32xf32, #tpu.memory_space<vmem>>, vector<1x1x32xf32>
    %959 = vector.shape_cast %958 : vector<1x1x32xf32> to vector<1x32xf32>
    %c1_446 = arith.constant 1 : index
    %c0_447 = arith.constant 0 : index
    %c0_448 = arith.constant 0 : index
    %960 = vector.load %arg40[%c1_446, %c0_447, %c0_448] : memref<2x1x32xf32, #tpu.memory_space<vmem>>, vector<1x1x32xf32>
    %961 = vector.shape_cast %960 : vector<1x1x32xf32> to vector<1x32xf32>
    %c1_449 = arith.constant 1 : index
    %c0_450 = arith.constant 0 : index
    %c0_451 = arith.constant 0 : index
    %962 = vector.load %arg41[%c1_449, %c0_450, %c0_451] : memref<2x1x32xf32, #tpu.memory_space<vmem>>, vector<1x1x32xf32>
    %963 = vector.shape_cast %962 : vector<1x1x32xf32> to vector<1x32xf32>
    %964 = arith.truncf %951 : vector<8x32xf32> to vector<8x32xbf16>
    %cst_452 = arith.constant dense<0.000000e+00> : vector<8x64xf32>
    %965 = tpu.matmul %964, %953, %cst_452 {dimension_numbers = #tpu.dot_dimension_numbers<[1], [0], [0], [1], [0, 0, 1, 1], [], []>} : vector<8x32xbf16>, vector<32x64xbf16>, vector<8x64xf32> -> vector<8x64xf32>
    %966 = vector.broadcast %955 : vector<1x64xf32> to vector<8x64xf32>
    %967 = arith.addf %965, %966 : vector<8x64xf32>
    %cst_453 = arith.constant 0.000000e+00 : f32
    %968 = vector.broadcast %cst_453 : f32 to vector<8x64xf32>
    %969 = arith.maximumf %967, %968 : vector<8x64xf32>
    %970 = arith.truncf %969 : vector<8x64xf32> to vector<8x64xbf16>
    %cst_454 = arith.constant dense<0.000000e+00> : vector<8x32xf32>
    %971 = tpu.matmul %970, %957, %cst_454 {dimension_numbers = #tpu.dot_dimension_numbers<[1], [0], [0], [1], [0, 0, 1, 1], [], []>} : vector<8x64xbf16>, vector<64x32xbf16>, vector<8x32xf32> -> vector<8x32xf32>
    %972 = vector.broadcast %959 : vector<1x32xf32> to vector<8x32xf32>
    %973 = arith.addf %971, %972 : vector<8x32xf32>
    %974 = arith.addf %973, %951 : vector<8x32xf32>
    %cst_455 = arith.constant dense<0.000000e+00> : vector<8xf32>
    %975 = vector.multi_reduction <add>, %974, %cst_455 [1] : vector<8x32xf32> to vector<8xf32>
    %976 = vector.shape_cast %975 : vector<8xf32> to vector<8x1xf32>
    %cst_456 = arith.constant 3.200000e+01 : f32
    %977 = vector.broadcast %cst_456 : f32 to vector<8x1xf32>
    %978 = arith.divf %976, %977 : vector<8x1xf32>
    %979 = vector.broadcast %978 : vector<8x1xf32> to vector<8x32xf32>
    %980 = arith.subf %974, %979 : vector<8x32xf32>
    %981 = arith.mulf %980, %980 : vector<8x32xf32>
    %cst_457 = arith.constant dense<0.000000e+00> : vector<8xf32>
    %982 = vector.multi_reduction <add>, %981, %cst_457 [1] : vector<8x32xf32> to vector<8xf32>
    %983 = vector.shape_cast %982 : vector<8xf32> to vector<8x1xf32>
    %cst_458 = arith.constant 3.200000e+01 : f32
    %984 = vector.broadcast %cst_458 : f32 to vector<8x1xf32>
    %985 = arith.divf %983, %984 : vector<8x1xf32>
    %986 = vector.broadcast %978 : vector<8x1xf32> to vector<8x32xf32>
    %987 = arith.subf %974, %986 : vector<8x32xf32>
    %cst_459 = arith.constant 9.99999974E-6 : f32
    %988 = vector.broadcast %cst_459 : f32 to vector<8x1xf32>
    %989 = arith.addf %985, %988 : vector<8x1xf32>
    %990 = math.rsqrt %989 : vector<8x1xf32>
    %991 = vector.broadcast %990 : vector<8x1xf32> to vector<8x32xf32>
    %992 = arith.mulf %987, %991 : vector<8x32xf32>
    %993 = vector.broadcast %961 : vector<1x32xf32> to vector<8x32xf32>
    %994 = arith.mulf %992, %993 : vector<8x32xf32>
    %995 = vector.broadcast %963 : vector<1x32xf32> to vector<8x32xf32>
    %996 = arith.addf %994, %995 : vector<8x32xf32>
    %997 = arith.truncf %996 : vector<8x32xf32> to vector<8x32xbf16>
    %c0_460 = arith.constant 0 : index
    %c0_461 = arith.constant 0 : index
    %998 = vector.load %arg42[%c0_460, %c0_461] : memref<32x128xbf16, #tpu.memory_space<vmem>>, vector<32x128xbf16>
    %cst_462 = arith.constant dense<0.000000e+00> : vector<8x128xf32>
    %999 = tpu.matmul %997, %998, %cst_462 {dimension_numbers = #tpu.dot_dimension_numbers<[1], [0], [0], [1], [0, 0, 1, 1], [], []>} : vector<8x32xbf16>, vector<32x128xbf16>, vector<8x128xf32> -> vector<8x128xf32>
    %c0_463 = arith.constant 0 : index
    %c0_464 = arith.constant 0 : index
    %1000 = vector.load %arg43[%c0_463, %c0_464] : memref<1x128xf32, #tpu.memory_space<vmem>>, vector<1x128xf32>
    %1001 = vector.broadcast %1000 : vector<1x128xf32> to vector<8x128xf32>
    %1002 = arith.addf %999, %1001 : vector<8x128xf32>
    %c0_465 = arith.constant 0 : index
    %c0_466 = arith.constant 0 : index
    %c0_467 = arith.constant 0 : index
    %1003 = vector.load %arg44[%c0_465, %c0_466, %c0_467] : memref<1x8x128xf32, #tpu.memory_space<vmem>>, vector<1x8x128xf32>
    %1004 = vector.shape_cast %1003 : vector<1x8x128xf32> to vector<8x128xf32>
    %1005 = vector.shape_cast %1002 : vector<8x128xf32> to vector<1x8x128xf32>
    tpu.vector_store %arg44[%c0_465, %c0_466, %c0_467], %1005 {strides = array<i32>} : memref<1x8x128xf32, #tpu.memory_space<vmem>>, vector<1x8x128xf32>,
    return
  }
  func.func @transform_0(%arg0: i32) -> (i32, i32, i32) {
    %c0_i32 = arith.constant 0 : i32
    %c0_i32_0 = arith.constant 0 : i32
    %c0_i32_1 = arith.constant 0 : i32
    return %arg0, %c0_i32, %c0_i32_0 : i32, i32, i32
  }
  func.func @transform_1(%arg0: i32) -> (i32, i32, i32) {
    %c0_i32 = arith.constant 0 : i32
    %c0_i32_0 = arith.constant 0 : i32
    %c0_i32_1 = arith.constant 0 : i32
    return %arg0, %c0_i32, %c0_i32_0 : i32, i32, i32
  }
  func.func @transform_2(%arg0: i32) -> (i32, i32, i32) {
    %c0_i32 = arith.constant 0 : i32
    %c0_i32_0 = arith.constant 0 : i32
    %c0_i32_1 = arith.constant 0 : i32
    return %arg0, %c0_i32, %c0_i32_0 : i32, i32, i32
  }
  func.func @transform_3(%arg0: i32) -> (i32, i32) {
    %c0_i32 = arith.constant 0 : i32
    %c0_i32_0 = arith.constant 0 : i32
    %c0_i32_1 = arith.constant 0 : i32
    return %c0_i32, %c0_i32_0 : i32, i32
  }
  func.func @transform_4(%arg0: i32) -> (i32, i32) {
    %c0_i32 = arith.constant 0 : i32
    %c0_i32_0 = arith.constant 0 : i32
    %c0_i32_1 = arith.constant 0 : i32
    return %c0_i32, %c0_i32_0 : i32, i32
  }
  func.func @transform_5(%arg0: i32) -> (i32, i32, i32) {
    %c0_i32 = arith.constant 0 : i32
    %c0_i32_0 = arith.constant 0 : i32
    %c0_i32_1 = arith.constant 0 : i32
    %c0_i32_2 = arith.constant 0 : i32
    return %c0_i32, %c0_i32_0, %c0_i32_1 : i32, i32, i32
  }
  func.func @transform_6(%arg0: i32) -> (i32, i32, i32) {
    %c0_i32 = arith.constant 0 : i32
    %c0_i32_0 = arith.constant 0 : i32
    %c0_i32_1 = arith.constant 0 : i32
    %c0_i32_2 = arith.constant 0 : i32
    return %c0_i32, %c0_i32_0, %c0_i32_1 : i32, i32, i32
  }
  func.func @transform_7(%arg0: i32) -> (i32, i32, i32) {
    %c0_i32 = arith.constant 0 : i32
    %c0_i32_0 = arith.constant 0 : i32
    %c0_i32_1 = arith.constant 0 : i32
    %c0_i32_2 = arith.constant 0 : i32
    return %c0_i32, %c0_i32_0, %c0_i32_1 : i32, i32, i32
  }
  func.func @transform_8(%arg0: i32) -> (i32, i32, i32) {
    %c0_i32 = arith.constant 0 : i32
    %c0_i32_0 = arith.constant 0 : i32
    %c0_i32_1 = arith.constant 0 : i32
    %c0_i32_2 = arith.constant 0 : i32
    return %c0_i32, %c0_i32_0, %c0_i32_1 : i32, i32, i32
  }
  func.func @transform_9(%arg0: i32) -> (i32, i32, i32) {
    %c0_i32 = arith.constant 0 : i32
    %c0_i32_0 = arith.constant 0 : i32
    %c0_i32_1 = arith.constant 0 : i32
    %c0_i32_2 = arith.constant 0 : i32
    return %c0_i32, %c0_i32_0, %c0_i32_1 : i32, i32, i32
  }
  func.func @transform_10(%arg0: i32) -> (i32, i32, i32) {
    %c0_i32 = arith.constant 0 : i32
    %c0_i32_0 = arith.constant 0 : i32
    %c0_i32_1 = arith.constant 0 : i32
    %c0_i32_2 = arith.constant 0 : i32
    return %c0_i32, %c0_i32_0, %c0_i32_1 : i32, i32, i32
  }
  func.func @transform_11(%arg0: i32) -> (i32, i32, i32) {
    %c0_i32 = arith.constant 0 : i32
    %c0_i32_0 = arith.constant 0 : i32
    %c0_i32_1 = arith.constant 0 : i32
    %c0_i32_2 = arith.constant 0 : i32
    return %c0_i32, %c0_i32_0, %c0_i32_1 : i32, i32, i32
  }
  func.func @transform_12(%arg0: i32) -> (i32, i32, i32) {
    %c0_i32 = arith.constant 0 : i32
    %c0_i32_0 = arith.constant 0 : i32
    %c0_i32_1 = arith.constant 0 : i32
    %c0_i32_2 = arith.constant 0 : i32
    return %c0_i32, %c0_i32_0, %c0_i32_1 : i32, i32, i32
  }
  func.func @transform_13(%arg0: i32) -> (i32, i32, i32) {
    %c0_i32 = arith.constant 0 : i32
    %c0_i32_0 = arith.constant 0 : i32
    %c0_i32_1 = arith.constant 0 : i32
    %c0_i32_2 = arith.constant 0 : i32
    return %c0_i32, %c0_i32_0, %c0_i32_1 : i32, i32, i32
  }
  func.func @transform_14(%arg0: i32) -> (i32, i32, i32) {
    %c0_i32 = arith.constant 0 : i32
    %c0_i32_0 = arith.constant 0 : i32
    %c0_i32_1 = arith.constant 0 : i32
    %c0_i32_2 = arith.constant 0 : i32
    return %c0_i32, %c0_i32_0, %c0_i32_1 : i32, i32, i32
  }
  func.func @transform_15(%arg0: i32) -> (i32, i32, i32) {
    %c0_i32 = arith.constant 0 : i32
    %c0_i32_0 = arith.constant 0 : i32
    %c0_i32_1 = arith.constant 0 : i32
    %c0_i32_2 = arith.constant 0 : i32
    return %c0_i32, %c0_i32_0, %c0_i32_1 : i32, i32, i32
  }
  func.func @transform_16(%arg0: i32) -> (i32, i32, i32) {
    %c0_i32 = arith.constant 0 : i32
    %c0_i32_0 = arith.constant 0 : i32
    %c0_i32_1 = arith.constant 0 : i32
    %c0_i32_2 = arith.constant 0 : i32
    return %c0_i32, %c0_i32_0, %c0_i32_1 : i32, i32, i32
  }
  func.func @transform_17(%arg0: i32) -> (i32, i32, i32) {
    %c0_i32 = arith.constant 0 : i32
    %c0_i32_0 = arith.constant 0 : i32
    %c0_i32_1 = arith.constant 0 : i32
    %c0_i32_2 = arith.constant 0 : i32
    return %c0_i32, %c0_i32_0, %c0_i32_1 : i32, i32, i32
  }
  func.func @transform_18(%arg0: i32) -> (i32, i32, i32) {
    %c0_i32 = arith.constant 0 : i32
    %c0_i32_0 = arith.constant 0 : i32
    %c0_i32_1 = arith.constant 0 : i32
    %c0_i32_2 = arith.constant 0 : i32
    return %c0_i32, %c0_i32_0, %c0_i32_1 : i32, i32, i32
  }
  func.func @transform_19(%arg0: i32) -> (i32, i32, i32) {
    %c0_i32 = arith.constant 0 : i32
    %c0_i32_0 = arith.constant 0 : i32
    %c0_i32_1 = arith.constant 0 : i32
    %c0_i32_2 = arith.constant 0 : i32
    return %c0_i32, %c0_i32_0, %c0_i32_1 : i32, i32, i32
  }
  func.func @transform_20(%arg0: i32) -> (i32, i32, i32) {
    %c0_i32 = arith.constant 0 : i32
    %c0_i32_0 = arith.constant 0 : i32
    %c0_i32_1 = arith.constant 0 : i32
    %c0_i32_2 = arith.constant 0 : i32
    return %c0_i32, %c0_i32_0, %c0_i32_1 : i32, i32, i32
  }
  func.func @transform_21(%arg0: i32) -> (i32, i32, i32) {
    %c0_i32 = arith.constant 0 : i32
    %c0_i32_0 = arith.constant 0 : i32
    %c0_i32_1 = arith.constant 0 : i32
    %c0_i32_2 = arith.constant 0 : i32
    return %c0_i32, %c0_i32_0, %c0_i32_1 : i32, i32, i32
  }
  func.func @transform_22(%arg0: i32) -> (i32, i32, i32) {
    %c0_i32 = arith.constant 0 : i32
    %c0_i32_0 = arith.constant 0 : i32
    %c0_i32_1 = arith.constant 0 : i32
    %c0_i32_2 = arith.constant 0 : i32
    return %c0_i32, %c0_i32_0, %c0_i32_1 : i32, i32, i32
  }
  func.func @transform_23(%arg0: i32) -> (i32, i32, i32) {
    %c0_i32 = arith.constant 0 : i32
    %c0_i32_0 = arith.constant 0 : i32
    %c0_i32_1 = arith.constant 0 : i32
    %c0_i32_2 = arith.constant 0 : i32
    return %c0_i32, %c0_i32_0, %c0_i32_1 : i32, i32, i32
  }
  func.func @transform_24(%arg0: i32) -> (i32, i32, i32) {
    %c0_i32 = arith.constant 0 : i32
    %c0_i32_0 = arith.constant 0 : i32
    %c0_i32_1 = arith.constant 0 : i32
    %c0_i32_2 = arith.constant 0 : i32
    return %c0_i32, %c0_i32_0, %c0_i32_1 : i32, i32, i32
  }
  func.func @transform_25(%arg0: i32) -> (i32, i32, i32) {
    %c0_i32 = arith.constant 0 : i32
    %c0_i32_0 = arith.constant 0 : i32
    %c0_i32_1 = arith.constant 0 : i32
    %c0_i32_2 = arith.constant 0 : i32
    return %c0_i32, %c0_i32_0, %c0_i32_1 : i32, i32, i32
  }
  func.func @transform_26(%arg0: i32) -> (i32, i32, i32) {
    %c0_i32 = arith.constant 0 : i32
    %c0_i32_0 = arith.constant 0 : i32
    %c0_i32_1 = arith.constant 0 : i32
    %c0_i32_2 = arith.constant 0 : i32
    return %c0_i32, %c0_i32_0, %c0_i32_1 : i32, i32, i32
  }
  func.func @transform_27(%arg0: i32) -> (i32, i32, i32) {
    %c0_i32 = arith.constant 0 : i32
    %c0_i32_0 = arith.constant 0 : i32
    %c0_i32_1 = arith.constant 0 : i32
    %c0_i32_2 = arith.constant 0 : i32
    return %c0_i32, %c0_i32_0, %c0_i32_1 : i32, i32, i32
  }
  func.func @transform_28(%arg0: i32) -> (i32, i32, i32) {
    %c0_i32 = arith.constant 0 : i32
    %c0_i32_0 = arith.constant 0 : i32
    %c0_i32_1 = arith.constant 0 : i32
    %c0_i32_2 = arith.constant 0 : i32
    return %c0_i32, %c0_i32_0, %c0_i32_1 : i32, i32, i32
  }
  func.func @transform_29(%arg0: i32) -> (i32, i32, i32) {
    %c0_i32 = arith.constant 0 : i32
    %c0_i32_0 = arith.constant 0 : i32
    %c0_i32_1 = arith.constant 0 : i32
    %c0_i32_2 = arith.constant 0 : i32
    return %c0_i32, %c0_i32_0, %c0_i32_1 : i32, i32, i32
  }
  func.func @transform_30(%arg0: i32) -> (i32, i32, i32) {
    %c0_i32 = arith.constant 0 : i32
    %c0_i32_0 = arith.constant 0 : i32
    %c0_i32_1 = arith.constant 0 : i32
    %c0_i32_2 = arith.constant 0 : i32
    return %c0_i32, %c0_i32_0, %c0_i32_1 : i32, i32, i32
  }
  func.func @transform_31(%arg0: i32) -> (i32, i32, i32) {
    %c0_i32 = arith.constant 0 : i32
    %c0_i32_0 = arith.constant 0 : i32
    %c0_i32_1 = arith.constant 0 : i32
    %c0_i32_2 = arith.constant 0 : i32
    return %c0_i32, %c0_i32_0, %c0_i32_1 : i32, i32, i32
  }
  func.func @transform_32(%arg0: i32) -> (i32, i32, i32) {
    %c0_i32 = arith.constant 0 : i32
    %c0_i32_0 = arith.constant 0 : i32
    %c0_i32_1 = arith.constant 0 : i32
    %c0_i32_2 = arith.constant 0 : i32
    return %c0_i32, %c0_i32_0, %c0_i32_1 : i32, i32, i32
  }
  func.func @transform_33(%arg0: i32) -> (i32, i32, i32) {
    %c0_i32 = arith.constant 0 : i32
    %c0_i32_0 = arith.constant 0 : i32
    %c0_i32_1 = arith.constant 0 : i32
    %c0_i32_2 = arith.constant 0 : i32
    return %c0_i32, %c0_i32_0, %c0_i32_1 : i32, i32, i32
  }
  func.func @transform_34(%arg0: i32) -> (i32, i32, i32) {
    %c0_i32 = arith.constant 0 : i32
    %c0_i32_0 = arith.constant 0 : i32
    %c0_i32_1 = arith.constant 0 : i32
    %c0_i32_2 = arith.constant 0 : i32
    return %c0_i32, %c0_i32_0, %c0_i32_1 : i32, i32, i32
  }
  func.func @transform_35(%arg0: i32) -> (i32, i32, i32) {
    %c0_i32 = arith.constant 0 : i32
    %c0_i32_0 = arith.constant 0 : i32
    %c0_i32_1 = arith.constant 0 : i32
    %c0_i32_2 = arith.constant 0 : i32
    return %c0_i32, %c0_i32_0, %c0_i32_1 : i32, i32, i32
  }
  func.func @transform_36(%arg0: i32) -> (i32, i32, i32) {
    %c0_i32 = arith.constant 0 : i32
    %c0_i32_0 = arith.constant 0 : i32
    %c0_i32_1 = arith.constant 0 : i32
    %c0_i32_2 = arith.constant 0 : i32
    return %c0_i32, %c0_i32_0, %c0_i32_1 : i32, i32, i32
  }
  func.func @transform_37(%arg0: i32) -> (i32, i32, i32) {
    %c0_i32 = arith.constant 0 : i32
    %c0_i32_0 = arith.constant 0 : i32
    %c0_i32_1 = arith.constant 0 : i32
    %c0_i32_2 = arith.constant 0 : i32
    return %c0_i32, %c0_i32_0, %c0_i32_1 : i32, i32, i32
  }
  func.func @transform_38(%arg0: i32) -> (i32, i32, i32) {
    %c0_i32 = arith.constant 0 : i32
    %c0_i32_0 = arith.constant 0 : i32
    %c0_i32_1 = arith.constant 0 : i32
    %c0_i32_2 = arith.constant 0 : i32
    return %c0_i32, %c0_i32_0, %c0_i32_1 : i32, i32, i32
  }
  func.func @transform_39(%arg0: i32) -> (i32, i32, i32) {
    %c0_i32 = arith.constant 0 : i32
    %c0_i32_0 = arith.constant 0 : i32
    %c0_i32_1 = arith.constant 0 : i32
    %c0_i32_2 = arith.constant 0 : i32
    return %c0_i32, %c0_i32_0, %c0_i32_1 : i32, i32, i32
  }
  func.func @transform_40(%arg0: i32) -> (i32, i32, i32) {
    %c0_i32 = arith.constant 0 : i32
    %c0_i32_0 = arith.constant 0 : i32
    %c0_i32_1 = arith.constant 0 : i32
    %c0_i32_2 = arith.constant 0 : i32
    return %c0_i32, %c0_i32_0, %c0_i32_1 : i32, i32, i32
  }
  func.func @transform_41(%arg0: i32) -> (i32, i32) {
    %c0_i32 = arith.constant 0 : i32
    %c0_i32_0 = arith.constant 0 : i32
    %c0_i32_1 = arith.constant 0 : i32
    return %c0_i32, %c0_i32_0 : i32, i32
  }
  func.func @transform_42(%arg0: i32) -> (i32, i32) {
    %c0_i32 = arith.constant 0 : i32
    %c0_i32_0 = arith.constant 0 : i32
    %c0_i32_1 = arith.constant 0 : i32
    return %c0_i32, %c0_i32_0 : i32, i32
  }
  func.func @transform_43(%arg0: i32) -> (i32, i32, i32) {
    %c0_i32 = arith.constant 0 : i32
    %c0_i32_0 = arith.constant 0 : i32
    %c0_i32_1 = arith.constant 0 : i32
    return %arg0, %c0_i32, %c0_i32_0 : i32, i32, i32
  }
}

</mosaic_0001>

<bundles_post_ra>
// kernel: transformer_forward.1
= control target key start
LH: loop header
LB: loop body
LE: loop exit
PB: predicated region body
PF: predicated region fallthrough
CT: control target
= control target key end

     0   :  { %s8528_s6 = smov 1   ;;  %s8529_s10 = smov 2   ;;  %s9873_s0 = inlined_call_operand.smem [shape: u32[44], index: -1, kind: input, shape index: {}] }
   0x1   :  { %s8605_s5 = sld [smem:[%s9873_s0]]   ;;  %s8530_s14 = smov 3  }
   0x2   :  { %s8610_s9 = sld [smem:[%s9873_s0 + %s8528_s6]]   ;;  %s8531_s18 = smov 4  }
   0x3   :  { %s8615_s13 = sld [smem:[%s9873_s0 + %s8529_s10]]   ;;  %s8532_s22 = smov 5  }
   0x4   :  { %s8620_s17 = sld [smem:[%s9873_s0 + %s8530_s14]]   ;;  %s8533_s26 = smov 6  }
   0x5   :  { %s8625_s21 = sld [smem:[%s9873_s0 + %s8531_s18]]   ;;  %s8534_s30 = smov 7  }
   0x6   :  { %s8630_s25 = sld [smem:[%s9873_s0 + %s8532_s22]]   ;;  %s8535_s4 = smov 8  }
   0x7   :  { %9947 = sst [smem:[#allocation29_spill]] %s8605_s5  ;;  %s8536_s10 = smov 9  }
   0x8   :  { %9948 = sst [smem:[#allocation30_spill]] %s8610_s9  ;;  %s8537_s15 = smov 10  }
   0x9   :  { %9949 = sst [smem:[#allocation31_spill]] %s8615_s13  ;;  %s8538_s20 = smov 11  }
   0xa   :  { %9950 = sst [smem:[#allocation32_spill]] %s8620_s17  ;;  %s8540_s1 = smov 13  }
   0xb   :  { %9951 = sst [smem:[#allocation33_spill]] %s8625_s21  ;;  %s8541_s7 = smov 14  }
   0xc   :  { %9952 = sst [smem:[#allocation34_spill]] %s8630_s25  ;;  %s8543_s22 = smov 16  }
   0xd   :  { %s8635_s29 = sld [smem:[%s9873_s0 + %s8533_s26]]   ;;  %s8539_s26 = smov 12  }
   0xe   :  { %s8640_s3 = sld [smem:[%s9873_s0 + %s8534_s30]]   ;;  %s8544_s28 = smov 17  }
   0xf   :  { %s8645_s8 = sld [smem:[%s9873_s0 + %s8535_s4]]  }
  0x10   :  { %s8650_s14 = sld [smem:[%s9873_s0 + %s8536_s10]]  }
  0x11   :  { %s8655_s19 = sld [smem:[%s9873_s0 + %s8537_s15]]   ;;  %s8542_s15 = smov 15  }
  0x12   :  { %s8660_s24 = sld [smem:[%s9873_s0 + %s8538_s20]]  }
  0x13   :  { %9953 = sst [smem:[#allocation35_spill]] %s8635_s29 }
  0x14   :  { %9954 = sst [smem:[#allocation36_spill]] %s8640_s3 }
  0x15   :  { %9955 = sst [smem:[#allocation37_spill]] %s8645_s8 }
  0x16   :  { %9956 = sst [smem:[#allocation38_spill]] %s8650_s14 }
  0x17   :  { %9957 = sst [smem:[#allocation39_spill]] %s8655_s19 }
  0x18   :  { %9958 = sst [smem:[#allocation40_spill]] %s8660_s24 }
  0x19   :  { %s8665_s30 = sld [smem:[%s9873_s0 + %s8539_s26]]  }
  0x1a   :  { %s8670_s6 = sld [smem:[%s9873_s0 + %s8540_s1]]  }
  0x1b   :  { %s8675_s12 = sld [smem:[%s9873_s0 + %s8541_s7]]   ;;  %s8545_s7 = smov 18  }
  0x1c   :  { %s8680_s20 = sld [smem:[%s9873_s0 + %s8542_s15]]   ;;  %s8546_s15 = smov 19  }
  0x1d   :  { %s8685_s27 = sld [smem:[%s9873_s0 + %s8543_s22]]   ;;  %s8547_s22 = smov 20  }
  0x1e   :  { %s8690_s4 = sld [smem:[%s9873_s0 + %s8544_s28]]   ;;  %s8548_s28 = smov 21  }
  0x1f   :  { %9959 = sst [smem:[#allocation41_spill]] %s8665_s30 }
  0x20   :  { %9960 = sst [smem:[#allocation42_spill]] %s8670_s6 }
  0x21   :  { %9961 = sst [smem:[#allocation43_spill]] %s8675_s12 }
  0x22   :  { %9962 = sst [smem:[#allocation44_spill]] %s8680_s20 }
  0x23   :  { %9963 = sst [smem:[#allocation45_spill]] %s8685_s27 }
  0x24   :  { %9964 = sst [smem:[#allocation46_spill]] %s8690_s4 }
  0x25   :  { %s8695_s13 = sld [smem:[%s9873_s0 + %s8545_s7]]   ;;  %s8549_s7 = smov 22  }
  0x26   :  { %s8700_s12 = sld [smem:[%s9873_s0 + %s8546_s15]]   ;;  %s8550_s15 = smov 23  }
  0x27   :  { %s8705_s27 = sld [smem:[%s9873_s0 + %s8547_s22]]   ;;  %s8551_s22 = smov 24  }
  0x28   :  { %s8710_s4 = sld [smem:[%s9873_s0 + %s8548_s28]]   ;;  %s8552_s28 = smov 25  }
  0x2b   :  { %9965 = sst [smem:[#allocation47_spill]] %s8695_s13 }
  0x2c   :  { %9966 = sst [smem:[#allocation48_spill]] %s8700_s12 }
  0x2d   :  { %9967 = sst [smem:[#allocation49_spill]] %s8705_s27 }
  0x2e   :  { %9968 = sst [smem:[#allocation50_spill]] %s8710_s4 }
  0x2f   :  { %s8715_s13 = sld [smem:[%s9873_s0 + %s8549_s7]]   ;;  %s8553_s7 = smov 26  }
  0x30   :  { %s8720_s12 = sld [smem:[%s9873_s0 + %s8550_s15]]   ;;  %s8554_s15 = smov 27  }
  0x31   :  { %s8725_s27 = sld [smem:[%s9873_s0 + %s8551_s22]]   ;;  %s8555_s22 = smov 28  }
  0x32   :  { %s8730_s4 = sld [smem:[%s9873_s0 + %s8552_s28]]   ;;  %s8556_s28 = smov 29  }
  0x33   :  { %s8750_s30 = sld [smem:[%s9873_s0 + %s8556_s28]]   ;;  %s8560_s28 = smov 33  }
  0x35   :  { %9969 = sst [smem:[#allocation51_spill]] %s8715_s13 }
  0x36   :  { %9970 = sst [smem:[#allocation52_spill]] %s8720_s12 }
  0x37   :  { %9971 = sst [smem:[#allocation53_spill]] %s8725_s27 }
  0x38   :  { %9972 = sst [smem:[#allocation54_spill]] %s8730_s4 }
  0x39   :  { %s8735_s13 = sld [smem:[%s9873_s0 + %s8553_s7]]   ;;  %s8557_s7 = smov 30  }
  0x3a   :  { %s8740_s12 = sld [smem:[%s9873_s0 + %s8554_s15]]   ;;  %s8558_s15 = smov 31  }
  0x3b   :  { %s8745_s27 = sld [smem:[%s9873_s0 + %s8555_s22]]   ;;  %s8559_s22 = smov 32  }
  0x3c   :  { %9975 = sst [smem:[#allocation57_spill]] %s8750_s30 }
  0x3d   :  { %s8755_s24 = sld [smem:[%s9873_s0 + %s8557_s7]]   ;;  %s8561_s7 = smov 34  }
  0x3e   :  { %s8765_s20 = sld [smem:[%s9873_s0 + %s8559_s22]]   ;;  %s8563_s22 = smov 36  }
  0x3f   :  { %9973 = sst [smem:[#allocation55_spill]] %s8735_s13 }
  0x40   :  { %9974 = sst [smem:[#allocation56_spill]] %s8740_s12 }
  0x41   :  { %s8760_s12 = sld [smem:[%s9873_s0 + %s8558_s15]]   ;;  %s8562_s15 = smov 35  }
  0x42   :  { %s8770_s30 = sld [smem:[%s9873_s0 + %s8560_s28]]   ;;  %s8564_s28 = smov 37  }
  0x43   :  { %9976 = sst [smem:[#allocation58_spill]] %s8755_s24 }
  0x44   :  { %9978 = sst [smem:[#allocation60_spill]] %s8765_s20 }
  0x45   :  { %s8775_s6 = sld [smem:[%s9873_s0 + %s8561_s7]]   ;;  %s8565_s7 = smov 38  }
  0x46   :  { %s8785_s19 = sld [smem:[%s9873_s0 + %s8563_s22]]   ;;  %s8567_s22 = smov 40  }
  0x47   :  { %9977 = sst [smem:[#allocation59_spill]] %s8760_s12 }
  0x48   :  { %s8780_s12 = sld [smem:[%s9873_s0 + %s8562_s15]]   ;;  %s8566_s15 = smov 39  }
  0x49   :  { %s8790_s14 = sld [smem:[%s9873_s0 + %s8564_s28]]   ;;  %s8568_s28 = smov 41  }
  0x4a   :  { %s8795_s29 = sld [smem:[%s9873_s0 + %s8565_s7]]   ;;  %s8569_s7 = smov 42  }
  0x4b   :  { %9979 = sst [smem:[#allocation61_spill]] %s8775_s6 }
  0x4c   :  { %9981 = sst [smem:[#allocation63_spill]] %s8785_s19 }
  0x4d   :  { %s8805_s8 = sld [smem:[%s9873_s0 + %s8567_s22]]  }
  0x4e   :  { %9980 = sst [smem:[#allocation62_spill]] %s8780_s12 }
  0x4f   :  { %9982 = sst [smem:[#allocation64_spill]] %s8790_s14 }
  0x50   :  { %s8800_s12 = sld [smem:[%s9873_s0 + %s8566_s15]]   ;;  %s8570_s15 = smov 43  }
  0x51   :  { %s8810_s14 = sld [smem:[%s9873_s0 + %s8568_s28]]  }
  0x52   :  { %s8815_s21 = sld [smem:[%s9873_s0 + %s8569_s7]]  }
  0x53   :  { %9984 = sst [smem:[#allocation66_spill]] %s8805_s8 }
  0x54   :  { %s8820_s9 = sld [smem:[%s9873_s0 + %s8570_s15]]  }
  0x56   :  { %9983 = sst [smem:[#allocation65_spill]] %s8800_s12 }
  0x57   :  { %92 = vsyncpa [#allocation4], 0 }
  0x58   :  { %93 = vsyncpa [#allocation7], 0 }
  0x59   :  { %94 = vsyncpa [#allocation10], 0 }
  0x5a   :  { %95 = vsyncpa [#allocation13], 0 }
  0x5b   :  { %96 = vsyncpa [#allocation16], 0 }
  0x5c   :  { %97 = vsyncpa [#allocation19], 0 }
  0x5d   :  { %98 = vsyncpa [#allocation5], 0 }
  0x5e   :  { %100 = vsyncpa [#allocation5 + $0x1], 0  ;;  %s8822_s22 = smov 0   ;;  %s8824_s23 = smov 0  }
  0x5f   :  { %s8826_s26 = smov 0   ;;  %s8828_s28 = smov 0  }
  0x60 LB: > { %s9985_s25 = sld [smem:[#allocation34_spill]]  ;;  %s9986_s20 = sld [smem:[#allocation60_spill]]  ;;  %s8518_s23 = sphi %s8824_s23, %s10073_s23   ;;  %s8514_s22 = sphi %s8822_s22, %s10072_s22   ;;  %s8526_s28 = sphi %s8828_s28, %s10069_s28   ;;  %s8522_s26 = sphi %s8826_s26, %s10071_s26  }
  0x61   : > { %s9987_s19 = sld [smem:[#allocation63_spill]]  ;;  %s9988_s12 = sld [smem:[#allocation65_spill]] }
  0x62   : > { %s9989_s3 = sld [smem:[#allocation36_spill]]  ;;  %s9990_s8 = sld [smem:[#allocation66_spill]] }
  0x63   : > { %s9991_s6 = sld [smem:[#allocation61_spill]]  ;;  %s9992_s4 = sld [smem:[#allocation54_spill]] }
  0x64   : > { %s9993_s24 = sld [smem:[#allocation58_spill]]  ;;  %s9994_s13 = sld [smem:[#allocation55_spill]] }
  0x65   : > { %9995 = sst [smem:[#allocation67_spill]] %s8514_s22  ;;  %s8843_s0 = sadd.s32 4294967295, %s8526_s28  }
  0x66   : > { %9996 = sst [smem:[#allocation68_spill]] %s8522_s26  ;;  %s6740_s1 = sadd.s32 4294967294, %s8526_s28  }
  0x67   : > { %9997 = sst [smem:[#allocation69_spill]] %s8526_s28  ;;  %s8847_s2 = sadd.s32 1, %s8526_s28  }
  0x68   : > { %9998 = sst [smem:[#allocation70_spill]] %s8847_s2  ;;  %s1031_s7 = sadd.s32 1, %s8522_s26 }
  0x69   : > { %s1028_s10 = ssub.s32 %s8526_s28, %s8847_s2  ;;  %p1041_p0 = scmp.ne.s32.totalorder %s8522_s26, %s8518_s23 }
  0x6a   : > { %p1029_p1 = scmp.eq.s32.totalorder %s1028_s10, 0  ;;  %p1042_p2 = scmp.eq.s32.totalorder %s8843_s0, 1 }
  0x6b   : > { %p1047_p3 = scmp.ne.s32.totalorder %s8518_s23, %s8514_s22  ;;  %p1048_p4 = scmp.eq.s32.totalorder %s6740_s1, 1 }
  0x6c   : > { %s8858_s11 = scalar_select %p1029_p1, %s8522_s26, %s1031_s7  }
  0x6d   : > { %p8860_p5 = por %p1042_p2, %p1041_p0  ;;  %p8864_p6 = por %p1048_p4, %p1047_p3 }
  0x6e   : > { %9999 = sst [smem:[#allocation71_spill]] %s8858_s11  ;;  %p6741_p7 = scmp.ge.s32.totalorder %s8526_s28, 1 }
  0x6f   : > { %s10000_s15 = scalar_select %p8860_p5, 1, 0 }
  0x70   : > { %s10001_s16 = scalar_select %p8864_p6, 1, 0 }
  0x71   : > { %p1055_p8 = scmp.lt.s32.totalorder %s8526_s28, 3  ;;  %p9902_p9 = scmp.eq.s32.totalorder %s8843_s0, 0 }
  0x72   : > { %10002 = sst [smem:[#allocation72_spill]] %s10001_s16  ;;  %s8571_s1 = smov [#allocation6]  }
  0x73   : > { %p8871_p10 = pnand %p6741_p7, %p1055_p8  ;;  %s1146_s7 = sshll.u32 %s8571_s1, 4  ;;  %s8877_s7 = int_to_ptr.vmem [resolvable:$true] %s1146_s7 }
  0x74   : > { %s8572_s11 = smov [#allocation9]   ;;  %s8573_s2 = smov [#allocation12]  }
  0x75   : > { %s10003_s18 = scalar_select %p8871_p10, 1, 0 }
  0x76   : > { %p7792_p11 = pneg %p8871_p10  ;;  %s1178_s26 = sshll.u32 %s8572_s11, 4  ;;  %s8885_s26 = int_to_ptr.vmem [resolvable:$true] %s1178_s26 }
  0x77   : > { %s8887_s16 = sshll.u32 %s8573_s2, 4  ;;  %s8132_s22 = scalar_lea.hbm %s9994_s13, 32  ;;  %s1208_s16 = int_to_ptr.vmem [resolvable:$true] %s8887_s16 }
  0x78   : > { %p8881_p12 = pnand %p9902_p9, %p7792_p11  ;;  %p8133_p13 = scmp.ne.s32.totalorder %s9994_s13, %s8132_s22 }
  0x79   : > { %p8139_p3 = scmp.lt.u32.totalorder %s8132_s22, %s9994_s13 }
  0x7a   : > { %p8893_p0 = pneg %p8881_p12 }
  0x7c   : > { %p8135_p1 = pnand %p8893_p0, %p8133_p13 }
  0x7e   : > { %p8136_p2 = pneg %p8135_p1 }
  0x80   : > { %p8141_p4 = pnand %p8139_p3, %p8136_p2 }
  0x82   : > { %8144 = shalt.err (!%p8141_p4)
}
  0x83   : > { %s8145_s2 = scalar_lea.vmem %s8877_s7, 32  ;;  %p8153_p9 = scmp.lt.s32.totalorder %s8877_s7, %s8877_s7 }
  0x84   : > { %p8146_p7 = scmp.ne.s32.totalorder %s8877_s7, %s8145_s2  ;;  %p8154_p6 = scmp.lt.s32.totalorder %s8145_s2, %s8145_s2 }
  0x86   : > { %p8148_p8 = pnand %p8146_p7, %p8893_p0  ;;  %p8155_p5 = por %p8154_p6, %p8153_p9 }
  0x88   : > { %p8149_p11 = pneg %p8148_p8 }
  0x8a   : > { %p8156_p10 = pnand %p8155_p5, %p8149_p11 }
  0x8c   : > { %8159 = shalt.err (!%p8156_p10)
}
  0x8d   : > { %s8574_s11 = smov 16   ;;  %s8575_s22 = smov 1  }
  0x8e   : > { %7798 = dma.hbm_to_vmem [thread:$0]  (!%p8881_p12), %s9994_s13, 32, %s8877_s7, [#allocation7], %s8574_s11, %s8574_s11, %s8575_s22  }
  0x8f   : > { %s8160_s28 = scalar_lea.hbm %s9993_s24, 32 }
  0x90   : > { %p8161_p13 = scmp.ne.s32.totalorder %s9993_s24, %s8160_s28  ;;  %p8167_p9 = scmp.lt.u32.totalorder %s8160_s28, %s9993_s24 }
  0x92   : > { %p8163_p6 = pnand %p8161_p13, %p8893_p0 }
  0x94   : > { %p8164_p5 = pneg %p8163_p6 }
  0x96   : > { %p8169_p10 = pnand %p8167_p9, %p8164_p5 }
  0x98   : > { %8172 = shalt.err (!%p8169_p10)
}
  0x99   : > { %s8173_s2 = scalar_lea.vmem %s8885_s26, 32  ;;  %p8181_p4 = scmp.lt.s32.totalorder %s8885_s26, %s8885_s26 }
  0x9a   : > { %p8174_p1 = scmp.ne.s32.totalorder %s8885_s26, %s8173_s2  ;;  %p8182_p7 = scmp.lt.s32.totalorder %s8173_s2, %s8173_s2 }
  0x9c   : > { %p8176_p2 = pnand %p8174_p1, %p8893_p0  ;;  %p8183_p8 = por %p8182_p7, %p8181_p4 }
  0x9e   : > { %p8177_p3 = pneg %p8176_p2 }
  0xa0   : > { %p8184_p11 = pnand %p8183_p8, %p8177_p3 }
  0xa2   : > { %8187 = shalt.err (!%p8184_p11)
}
  0xa3   : > { %7804 = dma.hbm_to_vmem [thread:$0]  (!%p8881_p12), %s9993_s24, 32, %s8885_s26, [#allocation10], %s8574_s11, %s8574_s11, %s8575_s22  }
  0xa4   : > { %s8188_s28 = scalar_lea.hbm %s8770_s30, 32 }
  0xa5   : > { %p8189_p13 = scmp.ne.s32.totalorder %s8770_s30, %s8188_s28  ;;  %p8195_p9 = scmp.lt.u32.totalorder %s8188_s28, %s8770_s30 }
  0xa7   : > { %p8191_p6 = pnand %p8189_p13, %p8893_p0 }
  0xa9   : > { %p8192_p5 = pneg %p8191_p6 }
  0xab   : > { %p8197_p10 = pnand %p8195_p9, %p8192_p5 }
  0xad   : > { %8200 = shalt.err (!%p8197_p10)
}
  0xae   : > { %s8201_s7 = scalar_lea.vmem %s1208_s16, 32  ;;  %p8209_p4 = scmp.lt.s32.totalorder %s1208_s16, %s1208_s16 }
  0xaf   : > { %p8202_p1 = scmp.ne.s32.totalorder %s1208_s16, %s8201_s7  ;;  %p8210_p7 = scmp.lt.s32.totalorder %s8201_s7, %s8201_s7 }
  0xb1   : > { %p8204_p2 = pnand %p8202_p1, %p8893_p0  ;;  %p8211_p8 = por %p8210_p7, %p8209_p4 }
  0xb3   : > { %p8205_p3 = pneg %p8204_p2 }
  0xb5   : > { %p8212_p11 = pnand %p8211_p8, %p8205_p3 }
  0xb7   : > { %8215 = shalt.err (!%p8212_p11)
}
  0xb8   : > { %7810 = dma.hbm_to_vmem [thread:$0]  (!%p8881_p12), %s8770_s30, 32, %s1208_s16, [#allocation13], %s8574_s11, %s8574_s11, %s8575_s22  }
  0xb9   : > { %s8576_s26 = smov [#allocation15]   ;;  %s8577_s28 = smov [#allocation18]  }
  0xba   : > { %s1236_s2 = sshll.u32 %s8576_s26, 4  ;;  %s1265_s13 = sshll.u32 %s8577_s28, 4  ;;  %s1237_s2 = int_to_ptr.vmem [resolvable:$true] %s1236_s2  ;;  %s1266_s13 = int_to_ptr.vmem [resolvable:$true] %s1265_s13 }
  0xbb   : > { %s8216_s7 = scalar_lea.hbm %s9987_s19, 32 }
  0xbc   : > { %p8217_p13 = scmp.ne.s32.totalorder %s9987_s19, %s8216_s7  ;;  %p8223_p9 = scmp.lt.u32.totalorder %s8216_s7, %s9987_s19 }
  0xbe   : > { %p8219_p6 = pnand %p8217_p13, %p8893_p0 }
  0xc0   : > { %p8220_p5 = pneg %p8219_p6 }
  0xc2   : > { %p8225_p10 = pnand %p8223_p9, %p8220_p5 }
  0xc4   : > { %8228 = shalt.err (!%p8225_p10)
}
  0xc5   : > { %s8229_s24 = scalar_lea.vmem %s1237_s2, 32  ;;  %p8237_p4 = scmp.lt.s32.totalorder %s1237_s2, %s1237_s2 }
  0xc6   : > { %p8230_p1 = scmp.ne.s32.totalorder %s1237_s2, %s8229_s24  ;;  %p8238_p7 = scmp.lt.s32.totalorder %s8229_s24, %s8229_s24 }
  0xc8   : > { %p8232_p2 = pnand %p8230_p1, %p8893_p0  ;;  %p8239_p8 = por %p8238_p7, %p8237_p4 }
  0xca   : > { %p8233_p3 = pneg %p8232_p2 }
  0xcc   : > { %p8240_p11 = pnand %p8239_p8, %p8233_p3 }
  0xce   : > { %8243 = shalt.err (!%p8240_p11)
}
  0xcf   : > { %7816 = dma.hbm_to_vmem [thread:$0]  (!%p8881_p12), %s9987_s19, 32, %s1237_s2, [#allocation16], %s8574_s11, %s8574_s11, %s8575_s22  }
  0xd0   : > { %s8244_s16 = scalar_lea.hbm %s9988_s12, 32 }
  0xd1   : > { %p8245_p13 = scmp.ne.s32.totalorder %s9988_s12, %s8244_s16  ;;  %p8251_p9 = scmp.lt.u32.totalorder %s8244_s16, %s9988_s12 }
  0xd3   : > { %p8247_p6 = pnand %p8245_p13, %p8893_p0 }
  0xd5   : > { %p8248_p5 = pneg %p8247_p6 }
  0xd7   : > { %p8253_p10 = pnand %p8251_p9, %p8248_p5 }
  0xd9   : > { %8256 = shalt.err (!%p8253_p10)
}
  0xda   : > { %s8257_s24 = scalar_lea.vmem %s1266_s13, 32  ;;  %p8265_p4 = scmp.lt.s32.totalorder %s1266_s13, %s1266_s13 }
  0xdb   : > { %p8258_p1 = scmp.ne.s32.totalorder %s1266_s13, %s8257_s24  ;;  %p8266_p7 = scmp.lt.s32.totalorder %s8257_s24, %s8257_s24 }
  0xdd   : > { %p8260_p2 = pnand %p8258_p1, %p8893_p0  ;;  %p8267_p8 = por %p8266_p7, %p8265_p4 }
  0xdf   : > { %p8261_p3 = pneg %p8260_p2 }
  0xe1   : > { %p8268_p11 = pnand %p8267_p8, %p8261_p3 }
  0xe3   : > { %8271 = shalt.err (!%p8268_p11)
}
  0xe4   : > { %7822 = dma.hbm_to_vmem [thread:$0]  (!%p8881_p12), %s9988_s12, 32, %s1266_s13, [#allocation19], %s8574_s11, %s8574_s11, %s8575_s22  }
  0xe5   : > { %s8578_s26 = smov [#allocation3]   ;;  %s8579_s28 = smov [#allocation8]  }
  0xe6   : > { %s1133_s2 = sshll.u32 %s8578_s26, 4  ;;  %s1162_s7 = sshll.u32 %s8579_s28, 4  ;;  %s1134_s2 = int_to_ptr.vmem [resolvable:$true] %s1133_s2  ;;  %s1163_s7 = int_to_ptr.vmem [resolvable:$true] %s1162_s7 }
  0xe7   : > { %s8272_s16 = scalar_lea.hbm %s9992_s4, 32 }
  0xe8   : > { %p8273_p13 = scmp.ne.s32.totalorder %s9992_s4, %s8272_s16  ;;  %p8279_p9 = scmp.lt.u32.totalorder %s8272_s16, %s9992_s4 }
  0xea   : > { %p8275_p6 = pnand %p8273_p13, %p8893_p0 }
  0xec   : > { %p8276_p5 = pneg %p8275_p6 }
  0xee   : > { %p8281_p10 = pnand %p8279_p9, %p8276_p5 }
  0xf0   : > { %8284 = shalt.err (!%p8281_p10)
}
  0xf1   : > { %s8285_s24 = scalar_lea.vmem %s1134_s2, 32  ;;  %p8293_p4 = scmp.lt.s32.totalorder %s1134_s2, %s1134_s2 }
  0xf2   : > { %p8286_p1 = scmp.ne.s32.totalorder %s1134_s2, %s8285_s24  ;;  %p8294_p7 = scmp.lt.s32.totalorder %s8285_s24, %s8285_s24 }
  0xf4   : > { %p8288_p2 = pnand %p8286_p1, %p8893_p0  ;;  %p8295_p8 = por %p8294_p7, %p8293_p4 }
  0xf6   : > { %p8289_p3 = pneg %p8288_p2 }
  0xf8   : > { %p8296_p11 = pnand %p8295_p8, %p8289_p3 }
  0xfa   : > { %8299 = shalt.err (!%p8296_p11)
}
  0xfb   : > { %7795 = dma.hbm_to_vmem [thread:$0]  (!%p8881_p12), %s9992_s4, 32, %s1134_s2, [#allocation4], %s8574_s11, %s8574_s11, %s8575_s22  }
  0xfc   : > { %s8300_s13 = scalar_lea.hbm %s8745_s27, 32 }
  0xfd   : > { %p8301_p13 = scmp.ne.s32.totalorder %s8745_s27, %s8300_s13  ;;  %p8307_p9 = scmp.lt.u32.totalorder %s8300_s13, %s8745_s27 }
  0xff   : > { %p8303_p6 = pnand %p8301_p13, %p8893_p0 }
 0x101   : > { %p8304_p5 = pneg %p8303_p6 }
 0x103   : > { %p8309_p10 = pnand %p8307_p9, %p8304_p5 }
 0x105   : > { %8312 = shalt.err (!%p8309_p10)
}
 0x106   : > { %s8313_s26 = scalar_lea.vmem %s1163_s7, 32  ;;  %p8321_p4 = scmp.lt.s32.totalorder %s1163_s7, %s1163_s7 }
 0x107   : > { %p8314_p1 = scmp.ne.s32.totalorder %s1163_s7, %s8313_s26  ;;  %p8322_p7 = scmp.lt.s32.totalorder %s8313_s26, %s8313_s26 }
 0x109   : > { %p8316_p2 = pnand %p8314_p1, %p8893_p0  ;;  %p8323_p8 = por %p8322_p7, %p8321_p4 }
 0x10b   : > { %p8317_p3 = pneg %p8316_p2 }
 0x10d   : > { %p8324_p11 = pnand %p8323_p8, %p8317_p3 }
 0x10f   : > { %8327 = shalt.err (!%p8324_p11)
}
 0x110   : > { %7801 = dma.hbm_to_vmem [thread:$0]  (!%p8881_p12), %s8745_s27, 32, %s1163_s7, [#allocation7], %s8574_s11, %s8574_s11, %s8575_s22  }
 0x111   : > { %s8580_s2 = smov [#allocation11]   ;;  %s8581_s16 = smov [#allocation14]  }
 0x112   : > { %s1194_s28 = sshll.u32 %s8580_s2, 4  ;;  %s1220_s24 = sshll.u32 %s8581_s16, 4  ;;  %s1195_s28 = int_to_ptr.vmem [resolvable:$true] %s1194_s28  ;;  %s1221_s24 = int_to_ptr.vmem [resolvable:$true] %s1220_s24 }
 0x113   : > { %s8328_s13 = scalar_lea.hbm %s9986_s20, 32 }
 0x114   : > { %p8329_p13 = scmp.ne.s32.totalorder %s9986_s20, %s8328_s13  ;;  %p8335_p9 = scmp.lt.u32.totalorder %s8328_s13, %s9986_s20 }
 0x116   : > { %p8331_p6 = pnand %p8329_p13, %p8893_p0 }
 0x118   : > { %p8332_p5 = pneg %p8331_p6 }
 0x11a   : > { %p8337_p10 = pnand %p8335_p9, %p8332_p5 }
 0x11c   : > { %8340 = shalt.err (!%p8337_p10)
}
 0x11d   : > { %s8341_s26 = scalar_lea.vmem %s1195_s28, 32  ;;  %p8349_p4 = scmp.lt.s32.totalorder %s1195_s28, %s1195_s28 }
 0x11e   : > { %p8342_p1 = scmp.ne.s32.totalorder %s1195_s28, %s8341_s26  ;;  %p8350_p7 = scmp.lt.s32.totalorder %s8341_s26, %s8341_s26 }
 0x120   : > { %p8344_p2 = pnand %p8342_p1, %p8893_p0  ;;  %p8351_p8 = por %p8350_p7, %p8349_p4 }
 0x122   : > { %p8345_p3 = pneg %p8344_p2 }
 0x124   : > { %p8352_p11 = pnand %p8351_p8, %p8345_p3 }
 0x126   : > { %8355 = shalt.err (!%p8352_p11)
}
 0x127   : > { %7807 = dma.hbm_to_vmem [thread:$0]  (!%p8881_p12), %s9986_s20, 32, %s1195_s28, [#allocation10], %s8574_s11, %s8574_s11, %s8575_s22  }
 0x128   : > { %s8356_s7 = scalar_lea.hbm %s9991_s6, 32 }
 0x129   : > { %p8357_p13 = scmp.ne.s32.totalorder %s9991_s6, %s8356_s7  ;;  %p8363_p9 = scmp.lt.u32.totalorder %s8356_s7, %s9991_s6 }
 0x12b   : > { %p8359_p6 = pnand %p8357_p13, %p8893_p0 }
 0x12d   : > { %p8360_p5 = pneg %p8359_p6 }
 0x12f   : > { %p8365_p10 = pnand %p8363_p9, %p8360_p5 }
 0x131   : > { %8368 = shalt.err (!%p8365_p10)
}
 0x132   : > { %s8369_s2 = scalar_lea.vmem %s1221_s24, 32  ;;  %p8377_p4 = scmp.lt.s32.totalorder %s1221_s24, %s1221_s24 }
 0x133   : > { %p8370_p1 = scmp.ne.s32.totalorder %s1221_s24, %s8369_s2  ;;  %p8378_p7 = scmp.lt.s32.totalorder %s8369_s2, %s8369_s2 }
 0x135   : > { %p8372_p2 = pnand %p8370_p1, %p8893_p0  ;;  %p8379_p8 = por %p8378_p7, %p8377_p4 }
 0x137   : > { %p8373_p3 = pneg %p8372_p2 }
 0x139   : > { %p8380_p11 = pnand %p8379_p8, %p8373_p3 }
 0x13b   : > { %8383 = shalt.err (!%p8380_p11)
}
 0x13c   : > { %7813 = dma.hbm_to_vmem [thread:$0]  (!%p8881_p12), %s9991_s6, 32, %s1221_s24, [#allocation13], %s8574_s11, %s8574_s11, %s8575_s22  }
 0x13d   : > { %s8582_s28 = smov [#allocation17]   ;;  %s8583_s13 = smov [#allocation20]  }
 0x13e   : > { %s1252_s16 = sshll.u32 %s8582_s28, 4  ;;  %s1278_s26 = sshll.u32 %s8583_s13, 4  ;;  %s1253_s16 = int_to_ptr.vmem [resolvable:$true] %s1252_s16  ;;  %s1279_s26 = int_to_ptr.vmem [resolvable:$true] %s1278_s26 }
 0x13f   : > { %s8384_s7 = scalar_lea.hbm %s8795_s29, 32 }
 0x140   : > { %p8385_p13 = scmp.ne.s32.totalorder %s8795_s29, %s8384_s7  ;;  %p8391_p9 = scmp.lt.u32.totalorder %s8384_s7, %s8795_s29 }
 0x142   : > { %p8387_p6 = pnand %p8385_p13, %p8893_p0 }
 0x144   : > { %p8388_p5 = pneg %p8387_p6 }
 0x146   : > { %p8393_p10 = pnand %p8391_p9, %p8388_p5 }
 0x148   : > { %8396 = shalt.err (!%p8393_p10)
}
 0x149   : > { %s8397_s2 = scalar_lea.vmem %s1253_s16, 32  ;;  %p8405_p4 = scmp.lt.s32.totalorder %s1253_s16, %s1253_s16 }
 0x14a   : > { %p8398_p1 = scmp.ne.s32.totalorder %s1253_s16, %s8397_s2  ;;  %p8406_p7 = scmp.lt.s32.totalorder %s8397_s2, %s8397_s2 }
 0x14c   : > { %p8400_p2 = pnand %p8398_p1, %p8893_p0  ;;  %p8407_p8 = por %p8406_p7, %p8405_p4 }
 0x14e   : > { %p8401_p3 = pneg %p8400_p2 }
 0x150   : > { %p8408_p11 = pnand %p8407_p8, %p8401_p3 }
 0x152   : > { %8411 = shalt.err (!%p8408_p11)
}
 0x153   : > { %7819 = dma.hbm_to_vmem [thread:$0]  (!%p8881_p12), %s8795_s29, 32, %s1253_s16, [#allocation16], %s8574_s11, %s8574_s11, %s8575_s22  }
 0x154   : > { %s8412_s24 = scalar_lea.hbm %s9990_s8, 32 }
 0x155   : > { %p8413_p13 = scmp.ne.s32.totalorder %s9990_s8, %s8412_s24  ;;  %p8419_p9 = scmp.lt.u32.totalorder %s8412_s24, %s9990_s8 }
 0x157   : > { %p8415_p6 = pnand %p8413_p13, %p8893_p0 }
 0x159   : > { %p8416_p5 = pneg %p8415_p6 }
 0x15b   : > { %p8421_p10 = pnand %p8419_p9, %p8416_p5 }
 0x15d   : > { %8424 = shalt.err (!%p8421_p10)
}
 0x15e   : > { %s8425_s28 = scalar_lea.vmem %s1279_s26, 32  ;;  %p8433_p4 = scmp.lt.s32.totalorder %s1279_s26, %s1279_s26 }
 0x15f   : > { %p8426_p1 = scmp.ne.s32.totalorder %s1279_s26, %s8425_s28  ;;  %p8434_p7 = scmp.lt.s32.totalorder %s8425_s28, %s8425_s28 }
 0x161   : > { %p8428_p2 = pnand %p8426_p1, %p8893_p0  ;;  %p8435_p8 = por %p8434_p7, %p8433_p4 }
 0x163   : > { %p8429_p3 = pneg %p8428_p2 }
 0x165   : > { %p8436_p11 = pnand %p8435_p8, %p8429_p3 }
 0x167   : > { %8439 = shalt.err (!%p8436_p11)
}
 0x168   : > { %7825 = dma.hbm_to_vmem [thread:$0]  (!%p8881_p12), %s9990_s8, 32, %s1279_s26, [#allocation19], %s8574_s11, %s8574_s11, %s8575_s22  }
 0x169   : > { %p10006_p13 = scmp.ne.s32.totalorder %s10003_s18, 0 }
 0x16a   : > { %p10007_p6 = scmp.eq.s32.totalorder (!%p10006_p13), %s8843_s0, 0 }
 0x16b   : > { %1321 = sbr.rel (%p10006_p13) target bundleno = 13753 (0x35b9), region = 192 }
 0x172   : > { %8485 = dma.done.wait (%p10007_p6), [#allocation4], 32   ;;  %p10008_p0 = pmov %p10007_p6 }
 0x174   : > { %8487 = vsyncadd (%p10008_p0), [#allocation4], 4294967264  ;;  %p10009_p5 = pmov %p10008_p0 }
 0x175   : > { %p10010_p9 = pmov %p10008_p0 }
 0x176   : > { %8489 = dma.done.wait (%p10009_p5), [#allocation7], 64  }
 0x177   : > { %8491 = vsyncadd (%p10010_p9), [#allocation7], 4294967232  ;;  %p10011_p10 = pmov %p10008_p0 }
 0x178   : > { %p10012_p12 = pmov %p10008_p0 }
 0x179   : > { %8493 = dma.done.wait (%p10011_p10), [#allocation10], 64  }
 0x17a   : > { %8495 = vsyncadd (%p10012_p12), [#allocation10], 4294967232  ;;  %p10013_p1 = pmov %p10008_p0 }
 0x17b   : > { %p10014_p2 = pmov %p10008_p0 }
 0x17c   : > { %8497 = dma.done.wait (%p10013_p1), [#allocation13], 64  }
 0x17d   : > { %8499 = vsyncadd (%p10014_p2), [#allocation13], 4294967232  ;;  %p10015_p3 = pmov %p10008_p0 }
 0x17e   : > { %p10016_p4 = pmov %p10008_p0 }
 0x17f   : > { %8501 = dma.done.wait (%p10015_p3), [#allocation16], 64  }
 0x180   : > { %8503 = vsyncadd (%p10016_p4), [#allocation16], 4294967232  ;;  %p10017_p7 = pmov %p10008_p0 }
 0x181   : > { %p10018_p8 = pmov %p10008_p0 }
 0x182   : > { %8505 = dma.done.wait (%p10017_p7), [#allocation19], 64  }
 0x183   : > { %8507 = vsyncadd (%p10018_p8), [#allocation19], 4294967232  ;;  %s10019_s5 = sld [smem:[#allocation29_spill]]  ;;  %s10020_s17 = sld [smem:[#allocation32_spill]]  ;;  %v8584_v0 = vmov 0.0   ;;  %vm8585_vm0 = vmmov 0  }
 0x184   : > { %p1472_p11 = scmp.lt.s32.totalorder %s8843_s0, 1  ;;  %7220 = vmatprep.subr.bf16.mxu0 %v8584_v0  ;;  %7222 = vmatprep.mubr.msk.bf16.mxu0 %vm8585_vm0, %v8584_v0  ;;  %vm1502_vm1 = vcmask 130048   ;;  %s10021_s11 = sld [smem:[#allocation30_spill]]  ;;  %v7954_v4 = vld [vmem:[%s9985_s25] sm:$0xff]   ;;  %v7956_v6 = vld [vmem:[%s9985_s25 + $0x8] sm:$0xff]   ;;  %vm1584_vm2 = vcmask 261120  }
 0x185   : > { %7226 = vmatprep.subr.bf16.mxu1 %v8584_v0  ;;  %7230 = vmatprep.mubr.msk.bf16.mxu1 %vm8585_vm0, %v8584_v0  ;;  %s10022_s22 = sld [smem:[#allocation33_spill]]  ;;  %v7955_v5 = vld [vmem:[%s9989_s3] sm:$0xff]   ;;  %v7957_v7 = vld [vmem:[%s9989_s3 + $0x8] sm:$0xff]   ;;  %s10023_s16 = sld [smem:[#allocation37_spill]]  ;;  %vm1688_vm3 = vcmask 64512   ;;  %vm1753_vm4 = vcmask 1043456  }
 0x186   : > { %s1473_s18 = scalar_select %p1472_p11, %s8843_s0, 1  ;;  %7227 = vmatpush3.bf16.msra.mxu1 %v7954_v4  ;;  %vm1913_vm5 = vcmask 130112   ;;  %vm2029_vm6 = vcmask 195712   ;;  %vm2145_vm7 = vcmask 261312   ;;  %vm2349_vm8 = vcmask 523264  }
 0x187   : > { %7228 = vmatprep.subr.bf16.mxu1 %v8584_v0  ;;  %s10024_s26 = sld [smem:[#allocation35_spill]]  ;;  %s9922_s2 = smov 112  }
 0x188   : > { %s9083_s10 = sshll.u32 %s1473_s18, 3  ;;  %s9926_s24 = smov 120  }
 0x189   : > { %s1475_s1 = scalar_lea.vmem %s10019_s5, %s9083_s10  ;;  %v7953_v1 = vld [vmem:[%s10020_s17] sm:$0xff]   ;;  %s9924_s28 = smov 104  }
 0x18a   : > { %v1485_v2 = vld [vmem:[%s1475_s1] sm:$0xff]  ;;  %7221 = vmatpush3.bf16.msra.mxu0 %v7953_v1  ;;  %7229 = vmatpush3.bf16.msra.mxu1 %v7956_v6  ;;  %s1479_s13 = scalar_lea.vmem %s10021_s11, %s9083_s10  ;;  %s9918_s18 = smov 96  }
 0x18b   : > { %v1486_v3 = vpack.c.bf16 %v1485_v2, %v1485_v2  ;;  %7234 = vmatprep.subr.bf16.mxu0 %v8584_v0  ;;  %7242 = vmatprep.subr.bf16.mxu1 %v8584_v0  ;;  %v6770_v8 = vld [vmem:[%s10022_s22] ss:$0 sm:$0xff]  ;;  %s9908_s1 = smov 80   ;;  %s9912_s11 = smov 72  }
 0x18c   : > { %v1546_v10 = vld [vmem:[%s1479_s13] sm:$0xff]  ;;  %s9920_s22 = smov 88   ;;  %s10026_s13 = sld [smem:[#allocation38_spill]] }
 0x18d   : > { %7223 = vmatmul.mubr.msk.bf16.vlgmr.msra.gmra.mrb[0].mxu0 %vm1502_vm1, %v1486_v3  ;;  %s10025_s7 = smov %s10024_s26  ;;  %v6777_v17 = vld [vmem:[%s10023_s16] ss:$0 sm:$0xff]  ;;  %s10037_s5 = sld [smem:[#allocation45_spill]] }
 0x18e   : > { %7238 = vmatprep.mubr.msk.bf16.mxu0 %vm8585_vm0, %v8584_v0  ;;  %7235 = vmatpush3.bf16.msra.mxu0 %v7955_v5  ;;  %v6773_v18 = vld [vmem:[%s10024_s26] ss:$0 sm:$0xff]  ;;  %s9910_s26 = smov 8   ;;  %s10047_s12 = smov 72  }
 0x18f   : > { %7236 = vmatprep.subr.bf16.mxu0 %v8584_v0  ;;  %s10049_s17 = smov 8   ;;  %s10050_s19 = smov 16  }
 0x190   : > { %s10051_s20 = smov 24   ;;  %p10064_p6 = scmp.ne.s32.totalorder %s10000_s15, 0 }
 0x192   : > { %7237 = vmatpush3.bf16.msra.mxu0 %v7957_v7 }
 0x193   : > { %7248 = vmatprep.subr.bf16.mxu0 %v8584_v0 }
 0x260   : > { %v1540_v9 = vpop.f32.mrb[0].mxu0 }
 0x261   : > { %v1541_v11 = vadd.f32 %v6770_v8, %v1540_v9  ;;  %v7224_v12 = vpop.f32.mrb[1].mxu0 }
 0x262   : > { %v1543_v13 = vpop.f32.mrb[2].mxu0 }
 0x263   : > { %v9102_v14 = vadd.f32 %v1546_v10, %v1541_v11  ;;  %v7225_v15 = vpop.f32.mrb[3].mxu0 }
 0x265   : > { %v1565_v16 = vpack.c.bf16 %v9102_v14, %v9102_v14 }
 0x267   : > { %7231 = vmatmul.mubr.msk.bf16.vlgmr.msra.gmra.mrb[0].mxu1 %vm1584_vm2, %v1565_v16  ;;  %7239 = vmatmul.mubr.msk.bf16.vlgmr.msra.gmra.mrb[4].mxu0 %vm1584_vm2, %v1565_v16 }
 0x268   : > { %7244 = vmatprep.mubr.msk.bf16.mxu1 %vm8585_vm0, %v8584_v0  ;;  %7250 = vmatprep.mubr.msk.bf16.mxu0 %vm8585_vm0, %v8584_v0 }
 0x33a   : > { %v1622_v19 = vpop.f32.mrb[0].mxu1  ;;  %v1680_v20 = vpop.f32.mrb[4].mxu0 }
 0x33b   : > { %v1681_v21 = vadd.f32 %v6777_v17, %v1680_v20  ;;  %v7232_v22 = vpop.f32.mrb[1].mxu1  ;;  %v7240_v23 = vpop.f32.mrb[5].mxu0  ;;  %v1623_v26 = vadd.f32 %v6773_v18, %v1622_v19 }
 0x33c   : > { %v1625_v24 = vpop.f32.mrb[2].mxu1  ;;  %v1683_v25 = vpop.f32.mrb[6].mxu0 }
 0x33d   : > { %v9114_v27 = vpack.c.bf16 %v1681_v21, %v1681_v21  ;;  %v7233_v28 = vpop.f32.mrb[3].mxu1  ;;  %v7241_v29 = vpop.f32.mrb[7].mxu0  ;;  %v1686_v31 = vpack.c.bf16 %v1623_v26, %v1623_v26 }
 0x33f   : > { %1917 = vrot.lane.b32.xlu1 %v9114_v27, %s9922_s2  ;;  %1801 = vrot.lane.b32.xlu0 %v9114_v27, %s9926_s24  ;;  %v1693_v30 = vsel %vm1688_vm3, %v9114_v27, 0 }
 0x340   : > { %7243 = vmatpush3.bf16.xpose.msra.mxu1 %v1693_v30 }
 0x341   : > { %7254 = vmatprep.subr.bf16.mxu1 %v8584_v0 }
 0x343   : > { %1915 = vrot.lane.b32.xlu1 %v1686_v31, %s9922_s2  ;;  %1799 = vrot.lane.b32.xlu0 %v1686_v31, %s9926_s24 }
 0x347   : > { %2031 = vrot.lane.b32.xlu1 %v1686_v31, %s9924_s28  ;;  %2033 = vrot.lane.b32.xlu0 %v9114_v27, %s9924_s28  ;;  %s10033_s28 = sld [smem:[#allocation41_spill]] }
 0x348   : > { %7245 = vmatmul.mubr.msk.bf16.vlgmr.msra.gmra.mrb[4].mxu1 %vm1688_vm3, %v1686_v31 }
 0x349   : > { %7256 = vmatprep.mubr.msk.bf16.mxu1 %vm8585_vm0, %v8584_v0 }
 0x34d   : > { %s10034_s24 = smov %s10033_s28 }
 0x3b1   : > { %v1802_v32 = vpop.permute.xlu0 %1801  ;;  %v1918_v34 = vpop.permute.xlu1 %1917 }
 0x3b2   : > { %v1807_v33 = vsel %vm1688_vm3, %v1802_v32, 0  ;;  %v1923_v36 = vsel %vm1688_vm3, %v1918_v34, 0 }
 0x3b3   : > { %7255 = vmatpush3.bf16.xpose.msra.mxu1 %v1807_v33 }
 0x3b4   : > { %7266 = vmatprep.subr.bf16.mxu1 %v8584_v0 }
 0x3b5   : > { %v1800_v35 = vpop.permute.xlu0 %1799  ;;  %v1916_v38 = vpop.permute.xlu1 %1915 }
 0x3b9   : > { %v2034_v37 = vpop.permute.xlu0 %2033  ;;  %v2032_v40 = vpop.permute.xlu1 %2031 }
 0x3ba   : > { %7257 = vmatmul.mubr.msk.bf16.vlgmr.msra.gmra.mrb[8].mxu1 %vm1688_vm3, %v1800_v35  ;;  %v2039_v39 = vsel %vm1688_vm3, %v2034_v37, 0 }
 0x3bb   : > { %7267 = vmatpush3.bf16.xpose.msra.mxu1 %v1923_v36  ;;  %7268 = vmatprep.mubr.msk.bf16.mxu1 %vm8585_vm0, %v8584_v0 }
 0x3bc   : > { %7278 = vmatprep.subr.bf16.mxu1 %v8584_v0 }
 0x3c2   : > { %7269 = vmatmul.mubr.msk.bf16.vlgmr.msra.gmra.mrb[12].mxu1 %vm1688_vm3, %v1916_v38 }
 0x3c3   : > { %7279 = vmatpush3.bf16.xpose.msra.mxu1 %v2039_v39  ;;  %7280 = vmatprep.mubr.msk.bf16.mxu1 %vm8585_vm0, %v8584_v0 }
 0x3c4   : > { %7290 = vmatprep.subr.bf16.mxu1 %v8584_v0 }
 0x3ca   : > { %7281 = vmatmul.mubr.msk.bf16.vlgmr.msra.gmra.mrb[16].mxu1 %vm1688_vm3, %v2032_v40 }
 0x3cb   : > { %7294 = vmatprep.mubr.msk.bf16.mxu1 %vm8585_vm0, %v8584_v0 }
 0x41b   : > { %v1729_v41 = vpop.f32.mrb[4].mxu1 }
 0x41c   : > { %v7246_v42 = vpop.f32.mrb[5].mxu1  ;;  %v1735_v43 = vsel %vm1688_vm3, %v1729_v41, -inf }
 0x41d   : > { %1736 = vmax.xlane.f32.xlu0 %v1735_v43  ;;  %v1732_v44 = vpop.f32.mrb[6].mxu1 }
 0x41e   : > { %v7247_v45 = vpop.f32.mrb[7].mxu1 }
 0x48d   : > { %v1843_v46 = vpop.f32.mrb[8].mxu1 }
 0x48e   : > { %v7258_v47 = vpop.f32.mrb[9].mxu1  ;;  %v1849_v48 = vsel %vm1688_vm3, %v1843_v46, -inf }
 0x48f   : > { %1850 = vmax.xlane.f32.xlu1 %v1849_v48  ;;  %v1846_v49 = vpop.f32.mrb[10].mxu1 }
 0x490   : > { %v7259_v50 = vpop.f32.mrb[11].mxu1 }
 0x495   : > { %v1959_v51 = vpop.f32.mrb[12].mxu1 }
 0x496   : > { %v7270_v52 = vpop.f32.mrb[13].mxu1  ;;  %v1965_v53 = vsel %vm1688_vm3, %v1959_v51, -inf }
 0x497   : > { %1966 = vmax.xlane.f32.xlu0 %v1965_v53  ;;  %v1962_v54 = vpop.f32.mrb[14].mxu1  ;;  %v7959_v52 = vld [vmem:[%s10026_s13 + $0x8] sm:$0xff]  }
 0x498   : > { %v7271_v55 = vpop.f32.mrb[15].mxu1 }
 0x49d   : > { %v2075_v56 = vpop.f32.mrb[16].mxu1 }
 0x49e   : > { %v7282_v57 = vpop.f32.mrb[17].mxu1  ;;  %v2081_v58 = vsel %vm1688_vm3, %v2075_v56, -inf }
 0x49f   : > { %2082 = vmax.xlane.f32.xlu0 %v2081_v58  ;;  %v2078_v59 = vpop.f32.mrb[18].mxu1 }
 0x4a0   : > { %v7283_v60 = vpop.f32.mrb[19].mxu1 }
 0x4aa   : > { %v1737_v61 = vpop.xlane.xlu0 %1736 }
 0x4ab   : > { %v1738_v62 = vsub.f32 %v1729_v41, %v1737_v61 }
 0x4ad   : > { %v1739_v63 = vmul.f32 1.442695, %v1738_v62 }
 0x4af   : > { %8016 = vpow2.f32 %v1739_v63 }
 0x4b9   : > { %v8017_v1 = vpop.eup %8016 }
 0x4ba   : > { %v1741_v2 = vsel %vm1688_vm3, %v8017_v1, 0.0 }
 0x4bb   : > { %1742 = vadd.xlane.f32.xlu1 %v1741_v2 }
 0x4cc   : > { %1748 = vrot.lane.b32.xlu1 %v9114_v27, %s9918_s18  ;;  %s10030_s18 = sld [smem:[#allocation44_spill]] }
 0x51c   : > { %v1851_v3 = vpop.xlane.xlu1 %1850 }
 0x51d   : > { %v1852_v4 = vsub.f32 %v1843_v46, %v1851_v3 }
 0x51f   : > { %v1853_v5 = vmul.f32 1.442695, %v1852_v4 }
 0x521   : > { %8018 = vpow2.f32 %v1853_v5 }
 0x524   : > { %v1967_v6 = vpop.xlane.xlu0 %1966 }
 0x525   : > { %v1968_v7 = vsub.f32 %v1959_v51, %v1967_v6  ;;  %v7958_v51 = vld [vmem:[%s10026_s13] sm:$0xff]  }
 0x526   : > { %7291 = vmatpush3.bf16.msra.mxu1 %v7958_v51 }
 0x527   : > { %v1969_v8 = vmul.f32 1.442695, %v1968_v7  ;;  %7292 = vmatprep.subr.bf16.mxu1 %v8584_v0 }
 0x529   : > { %8020 = vpow2.f32 %v1969_v8 }
 0x52a   : > { %7293 = vmatpush3.bf16.msra.mxu1 %v7959_v52 }
 0x52b   : > { %v8019_v9 = vpop.eup %8018  ;;  %7306 = vmatprep.subr.bf16.mxu1 %v8584_v0 }
 0x52c   : > { %v2083_v10 = vpop.xlane.xlu0 %2082  ;;  %v1855_v11 = vsel %vm1688_vm3, %v8019_v9, 0.0 }
 0x52d   : > { %v2084_v12 = vsub.f32 %v2075_v56, %v2083_v10  ;;  %1856 = vadd.xlane.f32.xlu0 %v1855_v11 }
 0x52f   : > { %v2085_v13 = vmul.f32 1.442695, %v2084_v12 }
 0x531   : > { %8022 = vpow2.f32 %v2085_v13 }
 0x533   : > { %v8021_v15 = vpop.eup %8020 }
 0x534   : > { %v1971_v16 = vsel %vm1688_vm3, %v8021_v15, 0.0 }
 0x535   : > { %1972 = vadd.xlane.f32.xlu1 %v1971_v16 }
 0x53b   : > { %v8023_v17 = vpop.eup %8022 }
 0x53c   : > { %v2087_v18 = vsel %vm1688_vm3, %v8023_v17, 0.0 }
 0x53d   : > { %2088 = vadd.xlane.f32.xlu0 %v2087_v18 }
 0x546   : > { %1977 = vrot.lane.b32.xlu1 %v9114_v27, %s9908_s1  ;;  %s9916_s1 = smov 16  }
 0x548   : > { %v1743_v19 = vpop.xlane.xlu1 %1742 }
 0x549   : > { %8024 = vrcp.f32 %v1743_v19  ;;  %v7963_v19 = vld [vmem:[%s10030_s18 + $0x8] sm:$0xff]  }
 0x54a   : > { %2093 = vrot.lane.b32.xlu1 %v9114_v27, %s9912_s11  ;;  %s10027_s11 = sld [smem:[#allocation39_spill]] }
 0x54c   : > { %v1749_v20 = vpop.permute.xlu1 %1748 }
 0x54d   : > { %v1755_v21 = vsel %vm1753_vm4, %v1749_v20, 0 }
 0x54e   : > { %7249 = vmatpush3.bf16.msra.mxu0 %v1755_v21 }
 0x54f   : > { %7260 = vmatprep.subr.bf16.mxu0 %v8584_v0 }
 0x550   : > { %v6789_v3 = vld [vmem:[%s10027_s11] ss:$0 sm:$0xff] }
 0x553   : > { %v8025_v22 = vpop.eup %8024  ;;  %1861 = vrot.lane.b32.xlu0 %v9114_v27, %s9920_s22  ;;  %s10031_s22 = sld [smem:[#allocation40_spill]] }
 0x554   : > { %v1745_v23 = vmul.f32 %v8025_v22, %v8017_v1 }
 0x556   : > { %v1746_v24 = vpack.c.bf16 %v1745_v23, %v1745_v23 }
 0x558   : > { %7251 = vmatmul.mubr.msk.bf16.vlgmr.msra.gmra.mrb[8].mxu0 %vm1688_vm3, %v1746_v24 }
 0x559   : > { %7262 = vmatprep.mubr.msk.bf16.mxu0 %vm8585_vm0, %v8584_v0  ;;  %s10032_s2 = smov %s10031_s22  ;;  %v6793_v24 = vld [vmem:[%s10031_s22] ss:$0 sm:$0xff]  ;;  %s10040_s22 = sld [smem:[#allocation47_spill]] }
 0x55f   : > { %s10041_s8 = smov %s10040_s22 }
 0x5ba   : > { %v1857_v25 = vpop.xlane.xlu0 %1856 }
 0x5bb   : > { %8026 = vrcp.f32 %v1857_v25 }
 0x5c2   : > { %v1973_v26 = vpop.xlane.xlu1 %1972 }
 0x5c3   : > { %8028 = vrcp.f32 %v1973_v26  ;;  %v6794_v26 = vld [vmem:[%s10033_s28] ss:$0 sm:$0xff]  ;;  %s10038_s28 = sld [smem:[#allocation46_spill]] }
 0x5c5   : > { %v8027_v28 = vpop.eup %8026 }
 0x5c6   : > { %v1859_v30 = vmul.f32 %v8027_v28, %v8019_v9  ;;  %v1978_v33 = vpop.permute.xlu1 %1977 }
 0x5c7   : > { %v1983_v35 = vsel %vm1753_vm4, %v1978_v33, 0 }
 0x5c8   : > { %v1860_v27 = vpack.c.bf16 %v1859_v30, %v1859_v30 }
 0x5c9   : > { %s10039_s6 = smov %s10038_s28 }
 0x5ca   : > { %v2089_v29 = vpop.xlane.xlu0 %2088  ;;  %v2094_v37 = vpop.permute.xlu1 %2093 }
 0x5cb   : > { %8030 = vrcp.f32 %v2089_v29  ;;  %v2099_v40 = vsel %vm1753_vm4, %v2094_v37, 0 }
 0x5cd   : > { %v8029_v34 = vpop.eup %8028 }
 0x5ce   : > { %v1862_v31 = vpop.permute.xlu0 %1861  ;;  %v1975_v36 = vmul.f32 %v8029_v34, %v8021_v15 }
 0x5cf   : > { %v1867_v32 = vsel %vm1753_vm4, %v1862_v31, 0  ;;  %v7964_v31 = vld [vmem:[%s10030_s18 + $0x10] sm:$0xff]  }
 0x5d0   : > { %7261 = vmatpush3.bf16.msra.mxu0 %v1867_v32  ;;  %v1976_v38 = vpack.c.bf16 %v1975_v36, %v1975_v36  ;;  %v7965_v32 = vld [vmem:[%s10030_s18 + $0x18] sm:$0xff]  }
 0x5d1   : > { %7272 = vmatprep.subr.bf16.mxu0 %v8584_v0 }
 0x5d3   : > { %7263 = vmatmul.mubr.msk.bf16.vlgmr.msra.gmra.mrb[12].mxu0 %vm1688_vm3, %v1860_v27 }
 0x5d4   : > { %7273 = vmatpush3.bf16.msra.mxu0 %v1983_v35  ;;  %7274 = vmatprep.mubr.msk.bf16.mxu0 %vm8585_vm0, %v8584_v0 }
 0x5d5   : > { %7284 = vmatprep.subr.bf16.mxu0 %v8584_v0  ;;  %v8031_v39 = vpop.eup %8030 }
 0x5d6   : > { %v2091_v41 = vmul.f32 %v8031_v39, %v8023_v17 }
 0x5d8   : > { %v2092_v42 = vpack.c.bf16 %v2091_v41, %v2091_v41 }
 0x5db   : > { %7275 = vmatmul.mubr.msk.bf16.vlgmr.msra.gmra.mrb[16].mxu0 %vm1688_vm3, %v1976_v38 }
 0x5dc   : > { %7285 = vmatpush3.bf16.msra.mxu0 %v2099_v40  ;;  %7286 = vmatprep.mubr.msk.bf16.mxu0 %vm8585_vm0, %v8584_v0  ;;  %v6799_v40 = vld [vmem:[%s10037_s5] ss:$0 sm:$0xff] }
 0x5dd   : > { %7298 = vmatprep.subr.bf16.mxu0 %v8584_v0 }
 0x5e3   : > { %7287 = vmatmul.mubr.msk.bf16.vlgmr.msra.gmra.mrb[20].mxu0 %vm1688_vm3, %v2092_v42 }
 0x5e4   : > { %7302 = vmatprep.mubr.msk.bf16.mxu0 %vm8585_vm0, %v8584_v0 }
 0x62b   : > { %v1791_v43 = vpop.f32.mrb[8].mxu0 }
 0x62c   : > { %1797 = vst.msk [vmem:[#allocation2] sm:$0xff] %vm1688_vm3, %v1791_v43  ;;  %v7252_v44 = vpop.f32.mrb[9].mxu0 }
 0x62d   : > { %v1794_v45 = vpop.f32.mrb[10].mxu0 }
 0x62e   : > { %v7253_v46 = vpop.f32.mrb[11].mxu0 }
 0x6a6   : > { %v1903_v47 = vpop.f32.mrb[12].mxu0 }
 0x6a7   : > { %1910 = vrot.lane.b32.xlu0 %v1903_v47, %s9910_s26  ;;  %v7264_v48 = vpop.f32.mrb[13].mxu0  ;;  %s9914_s26 = smov 24  }
 0x6a8   : > { %v1906_v49 = vpop.f32.mrb[14].mxu0 }
 0x6a9   : > { %v7265_v50 = vpop.f32.mrb[15].mxu0 }
 0x6ae   : > { %v2019_v53 = vpop.f32.mrb[16].mxu0 }
 0x6af   : > { %2026 = vrot.lane.b32.xlu1 %v2019_v53, %s9916_s1  ;;  %v7276_v54 = vpop.f32.mrb[17].mxu0  ;;  %v7966_v53 = vld [vmem:[%s9985_s25 + $0x10] sm:$0xff]  }
 0x6b0   : > { %v2022_v55 = vpop.f32.mrb[18].mxu0  ;;  %v7967_v54 = vld [vmem:[%s9985_s25 + $0x18] sm:$0xff]  }
 0x6b1   : > { %v7277_v56 = vpop.f32.mrb[19].mxu0 }
 0x6b6   : > { %v2135_v57 = vpop.f32.mrb[20].mxu0 }
 0x6b7   : > { %2142 = vrot.lane.b32.xlu0 %v2135_v57, %s9914_s26  ;;  %v7288_v58 = vpop.f32.mrb[21].mxu0  ;;  %s10028_s26 = sld [smem:[#allocation42_spill]] }
 0x6b8   : > { %v2138_v59 = vpop.f32.mrb[22].mxu0 }
 0x6b9   : > { %v7289_v60 = vpop.f32.mrb[23].mxu0  ;;  %v6805_v59 = vld [vmem:[%s10038_s28] ss:$0 sm:$0xff]  ;;  %s10043_s28 = smov 112  }
 0x6bd   : > { %s10029_s1 = smov %s10028_s26  ;;  %v7960_v17 = vld [vmem:[%s10028_s26] sm:$0xff]   ;;  %s10035_s26 = sld [smem:[#allocation43_spill]] }
 0x6be   : > { %7299 = vmatpush3.bf16.msra.mxu0 %v7960_v17  ;;  %v7961_v18 = vld [vmem:[%s10029_s1 + $0x8] sm:$0xff]  }
 0x6bf   : > { %7300 = vmatprep.subr.bf16.mxu0 %v8584_v0 }
 0x6c2   : > { %7301 = vmatpush3.bf16.msra.mxu0 %v7961_v18 }
 0x6c3   : > { %7318 = vmatprep.subr.bf16.mxu0 %v8584_v0  ;;  %s10036_s4 = smov %s10035_s26  ;;  %v6795_v33 = vld [vmem:[%s10035_s26] ss:$0 sm:$0xff]  ;;  %s10042_s26 = smov 120  }
 0x719   : > { %v1911_v61 = vpop.permute.xlu0 %1910 }
 0x71a   : > { %1914 = vst.msk [vmem:[#allocation2] sm:$0xff] %vm1913_vm5, %v1911_v61  ;;  %v6806_v61 = vld [vmem:[%s10040_s22] ss:$0 sm:$0xff]  ;;  %s10044_s22 = smov 104  }
 0x721   : > { %v2027_v62 = vpop.permute.xlu1 %2026 }
 0x722   : > { %2030 = vst.msk [vmem:[#allocation2] sm:$0xff] %vm2029_vm6, %v2027_v62 }
 0x729   : > { %v2143_v63 = vpop.permute.xlu0 %2142 }
 0x72a   : > { %2146 = vst.msk [vmem:[#allocation2] sm:$0xff] %vm2145_vm7, %v2143_v63 }
 0x731   : > { %v2147_v1 = vld [vmem:[#allocation2] sm:$0xff] }
 0x732   : > { %v2148_v2 = vpack.c.bf16 %v2147_v1, %v2147_v1  ;;  %v7968_v1 = vld [vmem:[%s9989_s3 + $0x10] sm:$0xff]  }
 0x734   : > { %7295 = vmatmul.mubr.msk.bf16.vlgmr.msra.gmra.mrb[20].mxu1 %vm1584_vm2, %v2148_v2 }
 0x735   : > { %7314 = vmatprep.mubr.msk.bf16.mxu1 %vm8585_vm0, %v8584_v0 }
 0x807   : > { %v2204_v4 = vpop.f32.mrb[20].mxu1 }
 0x808   : > { %v2205_v5 = vadd.f32 %v6789_v3, %v2204_v4  ;;  %v7296_v6 = vpop.f32.mrb[21].mxu1  ;;  %v7969_v3 = vld [vmem:[%s9989_s3 + $0x18] sm:$0xff]   ;;  %v6824_v4 = vld [vmem:[%s10025_s7 + $0x1] ss:$0 sm:$0xff]  ;;  %s10045_s3 = smov 88   ;;  %s10046_s7 = smov 96  }
 0x809   : > { %v2207_v7 = vpop.f32.mrb[22].mxu1 }
 0x80a   : > { %v7297_v8 = vpop.f32.mrb[23].mxu1  ;;  %v2210_v9 = vadd.f32 %v2205_v5, %v9102_v14  ;;  %v7962_v14 = vld [vmem:[%s10030_s18] sm:$0xff]  }
 0x80b   : > { %7307 = vmatpush3.bf16.msra.mxu1 %v7962_v14 }
 0x80c   : > { %v2211_v10 = vsel %vm1584_vm2, %v2210_v9, 0.0  ;;  %7308 = vmatprep.subr.bf16.mxu1 %v8584_v0 }
 0x80d   : > { %2212 = vadd.xlane.f32.xlu1 %v2211_v10 }
 0x80f   : > { %7309 = vmatpush3.bf16.msra.mxu1 %v7963_v19 }
 0x810   : > { %7310 = vmatprep.subr.bf16.mxu1 %v8584_v0 }
 0x813   : > { %7311 = vmatpush3.bf16.msra.mxu1 %v7964_v31 }
 0x814   : > { %7312 = vmatprep.subr.bf16.mxu1 %v8584_v0 }
 0x817   : > { %7313 = vmatpush3.bf16.msra.mxu1 %v7965_v32 }
 0x818   : > { %7334 = vmatprep.subr.bf16.mxu1 %v8584_v0 }
 0x89a   : > { %v2213_v11 = vpop.xlane.xlu1 %2212 }
 0x89b   : > { %v2215_v12 = vmul.f32 0.03125, %v2213_v11  ;;  %v6828_v11 = vld [vmem:[%s10023_s16 + $0x1] ss:$0 sm:$0xff]  ;;  %s10048_s16 = smov 80  }
 0x89d   : > { %v2216_v13 = vsub.f32 %v2210_v9, %v2215_v12 }
 0x89f   : > { %v2217_v15 = vmul.f32 %v2216_v13, %v2216_v13 }
 0x8a1   : > { %v2218_v16 = vsel %vm1584_vm2, %v2217_v15, 0.0 }
 0x8a2   : > { %2219 = vadd.xlane.f32.xlu0 %v2218_v16 }
 0x92f   : > { %v2220_v20 = vpop.xlane.xlu0 %2219 }
 0x930   : > { %v2221_v21 = vmul.f32 0.03125, %v2220_v20 }
 0x932   : > { %v2222_v22 = vadd.f32 1e-05, %v2221_v21 }
 0x934   : > { %8032 = vrsqrt.f32 %v2222_v22 }
 0x93e   : > { %v8033_v23 = vpop.eup %8032 }
 0x93f   : > { %v2224_v25 = vmul.f32 %v8033_v23, %v2216_v13 }
 0x941   : > { %v2231_v28 = vmul.f32 %v6793_v24, %v2224_v25 }
 0x943   : > { %v2238_v29 = vadd.f32 %v6794_v26, %v2231_v28 }
 0x945   : > { %v2255_v30 = vpack.c.bf16 %v2238_v29, %v2238_v29 }
 0x947   : > { %7303 = vmatmul.mubr.msk.bf16.vlgmr.msra.gmra.mrb[24].mxu0 %vm1584_vm2, %v2255_v30 }
 0x948   : > { %7322 = vmatprep.mubr.msk.bf16.mxu0 %vm8585_vm0, %v8584_v0  ;;  %7319 = vmatpush3.bf16.msra.mxu0 %v7966_v53 }
 0x949   : > { %7320 = vmatprep.subr.bf16.mxu0 %v8584_v0 }
 0x94c   : > { %7321 = vmatpush3.bf16.msra.mxu0 %v7967_v54 }
 0x94d   : > { %7326 = vmatprep.subr.bf16.mxu0 %v8584_v0 }
 0xa1a   : > { %v2311_v27 = vpop.f32.mrb[24].mxu0 }
 0xa1b   : > { %v2312_v34 = vadd.f32 %v6795_v33, %v2311_v27  ;;  %v7304_v35 = vpop.f32.mrb[25].mxu0 }
 0xa1c   : > { %v2314_v36 = vpop.f32.mrb[26].mxu0 }
 0xa1d   : > { %v2317_v37 = vmax.f32 %v2312_v34, 0.0  ;;  %v7305_v38 = vpop.f32.mrb[27].mxu0 }
 0xa1f   : > { %v2318_v39 = vpack.c.bf16 %v2317_v37, %v2317_v37 }
 0xa21   : > { %7315 = vmatmul.mubr.msk.bf16.vlgmr.msra.gmra.mrb[24].mxu1 %vm2349_vm8, %v2318_v39 }
 0xa22   : > { %7336 = vmatprep.mubr.msk.bf16.mxu1 %vm8585_vm0, %v8584_v0 }
 0xaf4   : > { %v2387_v41 = vpop.f32.mrb[24].mxu1 }
 0xaf5   : > { %v2388_v42 = vadd.f32 %v6799_v40, %v2387_v41  ;;  %v7316_v43 = vpop.f32.mrb[25].mxu1 }
 0xaf6   : > { %v2390_v44 = vpop.f32.mrb[26].mxu1 }
 0xaf7   : > { %v7317_v45 = vpop.f32.mrb[27].mxu1  ;;  %v2393_v46 = vadd.f32 %v2388_v42, %v2238_v29 }
 0xaf9   : > { %v2394_v47 = vsel %vm1584_vm2, %v2393_v46, 0.0 }
 0xafa   : > { %2395 = vadd.xlane.f32.xlu0 %v2394_v47 }
 0xb87   : > { %v2396_v48 = vpop.xlane.xlu0 %2395 }
 0xb88   : > { %v2397_v49 = vmul.f32 0.03125, %v2396_v48 }
 0xb8a   : > { %v2398_v50 = vsub.f32 %v2393_v46, %v2397_v49 }
 0xb8c   : > { %v2399_v51 = vmul.f32 %v2398_v50, %v2398_v50 }
 0xb8e   : > { %v2400_v52 = vsel %vm1584_vm2, %v2399_v51, 0.0 }
 0xb8f   : > { %2401 = vadd.xlane.f32.xlu1 %v2400_v52 }
 0xc1c   : > { %v2402_v55 = vpop.xlane.xlu1 %2401 }
 0xc1d   : > { %v2403_v56 = vmul.f32 0.03125, %v2402_v55 }
 0xc1f   : > { %v2404_v57 = vadd.f32 1e-05, %v2403_v56 }
 0xc21   : > { %8034 = vrsqrt.f32 %v2404_v57 }
 0xc2b   : > { %v8035_v58 = vpop.eup %8034 }
 0xc2c   : > { %v2406_v60 = vmul.f32 %v8035_v58, %v2398_v50 }
 0xc2e   : > { %v2413_v62 = vmul.f32 %v6805_v59, %v2406_v60 }
 0xc30   : > { %v9230_v63 = vadd.f32 %v6806_v61, %v2413_v62 }
 0xc32   : > { %v2446_v2 = vpack.c.bf16 %v9230_v63, %v9230_v63 }
 0xc34   : > { %7323 = vmatmul.mubr.msk.bf16.vlgmr.msra.gmra.mrb[28].mxu0 %vm1584_vm2, %v2446_v2 }
 0xc35   : > { %7327 = vmatpush3.bf16.msra.mxu0 %v7968_v1  ;;  %7330 = vmatprep.mubr.msk.bf16.mxu0 %vm8585_vm0, %v8584_v0 }
 0xc36   : > { %7328 = vmatprep.subr.bf16.mxu0 %v8584_v0 }
 0xc39   : > { %7329 = vmatpush3.bf16.msra.mxu0 %v7969_v3 }
 0xc3a   : > { %7340 = vmatprep.subr.bf16.mxu0 %v8584_v0 }
 0xc3c   : > { %7331 = vmatmul.mubr.msk.bf16.vlgmr.msra.gmra.mrb[32].mxu0 %vm1584_vm2, %v2446_v2 }
 0xc3d   : > { %7342 = vmatprep.mubr.msk.bf16.mxu0 %vm8585_vm0, %v8584_v0 }
 0xd07   : > { %v2502_v5 = vpop.f32.mrb[28].mxu0 }
 0xd08   : > { %v2503_v6 = vadd.f32 %v6824_v4, %v2502_v5  ;;  %v7324_v7 = vpop.f32.mrb[29].mxu0 }
 0xd09   : > { %v2505_v8 = vpop.f32.mrb[30].mxu0 }
 0xd0a   : > { %v2566_v9 = vpack.c.bf16 %v2503_v6, %v2503_v6  ;;  %v7325_v10 = vpop.f32.mrb[31].mxu0 }
 0xd0c   : > { %2677 = vrot.lane.b32.xlu1 %v2566_v9, %s10042_s26 }
 0xd0f   : > { %v2560_v12 = vpop.f32.mrb[32].mxu0 }
 0xd10   : > { %v2561_v13 = vadd.f32 %v6828_v11, %v2560_v12  ;;  %v7332_v15 = vpop.f32.mrb[33].mxu0 }
 0xd11   : > { %v2563_v16 = vpop.f32.mrb[34].mxu0 }
 0xd12   : > { %v9247_v17 = vpack.c.bf16 %v2561_v13, %v2561_v13  ;;  %v7333_v18 = vpop.f32.mrb[35].mxu0 }
 0xd14   : > { %2794 = vrot.lane.b32.xlu1 %v9247_v17, %s10043_s28  ;;  %2679 = vrot.lane.b32.xlu0 %v9247_v17, %s10042_s26  ;;  %v2572_v14 = vsel %vm1688_vm3, %v9247_v17, 0 }
 0xd15   : > { %7335 = vmatpush3.bf16.xpose.msra.mxu1 %v2572_v14 }
 0xd16   : > { %7346 = vmatprep.subr.bf16.mxu1 %v8584_v0 }
 0xd18   : > { %2909 = vrot.lane.b32.xlu1 %v9247_v17, %s10044_s22  ;;  %2792 = vrot.lane.b32.xlu0 %v2566_v9, %s10043_s28 }
 0xd1c   : > { %2907 = vrot.lane.b32.xlu0 %v2566_v9, %s10044_s22  ;;  %7337 = vmatmul.mubr.msk.bf16.vlgmr.msra.gmra.mrb[28].mxu1 %vm1688_vm3, %v2566_v9 }
 0xd1d   : > { %7348 = vmatprep.mubr.msk.bf16.mxu1 %vm8585_vm0, %v8584_v0 }
 0xd7e   : > { %v2678_v21 = vpop.permute.xlu1 %2677 }
 0xd86   : > { %v2680_v19 = vpop.permute.xlu0 %2679  ;;  %v2795_v22 = vpop.permute.xlu1 %2794 }
 0xd87   : > { %v2685_v20 = vsel %vm1688_vm3, %v2680_v19, 0  ;;  %v2800_v23 = vsel %vm1688_vm3, %v2795_v22, 0 }
 0xd88   : > { %7347 = vmatpush3.bf16.xpose.msra.mxu1 %v2685_v20 }
 0xd89   : > { %7358 = vmatprep.subr.bf16.mxu1 %v8584_v0 }
 0xd8a   : > { %v2910_v24 = vpop.permute.xlu1 %2909  ;;  %v2793_v25 = vpop.permute.xlu0 %2792 }
 0xd8b   : > { %v2915_v26 = vsel %vm1688_vm3, %v2910_v24, 0 }
 0xd8e   : > { %v2908_v28 = vpop.permute.xlu0 %2907 }
 0xd8f   : > { %7349 = vmatmul.mubr.msk.bf16.vlgmr.msra.gmra.mrb[32].mxu1 %vm1688_vm3, %v2678_v21 }
 0xd90   : > { %7359 = vmatpush3.bf16.xpose.msra.mxu1 %v2800_v23  ;;  %7360 = vmatprep.mubr.msk.bf16.mxu1 %vm8585_vm0, %v8584_v0 }
 0xd91   : > { %7370 = vmatprep.subr.bf16.mxu1 %v8584_v0 }
 0xd97   : > { %7361 = vmatmul.mubr.msk.bf16.vlgmr.msra.gmra.mrb[36].mxu1 %vm1688_vm3, %v2793_v25 }
 0xd98   : > { %7371 = vmatpush3.bf16.xpose.msra.mxu1 %v2915_v26  ;;  %7372 = vmatprep.mubr.msk.bf16.mxu1 %vm8585_vm0, %v8584_v0 }
 0xd99   : > { %7382 = vmatprep.subr.bf16.mxu1 %v8584_v0 }
 0xd9f   : > { %7373 = vmatmul.mubr.msk.bf16.vlgmr.msra.gmra.mrb[40].mxu1 %vm1688_vm3, %v2908_v28 }
 0xda0   : > { %7386 = vmatprep.mubr.msk.bf16.mxu1 %vm8585_vm0, %v8584_v0 }
 0xdef   : > { %v2608_v29 = vpop.f32.mrb[28].mxu1 }
 0xdf0   : > { %v7338_v30 = vpop.f32.mrb[29].mxu1  ;;  %v2614_v31 = vsel %vm1688_vm3, %v2608_v29, -inf }
 0xdf1   : > { %2615 = vmax.xlane.f32.xlu1 %v2614_v31  ;;  %v2611_v32 = vpop.f32.mrb[30].mxu1 }
 0xdf2   : > { %v7339_v33 = vpop.f32.mrb[31].mxu1 }
 0xe62   : > { %v2721_v27 = vpop.f32.mrb[32].mxu1 }
 0xe63   : > { %v7350_v34 = vpop.f32.mrb[33].mxu1  ;;  %v2727_v35 = vsel %vm1688_vm3, %v2721_v27, -inf }
 0xe64   : > { %2728 = vmax.xlane.f32.xlu0 %v2727_v35  ;;  %v2724_v36 = vpop.f32.mrb[34].mxu1 }
 0xe65   : > { %v7351_v37 = vpop.f32.mrb[35].mxu1 }
 0xe6a   : > { %v2836_v38 = vpop.f32.mrb[36].mxu1 }
 0xe6b   : > { %v7362_v39 = vpop.f32.mrb[37].mxu1  ;;  %v2842_v40 = vsel %vm1688_vm3, %v2836_v38, -inf }
 0xe6c   : > { %2843 = vmax.xlane.f32.xlu0 %v2842_v40  ;;  %v2839_v41 = vpop.f32.mrb[38].mxu1  ;;  %v7971_v39 = vld [vmem:[%s10026_s13 + $0x18] sm:$0xff]  }
 0xe6d   : > { %v7363_v42 = vpop.f32.mrb[39].mxu1 }
 0xe72   : > { %v2951_v43 = vpop.f32.mrb[40].mxu1 }
 0xe73   : > { %v7374_v44 = vpop.f32.mrb[41].mxu1  ;;  %v2957_v45 = vsel %vm1688_vm3, %v2951_v43, -inf }
 0xe74   : > { %2958 = vmax.xlane.f32.xlu1 %v2957_v45  ;;  %v2954_v46 = vpop.f32.mrb[42].mxu1 }
 0xe75   : > { %v7375_v47 = vpop.f32.mrb[43].mxu1 }
 0xe7e   : > { %v2616_v48 = vpop.xlane.xlu1 %2615 }
 0xe7f   : > { %v2617_v49 = vsub.f32 %v2608_v29, %v2616_v48 }
 0xe81   : > { %v2618_v50 = vmul.f32 1.442695, %v2617_v49 }
 0xe83   : > { %8036 = vpow2.f32 %v2618_v50 }
 0xe8d   : > { %v8037_v51 = vpop.eup %8036 }
 0xe8e   : > { %v2620_v52 = vsel %vm1688_vm3, %v8037_v51, 0.0 }
 0xe8f   : > { %2621 = vadd.xlane.f32.xlu0 %v2620_v52 }
 0xef1   : > { %v2729_v53 = vpop.xlane.xlu0 %2728 }
 0xef2   : > { %v2730_v54 = vsub.f32 %v2721_v27, %v2729_v53  ;;  %v6840_v53 = vld [vmem:[%s10027_s11 + $0x1] ss:$0 sm:$0xff]  ;;  %s10052_s11 = sld [smem:[#allocation48_spill]] }
 0xef4   : > { %v2731_v55 = vmul.f32 1.442695, %v2730_v54 }
 0xef6   : > { %8038 = vpow2.f32 %v2731_v55 }
 0xef9   : > { %v2844_v56 = vpop.xlane.xlu0 %2843 }
 0xefa   : > { %v2845_v57 = vsub.f32 %v2836_v38, %v2844_v56  ;;  %v7970_v38 = vld [vmem:[%s10026_s13 + $0x10] sm:$0xff]   ;;  %s10053_s13 = sld [smem:[#allocation31_spill]] }
 0xefb   : > { %7383 = vmatpush3.bf16.msra.mxu1 %v7970_v38 }
 0xefc   : > { %v2846_v58 = vmul.f32 1.442695, %v2845_v57  ;;  %7384 = vmatprep.subr.bf16.mxu1 %v8584_v0 }
 0xefe   : > { %8040 = vpow2.f32 %v2846_v58 }
 0xeff   : > { %7385 = vmatpush3.bf16.msra.mxu1 %v7971_v39 }
 0xf00   : > { %v8039_v59 = vpop.eup %8038  ;;  %7398 = vmatprep.subr.bf16.mxu1 %v8584_v0  ;;  %s1483_s25 = scalar_lea.vmem %s10053_s13, %s9083_s10  ;;  %s10056_s10 = sld [smem:[#allocation51_spill]] }
 0xf01   : > { %v2733_v60 = vsel %vm1688_vm3, %v8039_v59, 0.0  ;;  %v2959_v1 = vpop.xlane.xlu1 %2958  ;;  %s10057_s13 = sld [smem:[#allocation52_spill]] }
 0xf02   : > { %2734 = vadd.xlane.f32.xlu1 %v2733_v60  ;;  %v2960_v2 = vsub.f32 %v2951_v43, %v2959_v1 }
 0xf04   : > { %v2961_v3 = vmul.f32 1.442695, %v2960_v2 }
 0xf06   : > { %8042 = vpow2.f32 %v2961_v3 }
 0xf08   : > { %v8041_v61 = vpop.eup %8040 }
 0xf09   : > { %v2848_v62 = vsel %vm1688_vm3, %v8041_v61, 0.0 }
 0xf0a   : > { %2849 = vadd.xlane.f32.xlu0 %v2848_v62 }
 0xf10   : > { %v8043_v4 = vpop.eup %8042 }
 0xf11   : > { %v2963_v5 = vsel %vm1688_vm3, %v8043_v4, 0.0 }
 0xf13   : > { %2739 = vrot.lane.b32.xlu1 %v9247_v17, %s10045_s3 }
 0xf1c   : > { %v2622_v6 = vpop.xlane.xlu0 %2621 }
 0xf1d   : > { %8044 = vrcp.f32 %v2622_v6  ;;  %v7979_v6 = vld [vmem:[%s10030_s18 + $0x28] sm:$0xff]  }
 0xf20   : > { %2627 = vrot.lane.b32.xlu0 %v9247_v17, %s10046_s7 }
 0xf24   : > { %2969 = vrot.lane.b32.xlu0 %v9247_v17, %s10047_s12 }
 0xf27   : > { %v8045_v8 = vpop.eup %8044 }
 0xf28   : > { %v2624_v10 = vmul.f32 %v8045_v8, %v8037_v51 }
 0xf2a   : > { %v2625_v15 = vpack.c.bf16 %v2624_v10, %v2624_v10 }
 0xf37   : > { %2964 = vadd.xlane.f32.xlu1 %v2963_v5  ;;  %v7973_v5 = vld [vmem:[%s10029_s1 + $0x18] sm:$0xff]  }
 0xf48   : > { %2854 = vrot.lane.b32.xlu1 %v9247_v17, %s10048_s16 }
 0xf8f   : > { %v2735_v7 = vpop.xlane.xlu1 %2734 }
 0xf90   : > { %8046 = vrcp.f32 %v2735_v7 }
 0xf93   : > { %v2740_v13 = vpop.permute.xlu1 %2739 }
 0xf94   : > { %v2745_v18 = vsel %vm1753_vm4, %v2740_v13, 0  ;;  %v6845_v13 = vld [vmem:[%s10034_s24 + $0x1] ss:$0 sm:$0xff] }
 0xf97   : > { %v2850_v9 = vpop.xlane.xlu0 %2849 }
 0xf98   : > { %8048 = vrcp.f32 %v2850_v9 }
 0xf9a   : > { %v8047_v16 = vpop.eup %8046 }
 0xf9b   : > { %v2628_v11 = vpop.permute.xlu0 %2627  ;;  %v2737_v17 = vmul.f32 %v8047_v16, %v8039_v59 }
 0xf9c   : > { %v2633_v12 = vsel %vm1753_vm4, %v2628_v11, 0  ;;  %v6844_v11 = vld [vmem:[%s10032_s2 + $0x1] ss:$0 sm:$0xff]  ;;  %s10058_s2 = sld [smem:[#allocation53_spill]] }
 0xf9d   : > { %7341 = vmatpush3.bf16.msra.mxu0 %v2633_v12  ;;  %v2738_v14 = vpack.c.bf16 %v2737_v17, %v2737_v17 }
 0xf9e   : > { %7352 = vmatprep.subr.bf16.mxu0 %v8584_v0 }
 0xf9f   : > { %v2970_v24 = vpop.permute.xlu0 %2969 }
 0xfa0   : > { %7343 = vmatmul.mubr.msk.bf16.vlgmr.msra.gmra.mrb[36].mxu0 %vm1688_vm3, %v2625_v15  ;;  %v2975_v26 = vsel %vm1753_vm4, %v2970_v24, 0  ;;  %v7981_v24 = vld [vmem:[%s10030_s18 + $0x38] sm:$0xff]  }
 0xfa1   : > { %7353 = vmatpush3.bf16.msra.mxu0 %v2745_v18  ;;  %7354 = vmatprep.mubr.msk.bf16.mxu0 %vm8585_vm0, %v8584_v0  ;;  %v7974_v18 = vld [vmem:[%s10052_s11] sm:$0xff]  }
 0xfa2   : > { %7364 = vmatprep.subr.bf16.mxu0 %v8584_v0  ;;  %v8049_v19 = vpop.eup %8048 }
 0xfa3   : > { %v2852_v21 = vmul.f32 %v8049_v19, %v8041_v61  ;;  %v9353_v19 = vld [vmem:[%s1483_s25] sm:$0xff]  ;;  %s10055_s25 = sld [smem:[#allocation49_spill]] }
 0xfa5   : > { %v2853_v25 = vpack.c.bf16 %v2852_v21, %v2852_v21 }
 0xfa8   : > { %7355 = vmatmul.mubr.msk.bf16.vlgmr.msra.gmra.mrb[40].mxu0 %vm1688_vm3, %v2738_v14  ;;  %v7975_v14 = vld [vmem:[%s10052_s11 + $0x8] sm:$0xff]  }
 0xfa9   : > { %7366 = vmatprep.mubr.msk.bf16.mxu0 %vm8585_vm0, %v8584_v0 }
 0xfc4   : > { %v2965_v20 = vpop.xlane.xlu1 %2964 }
 0xfc5   : > { %8050 = vrcp.f32 %v2965_v20  ;;  %v3318_v20 = vpack.c.bf16 %v9353_v19, %v9353_v19 }
 0xfc8   : > { %v2855_v22 = vpop.permute.xlu1 %2854 }
 0xfc9   : > { %v2860_v23 = vsel %vm1753_vm4, %v2855_v22, 0 }
 0xfca   : > { %7365 = vmatpush3.bf16.msra.mxu0 %v2860_v23  ;;  %v7980_v23 = vld [vmem:[%s10030_s18 + $0x30] sm:$0xff]  }
 0xfcb   : > { %7376 = vmatprep.subr.bf16.mxu0 %v8584_v0 }
 0xfcd   : > { %7367 = vmatmul.mubr.msk.bf16.vlgmr.msra.gmra.mrb[44].mxu0 %vm1688_vm3, %v2853_v25  ;;  %v6862_v25 = vld [vmem:[%s10036_s4 + $0x1] ss:$0 sm:$0xff]  ;;  %s10059_s4 = sld [smem:[#allocation57_spill]] }
 0xfce   : > { %7377 = vmatpush3.bf16.msra.mxu0 %v2975_v26  ;;  %7378 = vmatprep.mubr.msk.bf16.mxu0 %vm8585_vm0, %v8584_v0 }
 0xfcf   : > { %v8051_v28 = vpop.eup %8050  ;;  %7390 = vmatprep.subr.bf16.mxu0 %v8584_v0 }
 0xfd0   : > { %v2967_v29 = vmul.f32 %v8051_v28, %v8043_v4  ;;  %v7972_v4 = vld [vmem:[%s10029_s1 + $0x10] sm:$0xff]   ;;  %s10054_s1 = sld [smem:[#allocation50_spill]] }
 0xfd2   : > { %v2968_v30 = vpack.c.bf16 %v2967_v29, %v2967_v29 }
 0xfd5   : > { %7379 = vmatmul.mubr.msk.bf16.vlgmr.msra.gmra.mrb[48].mxu0 %vm1688_vm3, %v2968_v30 }
 0xfd6   : > { %7394 = vmatprep.mubr.msk.bf16.mxu0 %vm8585_vm0, %v8584_v0  ;;  %7391 = vmatpush3.bf16.msra.mxu0 %v7972_v4  ;;  %v7976_v21 = vld [vmem:[%s10054_s1] sm:$0xff]   ;;  %v7977_v22 = vld [vmem:[%s10054_s1 + $0x8] sm:$0xff]  }
 0xfd7   : > { %7392 = vmatprep.subr.bf16.mxu0 %v8584_v0 }
 0xfda   : > { %7393 = vmatpush3.bf16.msra.mxu0 %v7973_v5 }
 0xfdb   : > { %7410 = vmatprep.subr.bf16.mxu0 %v8584_v0 }
0x1073   : > { %v2669_v31 = vpop.f32.mrb[36].mxu0 }
0x1074   : > { %2675 = vst.msk [vmem:[#allocation2] sm:$0xff] %vm1688_vm3, %v2669_v31  ;;  %v7344_v32 = vpop.f32.mrb[37].mxu0 }
0x1075   : > { %v2672_v33 = vpop.f32.mrb[38].mxu0 }
0x1076   : > { %v7345_v27 = vpop.f32.mrb[39].mxu0 }
0x1077   : > { %v6874_v27 = vld [vmem:[%s10055_s25] ss:$0 sm:$0xff] }
0x107b   : > { %v2781_v34 = vpop.f32.mrb[40].mxu0 }
0x107c   : > { %2788 = vrot.lane.b32.xlu1 %v2781_v34, %s10049_s17  ;;  %v7356_v35 = vpop.f32.mrb[41].mxu0 }
0x107d   : > { %v2784_v36 = vpop.f32.mrb[42].mxu0 }
0x107e   : > { %v7357_v37 = vpop.f32.mrb[43].mxu0 }
0x10a0   : > { %v2896_v40 = vpop.f32.mrb[44].mxu0 }
0x10a1   : > { %2903 = vrot.lane.b32.xlu0 %v2896_v40, %s10050_s19  ;;  %v7368_v41 = vpop.f32.mrb[45].mxu0  ;;  %v6878_v40 = vld [vmem:[%s10056_s10] ss:$0 sm:$0xff] }
0x10a2   : > { %v2899_v42 = vpop.f32.mrb[46].mxu0 }
0x10a3   : > { %v7369_v43 = vpop.f32.mrb[47].mxu0 }
0x10a8   : > { %v3011_v44 = vpop.f32.mrb[48].mxu0 }
0x10a9   : > { %3018 = vrot.lane.b32.xlu1 %v3011_v44, %s10051_s20  ;;  %v7380_v45 = vpop.f32.mrb[49].mxu0 }
0x10aa   : > { %v3014_v46 = vpop.f32.mrb[50].mxu0 }
0x10ab   : > { %v7381_v47 = vpop.f32.mrb[51].mxu0 }
0x10ee   : > { %v2789_v48 = vpop.permute.xlu1 %2788 }
0x10ef   : > { %2791 = vst.msk [vmem:[#allocation2] sm:$0xff] %vm1913_vm5, %v2789_v48 }
0x1113   : > { %v2904_v49 = vpop.permute.xlu0 %2903 }
0x1114   : > { %2906 = vst.msk [vmem:[#allocation2] sm:$0xff] %vm2029_vm6, %v2904_v49 }
0x111b   : > { %v3019_v50 = vpop.permute.xlu1 %3018 }
0x111c   : > { %3021 = vst.msk [vmem:[#allocation2] sm:$0xff] %vm2145_vm7, %v3019_v50 }
0x1123   : > { %v3022_v51 = vld [vmem:[#allocation2] sm:$0xff] }
0x1124   : > { %v3023_v52 = vpack.c.bf16 %v3022_v51, %v3022_v51 }
0x1126   : > { %7387 = vmatmul.mubr.msk.bf16.vlgmr.msra.gmra.mrb[44].mxu1 %vm1584_vm2, %v3023_v52 }
0x1127   : > { %7406 = vmatprep.mubr.msk.bf16.mxu1 %vm8585_vm0, %v8584_v0 }
0x11f9   : > { %v3079_v54 = vpop.f32.mrb[44].mxu1 }
0x11fa   : > { %v3080_v55 = vadd.f32 %v6840_v53, %v3079_v54  ;;  %v7388_v56 = vpop.f32.mrb[45].mxu1 }
0x11fb   : > { %v3082_v57 = vpop.f32.mrb[46].mxu1 }
0x11fc   : > { %v7389_v58 = vpop.f32.mrb[47].mxu1  ;;  %v3085_v59 = vadd.f32 %v3080_v55, %v9230_v63  ;;  %v7978_v63 = vld [vmem:[%s10030_s18 + $0x20] sm:$0xff]   ;;  %s10063_s18 = sld [smem:[#allocation64_spill]] }
0x11fd   : > { %7399 = vmatpush3.bf16.msra.mxu1 %v7978_v63 }
0x11fe   : > { %v3086_v60 = vsel %vm1584_vm2, %v3085_v59, 0.0  ;;  %7400 = vmatprep.subr.bf16.mxu1 %v8584_v0 }
0x11ff   : > { %3087 = vadd.xlane.f32.xlu0 %v3086_v60 }
0x1201   : > { %7401 = vmatpush3.bf16.msra.mxu1 %v7979_v6 }
0x1202   : > { %7402 = vmatprep.subr.bf16.mxu1 %v8584_v0 }
0x1205   : > { %7403 = vmatpush3.bf16.msra.mxu1 %v7980_v23 }
0x1206   : > { %7404 = vmatprep.subr.bf16.mxu1 %v8584_v0 }
0x1209   : > { %7405 = vmatpush3.bf16.msra.mxu1 %v7981_v24 }
0x120a   : > { %7426 = vmatprep.subr.bf16.mxu1 %v8584_v0 }
0x128c   : > { %v3088_v61 = vpop.xlane.xlu0 %3087 }
0x128d   : > { %v3089_v62 = vmul.f32 0.03125, %v3088_v61 }
0x128f   : > { %v3090_v1 = vsub.f32 %v3085_v59, %v3089_v62 }
0x1291   : > { %v3091_v2 = vmul.f32 %v3090_v1, %v3090_v1 }
0x1293   : > { %v3092_v3 = vsel %vm1584_vm2, %v3091_v2, 0.0 }
0x1294   : > { %3093 = vadd.xlane.f32.xlu1 %v3092_v3 }
0x1321   : > { %v3094_v7 = vpop.xlane.xlu1 %3093 }
0x1322   : > { %v3095_v8 = vmul.f32 0.03125, %v3094_v7 }
0x1324   : > { %v3096_v9 = vadd.f32 1e-05, %v3095_v8 }
0x1326   : > { %8052 = vrsqrt.f32 %v3096_v9 }
0x1330   : > { %v8053_v10 = vpop.eup %8052 }
0x1331   : > { %v3098_v12 = vmul.f32 %v8053_v10, %v3090_v1 }
0x1333   : > { %v3105_v15 = vmul.f32 %v6844_v11, %v3098_v12 }
0x1335   : > { %v9342_v16 = vadd.f32 %v6845_v13, %v3105_v15 }
0x1337   : > { %v3135_v17 = vpack.c.bf16 %v9342_v16, %v9342_v16 }
0x1339   : > { %7395 = vmatmul.mubr.msk.bf16.vlgmr.msra.gmra.mrb[52].mxu0 %vm1584_vm2, %v3135_v17 }
0x133a   : > { %7411 = vmatpush3.bf16.msra.mxu0 %v7974_v18  ;;  %7414 = vmatprep.mubr.msk.bf16.mxu0 %vm8585_vm0, %v8584_v0 }
0x133b   : > { %7412 = vmatprep.subr.bf16.mxu0 %v8584_v0 }
0x133e   : > { %7413 = vmatpush3.bf16.msra.mxu0 %v7975_v14 }
0x133f   : > { %7418 = vmatprep.subr.bf16.mxu0 %v8584_v0 }
0x1341   : > { %7415 = vmatmul.mubr.msk.bf16.vlgmr.msra.gmra.mrb[56].mxu0 %vm1584_vm2, %v3318_v20 }
0x1342   : > { %7419 = vmatpush3.bf16.msra.mxu0 %v7976_v21  ;;  %7422 = vmatprep.mubr.msk.bf16.mxu0 %vm8585_vm0, %v8584_v0 }
0x1343   : > { %7420 = vmatprep.subr.bf16.mxu0 %v8584_v0 }
0x1346   : > { %7421 = vmatpush3.bf16.msra.mxu0 %v7977_v22 }
0x1347   : > { %7432 = vmatprep.subr.bf16.mxu0 %v8584_v0 }
0x1349   : > { %7423 = vmatmul.mubr.msk.bf16.vlgmr.msra.gmra.mrb[60].mxu0 %vm1584_vm2, %v3318_v20 }
0x134a   : > { %7434 = vmatprep.mubr.msk.bf16.mxu0 %vm8585_vm0, %v8584_v0 }
0x140c   : > { %v3191_v26 = vpop.f32.mrb[52].mxu0 }
0x140d   : > { %v3192_v28 = vadd.f32 %v6862_v25, %v3191_v26  ;;  %v7396_v29 = vpop.f32.mrb[53].mxu0 }
0x140e   : > { %v3194_v30 = vpop.f32.mrb[54].mxu0 }
0x140f   : > { %v3197_v31 = vmax.f32 %v3192_v28, 0.0  ;;  %v7397_v32 = vpop.f32.mrb[55].mxu0 }
0x1411   : > { %v3198_v33 = vpack.c.bf16 %v3197_v31, %v3197_v31 }
0x1413   : > { %7407 = vmatmul.mubr.msk.bf16.vlgmr.msra.gmra.mrb[48].mxu1 %vm2349_vm8, %v3198_v33 }
0x1414   : > { %v3374_v34 = vpop.f32.mrb[56].mxu0  ;;  %7428 = vmatprep.mubr.msk.bf16.mxu1 %vm8585_vm0, %v8584_v0 }
0x1415   : > { %v3375_v35 = vadd.f32 %v6874_v27, %v3374_v34  ;;  %v7416_v36 = vpop.f32.mrb[57].mxu0 }
0x1416   : > { %v3377_v37 = vpop.f32.mrb[58].mxu0 }
0x1417   : > { %v3438_v38 = vpack.c.bf16 %v3375_v35, %v3375_v35  ;;  %v7417_v39 = vpop.f32.mrb[59].mxu0 }
0x1419   : > { %3549 = vrot.lane.b32.xlu1 %v3438_v38, %s10042_s26 }
0x141c   : > { %v3432_v41 = vpop.f32.mrb[60].mxu0 }
0x141d   : > { %v3433_v42 = vadd.f32 %v6878_v40, %v3432_v41  ;;  %3664 = vrot.lane.b32.xlu1 %v3438_v38, %s10043_s28  ;;  %v7424_v43 = vpop.f32.mrb[61].mxu0 }
0x141e   : > { %v3435_v44 = vpop.f32.mrb[62].mxu0 }
0x141f   : > { %v9381_v45 = vpack.c.bf16 %v3433_v42, %v3433_v42  ;;  %v7425_v46 = vpop.f32.mrb[63].mxu0 }
0x1421   : > { %3779 = vrot.lane.b32.xlu1 %v3438_v38, %s10044_s22  ;;  %3551 = vrot.lane.b32.xlu0 %v9381_v45, %s10042_s26  ;;  %v3444_v47 = vsel %vm1688_vm3, %v9381_v45, 0 }
0x1422   : > { %7427 = vmatpush3.bf16.xpose.msra.mxu1 %v3444_v47 }
0x1423   : > { %7438 = vmatprep.subr.bf16.mxu1 %v8584_v0 }
0x1425   : > { %3666 = vrot.lane.b32.xlu0 %v9381_v45, %s10043_s28 }
0x1429   : > { %3781 = vrot.lane.b32.xlu0 %v9381_v45, %s10044_s22  ;;  %7429 = vmatmul.mubr.msk.bf16.vlgmr.msra.gmra.mrb[52].mxu1 %vm1688_vm3, %v3438_v38 }
0x142a   : > { %7440 = vmatprep.mubr.msk.bf16.mxu1 %vm8585_vm0, %v8584_v0 }
0x148b   : > { %v3550_v51 = vpop.permute.xlu1 %3549 }
0x148f   : > { %v3665_v54 = vpop.permute.xlu1 %3664 }
0x1493   : > { %v3552_v48 = vpop.permute.xlu0 %3551  ;;  %v3780_v56 = vpop.permute.xlu1 %3779 }
0x1494   : > { %v3557_v49 = vsel %vm1688_vm3, %v3552_v48, 0 }
0x1495   : > { %7439 = vmatpush3.bf16.xpose.msra.mxu1 %v3557_v49 }
0x1496   : > { %7450 = vmatprep.subr.bf16.mxu1 %v8584_v0 }
0x1497   : > { %v3667_v50 = vpop.permute.xlu0 %3666 }
0x1498   : > { %v3672_v52 = vsel %vm1688_vm3, %v3667_v50, 0 }
0x149b   : > { %v3782_v53 = vpop.permute.xlu0 %3781 }
0x149c   : > { %7441 = vmatmul.mubr.msk.bf16.vlgmr.msra.gmra.mrb[56].mxu1 %vm1688_vm3, %v3550_v51  ;;  %v3787_v55 = vsel %vm1688_vm3, %v3782_v53, 0 }
0x149d   : > { %7451 = vmatpush3.bf16.xpose.msra.mxu1 %v3672_v52  ;;  %7452 = vmatprep.mubr.msk.bf16.mxu1 %vm8585_vm0, %v8584_v0 }
0x149e   : > { %7462 = vmatprep.subr.bf16.mxu1 %v8584_v0 }
0x14a4   : > { %7453 = vmatmul.mubr.msk.bf16.vlgmr.msra.gmra.mrb[60].mxu1 %vm1688_vm3, %v3665_v54 }
0x14a5   : > { %7463 = vmatpush3.bf16.xpose.msra.mxu1 %v3787_v55  ;;  %7464 = vmatprep.mubr.msk.bf16.mxu1 %vm8585_vm0, %v8584_v0 }
0x14a6   : > { %7474 = vmatprep.subr.bf16.mxu1 %v8584_v0 }
0x14ac   : > { %7465 = vmatmul.mubr.msk.bf16.vlgmr.msra.gmra.mrb[64].mxu1 %vm1688_vm3, %v3780_v56 }
0x14ad   : > { %7478 = vmatprep.mubr.msk.bf16.mxu1 %vm8585_vm0, %v8584_v0 }
0x14e6   : > { %v9411_v57 = vpop.f32.mrb[48].mxu1 }
0x14e7   : > { %v7408_v58 = vpop.f32.mrb[49].mxu1 }
0x14e8   : > { %v3269_v59 = vpop.f32.mrb[50].mxu1 }
0x14e9   : > { %v7409_v60 = vpop.f32.mrb[51].mxu1 }
0x14fc   : > { %v3480_v61 = vpop.f32.mrb[52].mxu1 }
0x14fd   : > { %v7430_v62 = vpop.f32.mrb[53].mxu1  ;;  %v3486_v1 = vsel %vm1688_vm3, %v3480_v61, -inf }
0x14fe   : > { %3487 = vmax.xlane.f32.xlu0 %v3486_v1  ;;  %v3483_v2 = vpop.f32.mrb[54].mxu1 }
0x14ff   : > { %v7431_v3 = vpop.f32.mrb[55].mxu1 }
0x156f   : > { %v3593_v4 = vpop.f32.mrb[56].mxu1 }
0x1570   : > { %v7442_v5 = vpop.f32.mrb[57].mxu1  ;;  %v3599_v63 = vsel %vm1688_vm3, %v3593_v4, -inf }
0x1571   : > { %3600 = vmax.xlane.f32.xlu1 %v3599_v63  ;;  %v3596_v6 = vpop.f32.mrb[58].mxu1 }
0x1572   : > { %v7443_v7 = vpop.f32.mrb[59].mxu1 }
0x1577   : > { %v3708_v8 = vpop.f32.mrb[60].mxu1 }
0x1578   : > { %v7454_v9 = vpop.f32.mrb[61].mxu1  ;;  %v3714_v10 = vsel %vm1688_vm3, %v3708_v8, -inf }
0x1579   : > { %3715 = vmax.xlane.f32.xlu0 %v3714_v10  ;;  %v3711_v11 = vpop.f32.mrb[62].mxu1  ;;  %v7982_v10 = vld [vmem:[%s10057_s13] sm:$0xff]  }
0x157a   : > { %v7455_v12 = vpop.f32.mrb[63].mxu1  ;;  %7475 = vmatpush3.bf16.msra.mxu1 %v7982_v10  ;;  %v7983_v11 = vld [vmem:[%s10057_s13 + $0x8] sm:$0xff]  }
0x157b   : > { %7476 = vmatprep.subr.bf16.mxu1 %v8584_v0 }
0x157e   : > { %7477 = vmatpush3.bf16.msra.mxu1 %v7983_v11 }
0x157f   : > { %v3823_v13 = vpop.f32.mrb[64].mxu1  ;;  %7490 = vmatprep.subr.bf16.mxu1 %v8584_v0 }
0x1580   : > { %v7466_v15 = vpop.f32.mrb[65].mxu1  ;;  %v3829_v18 = vsel %vm1688_vm3, %v3823_v13, -inf }
0x1581   : > { %3830 = vmax.xlane.f32.xlu0 %v3829_v18  ;;  %v3826_v17 = vpop.f32.mrb[66].mxu1 }
0x1582   : > { %v7467_v14 = vpop.f32.mrb[67].mxu1 }
0x158b   : > { %v3488_v20 = vpop.xlane.xlu0 %3487 }
0x158c   : > { %v3489_v21 = vsub.f32 %v3480_v61, %v3488_v20 }
0x158e   : > { %v3490_v22 = vmul.f32 1.442695, %v3489_v21 }
0x1590   : > { %8054 = vpow2.f32 %v3490_v22  ;;  %v6866_v22 = vld [vmem:[%s10037_s5 + $0x1] ss:$0 sm:$0xff]  ;;  %s10060_s5 = sld [smem:[#allocation56_spill]] }
0x159a   : > { %v8055_v23 = vpop.eup %8054 }
0x159b   : > { %v3492_v24 = vsel %vm1688_vm3, %v8055_v23, 0.0 }
0x159c   : > { %3493 = vadd.xlane.f32.xlu1 %v3492_v24 }
0x15ad   : > { %3499 = vrot.lane.b32.xlu1 %v9381_v45, %s10046_s7 }
0x15fe   : > { %v3601_v25 = vpop.xlane.xlu1 %3600 }
0x15ff   : > { %v3602_v26 = vsub.f32 %v3593_v4, %v3601_v25 }
0x1601   : > { %v3603_v28 = vmul.f32 1.442695, %v3602_v26 }
0x1603   : > { %8056 = vpow2.f32 %v3603_v28 }
0x1606   : > { %v3716_v29 = vpop.xlane.xlu0 %3715 }
0x1607   : > { %v3717_v30 = vsub.f32 %v3708_v8, %v3716_v29 }
0x1609   : > { %v3718_v31 = vmul.f32 1.442695, %v3717_v30 }
0x160b   : > { %8058 = vpow2.f32 %v3718_v31 }
0x160d   : > { %v8057_v32 = vpop.eup %8056 }
0x160e   : > { %v3831_v33 = vpop.xlane.xlu0 %3830  ;;  %v3605_v27 = vsel %vm1688_vm3, %v8057_v32, 0.0 }
0x160f   : > { %v3832_v34 = vsub.f32 %v3823_v13, %v3831_v33  ;;  %3606 = vadd.xlane.f32.xlu0 %v3605_v27 }
0x1611   : > { %v3833_v35 = vmul.f32 1.442695, %v3832_v34 }
0x1613   : > { %8060 = vpow2.f32 %v3833_v35 }
0x1615   : > { %v8059_v36 = vpop.eup %8058 }
0x1616   : > { %v3720_v37 = vsel %vm1688_vm3, %v8059_v36, 0.0 }
0x1617   : > { %3721 = vadd.xlane.f32.xlu1 %v3720_v37 }
0x161d   : > { %v8061_v38 = vpop.eup %8060 }
0x161e   : > { %v3835_v39 = vsel %vm1688_vm3, %v8061_v38, 0.0 }
0x161f   : > { %3836 = vadd.xlane.f32.xlu0 %v3835_v39 }
0x1628   : > { %3726 = vrot.lane.b32.xlu1 %v9381_v45, %s10048_s16 }
0x1629   : > { %v3494_v40 = vpop.xlane.xlu1 %3493 }
0x162a   : > { %8062 = vrcp.f32 %v3494_v40 }
0x162c   : > { %3841 = vrot.lane.b32.xlu1 %v9381_v45, %s10047_s12 }
0x162d   : > { %v3500_v41 = vpop.permute.xlu1 %3499 }
0x162e   : > { %v3505_v42 = vsel %vm1753_vm4, %v3500_v41, 0 }
0x162f   : > { %7433 = vmatpush3.bf16.msra.mxu0 %v3505_v42  ;;  %v7984_v42 = vld [vmem:[%s10059_s4] sm:$0xff]  }
0x1630   : > { %7444 = vmatprep.subr.bf16.mxu0 %v8584_v0 }
0x1634   : > { %v8063_v43 = vpop.eup %8062 }
0x1635   : > { %v3496_v44 = vmul.f32 %v8063_v43, %v8055_v23  ;;  %3611 = vrot.lane.b32.xlu0 %v9381_v45, %s10045_s3  ;;  %v3267_v23 = vadd.f32 %v6866_v22, %v9411_v57  ;;  %v7985_v43 = vld [vmem:[%s10059_s4 + $0x8] sm:$0xff]  }
0x1637   : > { %v3497_v46 = vpack.c.bf16 %v3496_v44, %v3496_v44  ;;  %v3272_v24 = vadd.f32 %v3267_v23, %v9342_v16 }
0x1639   : > { %7435 = vmatmul.mubr.msk.bf16.vlgmr.msra.gmra.mrb[64].mxu0 %vm1688_vm3, %v3497_v46  ;;  %v3273_v25 = vsel %vm1584_vm2, %v3272_v24, 0.0 }
0x163a   : > { %7446 = vmatprep.mubr.msk.bf16.mxu0 %vm8585_vm0, %v8584_v0 }
0x169c   : > { %v3607_v47 = vpop.xlane.xlu0 %3606 }
0x169d   : > { %8064 = vrcp.f32 %v3607_v47 }
0x16a4   : > { %v3722_v48 = vpop.xlane.xlu1 %3721 }
0x16a5   : > { %8066 = vrcp.f32 %v3722_v48 }
0x16a7   : > { %v8065_v49 = vpop.eup %8064 }
0x16a8   : > { %v3609_v51 = vmul.f32 %v8065_v49, %v8057_v32  ;;  %v3727_v54 = vpop.permute.xlu1 %3726  ;;  %v6890_v32 = vld [vmem:[%s10058_s2] ss:$0 sm:$0xff] }
0x16a9   : > { %v3732_v56 = vsel %vm1753_vm4, %v3727_v54, 0 }
0x16aa   : > { %v3610_v45 = vpack.c.bf16 %v3609_v51, %v3609_v51 }
0x16ac   : > { %v3837_v50 = vpop.xlane.xlu0 %3836  ;;  %v3842_v59 = vpop.permute.xlu1 %3841 }
0x16ad   : > { %8068 = vrcp.f32 %v3837_v50  ;;  %v3847_v62 = vsel %vm1753_vm4, %v3842_v59, 0  ;;  %v7986_v59 = vld [vmem:[%s10060_s5] sm:$0xff]  }
0x16af   : > { %v8067_v55 = vpop.eup %8066 }
0x16b0   : > { %v3612_v52 = vpop.permute.xlu0 %3611  ;;  %v3724_v58 = vmul.f32 %v8067_v55, %v8059_v36 }
0x16b1   : > { %v3617_v53 = vsel %vm1753_vm4, %v3612_v52, 0 }
0x16b2   : > { %7445 = vmatpush3.bf16.msra.mxu0 %v3617_v53  ;;  %v3725_v60 = vpack.c.bf16 %v3724_v58, %v3724_v58  ;;  %v6872_v53 = vld [vmem:[%s10039_s6 + $0x1] ss:$0 sm:$0xff]  ;;  %s10061_s6 = sld [smem:[#allocation59_spill]] }
0x16b3   : > { %7456 = vmatprep.subr.bf16.mxu0 %v8584_v0 }
0x16b5   : > { %7447 = vmatmul.mubr.msk.bf16.vlgmr.msra.gmra.mrb[68].mxu0 %vm1688_vm3, %v3610_v45  ;;  %v6873_v45 = vld [vmem:[%s10041_s8 + $0x1] ss:$0 sm:$0xff]  ;;  %s10062_s8 = sld [smem:[#allocation62_spill]] }
0x16b6   : > { %7457 = vmatpush3.bf16.msra.mxu0 %v3732_v56  ;;  %7458 = vmatprep.mubr.msk.bf16.mxu0 %vm8585_vm0, %v8584_v0 }
0x16b7   : > { %7468 = vmatprep.subr.bf16.mxu0 %v8584_v0  ;;  %v8069_v61 = vpop.eup %8068 }
0x16b8   : > { %v3839_v1 = vmul.f32 %v8069_v61, %v8061_v38 }
0x16ba   : > { %v3840_v2 = vpack.c.bf16 %v3839_v1, %v3839_v1 }
0x16bd   : > { %7459 = vmatmul.mubr.msk.bf16.vlgmr.msra.gmra.mrb[72].mxu0 %vm1688_vm3, %v3725_v60  ;;  %v7987_v60 = vld [vmem:[%s10060_s5 + $0x8] sm:$0xff]  }
0x16be   : > { %7469 = vmatpush3.bf16.msra.mxu0 %v3847_v62  ;;  %7470 = vmatprep.mubr.msk.bf16.mxu0 %vm8585_vm0, %v8584_v0 }
0x16bf   : > { %7482 = vmatprep.subr.bf16.mxu0 %v8584_v0 }
0x16c5   : > { %7471 = vmatmul.mubr.msk.bf16.vlgmr.msra.gmra.mrb[76].mxu0 %vm1688_vm3, %v3840_v2 }
0x16c6   : > { %7486 = vmatprep.mubr.msk.bf16.mxu0 %vm8585_vm0, %v8584_v0  ;;  %7483 = vmatpush3.bf16.msra.mxu0 %v7986_v59 }
0x16c7   : > { %7484 = vmatprep.subr.bf16.mxu0 %v8584_v0 }
0x16ca   : > { %7485 = vmatpush3.bf16.msra.mxu0 %v7987_v60 }
0x16cb   : > { %7498 = vmatprep.subr.bf16.mxu0 %v8584_v0 }
0x170c   : > { %v3541_v3 = vpop.f32.mrb[64].mxu0 }
0x170d   : > { %3547 = vst.msk [vmem:[#allocation2] sm:$0xff] %vm1688_vm3, %v3541_v3  ;;  %v7436_v4 = vpop.f32.mrb[65].mxu0  ;;  %v6894_v3 = vld [vmem:[#allocation3] ss:$0 sm:$0xff] }
0x170e   : > { %v3544_v5 = vpop.f32.mrb[66].mxu0 }
0x170f   : > { %v7437_v63 = vpop.f32.mrb[67].mxu0  ;;  %v6895_v5 = vld [vmem:[#allocation6] ss:$0 sm:$0xff] }
0x1788   : > { %v3653_v6 = vpop.f32.mrb[68].mxu0 }
0x1789   : > { %3660 = vrot.lane.b32.xlu0 %v3653_v6, %s10049_s17  ;;  %v7448_v7 = vpop.f32.mrb[69].mxu0 }
0x178a   : > { %v3656_v8 = vpop.f32.mrb[70].mxu0 }
0x178b   : > { %v7449_v9 = vpop.f32.mrb[71].mxu0  ;;  %v6900_v8 = vld [vmem:[#allocation9] ss:$0 sm:$0xff] }
0x1790   : > { %v3768_v12 = vpop.f32.mrb[72].mxu0 }
0x1791   : > { %3775 = vrot.lane.b32.xlu1 %v3768_v12, %s10050_s19  ;;  %v7460_v13 = vpop.f32.mrb[73].mxu0 }
0x1792   : > { %v3771_v15 = vpop.f32.mrb[74].mxu0 }
0x1793   : > { %v7461_v18 = vpop.f32.mrb[75].mxu0 }
0x1798   : > { %v3883_v17 = vpop.f32.mrb[76].mxu0 }
0x1799   : > { %3890 = vrot.lane.b32.xlu0 %v3883_v17, %s10051_s20  ;;  %v7472_v14 = vpop.f32.mrb[77].mxu0  ;;  %v6896_v17 = vld [vmem:[#allocation8] ss:$0 sm:$0xff] }
0x179a   : > { %v3886_v20 = vpop.f32.mrb[78].mxu0 }
0x179b   : > { %v7473_v21 = vpop.f32.mrb[79].mxu0 }
0x17b5   : > { %3274 = vadd.xlane.f32.xlu1 %v3273_v25 }
0x17fb   : > { %v3661_v26 = vpop.permute.xlu0 %3660 }
0x17fc   : > { %3663 = vst.msk [vmem:[#allocation2] sm:$0xff] %vm1913_vm5, %v3661_v26 }
0x1803   : > { %v3776_v28 = vpop.permute.xlu1 %3775 }
0x1804   : > { %3778 = vst.msk [vmem:[#allocation2] sm:$0xff] %vm2029_vm6, %v3776_v28 }
0x180b   : > { %v3891_v29 = vpop.permute.xlu0 %3890 }
0x180c   : > { %3893 = vst.msk [vmem:[#allocation2] sm:$0xff] %vm2145_vm7, %v3891_v29 }
0x1813   : > { %v3894_v30 = vld [vmem:[#allocation2] sm:$0xff] }
0x1814   : > { %v3895_v31 = vpack.c.bf16 %v3894_v30, %v3894_v30 }
0x1816   : > { %7479 = vmatmul.mubr.msk.bf16.vlgmr.msra.gmra.mrb[68].mxu1 %vm1584_vm2, %v3895_v31 }
0x1817   : > { %7494 = vmatprep.mubr.msk.bf16.mxu1 %vm8585_vm0, %v8584_v0  ;;  %7491 = vmatpush3.bf16.msra.mxu1 %v7984_v42 }
0x1818   : > { %7492 = vmatprep.subr.bf16.mxu1 %v8584_v0 }
0x181b   : > { %7493 = vmatpush3.bf16.msra.mxu1 %v7985_v43 }
0x181c   : > { %7504 = vmatprep.subr.bf16.mxu1 %v8584_v0 }
0x1842   : > { %v3275_v16 = vpop.xlane.xlu1 %3274 }
0x1843   : > { %v3276_v57 = vmul.f32 0.03125, %v3275_v16 }
0x1845   : > { %v3277_v27 = vsub.f32 %v3272_v24, %v3276_v57 }
0x1847   : > { %v3278_v40 = vmul.f32 %v3277_v27, %v3277_v27 }
0x1849   : > { %v3279_v41 = vsel %vm1584_vm2, %v3278_v40, 0.0 }
0x18e9   : > { %v3951_v33 = vpop.f32.mrb[68].mxu1 }
0x18ea   : > { %v3952_v34 = vadd.f32 %v6890_v32, %v3951_v33  ;;  %v7480_v35 = vpop.f32.mrb[69].mxu1 }
0x18eb   : > { %v3954_v36 = vpop.f32.mrb[70].mxu1 }
0x18ec   : > { %v7481_v37 = vpop.f32.mrb[71].mxu1  ;;  %v3957_v38 = vadd.f32 %v3952_v34, %v9353_v19 }
0x18ee   : > { %v3958_v39 = vsel %vm1584_vm2, %v3957_v38, 0.0 }
0x18ef   : > { %3959 = vadd.xlane.f32.xlu0 %v3958_v39 }
0x18f3   : > { %3280 = vadd.xlane.f32.xlu0 %v3279_v41 }
0x197c   : > { %v3960_v44 = vpop.xlane.xlu0 %3959 }
0x197d   : > { %v3961_v46 = vmul.f32 0.03125, %v3960_v44 }
0x197f   : > { %v3962_v19 = vsub.f32 %v3957_v38, %v3961_v46 }
0x1980   : > { %v3281_v47 = vpop.xlane.xlu0 %3280 }
0x1981   : > { %v3282_v48 = vmul.f32 0.03125, %v3281_v47  ;;  %v3963_v49 = vmul.f32 %v3962_v19, %v3962_v19 }
0x1983   : > { %v3283_v50 = vadd.f32 1e-05, %v3282_v48  ;;  %v3964_v51 = vsel %vm1584_vm2, %v3963_v49, 0.0 }
0x1984   : > { %3965 = vadd.xlane.f32.xlu1 %v3964_v51 }
0x1985   : > { %8070 = vrsqrt.f32 %v3283_v50 }
0x198f   : > { %v8071_v52 = vpop.eup %8070 }
0x1990   : > { %v3285_v54 = vmul.f32 %v8071_v52, %v3277_v27 }
0x1992   : > { %v3292_v55 = vmul.f32 %v6872_v53, %v3285_v54 }
0x1994   : > { %v3299_v56 = vadd.f32 %v6873_v45, %v3292_v55 }
0x1996   : > { %v9478_v58 = vpack.c.bf16 %v3299_v56, %v3299_v56 }
0x1998   : > { %7495 = vmatmul.mubr.msk.bf16.vlgmr.msra.gmra.mrb[72].mxu1 %vm1584_vm2, %v9478_v58 }
0x1999   : > { %7506 = vmatprep.mubr.msk.bf16.mxu1 %vm8585_vm0, %v8584_v0 }
0x1a11   : > { %v3966_v61 = vpop.xlane.xlu1 %3965 }
0x1a12   : > { %v3967_v62 = vmul.f32 0.03125, %v3966_v61 }
0x1a14   : > { %v3968_v1 = vadd.f32 1e-05, %v3967_v62 }
0x1a16   : > { %8072 = vrsqrt.f32 %v3968_v1 }
0x1a20   : > { %v8073_v2 = vpop.eup %8072 }
0x1a21   : > { %v3970_v4 = vmul.f32 %v8073_v2, %v3962_v19 }
0x1a23   : > { %v3977_v63 = vmul.f32 %v6894_v3, %v3970_v4 }
0x1a25   : > { %v9488_v6 = vadd.f32 %v6895_v5, %v3977_v63 }
0x1a27   : > { %v4002_v7 = vpack.c.bf16 %v9488_v6, %v9488_v6 }
0x1a29   : > { %7487 = vmatmul.mubr.msk.bf16.vlgmr.msra.gmra.mrb[80].mxu0 %vm1584_vm2, %v4002_v7 }
0x1a2a   : > { %7500 = vmatprep.mubr.msk.bf16.mxu0 %vm8585_vm0, %v8584_v0 }
0x1a6b   : > { %v4120_v9 = vpop.f32.mrb[72].mxu1 }
0x1a6c   : > { %v4121_v10 = vadd.f32 %v6900_v8, %v4120_v9  ;;  %v7496_v11 = vpop.f32.mrb[73].mxu1 }
0x1a6d   : > { %v4123_v12 = vpop.f32.mrb[74].mxu1 }
0x1a6e   : > { %v9495_v13 = vpack.c.bf16 %v4121_v10, %v4121_v10  ;;  %v7497_v15 = vpop.f32.mrb[75].mxu1 }
0x1a70   : > { %4239 = vrot.lane.b32.xlu0 %v9495_v13, %s10042_s26  ;;  %v4132_v18 = vsel %vm1688_vm3, %v9495_v13, 0 }
0x1a71   : > { %7499 = vmatpush3.bf16.xpose.msra.mxu0 %v4132_v18 }
0x1a72   : > { %7510 = vmatprep.subr.bf16.mxu0 %v8584_v0 }
0x1ae2   : > { %v4240_v23 = vpop.permute.xlu0 %4239 }
0x1ae3   : > { %v4245_v26 = vsel %vm1688_vm3, %v4240_v23, 0 }
0x1afc   : > { %v4058_v14 = vpop.f32.mrb[80].mxu0 }
0x1afd   : > { %v4059_v20 = vadd.f32 %v6896_v17, %v4058_v14  ;;  %v7488_v21 = vpop.f32.mrb[81].mxu0 }
0x1afe   : > { %v4061_v22 = vpop.f32.mrb[82].mxu0 }
0x1aff   : > { %v4126_v24 = vpack.c.bf16 %v4059_v20, %v4059_v20  ;;  %v7489_v25 = vpop.f32.mrb[83].mxu0 }
0x1b01   : > { %4352 = vrot.lane.b32.xlu0 %v4126_v24, %s10043_s28  ;;  %4237 = vrot.lane.b32.xlu1 %v4126_v24, %s10042_s26 }
0x1b02   : > { %7501 = vmatmul.mubr.msk.bf16.vlgmr.msra.gmra.mrb[84].mxu0 %vm1688_vm3, %v4126_v24 }
0x1b03   : > { %7511 = vmatpush3.bf16.xpose.msra.mxu0 %v4245_v26  ;;  %7512 = vmatprep.mubr.msk.bf16.mxu0 %vm8585_vm0, %v8584_v0 }
0x1b04   : > { %7522 = vmatprep.subr.bf16.mxu0 %v8584_v0 }
0x1b05   : > { %4467 = vrot.lane.b32.xlu0 %v4126_v24, %s10044_s22  ;;  %4354 = vrot.lane.b32.xlu1 %v9495_v13, %s10043_s28 }
0x1b09   : > { %4469 = vrot.lane.b32.xlu1 %v9495_v13, %s10044_s22 }
0x1b73   : > { %v4238_v28 = vpop.permute.xlu1 %4237  ;;  %v4353_v16 = vpop.permute.xlu0 %4352 }
0x1b74   : > { %7513 = vmatmul.mubr.msk.bf16.vlgmr.msra.gmra.mrb[88].mxu0 %vm1688_vm3, %v4238_v28 }
0x1b75   : > { %7524 = vmatprep.mubr.msk.bf16.mxu0 %vm8585_vm0, %v8584_v0 }
0x1b77   : > { %v4355_v29 = vpop.permute.xlu1 %4354  ;;  %v4468_v32 = vpop.permute.xlu0 %4467 }
0x1b78   : > { %v4360_v30 = vsel %vm1688_vm3, %v4355_v29, 0 }
0x1b79   : > { %7523 = vmatpush3.bf16.xpose.msra.mxu0 %v4360_v30 }
0x1b7a   : > { %7534 = vmatprep.subr.bf16.mxu0 %v8584_v0 }
0x1b7b   : > { %v4470_v31 = vpop.permute.xlu1 %4469 }
0x1b7c   : > { %v4475_v57 = vsel %vm1688_vm3, %v4470_v31, 0 }
0x1b80   : > { %7525 = vmatmul.mubr.msk.bf16.vlgmr.msra.gmra.mrb[92].mxu0 %vm1688_vm3, %v4353_v16 }
0x1b81   : > { %7535 = vmatpush3.bf16.xpose.msra.mxu0 %v4475_v57  ;;  %7536 = vmatprep.mubr.msk.bf16.mxu0 %vm8585_vm0, %v8584_v0 }
0x1b82   : > { %7546 = vmatprep.subr.bf16.mxu0 %v8584_v0 }
0x1b88   : > { %7537 = vmatmul.mubr.msk.bf16.vlgmr.msra.gmra.mrb[96].mxu0 %vm1688_vm3, %v4468_v32 }
0x1b89   : > { %7550 = vmatprep.mubr.msk.bf16.mxu0 %vm8585_vm0, %v8584_v0 }
0x1bd5   : > { %v4168_v33 = vpop.f32.mrb[84].mxu0 }
0x1bd6   : > { %v7502_v27 = vpop.f32.mrb[85].mxu0  ;;  %v4174_v34 = vsel %vm1688_vm3, %v4168_v33, -inf }
0x1bd7   : > { %4175 = vmax.xlane.f32.xlu1 %v4174_v34  ;;  %v4171_v35 = vpop.f32.mrb[86].mxu0 }
0x1bd8   : > { %v7503_v36 = vpop.f32.mrb[87].mxu0 }
0x1c47   : > { %v4281_v37 = vpop.f32.mrb[88].mxu0 }
0x1c48   : > { %v7514_v38 = vpop.f32.mrb[89].mxu0  ;;  %v4287_v39 = vsel %vm1688_vm3, %v4281_v37, -inf }
0x1c49   : > { %4288 = vmax.xlane.f32.xlu0 %v4287_v39  ;;  %v4284_v40 = vpop.f32.mrb[90].mxu0 }
0x1c4a   : > { %v7515_v41 = vpop.f32.mrb[91].mxu0 }
0x1c53   : > { %v4396_v42 = vpop.f32.mrb[92].mxu0 }
0x1c54   : > { %v7526_v43 = vpop.f32.mrb[93].mxu0  ;;  %v4402_v44 = vsel %vm1688_vm3, %v4396_v42, -inf }
0x1c55   : > { %4403 = vmax.xlane.f32.xlu0 %v4402_v44  ;;  %v4399_v46 = vpop.f32.mrb[94].mxu0  ;;  %v7988_v43 = vld [vmem:[%s10061_s6] sm:$0xff]   ;;  %v7989_v44 = vld [vmem:[%s10061_s6 + $0x8] sm:$0xff]  }
0x1c56   : > { %v7527_v19 = vpop.f32.mrb[95].mxu0  ;;  %7547 = vmatpush3.bf16.msra.mxu0 %v7988_v43 }
0x1c57   : > { %7548 = vmatprep.subr.bf16.mxu0 %v8584_v0 }
0x1c5a   : > { %7549 = vmatpush3.bf16.msra.mxu0 %v7989_v44 }
0x1c5b   : > { %v4511_v47 = vpop.f32.mrb[96].mxu0  ;;  %7562 = vmatprep.subr.bf16.mxu0 %v8584_v0 }
0x1c5c   : > { %v7538_v48 = vpop.f32.mrb[97].mxu0  ;;  %v4517_v49 = vsel %vm1688_vm3, %v4511_v47, -inf }
0x1c5d   : > { %4518 = vmax.xlane.f32.xlu1 %v4517_v49  ;;  %v4514_v50 = vpop.f32.mrb[98].mxu0 }
0x1c5e   : > { %v7539_v51 = vpop.f32.mrb[99].mxu0 }
0x1c64   : > { %v4176_v52 = vpop.xlane.xlu1 %4175 }
0x1c65   : > { %v4177_v53 = vsub.f32 %v4168_v33, %v4176_v52 }
0x1c67   : > { %v4178_v54 = vmul.f32 1.442695, %v4177_v53 }
0x1c69   : > { %8074 = vpow2.f32 %v4178_v54 }
0x1c73   : > { %v8075_v45 = vpop.eup %8074 }
0x1c74   : > { %v4180_v55 = vsel %vm1688_vm3, %v8075_v45, 0.0 }
0x1c75   : > { %4181 = vadd.xlane.f32.xlu0 %v4180_v55 }
0x1cd6   : > { %v4289_v56 = vpop.xlane.xlu0 %4288 }
0x1cd7   : > { %v4290_v59 = vsub.f32 %v4281_v37, %v4289_v56 }
0x1cd9   : > { %v4291_v60 = vmul.f32 1.442695, %v4290_v59  ;;  %v6912_v59 = vld [vmem:[#allocation11] ss:$0 sm:$0xff] }
0x1cdb   : > { %8076 = vpow2.f32 %v4291_v60 }
0x1ce2   : > { %v4404_v61 = vpop.xlane.xlu0 %4403 }
0x1ce3   : > { %v4405_v62 = vsub.f32 %v4396_v42, %v4404_v61 }
0x1ce5   : > { %v8077_v1 = vpop.eup %8076  ;;  %v4406_v2 = vmul.f32 1.442695, %v4405_v62 }
0x1ce6   : > { %v4293_v3 = vsel %vm1688_vm3, %v8077_v1, 0.0 }
0x1ce7   : > { %8078 = vpow2.f32 %v4406_v2  ;;  %4294 = vadd.xlane.f32.xlu1 %v4293_v3 }
0x1cea   : > { %v4519_v63 = vpop.xlane.xlu1 %4518 }
0x1ceb   : > { %v4520_v7 = vsub.f32 %v4511_v47, %v4519_v63 }
0x1ced   : > { %v4521_v8 = vmul.f32 1.442695, %v4520_v7 }
0x1cef   : > { %8080 = vpow2.f32 %v4521_v8 }
0x1cf1   : > { %v8079_v4 = vpop.eup %8078 }
0x1cf2   : > { %v4408_v5 = vsel %vm1688_vm3, %v8079_v4, 0.0 }
0x1cf3   : > { %4409 = vadd.xlane.f32.xlu0 %v4408_v5 }
0x1cf8   : > { %4299 = vrot.lane.b32.xlu1 %v9495_v13, %s10045_s3 }
0x1cf9   : > { %v8081_v9 = vpop.eup %8080 }
0x1cfa   : > { %v4523_v10 = vsel %vm1688_vm3, %v8081_v9, 0.0 }
0x1d02   : > { %v4182_v11 = vpop.xlane.xlu0 %4181 }
0x1d03   : > { %8082 = vrcp.f32 %v4182_v11  ;;  %v7991_v11 = vld [vmem:[%s10062_s8 + $0x8] sm:$0xff]  }
0x1d09   : > { %4187 = vrot.lane.b32.xlu0 %v9495_v13, %s10046_s7 }
0x1d0d   : > { %4529 = vrot.lane.b32.xlu0 %v9495_v13, %s10047_s12  ;;  %v8083_v15 = vpop.eup %8082 }
0x1d0e   : > { %v4184_v17 = vmul.f32 %v8083_v15, %v8075_v45 }
0x1d10   : > { %v4185_v22 = vpack.c.bf16 %v4184_v17, %v4184_v17 }
0x1d1c   : > { %4524 = vadd.xlane.f32.xlu1 %v4523_v10  ;;  %v7990_v10 = vld [vmem:[%s10062_s8] sm:$0xff]  }
0x1d2d   : > { %4414 = vrot.lane.b32.xlu1 %v9495_v13, %s10048_s16 }
0x1d74   : > { %v4295_v12 = vpop.xlane.xlu1 %4294 }
0x1d75   : > { %8084 = vrcp.f32 %v4295_v12  ;;  %v7992_v12 = vld [vmem:[%s10063_s18] sm:$0xff]  }
0x1d78   : > { %v4300_v21 = vpop.permute.xlu1 %4299 }
0x1d79   : > { %v4305_v24 = vsel %vm1753_vm4, %v4300_v21, 0 }
0x1d7f   : > { %v8085_v23 = vpop.eup %8084 }
0x1d80   : > { %v4410_v18 = vpop.xlane.xlu0 %4409  ;;  %v4297_v13 = vmul.f32 %v8085_v23, %v8077_v1 }
0x1d81   : > { %8086 = vrcp.f32 %v4410_v18 }
0x1d82   : > { %v4298_v25 = vpack.c.bf16 %v4297_v13, %v4297_v13 }
0x1d84   : > { %v4188_v14 = vpop.permute.xlu0 %4187 }
0x1d85   : > { %v4193_v20 = vsel %vm1753_vm4, %v4188_v14, 0 }
0x1d86   : > { %7505 = vmatpush3.bf16.msra.mxu1 %v4193_v20  ;;  %v6916_v20 = vld [vmem:[#allocation12] ss:$0 sm:$0xff] }
0x1d87   : > { %7516 = vmatprep.subr.bf16.mxu1 %v8584_v0 }
0x1d88   : > { %v4530_v16 = vpop.permute.xlu0 %4529 }
0x1d89   : > { %7507 = vmatmul.mubr.msk.bf16.vlgmr.msra.gmra.mrb[76].mxu1 %vm1688_vm3, %v4185_v22  ;;  %v4535_v32 = vsel %vm1753_vm4, %v4530_v16, 0  ;;  %v6917_v22 = vld [vmem:[#allocation14] ss:$0 sm:$0xff] }
0x1d8a   : > { %7517 = vmatpush3.bf16.msra.mxu1 %v4305_v24  ;;  %7518 = vmatprep.mubr.msk.bf16.mxu1 %vm8585_vm0, %v8584_v0 }
0x1d8b   : > { %7528 = vmatprep.subr.bf16.mxu1 %v8584_v0  ;;  %v8087_v26 = vpop.eup %8086 }
0x1d8c   : > { %v4412_v29 = vmul.f32 %v8087_v26, %v8079_v4  ;;  %v7995_v26 = vld [vmem:[%s10063_s18 + $0x18] sm:$0xff]  }
0x1d8e   : > { %v4413_v57 = vpack.c.bf16 %v4412_v29, %v4412_v29 }
0x1d91   : > { %7519 = vmatmul.mubr.msk.bf16.vlgmr.msra.gmra.mrb[80].mxu1 %vm1688_vm3, %v4298_v25  ;;  %v7994_v25 = vld [vmem:[%s10063_s18 + $0x10] sm:$0xff]  }
0x1d92   : > { %7530 = vmatprep.mubr.msk.bf16.mxu1 %vm8585_vm0, %v8584_v0 }
0x1da9   : > { %v4525_v28 = vpop.xlane.xlu1 %4524 }
0x1daa   : > { %8088 = vrcp.f32 %v4525_v28  ;;  %v6918_v28 = vld [vmem:[#allocation15] ss:$0 sm:$0xff] }
0x1dad   : > { %v4415_v30 = vpop.permute.xlu1 %4414 }
0x1dae   : > { %v4420_v31 = vsel %vm1753_vm4, %v4415_v30, 0 }
0x1daf   : > { %7529 = vmatpush3.bf16.msra.mxu1 %v4420_v31 }
0x1db0   : > { %7540 = vmatprep.subr.bf16.mxu1 %v8584_v0 }
0x1db2   : > { %7531 = vmatmul.mubr.msk.bf16.vlgmr.msra.gmra.mrb[84].mxu1 %vm1688_vm3, %v4413_v57 }
0x1db3   : > { %7541 = vmatpush3.bf16.msra.mxu1 %v4535_v32  ;;  %7542 = vmatprep.mubr.msk.bf16.mxu1 %vm8585_vm0, %v8584_v0 }
0x1db4   : > { %v8089_v33 = vpop.eup %8088  ;;  %7554 = vmatprep.subr.bf16.mxu1 %v8584_v0 }
0x1db5   : > { %v4527_v27 = vmul.f32 %v8089_v33, %v8081_v9 }
0x1db7   : > { %v4528_v34 = vpack.c.bf16 %v4527_v27, %v4527_v27  ;;  %v6922_v27 = vld [vmem:[#allocation17] ss:$0 sm:$0xff] }
0x1dba   : > { %7543 = vmatmul.mubr.msk.bf16.vlgmr.msra.gmra.mrb[88].mxu1 %vm1688_vm3, %v4528_v34 }
0x1dbb   : > { %7558 = vmatprep.mubr.msk.bf16.mxu1 %vm8585_vm0, %v8584_v0  ;;  %7555 = vmatpush3.bf16.msra.mxu1 %v7990_v10 }
0x1dbc   : > { %7556 = vmatprep.subr.bf16.mxu1 %v8584_v0 }
0x1dbf   : > { %7557 = vmatpush3.bf16.msra.mxu1 %v7991_v11 }
0x1dc0   : > { %7574 = vmatprep.subr.bf16.mxu1 %v8584_v0 }
0x1e5c   : > { %v4229_v35 = vpop.f32.mrb[76].mxu1 }
0x1e5d   : > { %4235 = vst.msk [vmem:[#allocation2] sm:$0xff] %vm1688_vm3, %v4229_v35  ;;  %v7508_v36 = vpop.f32.mrb[77].mxu1 }
0x1e5e   : > { %v4232_v37 = vpop.f32.mrb[78].mxu1 }
0x1e5f   : > { %v7509_v38 = vpop.f32.mrb[79].mxu1 }
0x1e64   : > { %v4341_v39 = vpop.f32.mrb[80].mxu1 }
0x1e65   : > { %4348 = vrot.lane.b32.xlu1 %v4341_v39, %s10049_s17  ;;  %v7520_v40 = vpop.f32.mrb[81].mxu1 }
0x1e66   : > { %v4344_v41 = vpop.f32.mrb[82].mxu1 }
0x1e67   : > { %v7521_v42 = vpop.f32.mrb[83].mxu1 }
0x1e85   : > { %v4456_v46 = vpop.f32.mrb[84].mxu1 }
0x1e86   : > { %4463 = vrot.lane.b32.xlu0 %v4456_v46, %s10050_s19  ;;  %v7532_v19 = vpop.f32.mrb[85].mxu1 }
0x1e87   : > { %v4459_v47 = vpop.f32.mrb[86].mxu1  ;;  %v7996_v19 = vld [vmem:[%s10052_s11 + $0x10] sm:$0xff]  }
0x1e88   : > { %v7533_v48 = vpop.f32.mrb[87].mxu1  ;;  %v7997_v47 = vld [vmem:[%s10052_s11 + $0x18] sm:$0xff]  }
0x1e8d   : > { %v4571_v49 = vpop.f32.mrb[88].mxu1 }
0x1e8e   : > { %4578 = vrot.lane.b32.xlu1 %v4571_v49, %s10051_s20  ;;  %v7544_v50 = vpop.f32.mrb[89].mxu1 }
0x1e8f   : > { %v4574_v51 = vpop.f32.mrb[90].mxu1 }
0x1e90   : > { %v7545_v52 = vpop.f32.mrb[91].mxu1 }
0x1e91   : > { %v6928_v52 = vld [vmem:[#allocation18] ss:$0 sm:$0xff] }
0x1ed7   : > { %v4349_v53 = vpop.permute.xlu1 %4348 }
0x1ed8   : > { %4351 = vst.msk [vmem:[#allocation2] sm:$0xff] %vm1913_vm5, %v4349_v53 }
0x1ef8   : > { %v4464_v54 = vpop.permute.xlu0 %4463 }
0x1ef9   : > { %4466 = vst.msk [vmem:[#allocation2] sm:$0xff] %vm2029_vm6, %v4464_v54  ;;  %v6929_v54 = vld [vmem:[#allocation20] ss:$0 sm:$0xff] }
0x1f00   : > { %v4579_v45 = vpop.permute.xlu1 %4578 }
0x1f01   : > { %4581 = vst.msk [vmem:[#allocation2] sm:$0xff] %vm2145_vm7, %v4579_v45 }
0x1f08   : > { %v4582_v55 = vld [vmem:[#allocation2] sm:$0xff] }
0x1f09   : > { %v4583_v56 = vpack.c.bf16 %v4582_v55, %v4582_v55 }
0x1f0b   : > { %7551 = vmatmul.mubr.msk.bf16.vlgmr.msra.gmra.mrb[100].mxu0 %vm1584_vm2, %v4583_v56  ;;  %v7998_v56 = vld [vmem:[%s10054_s1 + $0x10] sm:$0xff]  }
0x1f0c   : > { %7570 = vmatprep.mubr.msk.bf16.mxu0 %vm8585_vm0, %v8584_v0  ;;  %7563 = vmatpush3.bf16.msra.mxu0 %v7992_v12 }
0x1f0d   : > { %7564 = vmatprep.subr.bf16.mxu0 %v8584_v0 }
0x1fde   : > { %v4639_v60 = vpop.f32.mrb[100].mxu0 }
0x1fdf   : > { %v4640_v61 = vadd.f32 %v6912_v59, %v4639_v60  ;;  %v7552_v62 = vpop.f32.mrb[101].mxu0  ;;  %v7999_v60 = vld [vmem:[%s10054_s1 + $0x18] sm:$0xff]  }
0x1fe0   : > { %v4642_v1 = vpop.f32.mrb[102].mxu0 }
0x1fe1   : > { %v7553_v2 = vpop.f32.mrb[103].mxu0  ;;  %v4645_v3 = vadd.f32 %v4640_v61, %v9488_v6  ;;  %v7993_v6 = vld [vmem:[%s10063_s18 + $0x8] sm:$0xff]   ;;  %v6945_v61 = vld [vmem:[%s10055_s25 + $0x1] ss:$0 sm:$0xff] }
0x1fe2   : > { %7565 = vmatpush3.bf16.msra.mxu0 %v7993_v6 }
0x1fe3   : > { %v4646_v4 = vsel %vm1584_vm2, %v4645_v3, 0.0  ;;  %7566 = vmatprep.subr.bf16.mxu0 %v8584_v0 }
0x1fe4   : > { %4647 = vadd.xlane.f32.xlu0 %v4646_v4 }
0x1fe6   : > { %7567 = vmatpush3.bf16.msra.mxu0 %v7994_v25 }
0x1fe7   : > { %7568 = vmatprep.subr.bf16.mxu0 %v8584_v0 }
0x1fea   : > { %7569 = vmatpush3.bf16.msra.mxu0 %v7995_v26 }
0x1feb   : > { %7590 = vmatprep.subr.bf16.mxu0 %v8584_v0 }
0x2071   : > { %v4648_v5 = vpop.xlane.xlu0 %4647 }
0x2072   : > { %v4649_v63 = vmul.f32 0.03125, %v4648_v5 }
0x2074   : > { %v4650_v7 = vsub.f32 %v4645_v3, %v4649_v63  ;;  %v6949_v63 = vld [vmem:[%s10056_s10 + $0x1] ss:$0 sm:$0xff] }
0x2076   : > { %v4651_v8 = vmul.f32 %v4650_v7, %v4650_v7 }
0x2078   : > { %v4652_v9 = vsel %vm1584_vm2, %v4651_v8, 0.0 }
0x2079   : > { %4653 = vadd.xlane.f32.xlu1 %v4652_v9 }
0x2106   : > { %v4654_v15 = vpop.xlane.xlu1 %4653 }
0x2107   : > { %v4655_v18 = vmul.f32 0.03125, %v4654_v15 }
0x2109   : > { %v4656_v17 = vadd.f32 1e-05, %v4655_v18 }
0x210b   : > { %8090 = vrsqrt.f32 %v4656_v17 }
0x2115   : > { %v8091_v14 = vpop.eup %8090 }
0x2116   : > { %v4658_v21 = vmul.f32 %v8091_v14, %v4650_v7 }
0x2118   : > { %v4665_v23 = vmul.f32 %v6916_v20, %v4658_v21 }
0x211a   : > { %v4672_v24 = vadd.f32 %v6917_v22, %v4665_v23 }
0x211c   : > { %v4689_v13 = vpack.c.bf16 %v4672_v24, %v4672_v24 }
0x211e   : > { %7559 = vmatmul.mubr.msk.bf16.vlgmr.msra.gmra.mrb[92].mxu1 %vm1584_vm2, %v4689_v13 }
0x211f   : > { %7578 = vmatprep.mubr.msk.bf16.mxu1 %vm8585_vm0, %v8584_v0  ;;  %7575 = vmatpush3.bf16.msra.mxu1 %v7996_v19 }
0x2120   : > { %7576 = vmatprep.subr.bf16.mxu1 %v8584_v0 }
0x2123   : > { %7577 = vmatpush3.bf16.msra.mxu1 %v7997_v47 }
0x2124   : > { %7582 = vmatprep.subr.bf16.mxu1 %v8584_v0 }
0x21f1   : > { %v4745_v29 = vpop.f32.mrb[92].mxu1 }
0x21f2   : > { %v4746_v30 = vadd.f32 %v6918_v28, %v4745_v29  ;;  %v7560_v31 = vpop.f32.mrb[93].mxu1 }
0x21f3   : > { %v4748_v16 = vpop.f32.mrb[94].mxu1 }
0x21f4   : > { %v4751_v57 = vmax.f32 %v4746_v30, 0.0  ;;  %v7561_v32 = vpop.f32.mrb[95].mxu1 }
0x21f6   : > { %v4752_v33 = vpack.c.bf16 %v4751_v57, %v4751_v57 }
0x21f8   : > { %7571 = vmatmul.mubr.msk.bf16.vlgmr.msra.gmra.mrb[104].mxu0 %vm2349_vm8, %v4752_v33 }
0x21f9   : > { %7592 = vmatprep.mubr.msk.bf16.mxu0 %vm8585_vm0, %v8584_v0 }
0x22cb   : > { %v4820_v34 = vpop.f32.mrb[104].mxu0 }
0x22cc   : > { %v4821_v35 = vadd.f32 %v6922_v27, %v4820_v34  ;;  %v7572_v36 = vpop.f32.mrb[105].mxu0 }
0x22cd   : > { %v4823_v37 = vpop.f32.mrb[106].mxu0 }
0x22ce   : > { %v7573_v38 = vpop.f32.mrb[107].mxu0  ;;  %v4826_v39 = vadd.f32 %v4821_v35, %v4672_v24 }
0x22d0   : > { %v4827_v40 = vsel %vm1584_vm2, %v4826_v39, 0.0 }
0x22d1   : > { %4828 = vadd.xlane.f32.xlu0 %v4827_v40 }
0x235e   : > { %v4829_v41 = vpop.xlane.xlu0 %4828 }
0x235f   : > { %v4830_v42 = vmul.f32 0.03125, %v4829_v41 }
0x2361   : > { %v4831_v43 = vsub.f32 %v4826_v39, %v4830_v42 }
0x2363   : > { %v4832_v44 = vmul.f32 %v4831_v43, %v4831_v43 }
0x2365   : > { %v4833_v46 = vsel %vm1584_vm2, %v4832_v44, 0.0 }
0x2366   : > { %4834 = vadd.xlane.f32.xlu0 %v4833_v46 }
0x23f3   : > { %v4835_v48 = vpop.xlane.xlu0 %4834 }
0x23f4   : > { %v4836_v49 = vmul.f32 0.03125, %v4835_v48 }
0x23f6   : > { %v4837_v50 = vadd.f32 1e-05, %v4836_v49 }
0x23f8   : > { %8092 = vrsqrt.f32 %v4837_v50 }
0x2402   : > { %v8093_v51 = vpop.eup %8092 }
0x2403   : > { %v4839_v53 = vmul.f32 %v8093_v51, %v4831_v43 }
0x2405   : > { %v4846_v45 = vmul.f32 %v6928_v52, %v4839_v53 }
0x2407   : > { %v9604_v55 = vadd.f32 %v6929_v54, %v4846_v45 }
0x2409   : > { %v4879_v59 = vpack.c.bf16 %v9604_v55, %v9604_v55 }
0x240b   : > { %7579 = vmatmul.mubr.msk.bf16.vlgmr.msra.gmra.mrb[96].mxu1 %vm1584_vm2, %v4879_v59 }
0x240c   : > { %7583 = vmatpush3.bf16.msra.mxu1 %v7998_v56  ;;  %7586 = vmatprep.mubr.msk.bf16.mxu1 %vm8585_vm0, %v8584_v0 }
0x240d   : > { %7584 = vmatprep.subr.bf16.mxu1 %v8584_v0 }
0x2410   : > { %7585 = vmatpush3.bf16.msra.mxu1 %v7999_v60 }
0x2411   : > { %7596 = vmatprep.subr.bf16.mxu1 %v8584_v0 }
0x2413   : > { %7587 = vmatmul.mubr.msk.bf16.vlgmr.msra.gmra.mrb[100].mxu1 %vm1584_vm2, %v4879_v59 }
0x2414   : > { %7598 = vmatprep.mubr.msk.bf16.mxu1 %vm8585_vm0, %v8584_v0 }
0x24de   : > { %v4935_v62 = vpop.f32.mrb[96].mxu1 }
0x24df   : > { %v4936_v1 = vadd.f32 %v6945_v61, %v4935_v62  ;;  %v7580_v2 = vpop.f32.mrb[97].mxu1 }
0x24e0   : > { %v4938_v3 = vpop.f32.mrb[98].mxu1 }
0x24e1   : > { %v4999_v4 = vpack.c.bf16 %v4936_v1, %v4936_v1  ;;  %v7581_v5 = vpop.f32.mrb[99].mxu1 }
0x24e3   : > { %5110 = vrot.lane.b32.xlu0 %v4999_v4, %s10042_s26 }
0x24e6   : > { %v4993_v7 = vpop.f32.mrb[100].mxu1 }
0x24e7   : > { %v4994_v8 = vadd.f32 %v6949_v63, %v4993_v7  ;;  %v7588_v9 = vpop.f32.mrb[101].mxu1 }
0x24e8   : > { %v4996_v10 = vpop.f32.mrb[102].mxu1 }
0x24e9   : > { %v9621_v11 = vpack.c.bf16 %v4994_v8, %v4994_v8  ;;  %v7589_v12 = vpop.f32.mrb[103].mxu1 }
0x24eb   : > { %5342 = vrot.lane.b32.xlu0 %v9621_v11, %s10044_s22  ;;  %5112 = vrot.lane.b32.xlu1 %v9621_v11, %s10042_s26  ;;  %v5005_v6 = vsel %vm1688_vm3, %v9621_v11, 0 }
0x24ec   : > { %7591 = vmatpush3.bf16.xpose.msra.mxu0 %v5005_v6 }
0x24ed   : > { %7602 = vmatprep.subr.bf16.mxu0 %v8584_v0 }
0x24ef   : > { %5227 = vrot.lane.b32.xlu1 %v9621_v11, %s10043_s28 }
0x24f3   : > { %5225 = vrot.lane.b32.xlu1 %v4999_v4, %s10043_s28  ;;  %7593 = vmatmul.mubr.msk.bf16.vlgmr.msra.gmra.mrb[108].mxu0 %vm1688_vm3, %v4999_v4 }
0x24f4   : > { %7604 = vmatprep.mubr.msk.bf16.mxu0 %vm8585_vm0, %v8584_v0 }
0x24f7   : > { %5340 = vrot.lane.b32.xlu1 %v4999_v4, %s10044_s22 }
0x2555   : > { %v5111_v14 = vpop.permute.xlu0 %5110 }
0x255d   : > { %v5113_v15 = vpop.permute.xlu1 %5112  ;;  %v5343_v21 = vpop.permute.xlu0 %5342 }
0x255e   : > { %v5118_v18 = vsel %vm1688_vm3, %v5113_v15, 0  ;;  %v5348_v23 = vsel %vm1688_vm3, %v5343_v21, 0 }
0x255f   : > { %7603 = vmatpush3.bf16.xpose.msra.mxu0 %v5118_v18 }
0x2560   : > { %7614 = vmatprep.subr.bf16.mxu0 %v8584_v0 }
0x2561   : > { %v5228_v17 = vpop.permute.xlu1 %5227 }
0x2562   : > { %v5233_v20 = vsel %vm1688_vm3, %v5228_v17, 0 }
0x2565   : > { %v5226_v22 = vpop.permute.xlu1 %5225 }
0x2566   : > { %7605 = vmatmul.mubr.msk.bf16.vlgmr.msra.gmra.mrb[112].mxu0 %vm1688_vm3, %v5111_v14 }
0x2567   : > { %7615 = vmatpush3.bf16.xpose.msra.mxu0 %v5233_v20  ;;  %7616 = vmatprep.mubr.msk.bf16.mxu0 %vm8585_vm0, %v8584_v0 }
0x2568   : > { %7626 = vmatprep.subr.bf16.mxu0 %v8584_v0 }
0x2569   : > { %v5341_v24 = vpop.permute.xlu1 %5340 }
0x256e   : > { %7617 = vmatmul.mubr.msk.bf16.vlgmr.msra.gmra.mrb[116].mxu0 %vm1688_vm3, %v5226_v22 }
0x256f   : > { %7627 = vmatpush3.bf16.xpose.msra.mxu0 %v5348_v23  ;;  %7628 = vmatprep.mubr.msk.bf16.mxu0 %vm8585_vm0, %v8584_v0 }
0x2570   : > { %7638 = vmatprep.subr.bf16.mxu0 %v8584_v0 }
0x2576   : > { %7629 = vmatmul.mubr.msk.bf16.vlgmr.msra.gmra.mrb[120].mxu0 %vm1688_vm3, %v5341_v24 }
0x2577   : > { %7642 = vmatprep.mubr.msk.bf16.mxu0 %vm8585_vm0, %v8584_v0 }
0x25c6   : > { %v5041_v13 = vpop.f32.mrb[108].mxu0 }
0x25c7   : > { %v7594_v25 = vpop.f32.mrb[109].mxu0  ;;  %v5047_v26 = vsel %vm1688_vm3, %v5041_v13, -inf }
0x25c8   : > { %5048 = vmax.xlane.f32.xlu0 %v5047_v26  ;;  %v5044_v28 = vpop.f32.mrb[110].mxu0 }
0x25c9   : > { %v7595_v29 = vpop.f32.mrb[111].mxu0 }
0x2639   : > { %v5154_v30 = vpop.f32.mrb[112].mxu0 }
0x263a   : > { %v7606_v31 = vpop.f32.mrb[113].mxu0  ;;  %v5160_v16 = vsel %vm1688_vm3, %v5154_v30, -inf }
0x263b   : > { %5161 = vmax.xlane.f32.xlu1 %v5160_v16  ;;  %v5157_v57 = vpop.f32.mrb[114].mxu0 }
0x263c   : > { %v7607_v32 = vpop.f32.mrb[115].mxu0 }
0x2641   : > { %v5269_v33 = vpop.f32.mrb[116].mxu0 }
0x2642   : > { %v7618_v27 = vpop.f32.mrb[117].mxu0  ;;  %v5275_v34 = vsel %vm1688_vm3, %v5269_v33, -inf }
0x2643   : > { %5276 = vmax.xlane.f32.xlu0 %v5275_v34  ;;  %v5272_v35 = vpop.f32.mrb[118].mxu0  ;;  %v8000_v27 = vld [vmem:[%s10057_s13 + $0x10] sm:$0xff]   ;;  %v8001_v34 = vld [vmem:[%s10057_s13 + $0x18] sm:$0xff]  }
0x2644   : > { %v7619_v36 = vpop.f32.mrb[119].mxu0  ;;  %7639 = vmatpush3.bf16.msra.mxu0 %v8000_v27 }
0x2645   : > { %7640 = vmatprep.subr.bf16.mxu0 %v8584_v0 }
0x2648   : > { %7641 = vmatpush3.bf16.msra.mxu0 %v8001_v34 }
0x2649   : > { %v5384_v37 = vpop.f32.mrb[120].mxu0  ;;  %7654 = vmatprep.subr.bf16.mxu0 %v8584_v0 }
0x264a   : > { %v7630_v38 = vpop.f32.mrb[121].mxu0  ;;  %v5390_v39 = vsel %vm1688_vm3, %v5384_v37, -inf }
0x264b   : > { %5391 = vmax.xlane.f32.xlu0 %v5390_v39  ;;  %v5387_v40 = vpop.f32.mrb[122].mxu0 }
0x264c   : > { %v7631_v41 = vpop.f32.mrb[123].mxu0 }
0x2655   : > { %v5049_v42 = vpop.xlane.xlu0 %5048 }
0x2656   : > { %v5050_v43 = vsub.f32 %v5041_v13, %v5049_v42 }
0x2658   : > { %v5051_v44 = vmul.f32 1.442695, %v5050_v43 }
0x265a   : > { %8094 = vpow2.f32 %v5051_v44 }
0x2664   : > { %v8095_v46 = vpop.eup %8094 }
0x2665   : > { %v5053_v19 = vsel %vm1688_vm3, %v8095_v46, 0.0 }
0x2666   : > { %5054 = vadd.xlane.f32.xlu1 %v5053_v19 }
0x2677   : > { %5060 = vrot.lane.b32.xlu1 %v9621_v11, %s10046_s7 }
0x26c8   : > { %v5162_v47 = vpop.xlane.xlu1 %5161 }
0x26c9   : > { %v5163_v48 = vsub.f32 %v5154_v30, %v5162_v47  ;;  %v8002_v47 = vld [vmem:[%s10059_s4 + $0x10] sm:$0xff]  }
0x26cb   : > { %v5164_v49 = vmul.f32 1.442695, %v5163_v48 }
0x26cd   : > { %8096 = vpow2.f32 %v5164_v49  ;;  %v8003_v49 = vld [vmem:[%s10059_s4 + $0x18] sm:$0xff]  }
0x26d0   : > { %v5277_v50 = vpop.xlane.xlu0 %5276 }
0x26d1   : > { %v5278_v51 = vsub.f32 %v5269_v33, %v5277_v50  ;;  %v6961_v50 = vld [vmem:[%s10058_s2 + $0x1] ss:$0 sm:$0xff] }
0x26d3   : > { %v5279_v52 = vmul.f32 1.442695, %v5278_v51 }
0x26d5   : > { %8098 = vpow2.f32 %v5279_v52 }
0x26d7   : > { %v8097_v53 = vpop.eup %8096 }
0x26d8   : > { %v5392_v54 = vpop.xlane.xlu0 %5391  ;;  %v5166_v45 = vsel %vm1688_vm3, %v8097_v53, 0.0 }
0x26d9   : > { %v5393_v56 = vsub.f32 %v5384_v37, %v5392_v54  ;;  %5167 = vadd.xlane.f32.xlu0 %v5166_v45 }
0x26db   : > { %v5394_v59 = vmul.f32 1.442695, %v5393_v56 }
0x26dd   : > { %8100 = vpow2.f32 %v5394_v59 }
0x26df   : > { %v8099_v60 = vpop.eup %8098 }
0x26e0   : > { %v5281_v61 = vsel %vm1688_vm3, %v8099_v60, 0.0 }
0x26e1   : > { %5282 = vadd.xlane.f32.xlu1 %v5281_v61 }
0x26e7   : > { %v8101_v62 = vpop.eup %8100 }
0x26e8   : > { %v5396_v1 = vsel %vm1688_vm3, %v8101_v62, 0.0 }
0x26e9   : > { %5397 = vadd.xlane.f32.xlu0 %v5396_v1 }
0x26f2   : > { %5287 = vrot.lane.b32.xlu1 %v9621_v11, %s10048_s16 }
0x26f3   : > { %v5055_v2 = vpop.xlane.xlu1 %5054 }
0x26f4   : > { %8102 = vrcp.f32 %v5055_v2 }
0x26f6   : > { %5402 = vrot.lane.b32.xlu1 %v9621_v11, %s10047_s12 }
0x26f7   : > { %v5061_v3 = vpop.permute.xlu1 %5060 }
0x26f8   : > { %v5066_v4 = vsel %vm1753_vm4, %v5061_v3, 0 }
0x26f9   : > { %7597 = vmatpush3.bf16.msra.mxu1 %v5066_v4 }
0x26fa   : > { %7608 = vmatprep.subr.bf16.mxu1 %v8584_v0 }
0x26fe   : > { %v8103_v5 = vpop.eup %8102 }
0x26ff   : > { %v5057_v63 = vmul.f32 %v8103_v5, %v8095_v46  ;;  %5172 = vrot.lane.b32.xlu0 %v9621_v11, %s10045_s3 }
0x2701   : > { %v5058_v7 = vpack.c.bf16 %v5057_v63, %v5057_v63  ;;  %v6983_v63 = vld [vmem:[#allocation9 + $0x1] ss:$0 sm:$0xff] }
0x2703   : > { %7599 = vmatmul.mubr.msk.bf16.vlgmr.msra.gmra.mrb[104].mxu1 %vm1688_vm3, %v5058_v7 }
0x2704   : > { %7610 = vmatprep.mubr.msk.bf16.mxu1 %vm8585_vm0, %v8584_v0 }
0x2766   : > { %v5168_v8 = vpop.xlane.xlu0 %5167 }
0x2767   : > { %8104 = vrcp.f32 %v5168_v8  ;;  %v8004_v8 = vld [vmem:[%s10060_s5 + $0x10] sm:$0xff]  }
0x276e   : > { %v5283_v9 = vpop.xlane.xlu1 %5282 }
0x276f   : > { %8106 = vrcp.f32 %v5283_v9  ;;  %v8005_v9 = vld [vmem:[%s10060_s5 + $0x18] sm:$0xff]  }
0x2771   : > { %v8105_v10 = vpop.eup %8104 }
0x2772   : > { %v5170_v6 = vmul.f32 %v8105_v10, %v8097_v53  ;;  %v5288_v17 = vpop.permute.xlu1 %5287 }
0x2773   : > { %v5293_v20 = vsel %vm1753_vm4, %v5288_v17, 0 }
0x2774   : > { %v5171_v11 = vpack.c.bf16 %v5170_v6, %v5170_v6 }
0x2776   : > { %v5398_v12 = vpop.xlane.xlu0 %5397  ;;  %v5403_v22 = vpop.permute.xlu1 %5402 }
0x2777   : > { %8108 = vrcp.f32 %v5398_v12  ;;  %v5408_v13 = vsel %vm1753_vm4, %v5403_v22, 0 }
0x2779   : > { %v8107_v14 = vpop.eup %8106 }
0x277a   : > { %v5173_v15 = vpop.permute.xlu0 %5172  ;;  %v5285_v21 = vmul.f32 %v8107_v14, %v8099_v60 }
0x277b   : > { %v5178_v18 = vsel %vm1753_vm4, %v5173_v15, 0 }
0x277c   : > { %7609 = vmatpush3.bf16.msra.mxu1 %v5178_v18  ;;  %v5286_v23 = vpack.c.bf16 %v5285_v21, %v5285_v21  ;;  %v6965_v18 = vld [vmem:[#allocation3 + $0x1] ss:$0 sm:$0xff] }
0x277d   : > { %7620 = vmatprep.subr.bf16.mxu1 %v8584_v0 }
0x277f   : > { %7611 = vmatmul.mubr.msk.bf16.vlgmr.msra.gmra.mrb[108].mxu1 %vm1688_vm3, %v5171_v11  ;;  %v6966_v11 = vld [vmem:[#allocation6 + $0x1] ss:$0 sm:$0xff] }
0x2780   : > { %7621 = vmatpush3.bf16.msra.mxu1 %v5293_v20  ;;  %7622 = vmatprep.mubr.msk.bf16.mxu1 %vm8585_vm0, %v8584_v0 }
0x2781   : > { %7632 = vmatprep.subr.bf16.mxu1 %v8584_v0  ;;  %v8109_v24 = vpop.eup %8108 }
0x2782   : > { %v5400_v25 = vmul.f32 %v8109_v24, %v8101_v62 }
0x2784   : > { %v5401_v26 = vpack.c.bf16 %v5400_v25, %v5400_v25 }
0x2787   : > { %7623 = vmatmul.mubr.msk.bf16.vlgmr.msra.gmra.mrb[112].mxu1 %vm1688_vm3, %v5286_v23  ;;  %v6979_v23 = vld [vmem:[#allocation8 + $0x1] ss:$0 sm:$0xff] }
0x2788   : > { %7633 = vmatpush3.bf16.msra.mxu1 %v5408_v13  ;;  %7634 = vmatprep.mubr.msk.bf16.mxu1 %vm8585_vm0, %v8584_v0 }
0x2789   : > { %7646 = vmatprep.subr.bf16.mxu1 %v8584_v0 }
0x278f   : > { %7635 = vmatmul.mubr.msk.bf16.vlgmr.msra.gmra.mrb[116].mxu1 %vm1688_vm3, %v5401_v26 }
0x2790   : > { %7650 = vmatprep.mubr.msk.bf16.mxu1 %vm8585_vm0, %v8584_v0  ;;  %7647 = vmatpush3.bf16.msra.mxu1 %v8004_v8 }
0x2791   : > { %7648 = vmatprep.subr.bf16.mxu1 %v8584_v0 }
0x2794   : > { %7649 = vmatpush3.bf16.msra.mxu1 %v8005_v9 }
0x2795   : > { %7662 = vmatprep.subr.bf16.mxu1 %v8584_v0 }
0x27d6   : > { %v5102_v28 = vpop.f32.mrb[104].mxu1 }
0x27d7   : > { %5108 = vst.msk [vmem:[#allocation2] sm:$0xff] %vm1688_vm3, %v5102_v28  ;;  %v7600_v29 = vpop.f32.mrb[105].mxu1 }
0x27d8   : > { %v5105_v30 = vpop.f32.mrb[106].mxu1 }
0x27d9   : > { %v7601_v31 = vpop.f32.mrb[107].mxu1 }
0x2852   : > { %v5214_v16 = vpop.f32.mrb[108].mxu1 }
0x2853   : > { %5221 = vrot.lane.b32.xlu0 %v5214_v16, %s10049_s17  ;;  %v7612_v57 = vpop.f32.mrb[109].mxu1 }
0x2854   : > { %v5217_v32 = vpop.f32.mrb[110].mxu1 }
0x2855   : > { %v7613_v33 = vpop.f32.mrb[111].mxu1 }
0x285a   : > { %v5329_v35 = vpop.f32.mrb[112].mxu1 }
0x285b   : > { %5336 = vrot.lane.b32.xlu1 %v5329_v35, %s10050_s19  ;;  %v7624_v36 = vpop.f32.mrb[113].mxu1 }
0x285c   : > { %v5332_v37 = vpop.f32.mrb[114].mxu1 }
0x285d   : > { %v7625_v38 = vpop.f32.mrb[115].mxu1 }
0x2862   : > { %v5444_v39 = vpop.f32.mrb[116].mxu1 }
0x2863   : > { %5451 = vrot.lane.b32.xlu0 %v5444_v39, %s10051_s20  ;;  %v7636_v40 = vpop.f32.mrb[117].mxu1 }
0x2864   : > { %v5447_v41 = vpop.f32.mrb[118].mxu1 }
0x2865   : > { %v7637_v42 = vpop.f32.mrb[119].mxu1 }
0x28c5   : > { %v5222_v43 = vpop.permute.xlu0 %5221 }
0x28c6   : > { %5224 = vst.msk [vmem:[#allocation2] sm:$0xff] %vm1913_vm5, %v5222_v43 }
0x28cd   : > { %v5337_v44 = vpop.permute.xlu1 %5336 }
0x28ce   : > { %5339 = vst.msk [vmem:[#allocation2] sm:$0xff] %vm2029_vm6, %v5337_v44 }
0x28d5   : > { %v5452_v46 = vpop.permute.xlu0 %5451 }
0x28d6   : > { %5454 = vst.msk [vmem:[#allocation2] sm:$0xff] %vm2145_vm7, %v5452_v46 }
0x28dd   : > { %v5455_v19 = vld [vmem:[#allocation2] sm:$0xff] }
0x28de   : > { %v5456_v48 = vpack.c.bf16 %v5455_v19, %v5455_v19 }
0x28e0   : > { %7643 = vmatmul.mubr.msk.bf16.vlgmr.msra.gmra.mrb[124].mxu0 %vm1584_vm2, %v5456_v48 }
0x28e1   : > { %7655 = vmatpush3.bf16.msra.mxu0 %v8002_v47  ;;  %7658 = vmatprep.mubr.msk.bf16.mxu0 %vm8585_vm0, %v8584_v0 }
0x28e2   : > { %7656 = vmatprep.subr.bf16.mxu0 %v8584_v0 }
0x28e5   : > { %7657 = vmatpush3.bf16.msra.mxu0 %v8003_v49 }
0x28e6   : > { %7668 = vmatprep.subr.bf16.mxu0 %v8584_v0 }
0x28e8   : > { %7659 = vmatmul.mubr.msk.bf16.vlgmr.msra.gmra.mrb[128].mxu0 %vm1584_vm2, %v9478_v58 }
0x28e9   : > { %7670 = vmatprep.mubr.msk.bf16.mxu0 %vm8585_vm0, %v8584_v0 }
0x29b3   : > { %v5512_v51 = vpop.f32.mrb[124].mxu0 }
0x29b4   : > { %v5513_v52 = vadd.f32 %v6961_v50, %v5512_v51  ;;  %v7644_v53 = vpop.f32.mrb[125].mxu0 }
0x29b5   : > { %v5515_v54 = vpop.f32.mrb[126].mxu0 }
0x29b6   : > { %v5518_v45 = vadd.f32 %v5513_v52, %v9604_v55  ;;  %v7645_v56 = vpop.f32.mrb[127].mxu0 }
0x29b8   : > { %v5519_v59 = vsel %vm1584_vm2, %v5518_v45, 0.0 }
0x29b9   : > { %5520 = vadd.xlane.f32.xlu1 %v5519_v59 }
0x29bb   : > { %v5685_v60 = vpop.f32.mrb[128].mxu0 }
0x29bc   : > { %v7660_v61 = vpop.f32.mrb[129].mxu0  ;;  %v5686_v7 = vadd.f32 %v6983_v63, %v5685_v60 }
0x29bd   : > { %v5688_v62 = vpop.f32.mrb[130].mxu0 }
0x29be   : > { %v7661_v58 = vpop.f32.mrb[131].mxu0  ;;  %v9714_v55 = vpack.c.bf16 %v5686_v7, %v5686_v7 }
0x29c0   : > { %v5697_v22 = vsel %vm1688_vm3, %v9714_v55, 0 }
0x2a46   : > { %v5521_v1 = vpop.xlane.xlu1 %5520 }
0x2a47   : > { %v5522_v2 = vmul.f32 0.03125, %v5521_v1 }
0x2a49   : > { %v5523_v3 = vsub.f32 %v5518_v45, %v5522_v2 }
0x2a4b   : > { %v5524_v4 = vmul.f32 %v5523_v3, %v5523_v3 }
0x2a4d   : > { %v5525_v5 = vsel %vm1584_vm2, %v5524_v4, 0.0 }
0x2a4e   : > { %5526 = vadd.xlane.f32.xlu0 %v5525_v5 }
0x2a64   : > { %5804 = vrot.lane.b32.xlu0 %v9714_v55, %s10042_s26 }
0x2adb   : > { %v5527_v10 = vpop.xlane.xlu0 %5526 }
0x2adc   : > { %v5528_v12 = vmul.f32 0.03125, %v5527_v10 }
0x2ade   : > { %v5529_v6 = vadd.f32 1e-05, %v5528_v12 }
0x2adf   : > { %v5805_v28 = vpop.permute.xlu0 %5804 }
0x2ae0   : > { %8110 = vrsqrt.f32 %v5529_v6  ;;  %v5810_v31 = vsel %vm1688_vm3, %v5805_v28, 0 }
0x2aea   : > { %v8111_v15 = vpop.eup %8110 }
0x2aeb   : > { %v5531_v17 = vmul.f32 %v8111_v15, %v5523_v3 }
0x2aed   : > { %v5538_v14 = vmul.f32 %v6965_v18, %v5531_v17 }
0x2aef   : > { %v9722_v20 = vadd.f32 %v6966_v11, %v5538_v14 }
0x2af1   : > { %v5571_v21 = vpack.c.bf16 %v9722_v20, %v9722_v20 }
0x2af3   : > { %7651 = vmatmul.mubr.msk.bf16.vlgmr.msra.gmra.mrb[120].mxu1 %vm1584_vm2, %v5571_v21 }
0x2af4   : > { %7663 = vmatpush3.bf16.xpose.msra.mxu1 %v5697_v22  ;;  %7664 = vmatprep.mubr.msk.bf16.mxu1 %vm8585_vm0, %v8584_v0 }
0x2af5   : > { %7674 = vmatprep.subr.bf16.mxu1 %v8584_v0 }
0x2bc6   : > { %v5627_v24 = vpop.f32.mrb[120].mxu1 }
0x2bc7   : > { %v5628_v13 = vadd.f32 %v6979_v23, %v5627_v24  ;;  %v7652_v25 = vpop.f32.mrb[121].mxu1 }
0x2bc8   : > { %v5630_v26 = vpop.f32.mrb[122].mxu1 }
0x2bc9   : > { %v5691_v29 = vpack.c.bf16 %v5628_v13, %v5628_v13  ;;  %v7653_v30 = vpop.f32.mrb[123].mxu1 }
0x2bcb   : > { %5802 = vrot.lane.b32.xlu1 %v5691_v29, %s10042_s26  ;;  %5917 = vrot.lane.b32.xlu0 %v5691_v29, %s10043_s28 }
0x2bcc   : > { %7665 = vmatmul.mubr.msk.bf16.vlgmr.msra.gmra.mrb[124].mxu1 %vm1688_vm3, %v5691_v29 }
0x2bcd   : > { %7675 = vmatpush3.bf16.xpose.msra.mxu1 %v5810_v31  ;;  %7676 = vmatprep.mubr.msk.bf16.mxu1 %vm8585_vm0, %v8584_v0 }
0x2bce   : > { %7686 = vmatprep.subr.bf16.mxu1 %v8584_v0 }
0x2bcf   : > { %5919 = vrot.lane.b32.xlu1 %v9714_v55, %s10043_s28  ;;  %6032 = vrot.lane.b32.xlu0 %v5691_v29, %s10044_s22 }
0x2bd3   : > { %6034 = vrot.lane.b32.xlu1 %v9714_v55, %s10044_s22 }
0x2c3d   : > { %v5803_v16 = vpop.permute.xlu1 %5802  ;;  %v5918_v27 = vpop.permute.xlu0 %5917 }
0x2c3e   : > { %7677 = vmatmul.mubr.msk.bf16.vlgmr.msra.gmra.mrb[128].mxu1 %vm1688_vm3, %v5803_v16 }
0x2c3f   : > { %7688 = vmatprep.mubr.msk.bf16.mxu1 %vm8585_vm0, %v8584_v0 }
0x2c41   : > { %v5920_v57 = vpop.permute.xlu1 %5919  ;;  %v6033_v35 = vpop.permute.xlu0 %6032 }
0x2c42   : > { %v5925_v32 = vsel %vm1688_vm3, %v5920_v57, 0 }
0x2c43   : > { %7687 = vmatpush3.bf16.xpose.msra.mxu1 %v5925_v32 }
0x2c44   : > { %7698 = vmatprep.subr.bf16.mxu1 %v8584_v0 }
0x2c45   : > { %v6035_v33 = vpop.permute.xlu1 %6034 }
0x2c46   : > { %v6040_v34 = vsel %vm1688_vm3, %v6035_v33, 0 }
0x2c4a   : > { %7689 = vmatmul.mubr.msk.bf16.vlgmr.msra.gmra.mrb[132].mxu1 %vm1688_vm3, %v5918_v27 }
0x2c4b   : > { %7699 = vmatpush3.bf16.xpose.msra.mxu1 %v6040_v34  ;;  %7700 = vmatprep.mubr.msk.bf16.mxu1 %vm8585_vm0, %v8584_v0 }
0x2c4c   : > { %7710 = vmatprep.subr.bf16.mxu1 %v8584_v0 }
0x2c52   : > { %7701 = vmatmul.mubr.msk.bf16.vlgmr.msra.gmra.mrb[136].mxu1 %vm1688_vm3, %v6033_v35 }
0x2c53   : > { %7714 = vmatprep.mubr.msk.bf16.mxu1 %vm8585_vm0, %v8584_v0 }
0x2c9f   : > { %v5733_v36 = vpop.f32.mrb[124].mxu1 }
0x2ca0   : > { %v7666_v37 = vpop.f32.mrb[125].mxu1  ;;  %v5739_v38 = vsel %vm1688_vm3, %v5733_v36, -inf }
0x2ca1   : > { %5740 = vmax.xlane.f32.xlu1 %v5739_v38  ;;  %v5736_v39 = vpop.f32.mrb[126].mxu1 }
0x2ca2   : > { %v7667_v40 = vpop.f32.mrb[127].mxu1 }
0x2d11   : > { %v5846_v41 = vpop.f32.mrb[128].mxu1 }
0x2d12   : > { %v7678_v42 = vpop.f32.mrb[129].mxu1  ;;  %v5852_v43 = vsel %vm1688_vm3, %v5846_v41, -inf }
0x2d13   : > { %5853 = vmax.xlane.f32.xlu0 %v5852_v43  ;;  %v5849_v44 = vpop.f32.mrb[130].mxu1 }
0x2d14   : > { %v7679_v46 = vpop.f32.mrb[131].mxu1 }
0x2d1d   : > { %v5961_v19 = vpop.f32.mrb[132].mxu1 }
0x2d1e   : > { %v7690_v47 = vpop.f32.mrb[133].mxu1  ;;  %v5967_v48 = vsel %vm1688_vm3, %v5961_v19, -inf }
0x2d1f   : > { %5968 = vmax.xlane.f32.xlu0 %v5967_v48  ;;  %v5964_v49 = vpop.f32.mrb[134].mxu1  ;;  %v8007_v47 = vld [vmem:[%s10061_s6 + $0x18] sm:$0xff]  }
0x2d20   : > { %v7691_v50 = vpop.f32.mrb[135].mxu1 }
0x2d25   : > { %v6076_v51 = vpop.f32.mrb[136].mxu1 }
0x2d26   : > { %v7702_v52 = vpop.f32.mrb[137].mxu1  ;;  %v6082_v53 = vsel %vm1688_vm3, %v6076_v51, -inf }
0x2d27   : > { %6083 = vmax.xlane.f32.xlu1 %v6082_v53  ;;  %v6079_v54 = vpop.f32.mrb[138].mxu1 }
0x2d28   : > { %v7703_v45 = vpop.f32.mrb[139].mxu1 }
0x2d2e   : > { %v5741_v56 = vpop.xlane.xlu1 %5740 }
0x2d2f   : > { %v5742_v59 = vsub.f32 %v5733_v36, %v5741_v56 }
0x2d31   : > { %v5743_v60 = vmul.f32 1.442695, %v5742_v59 }
0x2d33   : > { %8112 = vpow2.f32 %v5743_v60 }
0x2d3d   : > { %v8113_v61 = vpop.eup %8112 }
0x2d3e   : > { %v5745_v62 = vsel %vm1688_vm3, %v8113_v61, 0.0 }
0x2d3f   : > { %5746 = vadd.xlane.f32.xlu0 %v5745_v62 }
0x2da0   : > { %v5854_v58 = vpop.xlane.xlu0 %5853 }
0x2da1   : > { %v5855_v1 = vsub.f32 %v5846_v41, %v5854_v58  ;;  %v6995_v58 = vld [vmem:[#allocation11 + $0x1] ss:$0 sm:$0xff] }
0x2da3   : > { %v5856_v2 = vmul.f32 1.442695, %v5855_v1 }
0x2da5   : > { %8114 = vpow2.f32 %v5856_v2 }
0x2dac   : > { %v5969_v3 = vpop.xlane.xlu0 %5968 }
0x2dad   : > { %v5970_v4 = vsub.f32 %v5961_v19, %v5969_v3  ;;  %v8006_v19 = vld [vmem:[%s10061_s6 + $0x10] sm:$0xff]  }
0x2dae   : > { %7711 = vmatpush3.bf16.msra.mxu1 %v8006_v19 }
0x2daf   : > { %v8115_v5 = vpop.eup %8114  ;;  %v5971_v63 = vmul.f32 1.442695, %v5970_v4  ;;  %7712 = vmatprep.subr.bf16.mxu1 %v8584_v0 }
0x2db0   : > { %v5858_v7 = vsel %vm1688_vm3, %v8115_v5, 0.0 }
0x2db1   : > { %8116 = vpow2.f32 %v5971_v63  ;;  %5859 = vadd.xlane.f32.xlu1 %v5858_v7 }
0x2db2   : > { %7713 = vmatpush3.bf16.msra.mxu1 %v8007_v47 }
0x2db3   : > { %7726 = vmatprep.subr.bf16.mxu1 %v8584_v0 }
0x2db4   : > { %v6084_v10 = vpop.xlane.xlu1 %6083 }
0x2db5   : > { %v6085_v12 = vsub.f32 %v6076_v51, %v6084_v10 }
0x2db7   : > { %v6086_v6 = vmul.f32 1.442695, %v6085_v12 }
0x2db9   : > { %8118 = vpow2.f32 %v6086_v6 }
0x2dbb   : > { %v8117_v8 = vpop.eup %8116 }
0x2dbc   : > { %v5973_v9 = vsel %vm1688_vm3, %v8117_v8, 0.0 }
0x2dbd   : > { %5974 = vadd.xlane.f32.xlu0 %v5973_v9 }
0x2dc2   : > { %5864 = vrot.lane.b32.xlu1 %v9714_v55, %s10045_s3 }
0x2dc3   : > { %v8119_v15 = vpop.eup %8118 }
0x2dc4   : > { %v6088_v18 = vsel %vm1688_vm3, %v8119_v15, 0.0 }
0x2dcc   : > { %v5747_v17 = vpop.xlane.xlu0 %5746 }
0x2dcd   : > { %8120 = vrcp.f32 %v5747_v17  ;;  %v8010_v17 = vld [vmem:[%s10063_s18 + $0x20] sm:$0xff]  }
0x2dd3   : > { %5752 = vrot.lane.b32.xlu0 %v9714_v55, %s10046_s7 }
0x2dd7   : > { %6094 = vrot.lane.b32.xlu0 %v9714_v55, %s10047_s12  ;;  %v8121_v14 = vpop.eup %8120 }
0x2dd8   : > { %v5749_v22 = vmul.f32 %v8121_v14, %v8113_v61 }
0x2dda   : > { %v5750_v25 = vpack.c.bf16 %v5749_v22, %v5749_v22 }
0x2de6   : > { %6089 = vadd.xlane.f32.xlu1 %v6088_v18  ;;  %v8009_v18 = vld [vmem:[%s10062_s8 + $0x18] sm:$0xff]  }
0x2df7   : > { %5979 = vrot.lane.b32.xlu1 %v9714_v55, %s10048_s16 }
0x2e3e   : > { %v5860_v11 = vpop.xlane.xlu1 %5859 }
0x2e3f   : > { %8122 = vrcp.f32 %v5860_v11 }
0x2e42   : > { %v5865_v13 = vpop.permute.xlu1 %5864 }
0x2e43   : > { %v5870_v28 = vsel %vm1753_vm4, %v5865_v13, 0  ;;  %v7000_v13 = vld [vmem:[#allocation14 + $0x1] ss:$0 sm:$0xff] }
0x2e49   : > { %v8123_v26 = vpop.eup %8122 }
0x2e4a   : > { %v5975_v21 = vpop.xlane.xlu0 %5974  ;;  %v5862_v55 = vmul.f32 %v8123_v26, %v8115_v5 }
0x2e4b   : > { %8124 = vrcp.f32 %v5975_v21 }
0x2e4c   : > { %v5863_v29 = vpack.c.bf16 %v5862_v55, %v5862_v55  ;;  %v8012_v55 = vld [vmem:[%s10063_s18 + $0x30] sm:$0xff]  }
0x2e4e   : > { %v5753_v23 = vpop.permute.xlu0 %5752 }
0x2e4f   : > { %v5758_v24 = vsel %vm1753_vm4, %v5753_v23, 0  ;;  %v6999_v23 = vld [vmem:[#allocation12 + $0x1] ss:$0 sm:$0xff] }
0x2e50   : > { %7669 = vmatpush3.bf16.msra.mxu0 %v5758_v24 }
0x2e51   : > { %7680 = vmatprep.subr.bf16.mxu0 %v8584_v0 }
0x2e52   : > { %v6095_v33 = vpop.permute.xlu0 %6094 }
0x2e53   : > { %7671 = vmatmul.mubr.msk.bf16.vlgmr.msra.gmra.mrb[132].mxu0 %vm1688_vm3, %v5750_v25  ;;  %v6100_v34 = vsel %vm1753_vm4, %v6095_v33, 0 }
0x2e54   : > { %7681 = vmatpush3.bf16.msra.mxu0 %v5870_v28  ;;  %7682 = vmatprep.mubr.msk.bf16.mxu0 %vm8585_vm0, %v8584_v0 }
0x2e55   : > { %7692 = vmatprep.subr.bf16.mxu0 %v8584_v0  ;;  %v8125_v30 = vpop.eup %8124 }
0x2e56   : > { %v5977_v16 = vmul.f32 %v8125_v30, %v8117_v8  ;;  %v7013_v30 = vld [vmem:[#allocation15 + $0x1] ss:$0 sm:$0xff] }
0x2e58   : > { %v5978_v27 = vpack.c.bf16 %v5977_v16, %v5977_v16 }
0x2e5b   : > { %7683 = vmatmul.mubr.msk.bf16.vlgmr.msra.gmra.mrb[136].mxu0 %vm1688_vm3, %v5863_v29  ;;  %v8013_v29 = vld [vmem:[%s10063_s18 + $0x38] sm:$0xff]  }
0x2e5c   : > { %7694 = vmatprep.mubr.msk.bf16.mxu0 %vm8585_vm0, %v8584_v0 }
0x2e73   : > { %v6090_v31 = vpop.xlane.xlu1 %6089 }
0x2e74   : > { %8126 = vrcp.f32 %v6090_v31 }
0x2e77   : > { %v5980_v57 = vpop.permute.xlu1 %5979 }
0x2e78   : > { %v5985_v32 = vsel %vm1753_vm4, %v5980_v57, 0 }
0x2e79   : > { %7693 = vmatpush3.bf16.msra.mxu0 %v5985_v32 }
0x2e7a   : > { %7704 = vmatprep.subr.bf16.mxu0 %v8584_v0 }
0x2e7c   : > { %7695 = vmatmul.mubr.msk.bf16.vlgmr.msra.gmra.mrb[140].mxu0 %vm1688_vm3, %v5978_v27 }
0x2e7d   : > { %7705 = vmatpush3.bf16.msra.mxu0 %v6100_v34  ;;  %7706 = vmatprep.mubr.msk.bf16.mxu0 %vm8585_vm0, %v8584_v0 }
0x2e7e   : > { %v8127_v35 = vpop.eup %8126  ;;  %7718 = vmatprep.subr.bf16.mxu0 %v8584_v0 }
0x2e7f   : > { %v6092_v36 = vmul.f32 %v8127_v35, %v8119_v15  ;;  %v8008_v15 = vld [vmem:[%s10062_s8 + $0x10] sm:$0xff]   ;;  %v7017_v35 = vld [vmem:[#allocation17 + $0x1] ss:$0 sm:$0xff] }
0x2e81   : > { %v6093_v37 = vpack.c.bf16 %v6092_v36, %v6092_v36 }
0x2e84   : > { %7707 = vmatmul.mubr.msk.bf16.vlgmr.msra.gmra.mrb[144].mxu0 %vm1688_vm3, %v6093_v37 }
0x2e85   : > { %7722 = vmatprep.mubr.msk.bf16.mxu0 %vm8585_vm0, %v8584_v0  ;;  %7719 = vmatpush3.bf16.msra.mxu0 %v8008_v15 }
0x2e86   : > { %7720 = vmatprep.subr.bf16.mxu0 %v8584_v0 }
0x2e89   : > { %7721 = vmatpush3.bf16.msra.mxu0 %v8009_v18 }
0x2e8a   : > { %7738 = vmatprep.subr.bf16.mxu0 %v8584_v0 }
0x2f26   : > { %v5794_v38 = vpop.f32.mrb[132].mxu0 }
0x2f27   : > { %5800 = vst.msk [vmem:[#allocation2] sm:$0xff] %vm1688_vm3, %v5794_v38  ;;  %v7672_v39 = vpop.f32.mrb[133].mxu0 }
0x2f28   : > { %v5797_v40 = vpop.f32.mrb[134].mxu0 }
0x2f29   : > { %v7673_v41 = vpop.f32.mrb[135].mxu0 }
0x2f2e   : > { %v5906_v42 = vpop.f32.mrb[136].mxu0 }
0x2f2f   : > { %5913 = vrot.lane.b32.xlu1 %v5906_v42, %s10049_s17  ;;  %v7684_v43 = vpop.f32.mrb[137].mxu0  ;;  %s1469_s17 = sand.u32 1, %s8518_s23  }
0x2f30   : > { %v5909_v44 = vpop.f32.mrb[138].mxu0  ;;  %s6766_s3 = sshll.u32 %s1469_s17, 3  ;;  %s6494_s7 = scalar_lea.sflag [#allocation5], %s1469_s17 }
0x2f31   : > { %v7685_v46 = vpop.f32.mrb[139].mxu0  ;;  %s1471_s12 = scalar_lea.vmem [#allocation21], %s6766_s3 }
0x2f4f   : > { %v6021_v48 = vpop.f32.mrb[140].mxu0 }
0x2f50   : > { %6028 = vrot.lane.b32.xlu0 %v6021_v48, %s10050_s19  ;;  %v7696_v49 = vpop.f32.mrb[141].mxu0  ;;  %v8014_v48 = vld [vmem:[%s8810_s14] sm:$0xff]   ;;  %s7030_s19 = sshll.u32 %s8843_s0, 7  ;;  %s8596_s0 = smov [#allocation21]  }
0x2f51   : > { %v6024_v50 = vpop.f32.mrb[142].mxu0  ;;  %v8015_v49 = vld [vmem:[%s8810_s14 + $0x8] sm:$0xff]   ;;  %s9835_s16 = scalar_lea.hbm %s8820_s9, %s7030_s19  ;;  %s8444_s28 = sshll.u32 %s8596_s0, 4  ;;  %s8445_s28 = int_to_ptr.vmem [resolvable:$false] %s8444_s28 }
0x2f52   : > { %v7697_v51 = vpop.f32.mrb[143].mxu0  ;;  %s8446_s22 = scalar_lea.vmem %s8445_s28, 256 }
0x2f57   : > { %v6136_v52 = vpop.f32.mrb[144].mxu0 }
0x2f58   : > { %6143 = vrot.lane.b32.xlu1 %v6136_v52, %s10051_s20  ;;  %v7708_v53 = vpop.f32.mrb[145].mxu0  ;;  %s6507_s20 = sshll.u32 %s1471_s12, 4  ;;  %s9837_s20 = int_to_ptr.vmem [resolvable:$true] %s6507_s20 }
0x2f59   : > { %v6139_v54 = vpop.f32.mrb[146].mxu0  ;;  %s8440_s26 = scalar_lea.vmem %s9837_s20, 128  ;;  %p8447_p9 = scmp.lt.s32.totalorder %s9837_s20, %s8445_s28 }
0x2f5a   : > { %v7709_v45 = vpop.f32.mrb[147].mxu0  ;;  %v7023_v54 = vld [vmem:[#allocation18 + $0x1] ss:$0 sm:$0xff]  ;;  %p8441_p13 = scmp.ne.s32.totalorder %s9837_s20, %s8440_s26  ;;  %p8448_p10 = scmp.lt.s32.totalorder %s8446_s22, %s8440_s26 }
0x2f5c   : > { %p8442_p0 = pnand %p8441_p13, %p10064_p6  ;;  %p8449_p12 = por %p8448_p10, %p8447_p9 }
0x2f5e   : > { %p8443_p5 = pneg %p8442_p0 }
0x2f60   : > { %p8450_p1 = pnand %p8449_p12, %p8443_p5 }
0x2fa1   : > { %v5914_v56 = vpop.permute.xlu1 %5913 }
0x2fa2   : > { %5916 = vst.msk [vmem:[#allocation2] sm:$0xff] %vm1913_vm5, %v5914_v56  ;;  %v7024_v56 = vld [vmem:[#allocation20 + $0x1] ss:$0 sm:$0xff] }
0x2fc2   : > { %v6029_v59 = vpop.permute.xlu0 %6028 }
0x2fc3   : > { %6031 = vst.msk [vmem:[#allocation2] sm:$0xff] %vm2029_vm6, %v6029_v59 }
0x2fca   : > { %v6144_v60 = vpop.permute.xlu1 %6143 }
0x2fcb   : > { %6146 = vst.msk [vmem:[#allocation2] sm:$0xff] %vm2145_vm7, %v6144_v60 }
0x2fd2   : > { %v6147_v61 = vld [vmem:[#allocation2] sm:$0xff] }
0x2fd3   : > { %v6148_v62 = vpack.c.bf16 %v6147_v61, %v6147_v61 }
0x2fd5   : > { %7715 = vmatmul.mubr.msk.bf16.vlgmr.msra.gmra.mrb[140].mxu1 %vm1584_vm2, %v6148_v62 }
0x2fd6   : > { %7734 = vmatprep.mubr.msk.bf16.mxu1 %vm8585_vm0, %v8584_v0  ;;  %7727 = vmatpush3.bf16.msra.mxu1 %v8010_v17 }
0x2fd7   : > { %7728 = vmatprep.subr.bf16.mxu1 %v8584_v0 }
0x30a8   : > { %v6204_v1 = vpop.f32.mrb[140].mxu1 }
0x30a9   : > { %v6205_v2 = vadd.f32 %v6995_v58, %v6204_v1  ;;  %v7716_v3 = vpop.f32.mrb[141].mxu1 }
0x30aa   : > { %v6207_v4 = vpop.f32.mrb[142].mxu1 }
0x30ab   : > { %v6210_v5 = vadd.f32 %v6205_v2, %v9722_v20  ;;  %v7717_v63 = vpop.f32.mrb[143].mxu1  ;;  %v8011_v20 = vld [vmem:[%s10063_s18 + $0x28] sm:$0xff]  }
0x30ac   : > { %7729 = vmatpush3.bf16.msra.mxu1 %v8011_v20 }
0x30ad   : > { %v6211_v7 = vsel %vm1584_vm2, %v6210_v5, 0.0  ;;  %7730 = vmatprep.subr.bf16.mxu1 %v8584_v0 }
0x30ae   : > { %6212 = vadd.xlane.f32.xlu0 %v6211_v7 }
0x30b0   : > { %7731 = vmatpush3.bf16.msra.mxu1 %v8012_v55 }
0x30b1   : > { %7732 = vmatprep.subr.bf16.mxu1 %v8584_v0 }
0x30b4   : > { %7733 = vmatpush3.bf16.msra.mxu1 %v8013_v29 }
0x313b   : > { %v6213_v8 = vpop.xlane.xlu0 %6212 }
0x313c   : > { %v6214_v9 = vmul.f32 0.03125, %v6213_v8 }
0x313e   : > { %v6215_v10 = vsub.f32 %v6210_v5, %v6214_v9 }
0x3140   : > { %v6216_v12 = vmul.f32 %v6215_v10, %v6215_v10 }
0x3142   : > { %v6217_v6 = vsel %vm1584_vm2, %v6216_v12, 0.0 }
0x3143   : > { %6218 = vadd.xlane.f32.xlu1 %v6217_v6 }
0x31d0   : > { %v6219_v11 = vpop.xlane.xlu1 %6218 }
0x31d1   : > { %v6220_v14 = vmul.f32 0.03125, %v6219_v11 }
0x31d3   : > { %v6221_v21 = vadd.f32 1e-05, %v6220_v14 }
0x31d5   : > { %8128 = vrsqrt.f32 %v6221_v21 }
0x31df   : > { %v8129_v22 = vpop.eup %8128 }
0x31e0   : > { %v6223_v24 = vmul.f32 %v8129_v22, %v6215_v10 }
0x31e2   : > { %v6230_v25 = vmul.f32 %v6999_v23, %v6223_v24 }
0x31e4   : > { %v6237_v26 = vadd.f32 %v7000_v13, %v6230_v25 }
0x31e6   : > { %v6260_v28 = vpack.c.bf16 %v6237_v26, %v6237_v26 }
0x31e8   : > { %7723 = vmatmul.mubr.msk.bf16.vlgmr.msra.gmra.mrb[148].mxu0 %vm1584_vm2, %v6260_v28 }
0x31e9   : > { %7742 = vmatprep.mubr.msk.bf16.mxu0 %vm8585_vm0, %v8584_v0  ;;  %7739 = vmatpush3.bf16.msra.mxu0 %v8014_v48 }
0x31ea   : > { %7740 = vmatprep.subr.bf16.mxu0 %v8584_v0  ;;  %v7025_v0 = vld [vmem:[%s8815_s21] ss:$0 sm:$0xff] }
0x31ed   : > { %7741 = vmatpush3.bf16.msra.mxu0 %v8015_v49 }
0x32bb   : > { %v6316_v31 = vpop.f32.mrb[148].mxu0 }
0x32bc   : > { %v6317_v16 = vadd.f32 %v7013_v30, %v6316_v31  ;;  %v7724_v57 = vpop.f32.mrb[149].mxu0 }
0x32bd   : > { %v6319_v32 = vpop.f32.mrb[150].mxu0 }
0x32be   : > { %v6322_v33 = vmax.f32 %v6317_v16, 0.0  ;;  %v7725_v27 = vpop.f32.mrb[151].mxu0 }
0x32c0   : > { %v6323_v34 = vpack.c.bf16 %v6322_v33, %v6322_v33 }
0x32c2   : > { %7735 = vmatmul.mubr.msk.bf16.vlgmr.msra.gmra.mrb[144].mxu1 %vm2349_vm8, %v6323_v34 }
0x3395   : > { %v6391_v36 = vpop.f32.mrb[144].mxu1 }
0x3396   : > { %v6392_v37 = vadd.f32 %v7017_v35, %v6391_v36  ;;  %v7736_v38 = vpop.f32.mrb[145].mxu1 }
0x3397   : > { %v6394_v39 = vpop.f32.mrb[146].mxu1 }
0x3398   : > { %v6397_v40 = vadd.f32 %v6392_v37, %v6237_v26  ;;  %v7737_v41 = vpop.f32.mrb[147].mxu1 }
0x339a   : > { %v6398_v42 = vsel %vm1584_vm2, %v6397_v40, 0.0 }
0x339b   : > { %6399 = vadd.xlane.f32.xlu0 %v6398_v42 }
0x3428   : > { %v6400_v43 = vpop.xlane.xlu0 %6399 }
0x3429   : > { %v6401_v44 = vmul.f32 0.03125, %v6400_v43 }
0x342b   : > { %v6402_v46 = vsub.f32 %v6397_v40, %v6401_v44 }
0x342d   : > { %v6403_v19 = vmul.f32 %v6402_v46, %v6402_v46 }
0x342f   : > { %v6404_v47 = vsel %vm1584_vm2, %v6403_v19, 0.0 }
0x3430   : > { %6405 = vadd.xlane.f32.xlu0 %v6404_v47 }
0x34bd   : > { %v6406_v50 = vpop.xlane.xlu0 %6405 }
0x34be   : > { %v6407_v51 = vmul.f32 0.03125, %v6406_v50 }
0x34c0   : > { %v6408_v52 = vadd.f32 1e-05, %v6407_v51 }
0x34c2   : > { %8130 = vrsqrt.f32 %v6408_v52 }
0x34cc   : > { %v8131_v53 = vpop.eup %8130 }
0x34cd   : > { %v6410_v45 = vmul.f32 %v8131_v53, %v6402_v46 }
0x34cf   : > { %v6417_v59 = vmul.f32 %v7023_v54, %v6410_v45 }
0x34d1   : > { %v6424_v60 = vadd.f32 %v7024_v56, %v6417_v59 }
0x34d3   : > { %v6425_v61 = vpack.c.bf16 %v6424_v60, %v6424_v60 }
0x34d5   : > { %7743 = vmatmul.mubr.msk.bf16.vlgmr.msra.gmra.mrb[152].mxu0 %vm1584_vm2, %v6425_v61 }
0x35a8   : > { %v6486_v62 = vpop.f32.mrb[152].mxu0 }
0x35a9   : > { %v6487_v58 = vadd.f32 %v7025_v0, %v6486_v62  ;;  %v7744_v1 = vpop.f32.mrb[153].mxu0 }
0x35aa   : > { %v6489_v2 = vpop.f32.mrb[154].mxu0 }
0x35ab   : > { %6492 = vst [vmem:[%s1471_s12] sm:$0xff] %v6487_v58  ;;  %v7745_v3 = vpop.f32.mrb[155].mxu0 }
0x35ac   : > { %8453 = shalt.err (!%p8450_p1)
}
0x35ad   : > { %s8454_s17 = scalar_lea.hbm %s9835_s16, 128  ;;  %s8458_s3 = scalar_lea.hbm %s8820_s9, 256 }
0x35ae   : > { %p8455_p2 = scmp.ne.s32.totalorder %s9835_s16, %s8454_s17  ;;  %p8459_p7 = scmp.lt.u32.totalorder %s9835_s16, %s8820_s9 }
0x35af   : > { %p8460_p8 = scmp.lt.u32.totalorder %s8458_s3, %s8454_s17  ;;  %p8462_p13 = scmp.lt.u32.totalorder %s8454_s17, %s9835_s16 }
0x35b0   : > { %p8456_p3 = pnand %p8455_p2, %p10064_p6 }
0x35b1   : > { %p8461_p11 = por %p8460_p8, %p8459_p7 }
0x35b2   : > { %p8457_p4 = pneg %p8456_p3 }
0x35b3   : > { %p8463_p0 = por %p8462_p13, %p8461_p11 }
0x35b5   : > { %p8464_p5 = pnand %p8463_p0, %p8457_p4 }
0x35b7   : > { %8467 = shalt.err (!%p8464_p5)
}
0x35b8   : > { %7790 = dma.vmem_to_hbm [thread:$0]  (%p10064_p6), %s9837_s20, 128, %s9835_s16, %s6494_s7  }
0x35b9 PF: > { %s10065_s19 = sld [smem:[#allocation69_spill]]  ;;  %s10066_s12 = sld [smem:[#allocation67_spill]] }
0x35ba   : > { %s10067_s26 = sld [smem:[#allocation72_spill]] }
0x35bf   : > { %p7852_p9 = scmp.ge.s32.totalorder %s10065_s19, 2  ;;  %s6519_s0 = sand.u32 1, %s10066_s12  }
0x35c0   : > { %p10068_p10 = scmp.ne.s32.totalorder %s10067_s26, 0  ;;  %s6520_s28 = scalar_lea.sflag [#allocation5], %s6519_s0 }
0x35c2   : > { %p7827_p12 = pnand %p7852_p9, %p10068_p10 }
0x35c4   : > { %8509 = dma.done.wait (!%p7827_p12), %s6520_s28, 128  }
0x35c5   : > { %8511 = vsyncadd (!%p7827_p12), %s6520_s28, 4294967168  ;;  %s10069_s28 = sld [smem:[#allocation70_spill]]  ;;  %s10070_s17 = sld [smem:[#allocation68_spill]] }
0x35c6   : > { %s10071_s26 = sld [smem:[#allocation71_spill]]  ;;  %s10072_s22 = smov %s8518_s23 }
0x35cb   : > { %p103_p1 = scmp.ge.s32.totalorder %s10069_s28, 4   ;;  %s10073_s23 = smov %s10070_s17 }
0x35cd   :  { %105 = sbr.rel (!%p103_p1) target bundleno = 96 (0x60), region = 357 }
0x35d4   :  { %6525 = vsyncpa [#allocation4], 1 }
0x35d5   :  { %6527 = vsyncpa [#allocation4 + $0x1], 1 }
0x35d6   :  { %6528 = vsyncpa [#allocation7], 1 }
0x35d7   :  { %6529 = vsyncpa [#allocation10], 1 }
0x35d8   :  { %6530 = vsyncpa [#allocation13], 1 }
0x35d9   :  { %6531 = vsyncpa [#allocation16], 1 }
0x35da   :  { %6532 = vsyncpa [#allocation19], 1 }
0x35db   :  { %6533 = vsyncpa [#allocation5], 1 }
0x35dc   :  { %6535 = vsyncpa [#allocation5 + $0x1], 1 }

</bundles_post_ra>
